<compile_context>
chip_gen: v5e
topology: v5e:2x2
jax: 0.10.0
libtpu: 0.0.40
codegen_flags: <defaults>
</compile_context>

<pallas_src>
import functools
import math

import jax
import jax.numpy as jnp
from jax import lax
from jax.experimental import pallas as pl
from jax.experimental.pallas import tpu as pltpu


def _mod_exact(p, period):
    """Exact `p mod period` for non-negative int32 `p` < 2**30.

    Uses a float-assisted quotient (error < 1) plus integer correction, so it
    only needs int mul/sub/compare/select and f32 floor/convert — all exact.
    """
    q = jnp.floor(p.astype(jnp.float32) * jnp.float32(1.0 / period)).astype(jnp.int32)
    r = p - q * period
    r = jnp.where(r < 0, r + period, r)
    r = jnp.where(r >= period, r - period, r)
    return r


def _dft_mag_kernel(x_ref, mag_ref, *, T, Tk, Hk, H):
    """Grid = (C,). One Hk-wide frequency tile per step, two-level DFT.

    x_ref: (Tn_pad, Tk) zero-padded waveform (sample n = n1*Tk + n0).
    mag_ref: (1, 1, Hk) masked positive-frequency magnitudes for this tile.
    """
    h = pl.program_id(0)
    k_base = h * Hk
    two_pi_over_T = jnp.float32(2.0 * math.pi / T)

    # ---- inner basis (Tk, Hk): angle = 2*pi*((n0 * k) mod T) / T, exact ----
    n0 = lax.broadcasted_iota(jnp.int32, (Tk, Hk), 0)
    lane = lax.broadcasted_iota(jnp.int32, (Tk, Hk), 1)
    p0 = n0 * k_base + n0 * lane                         # = n0 * k (exact int32)
    ang0 = two_pi_over_T * _mod_exact(p0, T).astype(jnp.float32)
    cos0 = jnp.cos(ang0)
    sin0 = jnp.sin(ang0)

    x = x_ref[...]                                       # (Tn_pad, Tk) f32
    yc = jnp.dot(x, cos0, preferred_element_type=jnp.float32)   # (Tn_pad, Hk)
    ys = jnp.dot(x, sin0, preferred_element_type=jnp.float32)   # (Tn_pad, Hk)

    # ---- twiddle (Tn_pad, Hk): angle = 2*pi*((n1 * Tk * k) mod T) / T ----
    Tn_pad = x.shape[0]
    n1 = lax.broadcasted_iota(jnp.int32, (Tn_pad, Hk), 0)
    lane1 = lax.broadcasted_iota(jnp.int32, (Tn_pad, Hk), 1)
    b = _mod_exact(Tk * k_base + Tk * lane1, T)          # (Tk * k) mod T, < T
    ptw = n1 * b                                         # < Tn_pad * T (guarded in wrapper)
    ang_tw = two_pi_over_T * _mod_exact(ptw, T).astype(jnp.float32)
    ctw = jnp.cos(ang_tw)
    stw = jnp.sin(ang_tw)

    # X[k] = sum_{n1} exp(-2*pi*i*n1*Tk*k/T) * (Yc - i*Ys)[n1, k]
    re = jnp.sum(ctw * yc - stw * ys, axis=0, keepdims=True)    # (1, Hk)
    im = jnp.sum(ctw * ys + stw * yc, axis=0, keepdims=True)    # (1, Hk) = -Im; |.| unaffected

    mag = jnp.sqrt(re * re + im * im)
    kk = k_base + lax.broadcasted_iota(jnp.int32, (1, Hk), 1)
    mag_ref[0] = jnp.where(kk < H, mag, 0.0)             # mask padded bins


def _rolloff_count_kernel(params_ref, mag_ref, o_ref, *, H, W):
    """mag_ref: (R, W) masked magnitudes (bin index = row*W + lane).
    Computes #{bins : cumulative < roll_percent * total} * freq_step."""
    p = params_ref[0]          # roll_percent
    freq_step = params_ref[1]  # sampling_rate / T

    mag = mag_ref[...]                                   # (R, W) f32
    R = mag.shape[0]

    # Within-row inclusive prefix sum via an in-register upper-tri matmul.
    r = lax.broadcasted_iota(jnp.int32, (W, W), 0)
    c = lax.broadcasted_iota(jnp.int32, (W, W), 1)
    triu = (r <= c).astype(jnp.float32)                  # triu[j, i] = 1 if j <= i
    within = jnp.dot(mag, triu, preferred_element_type=jnp.float32)   # (R, W)

    # Cross-row carry: strict prefix sum over row totals.
    rs = jnp.sum(mag, axis=-1, keepdims=True)            # (R, 1)
    if R == 1:
        carry = jnp.zeros((1, 1), jnp.float32)
    else:
        rr = lax.broadcasted_iota(jnp.int32, (R, R), 0)
        cc = lax.broadcasted_iota(jnp.int32, (R, R), 1)
        lower = (cc < rr).astype(jnp.float32)
        carry = jnp.dot(lower, rs, preferred_element_type=jnp.float32)  # (R, 1)

    cum = within + carry                                  # global inclusive prefix sum
    total = jnp.sum(rs, axis=0, keepdims=True)            # (1, 1)
    thr = p * total

    # searchsorted(normalized, p, side='left') == #{ i : cum[i] < p * total }
    row_i = lax.broadcasted_iota(jnp.int32, (R, W), 0)
    lane_i = lax.broadcasted_iota(jnp.int32, (R, W), 1)
    valid = (row_i * W + lane_i) < H
    below = jnp.where(jnp.logical_and(valid, cum < thr), 1.0, 0.0)

    idx = jnp.sum(jnp.sum(below, axis=-1, keepdims=True), axis=0, keepdims=True)
    o_ref[...] = idx * freq_step                          # positive_freqs[idx] = idx * sr / T


def _round_up(a, b):
    return ((a + b - 1) // b) * b


def rolloff(audio, sampling_rate: int, roll_percent: float, *, tk: int = 512, hk: int = 512):
    """audio: (1, T) float32 -> (1,) float32 roll-off frequency in Hz."""
    assert audio.ndim == 2 and audio.shape[0] == 1, "Expected (1, T) waveform"
    T = audio.shape[1]
    H = T // 2                                # positive-frequency bins (matches torch ref slice)

    # Time tiling: n = n1 * Tk + n0, waveform reshaped to (Tn_pad, Tk).
    Tk = min(tk, _round_up(T, 128))
    Tn = -(-T // Tk)
    Tn_pad = _round_up(Tn, 8)
    T_pad = Tn_pad * Tk

    # Frequency tiling.
    Hk = min(hk, _round_up(max(H, 1), 128))
    H_pad = _round_up(max(H, 1), Hk)
    C = H_pad // Hk
    if C == 1 and H_pad % 256 == 0:
        # Ensure >= 2 h-tiles so the "parallel" axis can shard across v7x's 2 TCs.
        Hk = H_pad // 2
        C = 2

    # int32 guards for the exact modular phase computation.
    # TODO(synk): for extremely long audio (> ~1 minute @ 16 kHz) use a split
    # (hi/lo) modular multiply so these products stay below 2**30.
    assert Tk * H_pad < 2 ** 30, "waveform too long for int32 phase reduction"
    assert Tn_pad * T < 2 ** 30, "waveform too long for int32 twiddle reduction"

    x = jnp.pad(audio.astype(jnp.float32).reshape(-1), (0, T_pad - T)).reshape(Tn_pad, Tk)

    # ---- Kernel 1: two-level DFT magnitudes (basis generated once per h-tile) ----
    mag = pl.pallas_call(
        functools.partial(_dft_mag_kernel, T=T, Tk=Tk, Hk=Hk, H=H),
        out_shape=jax.ShapeDtypeStruct((C, 1, Hk), jnp.float32),
        grid=(C,),
        in_specs=[pl.BlockSpec((Tn_pad, Tk), lambda h: (0, 0))],
        out_specs=pl.BlockSpec((1, 1, Hk), lambda h: (h, 0, 0)),
        compiler_params=pltpu.CompilerParams(
            dimension_semantics=("parallel",),
            vmem_limit_bytes=32 * 1024 * 1024,
        ),
    )(x)

    # Decouple kernel 2's row width from Hk (keep triangular matrices <= 512 wide).
    W = math.gcd(H_pad, 512)
    R = H_pad // W
    mag2d = mag.reshape(R, W)                 # contiguous reshape, bin order preserved

    # Runtime-varying scalars go through SMEM (no recompile when they change).
    params = jnp.array([roll_percent, sampling_rate / T], dtype=jnp.float32)

    # ---- Kernel 2: total energy, prefix sum, threshold count -> frequency ----
    out = pl.pallas_call(
        functools.partial(_rolloff_count_kernel, H=H, W=W),
        out_shape=jax.ShapeDtypeStruct((1, 1), jnp.float32),
        grid=(1,),
        in_specs=[
            pl.BlockSpec(memory_space=pltpu.MemorySpace.SMEM),   # params
            pl.BlockSpec((R, W), lambda i: (0, 0)),              # magnitudes
        ],
        out_specs=pl.BlockSpec((1, 1), lambda i: (0, 0)),
        compiler_params=pltpu.CompilerParams(
            dimension_semantics=("arbitrary",),
            vmem_limit_bytes=32 * 1024 * 1024,
        ),
    )(params, mag2d)

    return out.reshape((1,))                  # matches rolloff_freq.unsqueeze(0)


if __name__ == "__main__":
    # Small, deterministic example consistent with the module's (1, T) input.
    sampling_rate = 16000
    roll_percent = 0.85
    T = 256  # small synthetic waveform length (module would use sr * 10)

    key = jax.random.PRNGKey(0)
    audio = jax.random.normal(key, (1, T), dtype=jnp.float32)

    freq = rolloff(audio, sampling_rate, roll_percent)
    jax.block_until_ready(freq)
    print("KERNEL_OK")
</pallas_src>

<mosaic_0001>
module attributes {stable_mosaic.version = 11 : i64} {
  func.func @_dft_mag_kernel(%arg0: i32, %arg1: memref<8x256xf32, #tpu.memory_space<vmem>>, %arg2: memref<1x1x128xf32, #tpu.memory_space<vmem>>) attributes {dimension_semantics = [#tpu.dimension_semantics<parallel>], iteration_bounds = array<i64: 1>, scalar_prefetch = 0 : i64, scratch_operands = 0 : i64, tpu.core_type = #tpu.core_type<tc>, window_params = [{pipeline_mode = #tpu.pipeline_mode<synchronous>, transform_indices = @transform_0, window_bounds = array<i64: 8, 256>}, {transform_indices = @transform_1, window_bounds = array<i64: 1, 1, 128>}]} {
    %c128_i32 = arith.constant 128 : i32
    %0 = arith.muli %arg0, %c128_i32 : i32
    %1 = tpu.iota {dimensions = array<i32: 0>} : vector<256x128xi32>
    %2 = tpu.iota {dimensions = array<i32: 1>} : vector<256x128xi32>
    %3 = vector.broadcast %0 : i32 to vector<256x128xi32>
    %4 = arith.muli %1, %3 : vector<256x128xi32>
    %5 = arith.muli %1, %2 : vector<256x128xi32>
    %6 = arith.addi %4, %5 : vector<256x128xi32>
    %7 = arith.sitofp %6 : vector<256x128xi32> to vector<256x128xf32>
    %cst = arith.constant 3.906250e-03 : f32
    %8 = vector.broadcast %cst : f32 to vector<256x128xf32>
    %9 = arith.mulf %7, %8 : vector<256x128xf32>
    %10 = math.floor %9 : vector<256x128xf32>
    %11 = arith.fptosi %10 : vector<256x128xf32> to vector<256x128xi32>
    %c256_i32 = arith.constant 256 : i32
    %12 = vector.broadcast %c256_i32 : i32 to vector<256x128xi32>
    %13 = arith.muli %11, %12 : vector<256x128xi32>
    %14 = arith.subi %6, %13 : vector<256x128xi32>
    %c0_i32 = arith.constant 0 : i32
    %15 = vector.broadcast %c0_i32 : i32 to vector<256x128xi32>
    %16 = arith.cmpi slt, %14, %15 : vector<256x128xi32>
    %c256_i32_0 = arith.constant 256 : i32
    %17 = vector.broadcast %c256_i32_0 : i32 to vector<256x128xi32>
    %18 = arith.addi %14, %17 : vector<256x128xi32>
    %19 = arith.select %16, %18, %14 : vector<256x128xi1>, vector<256x128xi32>
    %c256_i32_1 = arith.constant 256 : i32
    %20 = vector.broadcast %c256_i32_1 : i32 to vector<256x128xi32>
    %21 = arith.cmpi sge, %19, %20 : vector<256x128xi32>
    %c256_i32_2 = arith.constant 256 : i32
    %22 = vector.broadcast %c256_i32_2 : i32 to vector<256x128xi32>
    %23 = arith.subi %19, %22 : vector<256x128xi32>
    %24 = arith.select %21, %23, %19 : vector<256x128xi1>, vector<256x128xi32>
    %25 = arith.sitofp %24 : vector<256x128xi32> to vector<256x128xf32>
    %cst_3 = arith.constant 0.0245436933 : f32
    %26 = vector.broadcast %cst_3 : f32 to vector<256x128xf32>
    %27 = arith.mulf %26, %25 : vector<256x128xf32>
    %28 = math.cos %27 : vector<256x128xf32>
    %29 = math.sin %27 : vector<256x128xf32>
    %c0 = arith.constant 0 : index
    %c0_4 = arith.constant 0 : index
    %30 = vector.load %arg1[%c0, %c0_4] : memref<8x256xf32, #tpu.memory_space<vmem>>, vector<8x256xf32>
    %cst_5 = arith.constant dense<0.000000e+00> : vector<8x128xf32>
    %31 = tpu.matmul %30, %28, %cst_5 {dimension_numbers = #tpu.dot_dimension_numbers<[1], [0], [0], [1], [0, 0, 1, 1], [], []>} : vector<8x256xf32>, vector<256x128xf32>, vector<8x128xf32> -> vector<8x128xf32>
    %cst_6 = arith.constant dense<0.000000e+00> : vector<8x128xf32>
    %32 = tpu.matmul %30, %29, %cst_6 {dimension_numbers = #tpu.dot_dimension_numbers<[1], [0], [0], [1], [0, 0, 1, 1], [], []>} : vector<8x256xf32>, vector<256x128xf32>, vector<8x128xf32> -> vector<8x128xf32>
    %33 = tpu.iota {dimensions = array<i32: 0>} : vector<8x128xi32>
    %34 = tpu.iota {dimensions = array<i32: 1>} : vector<8x128xi32>
    %c256_i32_7 = arith.constant 256 : i32
    %35 = arith.muli %c256_i32_7, %0 : i32
    %c256_i32_8 = arith.constant 256 : i32
    %36 = vector.broadcast %c256_i32_8 : i32 to vector<8x128xi32>
    %37 = arith.muli %36, %34 : vector<8x128xi32>
    %38 = vector.broadcast %35 : i32 to vector<8x128xi32>
    %39 = arith.addi %38, %37 : vector<8x128xi32>
    %40 = arith.sitofp %39 : vector<8x128xi32> to vector<8x128xf32>
    %cst_9 = arith.constant 3.906250e-03 : f32
    %41 = vector.broadcast %cst_9 : f32 to vector<8x128xf32>
    %42 = arith.mulf %40, %41 : vector<8x128xf32>
    %43 = math.floor %42 : vector<8x128xf32>
    %44 = arith.fptosi %43 : vector<8x128xf32> to vector<8x128xi32>
    %c256_i32_10 = arith.constant 256 : i32
    %45 = vector.broadcast %c256_i32_10 : i32 to vector<8x128xi32>
    %46 = arith.muli %44, %45 : vector<8x128xi32>
    %47 = arith.subi %39, %46 : vector<8x128xi32>
    %c0_i32_11 = arith.constant 0 : i32
    %48 = vector.broadcast %c0_i32_11 : i32 to vector<8x128xi32>
    %49 = arith.cmpi slt, %47, %48 : vector<8x128xi32>
    %c256_i32_12 = arith.constant 256 : i32
    %50 = vector.broadcast %c256_i32_12 : i32 to vector<8x128xi32>
    %51 = arith.addi %47, %50 : vector<8x128xi32>
    %52 = arith.select %49, %51, %47 : vector<8x128xi1>, vector<8x128xi32>
    %c256_i32_13 = arith.constant 256 : i32
    %53 = vector.broadcast %c256_i32_13 : i32 to vector<8x128xi32>
    %54 = arith.cmpi sge, %52, %53 : vector<8x128xi32>
    %c256_i32_14 = arith.constant 256 : i32
    %55 = vector.broadcast %c256_i32_14 : i32 to vector<8x128xi32>
    %56 = arith.subi %52, %55 : vector<8x128xi32>
    %57 = arith.select %54, %56, %52 : vector<8x128xi1>, vector<8x128xi32>
    %58 = arith.muli %33, %57 : vector<8x128xi32>
    %59 = arith.sitofp %58 : vector<8x128xi32> to vector<8x128xf32>
    %cst_15 = arith.constant 3.906250e-03 : f32
    %60 = vector.broadcast %cst_15 : f32 to vector<8x128xf32>
    %61 = arith.mulf %59, %60 : vector<8x128xf32>
    %62 = math.floor %61 : vector<8x128xf32>
    %63 = arith.fptosi %62 : vector<8x128xf32> to vector<8x128xi32>
    %c256_i32_16 = arith.constant 256 : i32
    %64 = vector.broadcast %c256_i32_16 : i32 to vector<8x128xi32>
    %65 = arith.muli %63, %64 : vector<8x128xi32>
    %66 = arith.subi %58, %65 : vector<8x128xi32>
    %c0_i32_17 = arith.constant 0 : i32
    %67 = vector.broadcast %c0_i32_17 : i32 to vector<8x128xi32>
    %68 = arith.cmpi slt, %66, %67 : vector<8x128xi32>
    %c256_i32_18 = arith.constant 256 : i32
    %69 = vector.broadcast %c256_i32_18 : i32 to vector<8x128xi32>
    %70 = arith.addi %66, %69 : vector<8x128xi32>
    %71 = arith.select %68, %70, %66 : vector<8x128xi1>, vector<8x128xi32>
    %c256_i32_19 = arith.constant 256 : i32
    %72 = vector.broadcast %c256_i32_19 : i32 to vector<8x128xi32>
    %73 = arith.cmpi sge, %71, %72 : vector<8x128xi32>
    %c256_i32_20 = arith.constant 256 : i32
    %74 = vector.broadcast %c256_i32_20 : i32 to vector<8x128xi32>
    %75 = arith.subi %71, %74 : vector<8x128xi32>
    %76 = arith.select %73, %75, %71 : vector<8x128xi1>, vector<8x128xi32>
    %77 = arith.sitofp %76 : vector<8x128xi32> to vector<8x128xf32>
    %cst_21 = arith.constant 0.0245436933 : f32
    %78 = vector.broadcast %cst_21 : f32 to vector<8x128xf32>
    %79 = arith.mulf %78, %77 : vector<8x128xf32>
    %80 = math.cos %79 : vector<8x128xf32>
    %81 = math.sin %79 : vector<8x128xf32>
    %82 = arith.mulf %80, %31 : vector<8x128xf32>
    %83 = arith.mulf %81, %32 : vector<8x128xf32>
    %84 = arith.subf %82, %83 : vector<8x128xf32>
    %cst_22 = arith.constant dense<0.000000e+00> : vector<128xf32>
    %85 = vector.multi_reduction <add>, %84, %cst_22 [0] : vector<8x128xf32> to vector<128xf32>
    %86 = vector.shape_cast %85 : vector<128xf32> to vector<1x128xf32>
    %87 = arith.mulf %80, %32 : vector<8x128xf32>
    %88 = arith.mulf %81, %31 : vector<8x128xf32>
    %89 = arith.addf %87, %88 : vector<8x128xf32>
    %cst_23 = arith.constant dense<0.000000e+00> : vector<128xf32>
    %90 = vector.multi_reduction <add>, %89, %cst_23 [0] : vector<8x128xf32> to vector<128xf32>
    %91 = vector.shape_cast %90 : vector<128xf32> to vector<1x128xf32>
    %92 = arith.mulf %86, %86 : vector<1x128xf32>
    %93 = arith.mulf %91, %91 : vector<1x128xf32>
    %94 = arith.addf %92, %93 : vector<1x128xf32>
    %95 = math.sqrt %94 : vector<1x128xf32>
    %96 = tpu.iota {dimensions = array<i32: 1>} : vector<1x128xi32>
    %97 = vector.broadcast %0 : i32 to vector<1x128xi32>
    %98 = arith.addi %97, %96 : vector<1x128xi32>
    %c128_i32_24 = arith.constant 128 : i32
    %99 = vector.broadcast %c128_i32_24 : i32 to vector<1x128xi32>
    %100 = arith.cmpi slt, %98, %99 : vector<1x128xi32>
    %cst_25 = arith.constant 0.000000e+00 : f32
    %101 = vector.broadcast %cst_25 : f32 to vector<1x128xf32>
    %102 = arith.select %100, %95, %101 : vector<1x128xi1>, vector<1x128xf32>
    %c0_26 = arith.constant 0 : index
    %c0_27 = arith.constant 0 : index
    %c0_28 = arith.constant 0 : index
    %103 = vector.load %arg2[%c0_26, %c0_27, %c0_28] : memref<1x1x128xf32, #tpu.memory_space<vmem>>, vector<1x1x128xf32>
    %104 = vector.shape_cast %103 : vector<1x1x128xf32> to vector<1x128xf32>
    %105 = vector.shape_cast %102 : vector<1x128xf32> to vector<1x1x128xf32>
    tpu.vector_store %arg2[%c0_26, %c0_27, %c0_28], %105 {strides = array<i32>} : memref<1x1x128xf32, #tpu.memory_space<vmem>>, vector<1x1x128xf32>,
    return
  }
  func.func @transform_0(%arg0: i32) -> (i32, i32) {
    %c0_i32 = arith.constant 0 : i32
    %c0_i32_0 = arith.constant 0 : i32
    %c0_i32_1 = arith.constant 0 : i32
    return %c0_i32, %c0_i32_0 : i32, i32
  }
  func.func @transform_1(%arg0: i32) -> (i32, i32, i32) {
    %c0_i32 = arith.constant 0 : i32
    %c0_i32_0 = arith.constant 0 : i32
    %c0_i32_1 = arith.constant 0 : i32
    return %arg0, %c0_i32, %c0_i32_0 : i32, i32, i32
  }
}

</mosaic_0001>

<bundles_post_ra>
// kernel: tpu_custom_call.1
= control target key start
LH: loop header
LB: loop body
LE: loop exit
PB: predicated region body
PF: predicated region fallthrough
CT: control target
= control target key end

     0   :  { %6 = vsyncpa [#allocation3], 0  ;;  %s18290_s0 = inlined_call_operand.hbm [shape: f32[8,256], index: 0, kind: input, shape index: {}]   ;;  %s18291_s1 = inlined_call_operand.hbm [shape: f32[1,1,128], index: 1, kind: output, shape index: {}]  }
   0x1   :  { %7 = vsyncpa [#allocation4], 0  ;;  %s13_s8 = sshll.u32 %s18290_s0, 4  ;;  %s11331_s9 = smov [#allocation2]   ;;  %v24_v0 = vlaneseq  ;;  %s14_s8 = int_to_ptr.hbm [resolvable:$true] %s13_s8 }
   0x2   :  { %s15_s10 = sshll.u32 %s11331_s9, 4  ;;  %s16_s10 = int_to_ptr.vmem [resolvable:$true] %s15_s10 }
   0x3   :  { %18 = dma.hbm_to_vmem [thread:$0]  %s14_s8, 256, %s16_s10, [#allocation3]   ;;  %v11353_v1 = vshrl.u32 %v24_v0, 7  ;;  %v11355_v2 = vand.u32 127, %v24_v0 }
   0x5   :  { %18718 = vst [vmem:[#allocation8_spill] sm:$0xff] %v11353_v1 }
   0x6   :  { %18719 = vst [vmem:[#allocation9_spill] sm:$0xff] %v11355_v2 }
   0x7   :  { %11327 = dma.done.wait [#allocation3], 256  }
   0x8   :  { %11328 = vsyncadd [#allocation3], 4294967040  ;;  %v40_v3 = vadd.s32 120, %v11353_v1  ;;  %v56_v4 = vadd.s32 248, %v11353_v1  ;;  %v39_v5 = vadd.s32 112, %v11353_v1  ;;  %s11339_s0 = smov [#allocation5]  }
   0x9   :  { %s10956_s11 = sshll.u32 %s11339_s0, 4  ;;  %s10958_s14 = sshll.u32 %s18291_s1, 4  ;;  %s10957_s11 = int_to_ptr.vmem [resolvable:$true] %s10956_s11  ;;  %s10959_s14 = int_to_ptr.hbm [resolvable:$true] %s10958_s14 }
   0xa   :  { %v107_v6 = vmul.u32 %v11355_v2, %v40_v3  ;;  %v123_v7 = vmul.u32 %v11355_v2, %v56_v4  ;;  %v106_v8 = vmul.u32 %v11355_v2, %v39_v5  ;;  %v11381_v3 = vadd.s32 240, %v11353_v1 }
   0xc   :  { %v171_v9 = vcvt.s32.f32 %v107_v6  ;;  %v187_v10 = vcvt.s32.f32 %v123_v7  ;;  %v170_v11 = vcvt.s32.f32 %v106_v8 }
   0xe   :  { %v203_v12 = vmul.f32 0.00390625, %v171_v9  ;;  %v219_v13 = vmul.f32 0.00390625, %v187_v10  ;;  %v202_v14 = vmul.f32 0.00390625, %v170_v11  ;;  %v18316_v9 = vmov 683565275  }
   0xf   :  { %v18314_v11 = vmov 2475754826  }
  0x10   :  { %v235_v15 = vfloor.f32 %v203_v12  ;;  %v251_v16 = vfloor.f32 %v219_v13  ;;  %v234_v17 = vfloor.f32 %v202_v14  ;;  %v18312_v13 = vmov 2131351028  }
  0x12   :  { %v11231_v18 = vcvt.f32.s32 %v235_v15  ;;  %v11263_v19 = vcvt.f32.s32 %v251_v16  ;;  %v11229_v20 = vcvt.f32.s32 %v234_v17  ;;  %v18310_v15 = vmov 2102212464  }
  0x13   :  { %v18308_v17 = vmov 920167782  }
  0x14   :  { %v299_v21 = vmul.u32 256, %v11231_v18  ;;  %v315_v22 = vmul.u32 256, %v11263_v19  ;;  %v298_v23 = vmul.u32 256, %v11229_v20 }
  0x16   :  { %v331_v24 = vsub.s32 %v107_v6, %v299_v21  ;;  %v347_v25 = vsub.s32 %v123_v7, %v315_v22  ;;  %v330_v26 = vsub.s32 %v106_v8, %v298_v23 }
  0x18   :  { %vm363_vm0 = vcmp.lt.s32.totalorder %v331_v24, 0  ;;  %v395_v27 = vadd.s32 256, %v331_v24  ;;  %vm379_vm1 = vcmp.lt.s32.totalorder %v347_v25, 0  ;;  %v411_v28 = vadd.s32 256, %v347_v25 }
  0x19   :  { %vm362_vm2 = vcmp.lt.s32.totalorder %v330_v26, 0  ;;  %v394_v29 = vadd.s32 256, %v330_v26 }
  0x1a   :  { %v427_v30 = vsel %vm363_vm0, %v395_v27, %v331_v24  ;;  %v443_v31 = vsel %vm379_vm1, %v411_v28, %v347_v25 }
  0x1b   :  { %vm459_vm3 = vcmp.ge.s32.totalorder %v427_v30, 256  ;;  %v10983_v32 = vadd.s32 4294967040, %v427_v30  ;;  %vm475_vm4 = vcmp.ge.s32.totalorder %v443_v31, 256  ;;  %v10999_v33 = vadd.s32 4294967040, %v443_v31 }
  0x1c   :  { %v426_v34 = vsel %vm362_vm2, %v394_v29, %v330_v26  ;;  %v18306_v26 = vmov 1326507024  }
  0x1d   :  { %v523_v35 = vsel %vm459_vm3, %v10983_v32, %v427_v30  ;;  %v539_v36 = vsel %vm475_vm4, %v10999_v33, %v443_v31  ;;  %vm458_vm5 = vcmp.ge.s32.totalorder %v426_v34, 256  ;;  %v10982_v37 = vadd.s32 4294967040, %v426_v34 }
  0x1e   :  { %v555_v38 = vcvt.s32.f32 %v523_v35  ;;  %v571_v39 = vcvt.s32.f32 %v539_v36 }
  0x1f   :  { %v522_v40 = vsel %vm458_vm5, %v10982_v37, %v426_v34 }
  0x20   :  { %v11363_v41 = vmul.f32 0.024543693, %v555_v38  ;;  %v11365_v42 = vmul.f32 0.024543693, %v571_v39  ;;  %v554_v43 = vcvt.s32.f32 %v522_v40 }
  0x22   :  { %18720 = vst [vmem:[#allocation10_spill] sm:$0xff] %v11363_v41  ;;  %v2914_v44 = vand.u32 2147483647, %v11363_v41  ;;  %v2917_v45 = vand.u32 2139095040, %v11363_v41  ;;  %v5378_v46 = vand.u32 2147483647, %v11365_v42 }
  0x23   :  { %18721 = vst [vmem:[#allocation11_spill] sm:$0xff] %v11365_v42  ;;  %v5381_v47 = vand.u32 2139095040, %v11365_v42  ;;  %v11371_v48 = vmul.f32 0.024543693, %v554_v43 }
  0x24   :  { %v2918_v49 = vshrl.u32 %v2917_v45, 23  ;;  %v2921_v50 = vand.u32 8388607, %v2914_v44  ;;  %v5385_v52 = vand.u32 8388607, %v5378_v46 }
  0x25   :  { %18722 = vst [vmem:[#allocation12_spill] sm:$0xff] %v11371_v48  ;;  %v5382_v51 = vshrl.u32 %v5381_v47, 23  ;;  %v2763_v56 = vand.u32 2139095040, %v11371_v48  ;;  %v2760_v7 = vand.u32 2147483647, %v11371_v48 }
  0x26   :  { %v11045_v53 = vadd.s32 4294967169, %v2918_v49  ;;  %v2922_v54 = vor.u32 8388608, %v2921_v50  ;;  %v5386_v58 = vor.u32 8388608, %v5385_v52 }
  0x27   :  { %v11093_v55 = vadd.s32 4294967169, %v5382_v51  ;;  %v2764_v62 = vshrl.u32 %v2763_v56, 23 }
  0x28   :  { %v2924_v57 = vadd.s32 1, %v11045_v53  ;;  %v11378_v61 = vshll.u32 %v2922_v54, 8  ;;  %v11387_v6 = vshll.u32 %v5386_v58, 8 }
  0x29   :  { %v5388_v59 = vadd.s32 1, %v11093_v55  ;;  %v11396_v20 = vadd.s32 4294967169, %v2764_v62 }
  0x2a   :  { %vm2925_vm6 = vcmp.gt.s32.totalorder %v2924_v57, 0  ;;  %v2963_v19 = vand.u32 65535, %v11378_v61  ;;  %v2964_v24 = vshrl.u32 %v11378_v61, 16 }
  0x2b   :  { %v2926_v60 = vsel %vm2925_vm6, %v2924_v57, 0  ;;  %vm5389_vm7 = vcmp.gt.s32.totalorder %v5388_v59, 0 }
  0x2c   :  { %v2928_v63 = vand.u32 31, %v2926_v60  ;;  %v5390_v0 = vsel %vm5389_vm7, %v5388_v59, 0  ;;  %v11383_v4 = vshrl.u32 %v2926_v60, 5 }
  0x2d   :  { %v11385_v5 = vand.u32 31, %v5390_v0  ;;  %v11416_v37 = vshrl.u32 %v5390_v0, 5 }
  0x2e   :  { %v2929_v8 = vsub.s32 32, %v2928_v63  ;;  %v2931_v10 = vshll.u32 %v18316_v9, %v2928_v63  ;;  %v2934_v12 = vshll.u32 %v18314_v11, %v2928_v63  ;;  %v2937_v14 = vshll.u32 %v18312_v13, %v2928_v63 }
  0x2f   :  { %v2940_v16 = vshll.u32 %v18310_v15, %v2928_v63  ;;  %v2943_v18 = vshll.u32 %v18308_v17, %v2928_v63  ;;  %vm2946_vm8 = vcmp.lt.s32.totalorder %v11383_v4, 1  ;;  %vm2949_vm9 = vcmp.lt.s32.totalorder %v11383_v4, 4 }
  0x30   :  { %v2932_v21 = vshrl.u32 %v18314_v11, %v2929_v8  ;;  %v2935_v22 = vshrl.u32 %v18312_v13, %v2929_v8  ;;  %v2938_v23 = vshrl.u32 %v18310_v15, %v2929_v8  ;;  %v2941_v25 = vshrl.u32 %v18308_v17, %v2929_v8 }
  0x31   :  { %v2944_v27 = vshrl.u32 %v18306_v26, %v2929_v8  ;;  %v11407_v31 = vsub.s32 32, %v11385_v5  ;;  %v2930_v32 = vshrl.u32 %v18316_v9, %v2929_v8  ;;  %vm2948_vm10 = vcmp.lt.s32.totalorder %v11383_v4, 3 }
  0x32   :  { %v2933_v28 = vor.u32 %v2932_v21, %v2931_v10  ;;  %v2936_v29 = vor.u32 %v2935_v22, %v2934_v12  ;;  %v2939_v30 = vor.u32 %v2938_v23, %v2937_v14  ;;  %v2942_v33 = vor.u32 %v2941_v25, %v2940_v16 }
  0x33   :  { %v2945_v34 = vor.u32 %v2944_v27, %v2943_v18  ;;  %vm2947_vm11 = vcmp.lt.s32.totalorder %v11383_v4, 2  ;;  %v5395_v40 = vshll.u32 %v18316_v9, %v11385_v5  ;;  %v5398_v43 = vshll.u32 %v18314_v11, %v11385_v5 }
  0x34   :  { %v2954_v35 = vsel %vm2946_vm8, %v2933_v28, %v2936_v29  ;;  %v2958_v36 = vsel %vm2946_vm8, %v2936_v29, %v2939_v30  ;;  %v2955_v38 = vsel %vm2949_vm9, %v2942_v33, 920167782  ;;  %v2951_v45 = vsel %vm2949_vm9, %v2939_v30, 2102212464 }
  0x35   :  { %v2959_v39 = vsel %vm2949_vm9, %v2945_v34, 1326507024  ;;  %v2956_v47 = vsel %vm2948_vm10, %v2939_v30, %v2955_v38  ;;  %v5396_v50 = vshrl.u32 %v18314_v11, %v11407_v31  ;;  %v2950_v51 = vsel %vm2946_vm8, %v2930_v32, %v2933_v28 }
  0x36   :  { %v2960_v49 = vsel %vm2948_vm10, %v2942_v33, %v2959_v39  ;;  %v2957_v52 = vsel %vm2947_vm11, %v2954_v35, %v2956_v47  ;;  %v5399_v54 = vshrl.u32 %v18312_v13, %v11407_v31  ;;  %v2952_v59 = vsel %vm2948_vm10, %v2936_v29, %v2951_v45 }
  0x37   :  { %v2961_v53 = vsel %vm2947_vm11, %v2958_v36, %v2960_v49  ;;  %v2987_v57 = vand.u32 65535, %v2957_v52  ;;  %v2988_v58 = vshrl.u32 %v2957_v52, 16  ;;  %v11444_v60 = vor.u32 %v5396_v50, %v5395_v40 }
  0x38   :  { %v2965_v55 = vand.u32 65535, %v2961_v53  ;;  %v2966_v56 = vshrl.u32 %v2961_v53, 16  ;;  %v11446_v62 = vor.u32 %v5399_v54, %v5398_v43  ;;  %v5401_v63 = vshll.u32 %v18312_v13, %v11385_v5 }
  0x39   :  { %v5402_v12 = vshrl.u32 %v18310_v15, %v11407_v31  ;;  %v2989_v16 = vmul.u32 %v2987_v57, %v2963_v19  ;;  %v2990_v18 = vmul.u32 %v2988_v58, %v2963_v19  ;;  %v2991_v21 = vmul.u32 %v2987_v57, %v2964_v24 }
  0x3a   :  { %v2967_v0 = vmul.u32 %v2965_v55, %v2963_v19  ;;  %v2968_v8 = vmul.u32 %v2966_v56, %v2963_v19  ;;  %v2969_v10 = vmul.u32 %v2965_v55, %v2964_v24  ;;  %v2970_v14 = vmul.u32 %v2966_v56, %v2964_v24 }
  0x3b   :  { %v2992_v27 = vmul.u32 %v2988_v58, %v2964_v24  ;;  %v2993_v29 = vshll.u32 %v2990_v18, 16  ;;  %v2994_v30 = vshrl.u32 %v2990_v18, 16  ;;  %v2995_v32 = vshll.u32 %v2991_v21, 16 }
  0x3c   :  { %v2971_v22 = vshll.u32 %v2968_v8, 16  ;;  %v2972_v23 = vshrl.u32 %v2968_v8, 16  ;;  %v2973_v25 = vshll.u32 %v2969_v10, 16  ;;  %v2974_v28 = vshrl.u32 %v2969_v10, 16 }
  0x3d   :  { %v2996_v34 = vshrl.u32 %v2991_v21, 16  ;;  %v5404_v35 = vshll.u32 %v18310_v15, %v11385_v5  ;;  %v18304_v36 = vmov 0   ;;  %vm2997_vm13 = vc.u32 %v2989_v16, %v2993_v29 }
  0x3e   :  { %vm2975_vm12 = vc.u32 %v2967_v0, %v2971_v22  ;;  %v2977_v33 = vadd.s32 %v2971_v22, %v2967_v0  ;;  %v2999_v19 = vadd.s32 %v2993_v29, %v2989_v16  ;;  %v5405_v39 = vshrl.u32 %v18308_v17, %v11407_v31 }
  0x3f   :  { %v2976_v38 = vsel %vm2975_vm12, 1, %v18304_v36  ;;  %v2998_v24 = vsel %vm2997_vm13, 1, %v18304_v36  ;;  %v5407_v43 = vshll.u32 %v18308_v17, %v11385_v5  ;;  %v5403_v49 = vor.u32 %v5402_v12, %v5401_v63 }
  0x40   :  { %v2978_v40 = vadd.s32 %v2976_v38, %v2970_v14  ;;  %vm2979_vm14 = vc.u32 %v2977_v33, %v2973_v25  ;;  %v3000_v47 = vadd.s32 %v2998_v24, %v2992_v27  ;;  %vm3001_vm15 = vc.u32 %v2999_v19, %v2995_v32 }
  0x41   :  { %v2980_v45 = vsel %vm2979_vm14, 1, %v18304_v36  ;;  %v3002_v52 = vsel %vm3001_vm15, 1, %v18304_v36  ;;  %v5406_v53 = vor.u32 %v5405_v39, %v5404_v35  ;;  %v5408_v54 = vshrl.u32 %v18306_v26, %v11407_v31 }
  0x42   :  { %v2982_v50 = vadd.s32 %v2980_v45, %v2978_v40  ;;  %v11464_v55 = vadd.s32 %v2999_v19, %v2995_v32  ;;  %v3004_v56 = vadd.s32 %v3002_v52, %v3000_v47  ;;  %vm5410_vm0 = vcmp.lt.s32.totalorder %v11416_v37, 1 }
  0x43   :  { %vm5412_vm1 = vcmp.lt.s32.totalorder %v11416_v37, 3  ;;  %v5409_v57 = vor.u32 %v5408_v54, %v5407_v43  ;;  %vm5411_vm2 = vcmp.lt.s32.totalorder %v11416_v37, 2  ;;  %vm5413_vm3 = vcmp.lt.s32.totalorder %v11416_v37, 4 }
  0x44   :  { %v2983_v5 = vadd.s32 %v2982_v50, %v2972_v23  ;;  %v2953_v58 = vsel %vm2947_vm11, %v2950_v51, %v2952_v59  ;;  %v3005_v63 = vadd.s32 %v3004_v56, %v2994_v30  ;;  %v5418_v0 = vsel %vm5410_vm0, %v11444_v60, %v11446_v62 }
  0x45   :  { %v5419_v8 = vsel %vm5413_vm3, %v5406_v53, 920167782  ;;  %v5422_v14 = vsel %vm5410_vm0, %v11446_v62, %v5403_v49  ;;  %v5427_v4 = vand.u32 65535, %v11387_v6  ;;  %v5423_v16 = vsel %vm5413_vm3, %v5409_v57, 1326507024 }
  0x46   :  { %v11478_v10 = vadd.s32 %v2983_v5, %v2974_v28  ;;  %v5420_v12 = vsel %vm5412_vm1, %v5403_v49, %v5419_v8  ;;  %v3006_v51 = vadd.s32 %v3005_v63, %v2996_v34  ;;  %v5428_v18 = vshrl.u32 %v11387_v6, 16 }
  0x47   :  { %v5421_v59 = vsel %vm5411_vm2, %v5418_v0, %v5420_v12  ;;  %v3007_v21 = vmul.u32 %v11378_v61, %v2953_v58  ;;  %v5424_v22 = vsel %vm5412_vm1, %v5406_v53, %v5423_v16  ;;  %v5394_v27 = vshrl.u32 %v18316_v9, %v11407_v31 }
  0x48   :  { %vm3009_vm4 = vc.u32 %v11478_v10, %v11464_v55  ;;  %v5451_v23 = vand.u32 65535, %v5421_v59  ;;  %v3010_v25 = vadd.s32 1, %v3006_v51  ;;  %v5425_v28 = vsel %vm5411_vm2, %v5422_v14, %v5424_v22 }
  0x49   :  { %v5452_v29 = vshrl.u32 %v5421_v59, 16  ;;  %v5429_v30 = vand.u32 65535, %v5425_v28  ;;  %v5430_v32 = vshrl.u32 %v5425_v28, 16  ;;  %v2770_v33 = vadd.s32 1, %v11396_v20 }
  0x4a   :  { %v11503_v61 = vmul.u32 %v11355_v2, %v11381_v3  ;;  %v3011_v34 = vsel %vm3009_vm4, %v3010_v25, %v3006_v51  ;;  %v5415_v35 = vsel %vm5413_vm3, %v5403_v49, 2102212464  ;;  %v5455_v19 = vmul.u32 %v5451_v23, %v5428_v18 }
  0x4b   :  { %v5454_v38 = vmul.u32 %v5452_v29, %v5427_v4  ;;  %v3012_v39 = vadd.s32 %v3011_v34, %v3007_v21  ;;  %v5431_v31 = vmul.u32 %v5429_v30, %v5427_v4  ;;  %v5432_v40 = vmul.u32 %v5430_v32, %v5427_v4 }
  0x4c   :  { %v5453_v24 = vmul.u32 %v5451_v23, %v5427_v4  ;;  %v5414_v43 = vsel %vm5410_vm0, %v5394_v27, %v11444_v60  ;;  %v5433_v45 = vmul.u32 %v5429_v30, %v5428_v18  ;;  %v11512_v3 = vand.u32 8388607, %v2760_v7 }
  0x4d   :  { %v5457_v20 = vshll.u32 %v5454_v38, 16  ;;  %v3013_v47 = vadd.s32 536870912, %v3012_v39  ;;  %v5416_v49 = vsel %vm5412_vm1, %v11446_v62, %v5415_v35  ;;  %v5434_v50 = vmul.u32 %v5430_v32, %v5428_v18 }
  0x4e   :  { %v5435_v52 = vshll.u32 %v5432_v40, 16  ;;  %v5437_v53 = vshll.u32 %v5433_v45, 16  ;;  %v5456_v54 = vmul.u32 %v5452_v29, %v5428_v18  ;;  %v5459_v56 = vshll.u32 %v5455_v19, 16 }
  0x4f   :  { %vm2771_vm5 = vcmp.gt.s32.totalorder %v2770_v33, 0  ;;  %v3014_v5 = vshrl.u32 %v3013_v47, 30  ;;  %vm5461_vm7 = vc.u32 %v5453_v24, %v5457_v20  ;;  %v5436_v57 = vshrl.u32 %v5432_v40, 16 }
  0x50   :  { %vm5439_vm6 = vc.u32 %v5431_v31, %v5435_v52  ;;  %v5441_v60 = vadd.s32 %v5435_v52, %v5431_v31  ;;  %v5462_v63 = vsel %vm5461_vm7, 1, %v18304_v36  ;;  %v5463_v0 = vadd.s32 %v5457_v20, %v5453_v24 }
  0x51   :  { %v5440_v58 = vsel %vm5439_vm6, 1, %v18304_v36  ;;  %v3015_v8 = vshll.u32 %v3014_v5, 30  ;;  %v2772_v62 = vsel %vm2771_vm5, %v2770_v33, 0  ;;  %v5458_v4 = vshrl.u32 %v5454_v38, 16 }
  0x52   :  { %v5442_v12 = vadd.s32 %v5440_v58, %v5434_v50  ;;  %vm5443_vm8 = vc.u32 %v5441_v60, %v5437_v53  ;;  %v5464_v51 = vadd.s32 %v5462_v63, %v5456_v54  ;;  %vm5465_vm9 = vc.u32 %v5463_v0, %v5459_v56 }
  0x53   :  { %v5444_v14 = vsel %vm5443_vm8, 1, %v18304_v36  ;;  %v3016_v59 = vsub.s32 %v3012_v39, %v3015_v8  ;;  %v5438_v16 = vshrl.u32 %v5433_v45, 16  ;;  %v5466_v21 = vsel %vm5465_vm9, 1, %v18304_v36 }
  0x54   :  { %v5446_v18 = vadd.s32 %v5444_v14, %v5442_v12  ;;  %v5460_v22 = vshrl.u32 %v5455_v19, 16  ;;  %v5468_v23 = vadd.s32 %v5466_v21, %v5464_v51  ;;  %v2774_v25 = vand.u32 31, %v2772_v62 }
  0x55   :  { %v186_v27 = vcvt.s32.f32 %v11503_v61  ;;  %vm3017_vm10 = vcmp.lt.s32.totalorder %v3016_v59, 0  ;;  %v3018_v28 = vsub.s32 0, %v3016_v59  ;;  %v11522_v30 = vadd.s32 %v5463_v0, %v5459_v56 }
  0x56   :  { %v5447_v29 = vadd.s32 %v5446_v18, %v5436_v57  ;;  %v3038_v32 = vsub.s32 4, %v3014_v5  ;;  %v5417_v33 = vsel %vm5411_vm2, %v5414_v43, %v5416_v49  ;;  %v5469_v34 = vadd.s32 %v5468_v23, %v5458_v4 }
  0x57   :  { %vm11528_vm11 = vcmp.le.f32.partialorder %v2914_v44, 0.7853982  ;;  %vm2916_vm12 = vcmp.lt.s32.totalorder %v11363_v41, 0  ;;  %v3019_v38 = vsel %vm3017_vm10, %v3018_v28, %v3016_v59  ;;  %v2768_v40 = vor.u32 8388608, %v11512_v3 }
  0x58   :  { %v11533_v19 = vadd.s32 %v5447_v29, %v5438_v16  ;;  %v3020_v39 = vclz %v3019_v38  ;;  %v5470_v31 = vadd.s32 %v5469_v34, %v5460_v22  ;;  %v2775_v24 = vsub.s32 32, %v2774_v25 }
  0x59   :  { %v3008_v37 = vadd.s32 %v11464_v55, %v11478_v10  ;;  %v5471_v43 = vmul.u32 %v11387_v6, %v5417_v33  ;;  %v11541_v44 = vmul.f32 0.00390625, %v186_v27  ;;  %v3039_v20 = vsel %vm2916_vm12, %v3038_v32, %v3014_v5 }
  0x5a   :  { %vm5473_vm13 = vc.u32 %v11533_v19, %v11522_v30  ;;  %v11046_v45 = vadd.s32 4294967294, %v3020_v39  ;;  %v5474_v47 = vadd.s32 1, %v5470_v31  ;;  %v11545_v49 = vshrl.u32 %v2772_v62, 5 }
  0x5b   :  { %v2777_v3 = vshll.u32 %v18316_v9, %v2774_v25  ;;  %v2780_v50 = vshll.u32 %v18314_v11, %v2774_v25  ;;  %v2783_v55 = vshll.u32 %v18312_v13, %v2774_v25  ;;  %v2786_v6 = vshll.u32 %v18310_v15, %v2774_v25 }
  0x5c   :  { %vm11047_vm14 = vcmp.lt.s32.totalorder %v11046_v45, 0  ;;  %v5475_v10 = vsel %vm5473_vm13, %v5474_v47, %v5470_v31  ;;  %v2778_v52 = vshrl.u32 %v18314_v11, %v2775_v24  ;;  %v2787_v53 = vshrl.u32 %v18308_v17, %v2775_v24 }
  0x5d   :  { %v3023_v54 = vsel %vm11047_vm14, 0, %v11046_v45  ;;  %v5476_v56 = vadd.s32 %v5475_v10, %v5471_v43  ;;  %v2781_v5 = vshrl.u32 %v18312_v13, %v2775_v24  ;;  %v2784_v60 = vshrl.u32 %v18310_v15, %v2775_v24 }
  0x5e   :  { %v3024_v57 = vsub.s32 32, %v3023_v54  ;;  %v3025_v58 = vshll.u32 %v3016_v59, %v3023_v54  ;;  %v3028_v63 = vsub.s32 4294967266, %v3023_v54  ;;  %v11557_v0 = vsel %vm11528_vm11, 0, %v3039_v20 }
  0x5f   :  { %18725 = vst [vmem:[#allocation13_spill] sm:$0xff] %v11557_v0  ;;  %v5477_v8 = vadd.s32 536870912, %v5476_v56  ;;  %v2776_v12 = vshrl.u32 %v18316_v9, %v2775_v24  ;;  %v2789_v62 = vshll.u32 %v18308_v17, %v2774_v25  ;;  %v2790_v14 = vshrl.u32 %v18306_v26, %v2775_v24 }
  0x60   :  { %v3026_v4 = vshrl.u32 %v3008_v37, %v3024_v57  ;;  %v3029_v51 = vadd.s32 127, %v3028_v63  ;;  %v2779_v16 = vor.u32 %v2778_v52, %v2777_v3  ;;  %v2788_v18 = vor.u32 %v2787_v53, %v2786_v6 }
  0x61   :  { %v5478_v21 = vshrl.u32 %v5477_v8, 30  ;;  %v2782_v22 = vor.u32 %v2781_v5, %v2780_v50  ;;  %v2785_v23 = vor.u32 %v2784_v60, %v2783_v55  ;;  %vm2792_vm15 = vcmp.lt.s32.totalorder %v11545_v49, 1 }
  0x62   :  { %v3027_v59 = vor.u32 %v3026_v4, %v3025_v58  ;;  %v3030_v27 = vshll.u32 %v3029_v51, 23  ;;  %vm2794_vm0 = vcmp.lt.s32.totalorder %v11545_v49, 3  ;;  %vm2795_vm1 = vcmp.lt.s32.totalorder %v11545_v49, 4 }
  0x63   :  { %v8001_v28 = vadd.s32 3, %v11557_v0  ;;  %v5479_v25 = vshll.u32 %v5478_v21, 30  ;;  %v2791_v29 = vor.u32 %v2790_v14, %v2789_v62  ;;  %v11566_v32 = vshll.u32 %v2768_v40, 8 }
  0x64   :  { %v3031_v33 = vor.u32 4788187, %v3030_v27  ;;  %v3034_v34 = vcvt.s32.f32 %v3027_v59  ;;  %v2797_v38 = vsel %vm2795_vm1, %v2785_v23, 2102212464  ;;  %v2801_v39 = vsel %vm2795_vm1, %v2788_v18, 920167782 }
  0x65   :  { %v11572_v31 = vsub.s32 %v5476_v56, %v5479_v25  ;;  %vm2793_vm2 = vcmp.lt.s32.totalorder %v11545_v49, 2  ;;  %v2800_v24 = vsel %vm2792_vm15, %v2779_v16, %v2782_v22  ;;  %v2802_v37 = vsel %vm2794_vm0, %v2785_v23, %v2801_v39 }
  0x66   :  { %v3032_v40 = vand.u32 2147483647, %v3031_v33  ;;  %v5502_v43 = vsub.s32 4, %v5478_v21  ;;  %v2796_v45 = vsel %vm2792_vm15, %v2776_v12, %v2779_v16  ;;  %v2804_v20 = vsel %vm2792_vm15, %v2782_v22, %v2785_v23 }
  0x67   :  { %vm5481_vm3 = vcmp.lt.s32.totalorder %v11572_v31, 0  ;;  %v5482_v47 = vsub.s32 0, %v11572_v31  ;;  %v2798_v3 = vsel %vm2794_vm0, %v2782_v22, %v2797_v38  ;;  %v2805_v50 = vsel %vm2795_vm1, %v2791_v29, 1326507024 }
  0x68   :  { %v3035_v55 = vmul.f32 %v3034_v34, %v3032_v40  ;;  %v2803_v6 = vsel %vm2793_vm2, %v2800_v24, %v2802_v37  ;;  %v2806_v10 = vsel %vm2794_vm0, %v2788_v18, %v2805_v50  ;;  %v2809_v52 = vand.u32 65535, %v11566_v32 }
  0x69   :  { %v5483_v53 = vsel %vm5481_vm3, %v5482_v47, %v11572_v31  ;;  %v2807_v54 = vsel %vm2793_vm2, %v2804_v20, %v2806_v10  ;;  %v2810_v56 = vshrl.u32 %v11566_v32, 16  ;;  %v2833_v5 = vand.u32 65535, %v2803_v6 }
  0x6a   :  { %v3036_v60 = vxor.u32 2147483648, %v3035_v55  ;;  %v5484_v57 = vclz %v5483_v53  ;;  %v2811_v58 = vand.u32 65535, %v2807_v54  ;;  %v2812_v63 = vshrl.u32 %v2807_v54, 16 }
  0x6b   :  { %v11598_v8 = vand.u32 3, %v8001_v28  ;;  %vm5380_vm4 = vcmp.lt.s32.totalorder %v11365_v42, 0  ;;  %v5472_v12 = vadd.s32 %v11522_v30, %v11533_v19  ;;  %v2834_v62 = vshrl.u32 %v2803_v6, 16 }
  0x6c   :  { %v3037_v14 = vsel %vm2916_vm12, %v3036_v60, %v3035_v55  ;;  %v11094_v4 = vadd.s32 4294967294, %v5484_v57  ;;  %v11607_v51 = vsel %vm5380_vm4, %v5502_v43, %v5478_v21  ;;  %v2814_v16 = vmul.u32 %v2812_v63, %v2809_v52 }
  0x6d   :  { %v11612_v18 = vsel %vm11528_vm11, %v11363_v41, %v3037_v14  ;;  %v11616_v22 = vsel %vm2793_vm2, %v2796_v45, %v2798_v3  ;;  %v2813_v30 = vmul.u32 %v2811_v58, %v2809_v52  ;;  %v11618_v19 = vmul.u32 %v2811_v58, %v2810_v56 }
  0x6e   :  { %v3042_v23 = vmul.f32 %v11612_v18, %v11612_v18  ;;  %vm11095_vm5 = vcmp.lt.s32.totalorder %v11094_v4, 0  ;;  %v2817_v59 = vshll.u32 %v2814_v16, 16  ;;  %v2835_v21 = vmul.u32 %v2833_v5, %v2809_v52 }
  0x6f   :  { %v5487_v27 = vsel %vm11095_vm5, 0, %v11094_v4  ;;  %v11622_v28 = vmul.u32 %v2834_v62, %v2809_v52  ;;  %v11624_v25 = vmul.u32 %v2833_v5, %v2810_v56  ;;  %v2838_v35 = vmul.u32 %v2834_v62, %v2810_v56 }
  0x70   :  { %v3043_v29 = vmul.f32 -0.001358992, %v3042_v23  ;;  %v3050_v33 = vmul.f32 -0.00019511016, %v3042_v23  ;;  %v5488_v49 = vsub.s32 32, %v5487_v27  ;;  %v5489_v34 = vshll.u32 %v11572_v31, %v5487_v27 }
  0x71   :  { %v5492_v38 = vsub.s32 4294967266, %v5487_v27  ;;  %v2816_v39 = vmul.u32 %v2812_v63, %v2810_v56  ;;  %v2819_v24 = vshll.u32 %v11618_v19, 16  ;;  %vm2821_vm6 = vc.u32 %v2813_v30, %v2817_v59 }
  0x72   :  { %v3044_v37 = vadd.f32 0.041655596, %v3043_v29  ;;  %v3051_v40 = vadd.f32 0.008332121, %v3050_v33  ;;  %v5490_v43 = vshrl.u32 %v5472_v12, %v5488_v49  ;;  %v2822_v45 = vsel %vm2821_vm6, 1, %v18304_v36 }
  0x73   :  { %vm8007_vm7 = vcmp.eq.s32.totalorder %v11598_v8, 2  ;;  %v5493_v20 = vadd.s32 127, %v5492_v38  ;;  %v2818_v47 = vshrl.u32 %v2814_v16, 16  ;;  %v2820_v3 = vshrl.u32 %v11618_v19, 16 }
  0x74   :  { %v2839_v50 = vshll.u32 %v11622_v28, 16  ;;  %v3045_v55 = vmul.f32 %v3044_v37, %v3042_v23  ;;  %v3052_v31 = vmul.f32 %v3051_v40, %v3042_v23  ;;  %v5491_v6 = vor.u32 %v5490_v43, %v5489_v34 }
  0x75   :  { %v2823_v10 = vadd.s32 %v2817_v59, %v2813_v30  ;;  %vm8004_vm8 = vcmp.eq.s32.totalorder %v11598_v8, 0  ;;  %vm11635_vm9 = vcmp.le.f32.partialorder %v5378_v46, 0.7853982  ;;  %v5494_v53 = vshll.u32 %v5493_v20, 23 }
  0x76   :  { %v2824_v54 = vadd.s32 %v2822_v45, %v2816_v39  ;;  %v2840_v56 = vshrl.u32 %v11622_v28, 16  ;;  %v2841_v5 = vshll.u32 %v11624_v25, 16  ;;  %v3046_v60 = vadd.f32 -0.4999988, %v3045_v55 }
  0x77   :  { %v3053_v57 = vadd.f32 -0.16666654, %v3052_v31  ;;  %vm8003_vm10 = vcmp.lt.s32.totalorder %v11598_v8, 2  ;;  %v5498_v58 = vcvt.s32.f32 %v5491_v6  ;;  %vm2825_vm11 = vc.u32 %v2823_v10, %v2819_v24 }
  0x78   :  { %vm18392_vm12 = vweird.f32 %v11363_v41  ;;  %v5495_v63 = vor.u32 4788187, %v5494_v53  ;;  %v2826_v46 = vsel %vm2825_vm11, 1, %v18304_v36  ;;  %v2842_v12 = vshrl.u32 %v11624_v25, 16 }
  0x79   :  { %vm2843_vm13 = vc.u32 %v2835_v21, %v2839_v50  ;;  %v3047_v62 = vmul.f32 %v3046_v60, %v3042_v23  ;;  %v3054_v14 = vmul.f32 %v3053_v57, %v3042_v23  ;;  %v2828_v4 = vadd.s32 %v2826_v46, %v2824_v54 }
  0x7a   :  { %v2844_v16 = vsel %vm2843_vm13, 1, %v18304_v36  ;;  %v5496_v30 = vand.u32 2147483647, %v5495_v63  ;;  %v2845_v19 = vadd.s32 %v2839_v50, %v2835_v21  ;;  %v250_v27 = vfloor.f32 %v11541_v44 }
  0x7b   :  { %v2846_v59 = vadd.s32 %v2844_v16, %v2838_v35  ;;  %v11647_v28 = vadd.f32 1.0, %v3047_v62  ;;  %v3055_v29 = vadd.f32 1.0, %v3054_v14  ;;  %v2829_v33 = vadd.s32 %v2828_v4, %v2818_v47 }
  0x7c   :  { %v38_v49 = vadd.s32 104, %v11353_v1  ;;  %v5499_v34 = vmul.f32 %v5498_v58, %v5496_v30  ;;  %vm2847_vm14 = vc.u32 %v2845_v19, %v2841_v5  ;;  %v11650_v25 = vadd.s32 %v2845_v19, %v2841_v5 }
  0x7d   :  { %18728 = vst [vmem:[#allocation14_spill] sm:$0xff] %v11647_v28  ;;  %v11261_v38 = vcvt.f32.s32 %v250_v27  ;;  %v11653_v23 = vmul.f32 %v3055_v29, %v11612_v18  ;;  %v18294_v39 = vxor.u32 2147483648, %v11647_v28  ;;  %v11656_v21 = vadd.s32 %v2829_v33, %v2820_v3 }
  0x7e   :  { %v2848_v44 = vsel %vm2847_vm14, 1, %v18304_v36  ;;  %v5500_v35 = vxor.u32 2147483648, %v5499_v34  ;;  %v105_v40 = vmul.u32 %v11355_v2, %v38_v49  ;;  %v11669_v45 = vsel %vm11635_vm9, 0, %v11607_v51 }
  0x7f   :  { %18729 = vst [vmem:[#allocation15_spill] sm:$0xff] %v11653_v23  ;;  %v2850_v24 = vadd.s32 %v2848_v44, %v2846_v59  ;;  %v314_v37 = vmul.u32 256, %v11261_v38  ;;  %v18295_v43 = vxor.u32 2147483648, %v11653_v23  ;;  %v8009_v18 = vsel %vm8007_vm7, %v18294_v39, %v11653_v23 }
  0x80   :  { %18730 = vst [vmem:[#allocation16_spill] sm:$0xff] %v11669_v45  ;;  %v2853_v20 = vmul.u32 %v11566_v32, %v11616_v22  ;;  %v5501_v47 = vsel %vm5380_vm4, %v5500_v35, %v5499_v34  ;;  %v169_v55 = vcvt.s32.f32 %v105_v40  ;;  %vm2855_vm15 = vc.u32 %v11656_v21, %v11650_v25 }
  0x81   :  { %v2851_v3 = vadd.s32 %v2850_v24, %v2840_v56  ;;  %v346_v50 = vsub.s32 %v11503_v61, %v314_v37  ;;  %v8006_v31 = vsel %vm8004_vm8, %v11647_v28, %v18295_v43  ;;  %v5504_v51 = vsel %vm11635_vm9, %v11365_v42, %v5501_v47 }
  0x82   :  { %v54_v32 = vadd.s32 232, %v11353_v1  ;;  %v8010_v22 = vsel %vm8003_vm10, %v8006_v31, %v8009_v18  ;;  %v5506_v61 = vmul.f32 %v5504_v51, %v5504_v51  ;;  %v201_v54 = vmul.f32 0.00390625, %v169_v55 }
  0x83   :  { %v2852_v6 = vadd.s32 %v2851_v3, %v2842_v12  ;;  %vm378_vm0 = vcmp.lt.s32.totalorder %v346_v50, 0  ;;  %v8011_v10 = vsel %vm18392_vm12, nan, %v8010_v22  ;;  %v410_v53 = vadd.s32 256, %v346_v50 }
  0x84   :  { %v11692_v56 = vmul.u32 %v11355_v2, %v54_v32  ;;  %10534 = vmatpush.msra.mxu2 %v8011_v10  ;;  %v5507_v52 = vmul.f32 -0.001358992, %v5506_v61  ;;  %v5514_v5 = vmul.f32 -0.00019511016, %v5506_v61  ;;  %v10481_v57 = vadd.s32 3, %v11669_v45 }
  0x85   :  { %v2856_v60 = vadd.s32 1, %v2852_v6  ;;  %v442_v58 = vsel %vm378_vm0, %v410_v53, %v346_v50  ;;  %v233_v8 = vfloor.f32 %v201_v54  ;;  %vm18379_vm7 = vweird.f32 %v11365_v42 }
  0x86   :  { %v5508_v63 = vadd.f32 0.041655596, %v5507_v52  ;;  %v5515_v46 = vadd.f32 0.008332121, %v5514_v5  ;;  %vm474_vm1 = vcmp.ge.s32.totalorder %v442_v58, 256  ;;  %v10998_v14 = vadd.s32 4294967040, %v442_v58 }
  0x87   :  { %v2857_v12 = vsel %vm2855_vm15, %v2856_v60, %v2852_v6  ;;  %v11227_v4 = vcvt.f32.s32 %v233_v8  ;;  %v185_v16 = vcvt.s32.f32 %v11692_v56  ;;  %v10482_v34 = vand.u32 3, %v10481_v57 }
  0x88   :  { %v2858_v62 = vadd.s32 %v2857_v12, %v2853_v20  ;;  %v5509_v30 = vmul.f32 %v5508_v63, %v5506_v61  ;;  %v5516_v19 = vmul.f32 %v5515_v46, %v5506_v61  ;;  %v538_v27 = vsel %vm474_vm1, %v10998_v14, %v442_v58 }
  0x89   :  { %v297_v29 = vmul.u32 256, %v11227_v4  ;;  %v570_v38 = vcvt.s32.f32 %v538_v27  ;;  %v217_v35 = vmul.f32 0.00390625, %v185_v16  ;;  %vm10483_vm2 = vcmp.lt.s32.totalorder %v10482_v34, 2 }
  0x8a   :  { %v2859_v59 = vadd.s32 536870912, %v2858_v62  ;;  %v5510_v33 = vadd.f32 -0.4999988, %v5509_v30  ;;  %v5517_v49 = vadd.f32 -0.16666654, %v5516_v19  ;;  %vm10487_vm3 = vcmp.eq.s32.totalorder %v10482_v34, 2 }
  0x8b   :  { %v11699_v18 = vmul.f32 0.024543693, %v570_v38  ;;  %v329_v20 = vsub.s32 %v105_v40, %v297_v29  ;;  %v249_v22 = vfloor.f32 %v217_v35  ;;  %vm10484_vm4 = vcmp.eq.s32.totalorder %v10482_v34, 0 }
  0x8c   :  { %v2860_v44 = vshrl.u32 %v2859_v59, 30  ;;  %v5511_v24 = vmul.f32 %v5510_v33, %v5506_v61  ;;  %v5518_v37 = vmul.f32 %v5517_v49, %v5506_v61  ;;  %vm11721_vm8 = vcmp.le.f32.partialorder %v2760_v7, 0.7853982 }
  0x8d   :  { %18731 = vst [vmem:[#allocation17_spill] sm:$0xff] %v11699_v18  ;;  %v5227_v55 = vand.u32 2139095040, %v11699_v18  ;;  %v5224_v32 = vand.u32 2147483647, %v11699_v18  ;;  %v393_v53 = vadd.s32 256, %v329_v20  ;;  %vm361_vm6 = vcmp.lt.s32.totalorder %v329_v20, 0 }
  0x8e   :  { %v2861_v47 = vshll.u32 %v2860_v44, 30  ;;  %v11701_v3 = vadd.f32 1.0, %v5511_v24  ;;  %v5519_v50 = vadd.f32 1.0, %v5518_v37  ;;  %v2884_v5 = vsub.s32 4, %v2860_v44 }
  0x8f   :  { %v5228_v61 = vshrl.u32 %v5227_v55, 23  ;;  %v5231_v57 = vand.u32 8388607, %v5224_v32  ;;  %v11259_v58 = vcvt.f32.s32 %v249_v22  ;;  %v425_v12 = vsel %vm361_vm6, %v393_v53, %v329_v20 }
  0x90   :  { %18732 = vst [vmem:[#allocation18_spill] sm:$0xff] %v11701_v3  ;;  %v2862_v31 = vsub.s32 %v2858_v62, %v2861_v47  ;;  %v11705_v6 = vmul.f32 %v5519_v50, %v5504_v51  ;;  %v18292_v10 = vxor.u32 2147483648, %v11701_v3  ;;  %vm2762_vm9 = vcmp.lt.s32.totalorder %v11371_v48, 0 }
  0x91   :  { %v11090_v60 = vadd.s32 4294967169, %v5228_v61  ;;  %v2885_v30 = vsel %vm2762_vm9, %v2884_v5, %v2860_v44  ;;  %v5232_v19 = vor.u32 8388608, %v5231_v57  ;;  %v10981_v27 = vadd.s32 4294967040, %v425_v12 }
  0x92   :  { %18733 = vst [vmem:[#allocation19_spill] sm:$0xff] %v11705_v6  ;;  %vm2863_vm5 = vcmp.lt.s32.totalorder %v2862_v31, 0  ;;  %v2864_v40 = vsub.s32 0, %v2862_v31  ;;  %v18293_v54 = vxor.u32 2147483648, %v11705_v6  ;;  %v10489_v52 = vsel %vm10487_vm3, %v18292_v10, %v11705_v6 }
  0x93   :  { %v5234_v46 = vadd.s32 1, %v11090_v60  ;;  %v313_v29 = vmul.u32 256, %v11259_v58  ;;  %v2854_v7 = vadd.s32 %v11650_v25, %v11656_v21  ;;  %vm457_vm13 = vcmp.ge.s32.totalorder %v425_v12, 256 }
  0x94   :  { %v2865_v51 = vsel %vm2863_vm5, %v2864_v40, %v2862_v31  ;;  %v10486_v8 = vsel %vm10484_vm4, %v11701_v3, %v18293_v54  ;;  %v11734_v34 = vsel %vm11721_vm8, 0, %v2885_v30  ;;  %v11737_v20 = vshll.u32 %v5232_v19, 8 }
  0x95   :  { %v2866_v63 = vclz %v2865_v51  ;;  %v10490_v62 = vsel %vm10483_vm2, %v10486_v8, %v10489_v52  ;;  %vm5235_vm10 = vcmp.gt.s32.totalorder %v5234_v46, 0  ;;  %18736 = vst [vmem:[#allocation20_spill] sm:$0xff] %v11734_v34  ;;  %v521_v47 = vsel %vm457_vm13, %v10981_v27, %v425_v12 }
  0x96   :  { %v10491_v4 = vsel %vm18379_vm7, nan, %v10490_v62  ;;  %v5236_v59 = vsel %vm5235_vm10, %v5234_v46, 0  ;;  %v11740_v50 = vsub.s32 %v11692_v56, %v313_v29  ;;  %v553_v56 = vcvt.s32.f32 %v521_v47 }
  0x97   :  { %v11043_v16 = vadd.s32 4294967294, %v2866_v63  ;;  %10554 = vmatpush.msra.mxu3 %v10491_v4  ;;  %v5238_v33 = vand.u32 31, %v5236_v59  ;;  %v11742_v55 = vshrl.u32 %v5236_v59, 5  ;;  %v11756_v4 = vadd.s32 3, %v11734_v34 }
  0x98   :  { %v11751_v8 = vadd.s32 256, %v11740_v50  ;;  %v5274_v47 = vshrl.u32 %v11737_v20, 16  ;;  %vm377_vm2 = vcmp.lt.s32.totalorder %v11740_v50, 0 }
  0x99   :  { %vm11044_vm11 = vcmp.lt.s32.totalorder %v11043_v16, 0  ;;  %v5239_v24 = vsub.s32 32, %v5238_v33  ;;  %v5241_v37 = vshll.u32 %v18316_v9, %v5238_v33  ;;  %v5244_v61 = vshll.u32 %v18314_v11, %v5238_v33 }
  0x9a   :  { %v2869_v49 = vsel %vm11044_vm11, 0, %v11043_v16  ;;  %v5247_v53 = vshll.u32 %v18312_v13, %v5238_v33  ;;  %v5250_v60 = vshll.u32 %v18310_v15, %v5238_v33  ;;  %v5253_v62 = vshll.u32 %v18308_v17, %v5238_v33 }
  0x9b   :  { %v2870_v38 = vsub.s32 32, %v2869_v49  ;;  %v2871_v35 = vshll.u32 %v2862_v31, %v2869_v49  ;;  %v2874_v44 = vsub.s32 4294967266, %v2869_v49  ;;  %v5242_v22 = vshrl.u32 %v18314_v11, %v5239_v24 }
  0x9c   :  { %v5245_v31 = vshrl.u32 %v18312_v13, %v5239_v24  ;;  %v5248_v40 = vshrl.u32 %v18310_v15, %v5239_v24  ;;  %v5251_v12 = vshrl.u32 %v18308_v17, %v5239_v24  ;;  %v5240_v16 = vshrl.u32 %v18316_v9, %v5239_v24 }
  0x9d   :  { %v2872_v25 = vshrl.u32 %v2854_v7, %v2870_v38  ;;  %v2875_v21 = vadd.s32 127, %v2874_v44  ;;  %v5243_v51 = vor.u32 %v5242_v22, %v5241_v37  ;;  %v5254_v30 = vshrl.u32 %v18306_v26, %v5239_v24 }
  0x9e   :  { %v5246_v57 = vor.u32 %v5245_v31, %v5244_v61  ;;  %v5249_v58 = vor.u32 %v5248_v40, %v5247_v53  ;;  %vm5256_vm14 = vcmp.lt.s32.totalorder %v11742_v55, 1  ;;  %v5252_v59 = vor.u32 %v5251_v12, %v5250_v60 }
  0x9f   :  { %v2873_v52 = vor.u32 %v2872_v25, %v2871_v35  ;;  %v2876_v5 = vshll.u32 %v2875_v21, 23  ;;  %vm5258_vm15 = vcmp.lt.s32.totalorder %v11742_v55, 3  ;;  %vm5259_vm0 = vcmp.lt.s32.totalorder %v11742_v55, 4 }
  0xa0   :  { %v5255_v27 = vor.u32 %v5254_v30, %v5253_v62  ;;  %vm5257_vm1 = vcmp.lt.s32.totalorder %v11742_v55, 2  ;;  %v5264_v29 = vsel %vm5256_vm14, %v5243_v51, %v5246_v57  ;;  %v11766_v7 = vmul.f32 0.024543693, %v553_v56 }
  0xa1   :  { %v2877_v63 = vor.u32 4788187, %v2876_v5  ;;  %v2880_v46 = vcvt.s32.f32 %v2873_v52  ;;  %v5265_v49 = vsel %vm5259_vm0, %v5252_v59, 920167782  ;;  %v5268_v38 = vsel %vm5256_vm14, %v5246_v57, %v5249_v58 }
  0xa2   :  { %18737 = vst [vmem:[#allocation21_spill] sm:$0xff] %v11766_v7  ;;  %v5273_v35 = vand.u32 65535, %v11737_v20  ;;  %v5261_v44 = vsel %vm5259_vm0, %v5249_v58, 2102212464  ;;  %v5266_v24 = vsel %vm5258_vm15, %v5249_v58, %v5265_v49  ;;  %v5269_v37 = vsel %vm5259_vm0, %v5255_v27, 1326507024 }
  0xa3   :  { %v2878_v19 = vand.u32 2147483647, %v2877_v63  ;;  %v5260_v21 = vsel %vm5256_vm14, %v5240_v16, %v5243_v51  ;;  %v5267_v22 = vsel %vm5257_vm1, %v5264_v29, %v5266_v24  ;;  %v5270_v61 = vsel %vm5258_vm15, %v5252_v59, %v5269_v37 }
  0xa4   :  { %v5271_v31 = vsel %vm5257_vm1, %v5268_v38, %v5270_v61  ;;  %v5297_v53 = vand.u32 65535, %v5267_v22  ;;  %v5298_v40 = vshrl.u32 %v5267_v22, 16  ;;  %v2609_v52 = vand.u32 2139095040, %v11766_v7 }
  0xa5   :  { %v2881_v33 = vmul.f32 %v2880_v46, %v2878_v19  ;;  %v5262_v60 = vsel %vm5258_vm15, %v5246_v57, %v5261_v44  ;;  %v5275_v56 = vand.u32 65535, %v5271_v31  ;;  %v5276_v51 = vshrl.u32 %v5271_v31, 16 }
  0xa6   :  { %v5300_v63 = vmul.u32 %v5298_v40, %v5273_v35  ;;  %v11790_v46 = vmul.u32 %v5297_v53, %v5274_v47  ;;  %v2606_v12 = vand.u32 2147483647, %v11766_v7  ;;  %v5299_v27 = vmul.u32 %v5297_v53, %v5273_v35 }
  0xa7   :  { %v2882_v25 = vxor.u32 2147483648, %v2881_v33  ;;  %v5277_v16 = vmul.u32 %v5275_v56, %v5273_v35  ;;  %v5278_v30 = vmul.u32 %v5276_v51, %v5273_v35  ;;  %v5279_v19 = vmul.u32 %v5275_v56, %v5274_v47 }
  0xa8   :  { %v5280_v59 = vmul.u32 %v5276_v51, %v5274_v47  ;;  %v5303_v29 = vshll.u32 %v5300_v63, 16  ;;  %v5302_v44 = vmul.u32 %v5298_v40, %v5274_v47  ;;  %v5304_v37 = vshrl.u32 %v5300_v63, 16 }
  0xa9   :  { %v2883_v5 = vsel %vm2762_vm9, %v2882_v25, %v2881_v33  ;;  %v2610_v33 = vshrl.u32 %v2609_v52, 23  ;;  %v5281_v38 = vshll.u32 %v5278_v30, 16  ;;  %v5282_v14 = vshrl.u32 %v5278_v30, 16 }
  0xaa   :  { %v2886_v58 = vsel %vm11721_vm8, %v11371_v48, %v2883_v5  ;;  %v5283_v24 = vshll.u32 %v5279_v19, 16  ;;  %v5305_v25 = vshll.u32 %v11790_v46, 16  ;;  %vm5307_vm4 = vc.u32 %v5299_v27, %v5303_v29 }
  0xab   :  { %v2888_v62 = vmul.f32 %v2886_v58, %v2886_v58  ;;  %vm5285_vm3 = vc.u32 %v5277_v16, %v5281_v38  ;;  %v5287_v31 = vadd.s32 %v5281_v38, %v5277_v16  ;;  %v5309_v35 = vadd.s32 %v5303_v29, %v5299_v27 }
  0xac   :  { %v5286_v5 = vsel %vm5285_vm3, 1, %v18304_v36  ;;  %v11039_v53 = vadd.s32 4294967169, %v2610_v33  ;;  %v5284_v47 = vshrl.u32 %v5279_v19, 16  ;;  %v5308_v63 = vsel %vm5307_vm4, 1, %v18304_v36 }
  0xad   :  { %v2889_v57 = vmul.f32 -0.001358992, %v2888_v62  ;;  %v2896_v49 = vmul.f32 -0.00019511016, %v2888_v62  ;;  %v5288_v51 = vadd.s32 %v5286_v5, %v5280_v59  ;;  %vm5289_vm5 = vc.u32 %v5287_v31, %v5283_v24 }
  0xae   :  { %v5290_v40 = vsel %vm5289_vm5, 1, %v18304_v36  ;;  %vm5311_vm6 = vc.u32 %v5309_v35, %v5305_v25  ;;  %v5310_v10 = vadd.s32 %v5308_v63, %v5302_v44  ;;  %v7847_v16 = vand.u32 3, %v11756_v4 }
  0xaf   :  { %v2890_v22 = vadd.f32 0.041655596, %v2889_v57  ;;  %v2897_v61 = vadd.f32 0.008332121, %v2896_v49  ;;  %v5292_v49 = vadd.s32 %v5290_v40, %v5288_v51  ;;  %v5306_v38 = vshrl.u32 %v11790_v46, 16 }
  0xb0   :  { %v5312_v27 = vsel %vm5311_vm6, 1, %v18304_v36  ;;  %v2616_v29 = vadd.s32 1, %v11039_v53  ;;  %v2613_v31 = vand.u32 8388607, %v2606_v12  ;;  %vm18395_vm9 = vweird.f32 %v11371_v48 }
  0xb1   :  { %v2891_v52 = vmul.f32 %v2890_v22, %v2888_v62  ;;  %v2898_v56 = vmul.f32 %v2897_v61, %v2888_v62  ;;  %v5293_v24 = vadd.s32 %v5292_v49, %v5282_v14  ;;  %v5314_v19 = vadd.s32 %v5312_v27, %v5310_v10 }
  0xb2   :  { %v5263_v22 = vsel %vm5257_vm1, %v5260_v21, %v5262_v60  ;;  %v11803_v61 = vadd.s32 %v5309_v35, %v5305_v25  ;;  %vm2617_vm8 = vcmp.gt.s32.totalorder %v2616_v29, 0  ;;  %vm7852_vm10 = vcmp.eq.s32.totalorder %v7847_v16, 2 }
  0xb3   :  { %v2892_v30 = vadd.f32 -0.4999988, %v2891_v52  ;;  %v2899_v57 = vadd.f32 -0.16666654, %v2898_v56  ;;  %v11809_v46 = vadd.s32 %v5293_v24, %v5284_v47  ;;  %v5315_v5 = vadd.s32 %v5314_v19, %v5304_v37 }
  0xb4   :  { %v441_v10 = vsel %vm377_vm2, %v11751_v8, %v11740_v50  ;;  %vm7848_vm11 = vcmp.lt.s32.totalorder %v7847_v16, 2  ;;  %vm7849_vm13 = vcmp.eq.s32.totalorder %v7847_v16, 0  ;;  %v5317_v14 = vmul.u32 %v11737_v20, %v5263_v22 }
  0xb5   :  { %v2893_v33 = vmul.f32 %v2892_v30, %v2888_v62  ;;  %v2900_v59 = vmul.f32 %v2899_v57, %v2888_v62  ;;  %v2618_v62 = vsel %vm2617_vm8, %v2616_v29, 0  ;;  %v5316_v60 = vadd.s32 %v5315_v5, %v5306_v38 }
  0xb6   :  { %vm5319_vm14 = vc.u32 %v11809_v46, %v11803_v61  ;;  %v2620_v37 = vand.u32 31, %v2618_v62  ;;  %v2614_v8 = vor.u32 8388608, %v2613_v31  ;;  %vm473_vm3 = vcmp.ge.s32.totalorder %v441_v10, 256 }
  0xb7   :  { %v11807_v44 = vadd.f32 1.0, %v2893_v33  ;;  %v2901_v4 = vadd.f32 1.0, %v2900_v59  ;;  %v5320_v50 = vadd.s32 1, %v5316_v60 }
  0xb8   :  { %v2621_v53 = vsub.s32 32, %v2620_v37  ;;  %v2623_v52 = vshll.u32 %v18316_v9, %v2620_v37  ;;  %v2626_v56 = vshll.u32 %v18314_v11, %v2620_v37  ;;  %v2629_v47 = vshll.u32 %v18312_v13, %v2620_v37 }
  0xb9   :  { %18738 = vst [vmem:[#allocation22_spill] sm:$0xff] %v11807_v44  ;;  %v11816_v55 = vmul.f32 %v2901_v4, %v2886_v58  ;;  %v18296_v21 = vxor.u32 2147483648, %v11807_v44  ;;  %v11826_v58 = vshrl.u32 %v2618_v62, 5  ;;  %v5321_v51 = vsel %vm5319_vm14, %v5320_v50, %v5316_v60 }
  0xba   :  { %v2632_v40 = vshll.u32 %v18310_v15, %v2620_v37  ;;  %v5322_v30 = vadd.s32 %v5321_v51, %v5317_v14  ;;  %v2624_v57 = vshrl.u32 %v18314_v11, %v2621_v53  ;;  %v2635_v49 = vshll.u32 %v18308_v17, %v2620_v37 }
  0xbb   :  { %18739 = vst [vmem:[#allocation23_spill] sm:$0xff] %v11816_v55  ;;  %v18303_v25 = vxor.u32 2147483648, %v11816_v55  ;;  %v7854_v35 = vsel %vm7852_vm10, %v18296_v21, %v11816_v55  ;;  %v2627_v27 = vshrl.u32 %v18312_v13, %v2621_v53  ;;  %v2630_v29 = vshrl.u32 %v18310_v15, %v2621_v53 }
  0xbc   :  { %v2633_v33 = vshrl.u32 %v18308_v17, %v2621_v53  ;;  %v5323_v59 = vadd.s32 536870912, %v5322_v30  ;;  %v2625_v24 = vor.u32 %v2624_v57, %v2623_v52  ;;  %v2636_v16 = vshrl.u32 %v18306_v26, %v2621_v53 }
  0xbd   :  { %v7851_v20 = vsel %vm7849_vm13, %v11807_v44, %v18303_v25  ;;  %vm2638_vm15 = vcmp.lt.s32.totalorder %v11826_v58, 1  ;;  %v11845_v19 = vor.u32 %v2627_v27, %v2626_v56  ;;  %v2631_v22 = vor.u32 %v2630_v29, %v2629_v47 }
  0xbe   :  { %v7855_v63 = vsel %vm7848_vm11, %v7851_v20, %v7854_v35  ;;  %v2634_v31 = vor.u32 %v2633_v33, %v2632_v40  ;;  %v11847_v4 = vshll.u32 %v2614_v8, 8  ;;  %v11849_v5 = vshrl.u32 %v5323_v59, 30 }
  0xbf   :  { %v7856_v38 = vsel %vm18395_vm9, nan, %v7855_v63  ;;  %v2637_v62 = vor.u32 %v2636_v16, %v2635_v49  ;;  %vm2640_vm0 = vcmp.lt.s32.totalorder %v11826_v58, 3  ;;  %vm2641_vm1 = vcmp.lt.s32.totalorder %v11826_v58, 4 }
  0xc0   :  { %10535 = vmatpush.msra.mxu2 %v7856_v38  ;;  %vm2639_vm2 = vcmp.lt.s32.totalorder %v11826_v58, 2  ;;  %v2646_v60 = vsel %vm2638_vm15, %v2625_v24, %v11845_v19  ;;  %v2647_v14 = vsel %vm2641_vm1, %v2634_v31, 920167782  ;;  %v10997_v37 = vadd.s32 4294967040, %v441_v10 }
  0xc1   :  { %v5325_v35 = vshll.u32 %v11849_v5, 30  ;;  %v2648_v50 = vsel %vm2640_vm0, %v2631_v22, %v2647_v14  ;;  %v2650_v8 = vsel %vm2638_vm15, %v11845_v19, %v2631_v22  ;;  %v2655_v52 = vand.u32 65535, %v11847_v4 }
  0xc2   :  { %v2649_v20 = vsel %vm2639_vm2, %v2646_v60, %v2648_v50  ;;  %v2651_v51 = vsel %vm2641_vm1, %v2637_v62, 1326507024  ;;  %v2656_v47 = vshrl.u32 %v11847_v4, 16  ;;  %v537_v49 = vsel %vm473_vm3, %v10997_v37, %v441_v10 }
  0xc3   :  { %v5326_v56 = vsub.s32 %v5322_v30, %v5325_v35  ;;  %v2652_v40 = vsel %vm2640_vm0, %v2634_v31, %v2651_v51  ;;  %v2679_v63 = vand.u32 65535, %v2649_v20  ;;  %v2680_v57 = vshrl.u32 %v2649_v20, 16 }
  0xc4   :  { %v2653_v27 = vsel %vm2639_vm2, %v2650_v8, %v2652_v40  ;;  %v2622_v16 = vshrl.u32 %v18316_v9, %v2621_v53  ;;  %v569_v60 = vcvt.s32.f32 %v537_v49  ;;  %v5318_v10 = vadd.s32 %v11803_v61, %v11809_v46 }
  0xc5   :  { %vm5327_vm4 = vcmp.lt.s32.totalorder %v5326_v56, 0  ;;  %v5328_v38 = vsub.s32 0, %v5326_v56  ;;  %v2657_v30 = vand.u32 65535, %v2653_v27  ;;  %v2658_v29 = vshrl.u32 %v2653_v27, 16 }
  0xc6   :  { %v2682_v33 = vmul.u32 %v2680_v57, %v2655_v52  ;;  %v2681_v62 = vmul.u32 %v2679_v63, %v2655_v52  ;;  %v2683_v51 = vmul.u32 %v2679_v63, %v2656_v47  ;;  %v2642_v40 = vsel %vm2638_vm15, %v2622_v16, %v2625_v24 }
  0xc7   :  { %v5329_v59 = vsel %vm5327_vm4, %v5328_v38, %v5326_v56  ;;  %v2659_v35 = vmul.u32 %v2657_v30, %v2655_v52  ;;  %v2660_v50 = vmul.u32 %v2658_v29, %v2655_v52  ;;  %v2661_v31 = vmul.u32 %v2657_v30, %v2656_v47 }
  0xc8   :  { %v5330_v14 = vclz %v5329_v59  ;;  %v2685_v20 = vshll.u32 %v2682_v33, 16  ;;  %v2662_v54 = vmul.u32 %v2658_v29, %v2656_v47  ;;  %v2684_v27 = vmul.u32 %v2680_v57, %v2656_v47 }
  0xc9   :  { %v2663_v8 = vshll.u32 %v2660_v50, 16  ;;  %v2665_v38 = vshll.u32 %v2661_v31, 16  ;;  %v11880_v49 = vmul.f32 0.024543693, %v569_v60  ;;  %v2687_v30 = vshll.u32 %v2683_v51, 16 }
  0xca   :  { %v11091_v37 = vadd.s32 4294967294, %v5330_v14  ;;  %vm2689_vm5 = vc.u32 %v2681_v62, %v2685_v20  ;;  %v5348_v24 = vsub.s32 4, %v11849_v5  ;;  %v2643_v47 = vsel %vm2641_vm1, %v2631_v22, 2102212464 }
  0xcb   :  { %vm2667_vm8 = vc.u32 %v2659_v35, %v2663_v8  ;;  %v2669_v53 = vadd.s32 %v2663_v8, %v2659_v35  ;;  %18740 = vst [vmem:[#allocation24_spill] sm:$0xff] %v11880_v49  ;;  %v2690_v61 = vsel %vm2689_vm5, 1, %v18304_v36  ;;  %v2664_v57 = vshrl.u32 %v2660_v50, 16 }
  0xcc   :  { %vm11092_vm6 = vcmp.lt.s32.totalorder %v11091_v37, 0  ;;  %v2668_v63 = vsel %vm2667_vm8, 1, %v18304_v36  ;;  %v2666_v8 = vshrl.u32 %v2661_v31, 16  ;;  %v2692_v43 = vadd.s32 %v2690_v61, %v2684_v27 }
  0xcd   :  { %v5333_v52 = vsel %vm11092_vm6, 0, %v11091_v37  ;;  %v2670_v14 = vadd.s32 %v2668_v63, %v2662_v54  ;;  %vm2671_vm10 = vc.u32 %v2669_v53, %v2665_v38  ;;  %v2691_v37 = vadd.s32 %v2685_v20, %v2681_v62 }
  0xce   :  { %v5334_v46 = vsub.s32 32, %v5333_v52  ;;  %v5335_v29 = vshll.u32 %v5326_v56, %v5333_v52  ;;  %v5338_v59 = vsub.s32 4294967266, %v5333_v52  ;;  %v2672_v35 = vsel %vm2671_vm10, 1, %v18304_v36 }
  0xcf   :  { %v2674_v39 = vadd.s32 %v2672_v35, %v2670_v14  ;;  %v5073_v21 = vand.u32 2139095040, %v11880_v49  ;;  %v2686_v54 = vshrl.u32 %v2682_v33, 16  ;;  %vm2693_vm11 = vc.u32 %v2691_v37, %v2687_v30 }
  0xd0   :  { %v5336_v16 = vshrl.u32 %v5318_v10, %v5334_v46  ;;  %v5339_v60 = vadd.s32 127, %v5338_v59  ;;  %v2644_v22 = vsel %vm2640_vm0, %v11845_v19, %v2643_v47  ;;  %v2694_v10 = vsel %vm2693_vm11, 1, %v18304_v36 }
  0xd1   :  { %v2675_v50 = vadd.s32 %v2674_v39, %v2664_v57  ;;  %v5074_v38 = vshrl.u32 %v5073_v21, 23  ;;  %v2688_v62 = vshrl.u32 %v2683_v51, 16  ;;  %v2696_v31 = vadd.s32 %v2694_v10, %v2692_v43 }
  0xd2   :  { %v5337_v56 = vor.u32 %v5336_v16, %v5335_v29  ;;  %v5340_v52 = vshll.u32 %v5339_v60, 23  ;;  %v11895_v27 = vadd.s32 %v2691_v37, %v2687_v30  ;;  %v2645_v33 = vsel %vm2639_vm2, %v2642_v40, %v2644_v22 }
  0xd3   :  { %v11893_v20 = vadd.s32 %v2675_v50, %v2666_v8  ;;  %v11087_v61 = vadd.s32 4294967169, %v5074_v38  ;;  %v2697_v29 = vadd.s32 %v2696_v31, %v2686_v54  ;;  %vm5226_vm13 = vcmp.lt.s32.totalorder %v11699_v18, 0 }
  0xd4   :  { %v5341_v53 = vor.u32 4788187, %v5340_v52  ;;  %v5344_v63 = vcvt.s32.f32 %v5337_v56  ;;  %v5349_v21 = vsel %vm5226_vm13, %v5348_v24, %v11849_v5  ;;  %vm5225_vm14 = vcmp.le.f32.partialorder %v5224_v32, 0.7853982 }
  0xd5   :  { %v5080_v39 = vadd.s32 1, %v11087_v61  ;;  %v2698_v59 = vadd.s32 %v2697_v29, %v2688_v62  ;;  %v2699_v43 = vmul.u32 %v11847_v4, %v2645_v33  ;;  %vm2701_vm15 = vc.u32 %v11893_v20, %v11895_v27 }
  0xd6   :  { %v5342_v46 = vand.u32 2147483647, %v5341_v53  ;;  %v5070_v40 = vand.u32 2147483647, %v11880_v49  ;;  %v11907_v14 = vsel %vm5225_vm14, 0, %v5349_v21  ;;  %vm18380_vm4 = vweird.f32 %v11699_v18 }
  0xd7   :  { %vm5081_vm0 = vcmp.gt.s32.totalorder %v5080_v39, 0  ;;  %v2702_v58 = vadd.s32 1, %v2698_v59  ;;  %18741 = vst [vmem:[#allocation25_spill] sm:$0xff] %v11907_v14  ;;  %v10326_v60 = vadd.s32 3, %v11907_v14  ;;  %v53_v25 = vadd.s32 224, %v11353_v1 }
  0xd8   :  { %v5345_v19 = vmul.f32 %v5344_v63, %v5342_v46  ;;  %v5082_v30 = vsel %vm5081_vm0, %v5080_v39, 0  ;;  %v5077_v35 = vand.u32 8388607, %v5070_v40 }
  0xd9   :  { %v5084_v47 = vand.u32 31, %v5082_v30  ;;  %v2703_v5 = vsel %vm2701_vm15, %v2702_v58, %v2698_v59  ;;  %v11926_v63 = vshrl.u32 %v5082_v30, 5  ;;  %v10327_v33 = vand.u32 3, %v10326_v60 }
  0xda   :  { %v5346_v51 = vxor.u32 2147483648, %v5345_v19  ;;  %v2704_v16 = vadd.s32 %v2703_v5, %v2699_v43  ;;  %v5078_v29 = vor.u32 8388608, %v5077_v35  ;;  %vm11992_vm15 = vcmp.le.f32.partialorder %v2606_v12, 0.7853982 }
  0xdb   :  { %v11910_v32 = vsub.s32 32, %v5084_v47  ;;  %v5087_v37 = vshll.u32 %v18316_v9, %v5084_v47  ;;  %v5090_v52 = vshll.u32 %v18314_v11, %v5084_v47  ;;  %v5096_v54 = vshll.u32 %v18310_v15, %v5084_v47 }
  0xdc   :  { %v5347_v57 = vsel %vm5226_vm13, %v5346_v51, %v5345_v19  ;;  %v2705_v8 = vadd.s32 536870912, %v2704_v16  ;;  %v5093_v62 = vshll.u32 %v18312_v13, %v5084_v47  ;;  %v5099_v21 = vshll.u32 %v18308_v17, %v5084_v47 }
  0xdd   :  { %v5350_v24 = vsel %vm5225_vm14, %v11699_v18, %v5347_v57  ;;  %v5088_v56 = vshrl.u32 %v18314_v11, %v11910_v32  ;;  %v5091_v10 = vshrl.u32 %v18312_v13, %v11910_v32  ;;  %v5097_v38 = vshrl.u32 %v18308_v17, %v11910_v32 }
  0xde   :  { %v5352_v4 = vmul.f32 %v5350_v24, %v5350_v24  ;;  %v11924_v53 = vshrl.u32 %v2705_v8, 30  ;;  %v5094_v31 = vshrl.u32 %v18310_v15, %v11910_v32  ;;  %v5100_v59 = vshrl.u32 %v18306_v26, %v11910_v32 }
  0xdf   :  { %v11932_v19 = vor.u32 %v5088_v56, %v5087_v37  ;;  %v11937_v58 = vor.u32 %v5091_v10, %v5090_v52  ;;  %v5098_v30 = vor.u32 %v5097_v38, %v5096_v54  ;;  %vm5102_vm1 = vcmp.lt.s32.totalorder %v11926_v63, 1 }
  0xe0   :  { %v5353_v22 = vmul.f32 -0.001358992, %v5352_v4  ;;  %v5360_v50 = vmul.f32 -0.00019511016, %v5352_v4  ;;  %v2707_v39 = vshll.u32 %v11924_v53, 30  ;;  %v11939_v5 = vor.u32 %v5094_v31, %v5093_v62 }
  0xe1   :  { %vm5105_vm2 = vcmp.lt.s32.totalorder %v11926_v63, 4  ;;  %vm5104_vm3 = vcmp.lt.s32.totalorder %v11926_v63, 3  ;;  %v5101_v37 = vor.u32 %v5100_v59, %v5099_v21  ;;  %vm5103_vm6 = vcmp.lt.s32.totalorder %v11926_v63, 2 }
  0xe2   :  { %v5354_v61 = vadd.f32 0.041655596, %v5353_v22  ;;  %v5361_v46 = vadd.f32 0.008332121, %v5360_v50  ;;  %v2708_v57 = vsub.s32 %v2704_v16, %v2707_v39  ;;  %v5110_v16 = vsel %vm5102_vm1, %v11932_v19, %v11937_v58 }
  0xe3   :  { %v5111_v52 = vsel %vm5105_vm2, %v5098_v30, 920167782  ;;  %vm10328_vm8 = vcmp.lt.s32.totalorder %v10327_v33, 2  ;;  %v11955_v50 = vshll.u32 %v5078_v29, 8  ;;  %v5114_v62 = vsel %vm5102_vm1, %v11937_v58, %v11939_v5 }
  0xe4   :  { %v5355_v43 = vmul.f32 %v5354_v61, %v5352_v4  ;;  %v5362_v51 = vmul.f32 %v5361_v46, %v5352_v4  ;;  %vm2709_vm5 = vcmp.lt.s32.totalorder %v2708_v57, 0  ;;  %v2710_v47 = vsub.s32 0, %v2708_v57 }
  0xe5   :  { %v5112_v22 = vsel %vm5104_vm3, %v11939_v5, %v5111_v52  ;;  %vm10329_vm10 = vcmp.eq.s32.totalorder %v10327_v33, 0  ;;  %vm10332_vm11 = vcmp.eq.s32.totalorder %v10327_v33, 2  ;;  %v5115_v61 = vsel %vm5105_vm2, %v5101_v37, 1326507024 }
  0xe6   :  { %v5356_v60 = vadd.f32 -0.4999988, %v5355_v43  ;;  %v5363_v35 = vadd.f32 -0.16666654, %v5362_v51  ;;  %v2711_v54 = vsel %vm2709_vm5, %v2710_v47, %v2708_v57  ;;  %v5113_v31 = vsel %vm5103_vm6, %v5110_v16, %v5112_v22 }
  0xe7   :  { %v5116_v21 = vsel %vm5104_vm3, %v5098_v30, %v5115_v61  ;;  %v2700_v59 = vadd.s32 %v11895_v27, %v11893_v20  ;;  %v5119_v51 = vand.u32 65535, %v11955_v50  ;;  %v5144_v47 = vshrl.u32 %v5113_v31, 16 }
  0xe8   :  { %v5357_v8 = vmul.f32 %v5356_v60, %v5352_v4  ;;  %v5364_v56 = vmul.f32 %v5363_v35, %v5352_v4  ;;  %v2712_v4 = vclz %v2711_v54  ;;  %v5117_v43 = vsel %vm5103_vm6, %v5114_v62, %v5116_v21 }
  0xe9   :  { %v5120_v60 = vshrl.u32 %v11955_v50, 16  ;;  %v5121_v30 = vand.u32 65535, %v5117_v43  ;;  %v5146_v62 = vmul.u32 %v5144_v47, %v5119_v51  ;;  %vm2608_vm14 = vcmp.lt.s32.totalorder %v11766_v7, 0 }
  0xea   :  { %v11957_v10 = vadd.f32 1.0, %v5357_v8  ;;  %v5365_v38 = vadd.f32 1.0, %v5364_v56  ;;  %v11040_v39 = vadd.s32 4294967294, %v2712_v4  ;;  %v5122_v8 = vshrl.u32 %v5117_v43, 16 }
  0xeb   :  { %v5143_v56 = vand.u32 65535, %v5113_v31  ;;  %v5123_v31 = vmul.u32 %v5121_v30, %v5119_v51  ;;  %v5107_v12 = vsel %vm5105_vm2, %v11939_v5, 2102212464 }
  0xec   :  { %18742 = vst [vmem:[#allocation26_spill] sm:$0xff] %v11957_v10  ;;  %v11967_v46 = vmul.f32 %v5365_v38, %v5350_v24  ;;  %v18297_v29 = vxor.u32 2147483648, %v11957_v10  ;;  %vm11041_vm13 = vcmp.lt.s32.totalorder %v11040_v39, 0  ;;  %v5124_v61 = vmul.u32 %v5122_v8, %v5119_v51 }
  0xed   :  { %v2715_v37 = vsel %vm11041_vm13, 0, %v11040_v39  ;;  %v5125_v39 = vmul.u32 %v5121_v30, %v5120_v60  ;;  %v5145_v43 = vmul.u32 %v5143_v56, %v5119_v51  ;;  %v5149_v30 = vshll.u32 %v5146_v62, 16 }
  0xee   :  { %18743 = vst [vmem:[#allocation27_spill] sm:$0xff] %v11967_v46  ;;  %v18298_v35 = vxor.u32 2147483648, %v11967_v46  ;;  %v10334_v24 = vsel %vm10332_vm11, %v18297_v29, %v11967_v46  ;;  %v2716_v27 = vsub.s32 32, %v2715_v37  ;;  %v2717_v16 = vshll.u32 %v2708_v57, %v2715_v37 }
  0xef   :  { %v2720_v52 = vsub.s32 4294967266, %v2715_v37  ;;  %v5126_v37 = vmul.u32 %v5122_v8, %v5120_v60  ;;  %v5128_v51 = vshrl.u32 %v5124_v61, 16  ;;  %vm5153_vm5 = vc.u32 %v5145_v43, %v5149_v30 }
  0xf0   :  { %v10331_v20 = vsel %vm10329_vm10, %v11957_v10, %v18298_v35  ;;  %v2718_v38 = vshrl.u32 %v2700_v59, %v2716_v27  ;;  %v5086_v59 = vshrl.u32 %v18316_v9, %v11910_v32  ;;  %v5129_v27 = vshll.u32 %v5125_v39, 16 }
  0xf1   :  { %v10335_v54 = vsel %vm10328_vm8, %v10331_v20, %v10334_v24  ;;  %v2721_v4 = vadd.s32 127, %v2720_v52  ;;  %v5147_v24 = vmul.u32 %v5143_v56, %v5120_v60  ;;  %v5127_v20 = vshll.u32 %v5124_v61, 16 }
  0xf2   :  { %v10336_v22 = vsel %vm18380_vm4, nan, %v10335_v54  ;;  %v2719_v33 = vor.u32 %v2718_v38, %v2717_v16  ;;  %v5154_v8 = vsel %vm5153_vm5, 1, %v18304_v36  ;;  %v5130_v5 = vshrl.u32 %v5125_v39, 16 }
  0xf3   :  { %10555 = vmatpush.msra.mxu3 %v10336_v22  ;;  %v2722_v57 = vshll.u32 %v2721_v4, 23  ;;  %v5148_v22 = vmul.u32 %v5144_v47, %v5120_v60  ;;  %vm5131_vm0 = vc.u32 %v5123_v31, %v5127_v20  ;;  %v5133_v29 = vadd.s32 %v5127_v20, %v5123_v31 }
  0xf4   :  { %v2726_v54 = vcvt.s32.f32 %v2719_v33  ;;  %v5151_v16 = vshll.u32 %v5147_v24, 16  ;;  %v5132_v56 = vsel %vm5131_vm0, 1, %v18304_v36  ;;  %v5155_v4 = vadd.s32 %v5149_v30, %v5145_v43 }
  0xf5   :  { %v2723_v52 = vor.u32 4788187, %v2722_v57  ;;  %v5134_v32 = vadd.s32 %v5132_v56, %v5126_v37  ;;  %vm5135_vm8 = vc.u32 %v5133_v29, %v5129_v27  ;;  %v2730_v60 = vsub.s32 4, %v11924_v53 }
  0xf6   :  { %v5136_v47 = vsel %vm5135_vm8, 1, %v18304_v36  ;;  %v5156_v57 = vadd.s32 %v5154_v8, %v5148_v22  ;;  %v5150_v31 = vshrl.u32 %v5146_v62, 16  ;;  %vm5157_vm2 = vc.u32 %v5155_v4, %v5151_v16 }
  0xf7   :  { %v2724_v38 = vand.u32 2147483647, %v2723_v52  ;;  %v5138_v35 = vadd.s32 %v5136_v47, %v5134_v32  ;;  %v5106_v61 = vsel %vm5102_vm1, %v5086_v59, %v11932_v19  ;;  %v5108_v29 = vsel %vm5104_vm3, %v11937_v58, %v5107_v12 }
  0xf8   :  { %v5158_v43 = vsel %vm5157_vm2, 1, %v18304_v36  ;;  %v5152_v27 = vshrl.u32 %v5147_v24, 16  ;;  %v2731_v62 = vsel %vm2608_vm14, %v2730_v60, %v11924_v53  ;;  %v5109_v58 = vsel %vm5103_vm6, %v5106_v61, %v5108_v29 }
  0xf9   :  { %v2727_v33 = vmul.f32 %v2726_v54, %v2724_v38  ;;  %v5139_v37 = vadd.s32 %v5138_v35, %v5128_v51  ;;  %v5160_v52 = vadd.s32 %v5158_v43, %v5156_v57  ;;  %v5159_v54 = vadd.s32 %v5155_v4, %v5151_v16 }
  0xfa   :  { %v12024_v24 = vsel %vm11992_vm15, 0, %v2731_v62  ;;  %v5163_v53 = vmul.u32 %v11955_v50, %v5109_v58  ;;  %vm18381_vm13 = vweird.f32 %v11766_v7  ;;  %vm5071_vm0 = vcmp.le.f32.partialorder %v5070_v40, 0.7853982 }
  0xfb   :  { %v2728_v20 = vxor.u32 2147483648, %v2727_v33  ;;  %v5140_v59 = vadd.s32 %v5139_v37, %v5130_v5  ;;  %v5161_v22 = vadd.s32 %v5160_v52, %v5150_v31  ;;  %18746 = vst [vmem:[#allocation28_spill] sm:$0xff] %v12024_v24  ;;  %v7691_v32 = vadd.s32 3, %v12024_v24 }
  0xfd   :  { %v2729_v39 = vsel %vm2608_vm14, %v2728_v20, %v2727_v33  ;;  %v5162_v30 = vadd.s32 %v5161_v22, %v5152_v27  ;;  %vm5165_vm1 = vc.u32 %v5140_v59, %v5159_v54  ;;  %v7692_v57 = vand.u32 3, %v7691_v32 }
  0xfe   :  { %v2732_v19 = vsel %vm11992_vm15, %v11766_v7, %v2729_v39  ;;  %vm5072_vm15 = vcmp.lt.s32.totalorder %v11880_v49, 0 }
  0xff   :  { %v2734_v35 = vmul.f32 %v2732_v19, %v2732_v19  ;;  %v5166_v16 = vadd.s32 1, %v5162_v30  ;;  %vm7697_vm3 = vcmp.eq.s32.totalorder %v7692_v57, 2  ;;  %vm7693_vm6 = vcmp.lt.s32.totalorder %v7692_v57, 2 }
 0x100   :  { %vm7694_vm10 = vcmp.eq.s32.totalorder %v7692_v57, 0 }
 0x101   :  { %v2735_v12 = vmul.f32 -0.001358992, %v2734_v35  ;;  %v2742_v38 = vmul.f32 -0.00019511016, %v2734_v35  ;;  %v5167_v63 = vsel %vm5165_vm1, %v5166_v16, %v5162_v30  ;;  %vm18378_vm1 = vweird.f32 %v11880_v49 }
 0x102   :  { %v5168_v33 = vadd.s32 %v5167_v63, %v5163_v53 }
 0x103   :  { %v2736_v51 = vadd.f32 0.041655596, %v2735_v12  ;;  %v2743_v56 = vadd.f32 0.008332121, %v2742_v38  ;;  %v5164_v38 = vadd.s32 %v5159_v54, %v5140_v59 }
 0x104   :  { %v5169_v21 = vadd.s32 536870912, %v5168_v33 }
 0x105   :  { %v2737_v8 = vmul.f32 %v2736_v51, %v2734_v35  ;;  %v2744_v4 = vmul.f32 %v2743_v56, %v2734_v35 }
 0x106   :  { %v5170_v20 = vshrl.u32 %v5169_v21, 30 }
 0x107   :  { %v2738_v60 = vadd.f32 -0.4999988, %v2737_v8  ;;  %v2745_v47 = vadd.f32 -0.16666654, %v2744_v4 }
 0x108   :  { %v5171_v29 = vshll.u32 %v5170_v20, 30  ;;  %v5194_v57 = vsub.s32 4, %v5170_v20 }
 0x109   :  { %v2739_v5 = vmul.f32 %v2738_v60, %v2734_v35  ;;  %v2746_v31 = vmul.f32 %v2745_v47, %v2734_v35 }
 0x10a   :  { %v5172_v27 = vsub.s32 %v5168_v33, %v5171_v29 }
 0x10b   :  { %v12028_v61 = vadd.f32 1.0, %v2739_v5  ;;  %v2747_v50 = vadd.f32 1.0, %v2746_v31  ;;  %v5195_v5 = vsel %vm5072_vm15, %v5194_v57, %v5170_v20  ;;  %v26_v57 = vadd.s32 8, %v11353_v1 }
 0x10c   :  { %vm5173_vm11 = vcmp.lt.s32.totalorder %v5172_v27, 0  ;;  %v5174_v62 = vsub.s32 0, %v5172_v27  ;;  %v12047_v29 = vsel %vm5071_vm0, 0, %v5195_v5 }
 0x10d   :  { %18747 = vst [vmem:[#allocation29_spill] sm:$0xff] %v12028_v61  ;;  %v12030_v43 = vmul.f32 %v2747_v50, %v2732_v19  ;;  %v18301_v37 = vxor.u32 2147483648, %v12028_v61 }
 0x10e   :  { %v5175_v58 = vsel %vm5173_vm11, %v5174_v62, %v5172_v27  ;;  %18749 = vst [vmem:[#allocation31_spill] sm:$0xff] %v12047_v29 }
 0x10f   :  { %18748 = vst [vmem:[#allocation30_spill] sm:$0xff] %v12030_v43  ;;  %v18302_v52 = vxor.u32 2147483648, %v12030_v43  ;;  %v7699_v39 = vsel %vm7697_vm3, %v18301_v37, %v12030_v43  ;;  %v5176_v35 = vclz %v5175_v58  ;;  %v10171_v58 = vadd.s32 3, %v12047_v29 }
 0x111   :  { %v7696_v19 = vsel %vm7694_vm10, %v12028_v61, %v18302_v52  ;;  %v11088_v12 = vadd.s32 4294967294, %v5176_v35  ;;  %v52_v52 = vadd.s32 216, %v11353_v1  ;;  %v18778_v61 = vmov 1326507024  }
 0x112   :  { %v7700_v22 = vsel %vm7693_vm6, %v7696_v19, %v7699_v39 }
 0x113   :  { %v7701_v30 = vsel %vm18381_vm13, nan, %v7700_v22  ;;  %vm11089_vm14 = vcmp.lt.s32.totalorder %v11088_v12, 0 }
 0x114   :  { %10536 = vmatpush.msra.mxu2 %v7701_v30  ;;  %v5179_v53 = vsel %vm11089_vm14, 0, %v11088_v12 }
 0x115   :  { %v5180_v16 = vsub.s32 32, %v5179_v53  ;;  %v5181_v51 = vshll.u32 %v5172_v27, %v5179_v53  ;;  %v5184_v56 = vsub.s32 4294967266, %v5179_v53 }
 0x117   :  { %v5182_v32 = vshrl.u32 %v5164_v38, %v5180_v16  ;;  %v5185_v63 = vadd.s32 127, %v5184_v56  ;;  %v10172_v38 = vand.u32 3, %v10171_v58  ;;  %v28_v58 = vadd.s32 24, %v11353_v1 }
 0x119   :  { %v5183_v8 = vor.u32 %v5182_v32, %v5181_v51  ;;  %v5186_v4 = vshll.u32 %v5185_v63, 23  ;;  %vm10177_vm5 = vcmp.eq.s32.totalorder %v10172_v38, 2  ;;  %vm10174_vm8 = vcmp.eq.s32.totalorder %v10172_v38, 0 }
 0x11a   :  { %vm10173_vm2 = vcmp.lt.s32.totalorder %v10172_v38, 2  ;;  %v33_v38 = vadd.s32 64, %v11353_v1  ;;  %v12097_v36 = vmul.u32 %v11355_v2, %v28_v58 }
 0x11b   :  { %v5187_v33 = vor.u32 4788187, %v5186_v4  ;;  %v5190_v60 = vcvt.s32.f32 %v5183_v8 }
 0x11c   :  { %v12112_v17 = vmul.u32 %v11355_v2, %v33_v38 }
 0x11d   :  { %v5188_v47 = vand.u32 2147483647, %v5187_v33 }
 0x11f   :  { %v5191_v21 = vmul.f32 %v5190_v60, %v5188_v47  ;;  %v92_v60 = vmul.u32 %v11355_v2, %v11353_v1 }
 0x121   :  { %v5192_v54 = vxor.u32 2147483648, %v5191_v21  ;;  %v156_v47 = vcvt.s32.f32 %v92_v60 }
 0x123   :  { %v5193_v59 = vsel %vm5072_vm15, %v5192_v54, %v5191_v21  ;;  %v188_v21 = vmul.f32 0.00390625, %v156_v47  ;;  %v43_v47 = vadd.s32 144, %v11353_v1 }
 0x124   :  { %v5196_v31 = vsel %vm5071_vm0, %v11880_v49, %v5193_v59  ;;  %v93_v59 = vmul.u32 %v11355_v2, %v26_v57  ;;  %v45_v57 = vadd.s32 160, %v11353_v1 }
 0x125   :  { %v5198_v50 = vmul.f32 %v5196_v31, %v5196_v31  ;;  %v220_v54 = vfloor.f32 %v188_v21  ;;  %v44_v21 = vadd.s32 152, %v11353_v1 }
 0x127   :  { %v5199_v27 = vmul.f32 -0.001358992, %v5198_v50  ;;  %v5206_v39 = vmul.f32 -0.00019511016, %v5198_v50  ;;  %v11201_v5 = vcvt.f32.s32 %v220_v54  ;;  %v46_v54 = vadd.s32 168, %v11353_v1 }
 0x128   :  { %v12137_v11 = vmul.u32 %v11355_v2, %v44_v21 }
 0x129   :  { %v5200_v62 = vadd.f32 0.041655596, %v5199_v27  ;;  %v5207_v19 = vadd.f32 0.008332121, %v5206_v39 }
 0x12b   :  { %v5201_v22 = vmul.f32 %v5200_v62, %v5198_v50  ;;  %v5208_v35 = vmul.f32 %v5207_v19, %v5198_v50  ;;  %v27_v19 = vadd.s32 16, %v11353_v1 }
 0x12d   :  { %v5202_v30 = vadd.f32 -0.4999988, %v5201_v22  ;;  %v5209_v12 = vadd.f32 -0.16666654, %v5208_v35  ;;  %v29_v22 = vadd.s32 32, %v11353_v1  ;;  %v30_v35 = vadd.s32 40, %v11353_v1 }
 0x12f   :  { %v5203_v40 = vmul.f32 %v5202_v30, %v5198_v50  ;;  %v5210_v53 = vmul.f32 %v5209_v12, %v5198_v50  ;;  %v284_v50 = vmul.u32 256, %v11201_v5  ;;  %v31_v30 = vadd.s32 48, %v11353_v1 }
 0x130   :  { %v32_v12 = vadd.s32 56, %v11353_v1  ;;  %v47_v5 = vadd.s32 176, %v11353_v1  ;;  %v12100_v26 = vmul.u32 %v11355_v2, %v29_v22 }
 0x131   :  { %v12050_v16 = vadd.f32 1.0, %v5203_v40  ;;  %v5211_v20 = vadd.f32 1.0, %v5210_v53  ;;  %v316_v39 = vsub.s32 %v92_v60, %v284_v50  ;;  %v34_v53 = vadd.s32 72, %v11353_v1 }
 0x132   :  { %v42_v60 = vadd.s32 136, %v11353_v1  ;;  %v12089_v50 = vmul.u32 %v11355_v2, %v27_v19  ;;  %v12103_v19 = vmul.u32 %v11355_v2, %v30_v35 }
 0x133   :  { %18750 = vst [vmem:[#allocation32_spill] sm:$0xff] %v12050_v16  ;;  %v12052_v51 = vmul.f32 %v5211_v20, %v5196_v31  ;;  %v18299_v56 = vxor.u32 2147483648, %v12050_v16  ;;  %v157_v31 = vcvt.s32.f32 %v93_v59  ;;  %v380_v40 = vadd.s32 256, %v316_v39 }
 0x134   :  { %v35_v20 = vadd.s32 80, %v11353_v1  ;;  %vm348_vm3 = vcmp.lt.s32.totalorder %v316_v39, 0  ;;  %v12115_v15 = vmul.u32 %v11355_v2, %v34_v53  ;;  %v158_v58 = vcvt.s32.f32 %v12089_v50 }
 0x135   :  { %18751 = vst [vmem:[#allocation33_spill] sm:$0xff] %v12052_v51  ;;  %v18300_v32 = vxor.u32 2147483648, %v12052_v51  ;;  %v10179_v63 = vsel %vm10177_vm5, %v18299_v56, %v12052_v51  ;;  %v189_v27 = vmul.f32 0.00390625, %v157_v31  ;;  %v48_v31 = vadd.s32 184, %v11353_v1 }
 0x136   :  { %v50_v56 = vadd.s32 200, %v11353_v1  ;;  %v12119_v22 = vmul.u32 %v11355_v2, %v35_v20  ;;  %v12131_v38 = vmul.u32 %v11355_v2, %v42_v60  ;;  %v12134_v53 = vmul.u32 %v11355_v2, %v43_v47 }
 0x137   :  { %v10176_v8 = vsel %vm10174_vm8, %v12050_v16, %v18300_v32  ;;  %v221_v62 = vfloor.f32 %v189_v27  ;;  %v412_v27 = vsel %vm348_vm3, %v380_v40, %v316_v39  ;;  %v51_v32 = vadd.s32 208, %v11353_v1 }
 0x138   :  { %v10180_v4 = vsel %vm10173_vm2, %v10176_v8, %v10179_v63  ;;  %v36_v8 = vadd.s32 88, %v11353_v1  ;;  %v12106_v39 = vmul.u32 %v11355_v2, %v31_v30  ;;  %v12109_v40 = vmul.u32 %v11355_v2, %v32_v12 }
 0x139   :  { %v10181_v33 = vsel %vm18378_vm1, nan, %v10180_v4  ;;  %v11203_v63 = vcvt.f32.s32 %v221_v62  ;;  %v37_v4 = vadd.s32 96, %v11353_v1  ;;  %v49_v62 = vadd.s32 192, %v11353_v1 }
 0x13a   :  { %10556 = vmatpush.msra.mxu3 %v10181_v33  ;;  %v41_v33 = vadd.s32 128, %v11353_v1  ;;  %vm444_vm6 = vcmp.ge.s32.totalorder %v412_v27, 256  ;;  %v12122_v35 = vmul.u32 %v11355_v2, %v36_v8  ;;  %v12140_v20 = vmul.u32 %v11355_v2, %v45_v57 }
 0x13b   :  { %v285_v37 = vmul.u32 256, %v11203_v63  ;;  %v10968_v63 = vadd.s32 4294967040, %v412_v27  ;;  %v12125_v30 = vmul.u32 %v11355_v2, %v37_v4  ;;  %v12143_v8 = vmul.u32 %v11355_v2, %v46_v54 }
 0x13c   :  { %v12128_v13 = vmul.u32 %v11355_v2, %v41_v33  ;;  %18752 = vst [vmem:[#allocation34_spill] sm:$0xff] %v12140_v20  ;;  %v12149_v4 = vmul.u32 %v11355_v2, %v48_v31  ;;  %v12152_v33 = vmul.u32 %v11355_v2, %v49_v62  ;;  %v12155_v60 = vmul.u32 %v11355_v2, %v50_v56 }
 0x13d   :  { %v317_v12 = vsub.s32 %v93_v59, %v285_v37  ;;  %18753 = vst [vmem:[#allocation35_spill] sm:$0xff] %v12143_v8  ;;  %v12146_v37 = vmul.u32 %v11355_v2, %v47_v5  ;;  %v508_v59 = vsel %vm444_vm6, %v10968_v63, %v412_v27  ;;  %v190_v47 = vmul.f32 0.00390625, %v158_v58 }
 0x13e   :  { %18755 = vst [vmem:[#allocation37_spill] sm:$0xff] %v12149_v4  ;;  %v12158_v21 = vmul.u32 %v11355_v2, %v51_v32  ;;  %v12161_v57 = vmul.u32 %v11355_v2, %v52_v52  ;;  %v12164_v54 = vmul.u32 %v11355_v2, %v53_v25  ;;  %v159_v31 = vcvt.s32.f32 %v12097_v36 }
 0x13f   :  { %18754 = vst [vmem:[#allocation36_spill] sm:$0xff] %v12146_v37  ;;  %v381_v5 = vadd.s32 256, %v317_v12  ;;  %v160_v27 = vcvt.s32.f32 %v12100_v26  ;;  %vm349_vm10 = vcmp.lt.s32.totalorder %v317_v12, 0  ;;  %v540_v62 = vcvt.s32.f32 %v508_v59 }
 0x140   :  { %18756 = vst [vmem:[#allocation38_spill] sm:$0xff] %v12152_v33  ;;  %v161_v56 = vcvt.s32.f32 %v12103_v19  ;;  %v162_v63 = vcvt.s32.f32 %v12106_v39  ;;  %v163_v32 = vcvt.s32.f32 %v12109_v40  ;;  %v164_v58 = vcvt.s32.f32 %v12112_v17 }
 0x141   :  { %18757 = vst [vmem:[#allocation39_spill] sm:$0xff] %v12155_v60  ;;  %v165_v52 = vcvt.s32.f32 %v12115_v15  ;;  %v166_v25 = vcvt.s32.f32 %v12119_v22  ;;  %v167_v9 = vcvt.s32.f32 %v12122_v35  ;;  %v222_v1 = vfloor.f32 %v190_v47 }
 0x142   :  { %18758 = vst [vmem:[#allocation40_spill] sm:$0xff] %v12158_v21  ;;  %v168_v2 = vcvt.s32.f32 %v12125_v30  ;;  %v172_v49 = vcvt.s32.f32 %v12128_v13  ;;  %v173_v59 = vcvt.s32.f32 %v12131_v38  ;;  %v413_v42 = vsel %vm349_vm10, %v381_v5, %v317_v12 }
 0x143   :  { %18759 = vst [vmem:[#allocation41_spill] sm:$0xff] %v12161_v57  ;;  %v174_v18 = vcvt.s32.f32 %v12134_v53  ;;  %v175_v16 = vcvt.s32.f32 %v12137_v11  ;;  %v176_v51 = vcvt.s32.f32 %v12140_v20  ;;  %v12181_v10 = vmul.f32 0.024543693, %v540_v62 }
 0x144   :  { %18760 = vst [vmem:[#allocation42_spill] sm:$0xff] %v12164_v54  ;;  %v177_v46 = vcvt.s32.f32 %v12143_v8  ;;  %v178_v3 = vcvt.s32.f32 %v12146_v37  ;;  %v179_v47 = vcvt.s32.f32 %v12149_v4  ;;  %v180_v6 = vcvt.s32.f32 %v12152_v33 }
 0x145   :  { %18761 = vst [vmem:[#allocation43_spill] sm:$0xff] %v12181_v10  ;;  %v181_v29 = vcvt.s32.f32 %v12155_v60  ;;  %v182_v12 = vcvt.s32.f32 %v12158_v21  ;;  %v11205_v5 = vcvt.f32.s32 %v222_v1  ;;  %v10969_v14 = vadd.s32 4294967040, %v413_v42 }
 0x146   :  { %v183_v45 = vcvt.s32.f32 %v12161_v57  ;;  %v184_v20 = vcvt.s32.f32 %v12164_v54  ;;  %v12191_v62 = vmul.f32 0.00390625, %v159_v31  ;;  %vm445_vm11 = vcmp.ge.s32.totalorder %v413_v42, 256 }
 0x147   :  { %v12193_v8 = vmul.f32 0.00390625, %v160_v27  ;;  %v12195_v37 = vmul.f32 0.00390625, %v161_v56  ;;  %v12197_v4 = vmul.f32 0.00390625, %v162_v63  ;;  %v607_v33 = vand.u32 2139095040, %v12181_v10 }
 0x148   :  { %v12200_v60 = vmul.f32 0.00390625, %v163_v32  ;;  %v12202_v21 = vmul.f32 0.00390625, %v164_v58  ;;  %v12204_v1 = vmul.f32 0.00390625, %v165_v52  ;;  %v12206_v57 = vmul.f32 0.00390625, %v166_v25 }
 0x149   :  { %v12208_v54 = vmul.f32 0.00390625, %v167_v9  ;;  %v286_v31 = vmul.u32 256, %v11205_v5  ;;  %v509_v7 = vsel %vm445_vm11, %v10969_v14, %v413_v42  ;;  %v608_v27 = vshrl.u32 %v607_v33, 23 }
 0x14a   :  { %v12210_v41 = vmul.f32 0.00390625, %v168_v2  ;;  %v12212_v56 = vmul.f32 0.00390625, %v172_v49  ;;  %v12214_v63 = vmul.f32 0.00390625, %v173_v59  ;;  %v12216_v48 = vmul.f32 0.00390625, %v174_v18 }
 0x14b   :  { %v12218_v32 = vmul.f32 0.00390625, %v175_v16  ;;  %v12220_v58 = vmul.f32 0.00390625, %v176_v51  ;;  %v12222_v52 = vmul.f32 0.00390625, %v177_v46  ;;  %v11000_v25 = vadd.s32 4294967169, %v608_v27 }
 0x14c   :  { %v12224_v9 = vmul.f32 0.00390625, %v178_v3  ;;  %v12226_v5 = vmul.f32 0.00390625, %v179_v47  ;;  %v12228_v42 = vmul.f32 0.00390625, %v180_v6  ;;  %v541_v2 = vcvt.s32.f32 %v509_v7 }
 0x14d   :  { %18762 = vst [vmem:[#allocation44_spill] sm:$0xff] %v12220_v58  ;;  %v12230_v49 = vmul.f32 0.00390625, %v181_v29  ;;  %v12232_v14 = vmul.f32 0.00390625, %v182_v12  ;;  %v318_v18 = vsub.s32 %v12089_v50, %v286_v31  ;;  %v614_v16 = vadd.s32 1, %v11000_v25 }
 0x14e   :  { %18763 = vst [vmem:[#allocation45_spill] sm:$0xff] %v12222_v52  ;;  %v12235_v33 = vmul.f32 0.00390625, %v183_v45  ;;  %v12237_v51 = vmul.f32 0.00390625, %v184_v20  ;;  %v223_v46 = vfloor.f32 %v12191_v62  ;;  %v18351_v3 = vand.u32 2147483647, %v12181_v10 }
 0x14f   :  { %18764 = vst [vmem:[#allocation46_spill] sm:$0xff] %v12224_v9  ;;  %vm615_vm14 = vcmp.gt.s32.totalorder %v614_v16, 0  ;;  %v12246_v47 = vmul.f32 0.024543693, %v541_v2  ;;  %v382_v62 = vadd.s32 256, %v318_v18  ;;  %v231_v27 = vfloor.f32 %v12208_v54 }
 0x150   :  { %18765 = vst [vmem:[#allocation47_spill] sm:$0xff] %v12226_v5  ;;  %v616_v45 = vsel %vm615_vm14, %v614_v16, 0  ;;  %vm350_vm15 = vcmp.lt.s32.totalorder %v318_v18, 0  ;;  %v611_v25 = vand.u32 8388607, %v18351_v3  ;;  %v232_v12 = vfloor.f32 %v12210_v41 }
 0x151   :  { %18766 = vst [vmem:[#allocation48_spill] sm:$0xff] %v12228_v42  ;;  %v618_v31 = vand.u32 31, %v616_v45  ;;  %v12253_v7 = vshrl.u32 %v616_v45, 5  ;;  %v18773_v50 = vmov 683565275   ;;  %v414_v42 = vsel %vm350_vm15, %v382_v62, %v318_v18 }
 0x152   :  { %18767 = vst [vmem:[#allocation49_spill] sm:$0xff] %v12230_v49  ;;  %v18774_v6 = vmov 2475754826   ;;  %v18775_v59 = vmov 2131351028   ;;  %v761_v49 = vand.u32 2139095040, %v12246_v47  ;;  %v236_v24 = vfloor.f32 %v12212_v56 }
 0x153   :  { %18768 = vst [vmem:[#allocation50_spill] sm:$0xff] %v12232_v14  ;;  %v12255_v29 = vsub.s32 32, %v618_v31  ;;  %v621_v2 = vshll.u32 %v18773_v50, %v618_v31  ;;  %v624_v16 = vshll.u32 %v18774_v6, %v618_v31  ;;  %v627_v20 = vshll.u32 %v18775_v59, %v618_v31 }
 0x154   :  { %18769 = vst [vmem:[#allocation51_spill] sm:$0xff] %v12235_v33  ;;  %v18777_v14 = vmov 920167782   ;;  %v612_v23 = vor.u32 8388608, %v611_v25  ;;  %vm636_vm0 = vcmp.lt.s32.totalorder %v12253_v7, 1  ;;  %vm639_vm5 = vcmp.lt.s32.totalorder %v12253_v7, 4 }
 0x155   :  { %18770 = vst [vmem:[#allocation52_spill] sm:$0xff] %v12237_v51  ;;  %v18776_v51 = vmov 2102212464   ;;  %v633_v54 = vshll.u32 %v18777_v14, %v618_v31  ;;  %v622_v45 = vshrl.u32 %v18774_v6, %v12255_v29  ;;  %v625_v3 = vshrl.u32 %v18775_v59, %v12255_v29 }
 0x156   :  { %18771 = vst [vmem:[#allocation53_spill] sm:$0xff] %v12246_v47  ;;  %v630_v33 = vshll.u32 %v18776_v51, %v618_v31  ;;  %v628_v28 = vshrl.u32 %v18776_v51, %v12255_v29  ;;  %v631_v41 = vshrl.u32 %v18777_v14, %v12255_v29  ;;  %v634_v43 = vshrl.u32 %v18778_v61, %v12255_v29 }
 0x157   :  { %18772 = vst [vmem:[#allocation54_spill] sm:$0xff] %v12253_v7  ;;  %v12275_v31 = vor.u32 %v622_v45, %v621_v2  ;;  %v12277_v18 = vor.u32 %v625_v3, %v624_v16  ;;  %vm638_vm8 = vcmp.lt.s32.totalorder %v12253_v7, 3  ;;  %v762_v25 = vshrl.u32 %v761_v49, 23 }
 0x158   :  { %v12279_v62 = vor.u32 %v628_v28, %v627_v20  ;;  %v632_v44 = vor.u32 %v631_v41, %v630_v33  ;;  %v635_v55 = vor.u32 %v634_v43, %v633_v54  ;;  %vm637_vm2 = vcmp.lt.s32.totalorder %v12253_v7, 2 }
 0x159   :  { %18779 = vst [vmem:[#allocation55_spill] sm:$0xff] %v12275_v31  ;;  %v644_v2 = vsel %vm636_vm0, %v12275_v31, %v12277_v18  ;;  %v237_v33 = vfloor.f32 %v12214_v63  ;;  %v12298_v49 = vshll.u32 %v612_v23, 8  ;;  %v238_v3 = vfloor.f32 %v12216_v48 }
 0x15a   :  { %18780 = vst [vmem:[#allocation56_spill] sm:$0xff] %v12277_v18  ;;  %v648_v28 = vsel %vm636_vm0, %v12277_v18, %v12279_v62  ;;  %v645_v43 = vsel %vm639_vm5, %v632_v44, 920167782  ;;  %v649_v56 = vsel %vm639_vm5, %v635_v55, 1326507024  ;;  %v10970_v20 = vadd.s32 4294967040, %v414_v42 }
 0x15b   :  { %18781 = vst [vmem:[#allocation57_spill] sm:$0xff] %v12298_v49  ;;  %v646_v16 = vsel %vm638_vm8, %v12279_v62, %v645_v43  ;;  %v650_v54 = vsel %vm638_vm8, %v632_v44, %v649_v56  ;;  %vm446_vm3 = vcmp.ge.s32.totalorder %v414_v42, 256  ;;  %v11003_v23 = vadd.s32 4294967169, %v762_v25 }
 0x15c   :  { %v12308_v63 = vsel %vm637_vm2, %v644_v2, %v646_v16  ;;  %v12312_v55 = vsel %vm637_vm2, %v648_v28, %v650_v54  ;;  %v239_v48 = vfloor.f32 %v12218_v32  ;;  %v11207_v56 = vcvt.f32.s32 %v223_v46 }
 0x15d   :  { %v653_v34 = vand.u32 65535, %v12298_v49  ;;  %v678_v2 = vshrl.u32 %v12308_v63, 16  ;;  %v18782_v16 = vfloor.f32 %v12193_v8  ;;  %v18783_v25 = vfloor.f32 %v12195_v37 }
 0x15e   :  { %v510_v32 = vsel %vm446_vm3, %v10970_v20, %v414_v42  ;;  %v656_v45 = vshrl.u32 %v12312_v55, 16  ;;  %v18784_v41 = vfloor.f32 %v12197_v4  ;;  %v18785_v43 = vfloor.f32 %v12200_v60 }
 0x15f   :  { %v11209_v28 = vcvt.f32.s32 %v18782_v16  ;;  %v11211_v54 = vcvt.f32.s32 %v18783_v25  ;;  %v18786_v46 = vfloor.f32 %v12202_v21  ;;  %v768_v9 = vadd.s32 1, %v11003_v23 }
 0x160   :  { %v11213_v52 = vcvt.f32.s32 %v18784_v41  ;;  %v11215_v44 = vcvt.f32.s32 %v18785_v43  ;;  %v18787_v58 = vfloor.f32 %v12204_v1  ;;  %v18788_v16 = vfloor.f32 %v12206_v57 }
 0x161   :  { %v11217_v5 = vcvt.f32.s32 %v18786_v46  ;;  %v11223_v25 = vcvt.f32.s32 %v231_v27  ;;  %v11225_v42 = vcvt.f32.s32 %v232_v12  ;;  %v542_v20 = vcvt.s32.f32 %v510_v32 }
 0x162   :  { %v11219_v8 = vcvt.f32.s32 %v18787_v58  ;;  %v11221_v37 = vcvt.f32.s32 %v18788_v16  ;;  %v654_v0 = vshrl.u32 %v12298_v49, 16  ;;  %v677_v4 = vand.u32 65535, %v12308_v63 }
 0x163   :  { %v12338_v41 = vmul.u32 %v678_v2, %v653_v34  ;;  %v11233_v60 = vcvt.f32.s32 %v236_v24  ;;  %v11235_v43 = vcvt.f32.s32 %v237_v33  ;;  %v655_v21 = vand.u32 65535, %v12312_v55 }
 0x164   :  { %v12341_v23 = vmul.u32 %v656_v45, %v653_v34  ;;  %v11237_v1 = vcvt.f32.s32 %v238_v3  ;;  %v11239_v58 = vcvt.f32.s32 %v239_v48  ;;  %v287_v46 = vmul.u32 256, %v11207_v56 }
 0x165   :  { %vm769_vm6 = vcmp.gt.s32.totalorder %v768_v9, 0  ;;  %v288_v57 = vmul.u32 256, %v11209_v28  ;;  %v289_v27 = vmul.u32 256, %v11211_v54  ;;  %v290_v12 = vmul.u32 256, %v11213_v52 }
 0x166   :  { %v291_v32 = vmul.u32 256, %v11215_v44  ;;  %v12343_v16 = vmul.f32 0.024543693, %v542_v20  ;;  %v679_v10 = vmul.u32 %v677_v4, %v653_v34  ;;  %v12345_v63 = vmul.u32 %v677_v4, %v654_v0 }
 0x167   :  { %v683_v24 = vshll.u32 %v12338_v41, 16  ;;  %v657_v33 = vmul.u32 %v655_v21, %v653_v34  ;;  %v12348_v49 = vmul.u32 %v655_v21, %v654_v0  ;;  %v661_v55 = vshll.u32 %v12341_v23, 16 }
 0x168   :  { %18789 = vst [vmem:[#allocation58_spill] sm:$0xff] %v12343_v16  ;;  %v770_v3 = vsel %vm769_vm6, %v768_v9, 0  ;;  %v292_v48 = vmul.u32 256, %v11217_v5  ;;  %v293_v56 = vmul.u32 256, %v11219_v8  ;;  %v294_v18 = vmul.u32 256, %v11221_v37 }
 0x169   :  { %v295_v28 = vmul.u32 256, %v11223_v25  ;;  %v296_v54 = vmul.u32 256, %v11225_v42  ;;  %v300_v52 = vmul.u32 256, %v11233_v60  ;;  %v301_v44 = vmul.u32 256, %v11235_v43 }
 0x16a   :  { %v302_v20 = vmul.u32 256, %v11237_v1  ;;  %v685_v31 = vshll.u32 %v12345_v63, 16  ;;  %vm687_vm10 = vc.u32 %v679_v10, %v683_v24  ;;  %v12352_v4 = vadd.s32 %v683_v24, %v679_v10 }
 0x16b   :  { %v772_v7 = vand.u32 31, %v770_v3  ;;  %v663_v34 = vshll.u32 %v12348_v49, 16  ;;  %vm665_vm11 = vc.u32 %v657_v33, %v661_v55  ;;  %v667_v21 = vadd.s32 %v661_v55, %v657_v33 }
 0x16c   :  { %v915_v9 = vand.u32 2139095040, %v12343_v16  ;;  %v303_v5 = vmul.u32 256, %v11239_v58  ;;  %v12357_v8 = vsub.s32 %v12097_v36, %v287_v46  ;;  %v12360_v37 = vsub.s32 %v12100_v26, %v288_v57 }
 0x16d   :  { %v682_v25 = vmul.u32 %v678_v2, %v654_v0  ;;  %v12363_v42 = vsub.s32 %v12103_v19, %v289_v27  ;;  %v12366_v10 = vsub.s32 %v12106_v39, %v290_v12  ;;  %v660_v60 = vmul.u32 %v656_v45, %v654_v0 }
 0x16e   :  { %v18790_v43 = vmov 0   ;;  %v12370_v24 = vsub.s32 %v12109_v40, %v291_v32  ;;  %vm691_vm14 = vc.u32 %v12352_v4, %v685_v31  ;;  %v12376_v26 = vsub.s32 32, %v772_v7 }
 0x16f   :  { %v688_v1 = vsel %vm687_vm10, 1, %v18790_v43  ;;  %v666_v58 = vsel %vm665_vm11, 1, %v18790_v43  ;;  %v12379_v36 = vsub.s32 %v12112_v17, %v292_v48  ;;  %v12382_v19 = vsub.s32 %v12115_v15, %v293_v56 }
 0x170   :  { %vm669_vm15 = vc.u32 %v667_v21, %v663_v34  ;;  %v916_v0 = vshrl.u32 %v915_v9, 23  ;;  %v12385_v39 = vsub.s32 %v12119_v22, %v294_v18  ;;  %v12388_v40 = vsub.s32 %v12122_v35, %v295_v28  ;;  %v18797_v34 = vld [vmem:[#allocation57_spill] sm:$0xff] }
 0x171   :  { %v12391_v45 = vsub.s32 %v12125_v30, %v296_v54  ;;  %v690_v2 = vadd.s32 %v688_v1, %v682_v25  ;;  %v12394_v46 = vsub.s32 %v12128_v13, %v300_v52  ;;  %v12397_v17 = vsub.s32 %v12131_v38, %v301_v44 }
 0x172   :  { %v668_v15 = vadd.s32 %v666_v58, %v660_v60  ;;  %v692_v57 = vsel %vm691_vm14, 1, %v18790_v43  ;;  %v670_v27 = vsel %vm669_vm15, 1, %v18790_v43  ;;  %v18382_v22 = vand.u32 2147483647, %v12246_v47 }
 0x173   :  { %v787_v35 = vshll.u32 %v18777_v14, %v772_v7  ;;  %v788_v30 = vshrl.u32 %v18778_v61, %v12376_v26  ;;  %v12406_v18 = vsub.s32 %v12134_v53, %v302_v20  ;;  %v12409_v13 = vsub.s32 %v12137_v11, %v303_v5 }
 0x174   :  { %v12411_v38 = vshrl.u32 %v770_v3, 5  ;;  %v11006_v12 = vadd.s32 4294967169, %v916_v0  ;;  %v684_v32 = vshrl.u32 %v12338_v41, 16  ;;  %v694_v33 = vadd.s32 %v692_v57, %v690_v2  ;;  %v18793_v0 = vld [vmem:[#allocation55_spill] sm:$0xff] }
 0x175   :  { %18791 = vst [vmem:[#allocation59_spill] sm:$0xff] %v12409_v13  ;;  %v778_v55 = vshll.u32 %v18774_v6, %v772_v7  ;;  %v779_v48 = vshrl.u32 %v18775_v59, %v12376_v26  ;;  %v662_v56 = vshrl.u32 %v12341_v23, 16  ;;  %v672_v28 = vadd.s32 %v670_v27, %v668_v15  ;;  %v18794_v15 = vld [vmem:[#allocation56_spill] sm:$0xff] }
 0x176   :  { %v781_v53 = vshll.u32 %v18775_v59, %v772_v7  ;;  %v782_v11 = vshrl.u32 %v18776_v51, %v12376_v26  ;;  %v765_v3 = vand.u32 8388607, %v18382_v22  ;;  %v784_v54 = vshll.u32 %v18776_v51, %v772_v7 }
 0x177   :  { %v785_v41 = vshrl.u32 %v18777_v14, %v12376_v26  ;;  %v789_v52 = vor.u32 %v788_v30, %v787_v35  ;;  %v620_v44 = vshrl.u32 %v18773_v50, %v12255_v29  ;;  %v775_v23 = vshll.u32 %v18773_v50, %v772_v7 }
 0x178   :  { %vm793_vm3 = vcmp.lt.s32.totalorder %v12411_v38, 4  ;;  %v922_v20 = vadd.s32 1, %v11006_v12  ;;  %v641_v21 = vsel %vm639_vm5, %v12279_v62, 2102212464  ;;  %v686_v9 = vshrl.u32 %v12345_v63, 16 }
 0x179   :  { %v695_v5 = vadd.s32 %v694_v33, %v684_v32  ;;  %v776_v25 = vshrl.u32 %v18774_v6, %v12376_v26  ;;  %v664_v60 = vshrl.u32 %v12348_v49, 16  ;;  %v673_v1 = vadd.s32 %v672_v28, %v662_v56 }
 0x17a   :  { %v12437_v58 = vor.u32 %v779_v48, %v778_v55  ;;  %v12439_v29 = vor.u32 %v782_v11, %v781_v53  ;;  %v786_v7 = vor.u32 %v785_v41, %v784_v54  ;;  %vm790_vm6 = vcmp.lt.s32.totalorder %v12411_v38, 1 }
 0x17b   :  { %vm792_vm10 = vcmp.lt.s32.totalorder %v12411_v38, 3  ;;  %v803_v62 = vsel %vm793_vm3, %v789_v52, 1326507024  ;;  %vm351_vm5 = vcmp.lt.s32.totalorder %v12357_v8, 0  ;;  %v640_v2 = vsel %vm636_vm0, %v620_v44, %v18793_v0 }
 0x17c   :  { %v766_v49 = vor.u32 8388608, %v765_v3  ;;  %vm923_vm11 = vcmp.gt.s32.totalorder %v922_v20, 0  ;;  %v642_v57 = vsel %vm638_vm8, %v18794_v15, %v641_v21  ;;  %v12455_v27 = vadd.s32 %v12352_v4, %v685_v31 }
 0x17d   :  { %v696_v35 = vadd.s32 %v695_v5, %v686_v9  ;;  %v12457_v30 = vor.u32 %v776_v25, %v775_v23  ;;  %vm352_vm14 = vcmp.lt.s32.totalorder %v12360_v37, 0  ;;  %vm353_vm15 = vcmp.lt.s32.totalorder %v12363_v42, 0 }
 0x17e   :  { %18795 = vst [vmem:[#allocation54_spill] sm:$0xff] %v12455_v27  ;;  %v12461_v12 = vadd.s32 %v673_v1, %v664_v60  ;;  %vm791_vm0 = vcmp.lt.s32.totalorder %v12411_v38, 2  ;;  %v802_v32 = vsel %vm790_vm6, %v12437_v58, %v12439_v29  ;;  %v804_v31 = vsel %vm792_vm10, %v786_v7, %v803_v62 }
 0x17f   :  { %vm354_vm8 = vcmp.lt.s32.totalorder %v12366_v10, 0  ;;  %vm355_vm1 = vcmp.lt.s32.totalorder %v12370_v24, 0  ;;  %vm356_vm7 = vcmp.lt.s32.totalorder %v12379_v36, 0  ;;  %v799_v63 = vsel %vm793_vm3, %v786_v7, 920167782 }
 0x180   :  { %18796 = vst [vmem:[#allocation55_spill] sm:$0xff] %v12461_v12  ;;  %vm357_vm4 = vcmp.lt.s32.totalorder %v12382_v19, 0  ;;  %v383_v4 = vadd.s32 256, %v12357_v8  ;;  %v12477_v33 = vshll.u32 %v766_v49, 8  ;;  %v924_v55 = vsel %vm923_vm11, %v922_v20, 0 }
 0x181   :  { %v384_v48 = vadd.s32 256, %v12360_v37  ;;  %v643_v56 = vsel %vm637_vm2, %v640_v2, %v642_v57  ;;  %v700_v28 = vadd.s32 1, %v696_v35  ;;  %v12485_v53 = vsel %vm791_vm0, %v802_v32, %v804_v31 }
 0x182   :  { %v385_v11 = vadd.s32 256, %v12363_v42  ;;  %vm699_vm13 = vc.u32 %v12461_v12, %v12455_v27  ;;  %v798_v3 = vsel %vm790_vm6, %v12457_v30, %v12437_v58  ;;  %v800_v54 = vsel %vm792_vm10, %v12439_v29, %v799_v63 }
 0x183   :  { %v386_v41 = vadd.s32 256, %v12366_v10  ;;  %v387_v52 = vadd.s32 256, %v12370_v24  ;;  %v388_v44 = vadd.s32 256, %v12379_v36  ;;  %v926_v23 = vand.u32 31, %v924_v55 }
 0x184   :  { %vm358_vm2 = vcmp.lt.s32.totalorder %v12385_v39, 0  ;;  %v389_v20 = vadd.s32 256, %v12382_v19  ;;  %v697_v21 = vmul.u32 %v18797_v34, %v643_v56  ;;  %v807_v9 = vand.u32 65535, %v12477_v33 }
 0x185   :  { %v18383_v5 = vshrl.u32 %v12485_v53, 16  ;;  %v390_v25 = vadd.s32 256, %v12385_v39  ;;  %v12507_v60 = vadd.s32 256, %v12388_v40  ;;  %v701_v1 = vsel %vm699_vm13, %v700_v28, %v696_v35 }
 0x186   :  { %v12511_v7 = vsel %vm791_vm0, %v798_v3, %v800_v54  ;;  %v12514_v62 = vadd.s32 256, %v12391_v45  ;;  %v12517_v0 = vadd.s32 256, %v12394_v46  ;;  %v12520_v2 = vadd.s32 256, %v12397_v17 }
 0x187   :  { %v12523_v49 = vadd.s32 256, %v12406_v18  ;;  %v12526_v15 = vadd.s32 256, %v12409_v13  ;;  %v12531_v57 = vsel %vm351_vm5, %v383_v4, %v12357_v8  ;;  %v809_v35 = vand.u32 65535, %v12485_v53 }
 0x188   :  { %v12534_v32 = vsub.s32 32, %v926_v23  ;;  %v12536_v31 = vadd.s32 %v701_v1, %v697_v21  ;;  %v808_v63 = vshrl.u32 %v12477_v33, 16  ;;  %v12541_v56 = vmul.u32 %v18383_v5, %v807_v9 }
 0x189   :  { %18798 = vst [vmem:[#allocation56_spill] sm:$0xff] %v12526_v15  ;;  %v832_v28 = vshrl.u32 %v12511_v7, 16  ;;  %v12547_v3 = vsel %vm352_vm14, %v384_v48, %v12360_v37  ;;  %v12552_v8 = vsel %vm353_vm15, %v385_v11, %v12363_v42  ;;  %v12557_v4 = vsel %vm354_vm8, %v386_v41, %v12366_v10 }
 0x18a   :  { %v12562_v54 = vsel %vm355_vm1, %v387_v52, %v12370_v24  ;;  %vm359_vm13 = vcmp.lt.s32.totalorder %v12388_v40, 0  ;;  %v12568_v37 = vsel %vm356_vm7, %v388_v44, %v12379_v36  ;;  %v12573_v42 = vsel %vm357_vm4, %v389_v20, %v12382_v19 }
 0x18b   :  { %v831_v10 = vand.u32 65535, %v12511_v7  ;;  %v811_v11 = vmul.u32 %v809_v35, %v807_v9  ;;  %v12577_v41 = vshrl.u32 %v924_v55, 5  ;;  %v938_v24 = vshll.u32 %v18776_v51, %v926_v23 }
 0x18c   :  { %v939_v52 = vshrl.u32 %v18777_v14, %v12534_v32  ;;  %v703_v36 = vadd.s32 536870912, %v12536_v31  ;;  %v12583_v44 = vmul.u32 %v809_v35, %v808_v63  ;;  %v815_v34 = vshll.u32 %v12541_v56, 16 }
 0x18d   :  { %v12586_v19 = vmul.u32 %v832_v28, %v807_v9  ;;  %vm360_vm7 = vcmp.lt.s32.totalorder %v12391_v45, 0  ;;  %vm364_vm4 = vcmp.lt.s32.totalorder %v12394_v46, 0  ;;  %v929_v55 = vshll.u32 %v18773_v50, %v926_v23 }
 0x18e   :  { %v930_v20 = vshrl.u32 %v18774_v6, %v12534_v32  ;;  %v932_v21 = vshll.u32 %v18774_v6, %v926_v23  ;;  %v933_v1 = vshrl.u32 %v18775_v59, %v12534_v32  ;;  %v935_v7 = vshll.u32 %v18775_v59, %v926_v23 }
 0x18f   :  { %v936_v35 = vshrl.u32 %v18776_v51, %v12534_v32  ;;  %v941_v22 = vshll.u32 %v18777_v14, %v926_v23  ;;  %v942_v5 = vshrl.u32 %v18778_v61, %v12534_v32  ;;  %vm365_vm1 = vcmp.lt.s32.totalorder %v12397_v17, 0 }
 0x190   :  { %v12606_v48 = vsel %vm358_vm2, %v390_v25, %v12385_v39  ;;  %vm447_vm5 = vcmp.ge.s32.totalorder %v12531_v57, 256  ;;  %v18799_v15 = vand.u32 2147483647, %v12343_v16  ;;  %v940_v47 = vor.u32 %v939_v52, %v938_v24 }
 0x191   :  { %vm366_vm11 = vcmp.lt.s32.totalorder %v12406_v18, 0  ;;  %v833_v27 = vmul.u32 %v831_v10, %v807_v9  ;;  %v12612_v23 = vmul.u32 %v831_v10, %v808_v63  ;;  %v837_v12 = vshll.u32 %v12586_v19, 16 }
 0x192   :  { %v919_v13 = vand.u32 8388607, %v18799_v15  ;;  %vm947_vm14 = vcmp.lt.s32.totalorder %v12577_v41, 4  ;;  %v10971_v61 = vadd.s32 4294967040, %v12531_v57  ;;  %v12617_v14 = vshrl.u32 %v703_v36, 30 }
 0x193   :  { %v817_v39 = vshll.u32 %v12583_v44, 16  ;;  %vm819_vm15 = vc.u32 %v811_v11, %v815_v34  ;;  %v12620_v25 = vor.u32 %v930_v20, %v929_v55  ;;  %v12622_v15 = vor.u32 %v933_v1, %v932_v21 }
 0x194   :  { %18800 = vst [vmem:[#allocation57_spill] sm:$0xff] %v12617_v14  ;;  %v12624_v24 = vor.u32 %v936_v35, %v935_v7  ;;  %v943_v9 = vor.u32 %v942_v5, %v941_v22  ;;  %v821_v10 = vadd.s32 %v815_v34, %v811_v11  ;;  %vm944_vm8 = vcmp.lt.s32.totalorder %v12577_v41, 1 }
 0x195   :  { %vm946_vm2 = vcmp.lt.s32.totalorder %v12577_v41, 3  ;;  %v953_v52 = vsel %vm947_vm14, %v940_v47, 920167782  ;;  %v18396_v36 = vshll.u32 %v12612_v23, 16  ;;  %vm841_vm12 = vc.u32 %v833_v27, %v837_v12 }
 0x196   :  { %v12631_v16 = vadd.s32 %v837_v12, %v833_v27  ;;  %v920_v55 = vor.u32 8388608, %v919_v13  ;;  %v12637_v20 = vsel %vm359_vm13, %v12507_v60, %v12388_v40  ;;  %v18801_v22 = vshrl.u32 %v12485_v53, 16 }
 0x197   :  { %v820_v11 = vsel %vm819_vm15, 1, %v18790_v43  ;;  %v836_v34 = vmul.u32 %v832_v28, %v808_v63  ;;  %vm945_vm9 = vcmp.lt.s32.totalorder %v12577_v41, 2  ;;  %v952_v27 = vsel %vm944_vm8, %v12620_v25, %v12622_v15 }
 0x198   :  { %v814_v5 = vmul.u32 %v18801_v22, %v808_v63  ;;  %v954_v13 = vsel %vm946_vm2, %v12624_v24, %v953_v52  ;;  %v957_v40 = vsel %vm947_vm14, %v943_v9, 1326507024  ;;  %v511_v12 = vsel %vm447_vm5, %v10971_v61, %v12531_v57 }
 0x199   :  { %v705_v53 = vshll.u32 %v12617_v14, 30  ;;  %vm823_vm13 = vc.u32 %v821_v10, %v817_v39  ;;  %v842_v60 = vsel %vm841_vm12, 1, %v18790_v43  ;;  %v12661_v63 = vsel %vm360_vm7, %v12514_v62, %v12391_v45 }
 0x19a   :  { %v12667_v28 = vsel %vm364_vm4, %v12517_v0, %v12394_v46  ;;  %vm845_vm5 = vc.u32 %v12631_v16, %v18396_v36  ;;  %v12672_v61 = vshll.u32 %v920_v55, 8  ;;  %v822_v57 = vadd.s32 %v820_v11, %v814_v5 }
 0x19b   :  { %v12676_v21 = vsel %vm945_vm9, %v952_v27, %v954_v13  ;;  %v956_v45 = vsel %vm944_vm8, %v12622_v15, %v12624_v24  ;;  %v958_v46 = vsel %vm946_vm2, %v940_v47, %v957_v40  ;;  %v12688_v62 = vsel %vm365_vm1, %v12520_v2, %v12397_v17 }
 0x19c   :  { %18802 = vst [vmem:[#allocation60_spill] sm:$0xff] %v12672_v61  ;;  %v543_v0 = vcvt.s32.f32 %v511_v12  ;;  %v824_v1 = vsel %vm823_vm13, 1, %v18790_v43  ;;  %v844_v7 = vadd.s32 %v842_v60, %v836_v34  ;;  %v12695_v35 = vsel %vm366_vm11, %v12523_v49, %v12406_v18 }
 0x19d   :  { %v12698_v39 = vadd.s32 4294967040, %v12547_v3  ;;  %v12701_v47 = vsub.s32 %v12536_v31, %v705_v53  ;;  %v846_v9 = vsel %vm845_vm5, 1, %v18790_v43  ;;  %v12705_v17 = vadd.s32 4294967040, %v12552_v8 }
 0x19e   :  { %v12709_v2 = vsel %vm945_vm9, %v956_v45, %v958_v46  ;;  %v961_v10 = vand.u32 65535, %v12672_v61  ;;  %v986_v18 = vshrl.u32 %v12676_v21, 16  ;;  %v12714_v49 = vadd.s32 4294967040, %v12557_v4 }
 0x19f   :  { %18803 = vst [vmem:[#allocation61_spill] sm:$0xff] %v12701_v47  ;;  %v12717_v52 = vadd.s32 4294967040, %v12562_v54  ;;  %v816_v31 = vshrl.u32 %v12541_v56, 16  ;;  %v826_v55 = vadd.s32 %v824_v1, %v822_v57  ;;  %vm448_vm12 = vcmp.ge.s32.totalorder %v12547_v3, 256 }
 0x1a0   :  { %v12722_v22 = vadd.s32 4294967040, %v12568_v37  ;;  %v12724_v5 = vmul.f32 0.024543693, %v543_v0  ;;  %v838_v11 = vshrl.u32 %v12586_v19, 16  ;;  %v848_v34 = vadd.s32 %v846_v9, %v844_v7 }
 0x1a1   :  { %v12728_v27 = vadd.s32 4294967040, %v12573_v42  ;;  %v12731_v13 = vadd.s32 4294967040, %v12606_v48  ;;  %v708_v40 = vsub.s32 0, %v12701_v47  ;;  %v964_v56 = vshrl.u32 %v12709_v2, 16 }
 0x1a2   :  { %18804 = vst [vmem:[#allocation62_spill] sm:$0xff] %v12724_v5  ;;  %vm707_vm7 = vcmp.lt.s32.totalorder %v12701_v47, 0  ;;  %v962_v12 = vshrl.u32 %v12672_v61, 16  ;;  %v985_v53 = vand.u32 65535, %v12676_v21  ;;  %v12738_v60 = vmul.u32 %v986_v18, %v961_v10 }
 0x1a3   :  { %vm449_vm4 = vcmp.ge.s32.totalorder %v12552_v8, 256  ;;  %v12742_v19 = vadd.s32 4294967040, %v12637_v20  ;;  %v774_v57 = vshrl.u32 %v18773_v50, %v12376_v26  ;;  %v818_v45 = vshrl.u32 %v12583_v44, 16 }
 0x1a4   :  { %v827_v46 = vadd.s32 %v826_v55, %v816_v31  ;;  %vm450_vm1 = vcmp.ge.s32.totalorder %v12557_v4, 256  ;;  %v840_v0 = vshrl.u32 %v12612_v23, 16  ;;  %v849_v1 = vadd.s32 %v848_v34, %v838_v11 }
 0x1a5   :  { %18805 = vst [vmem:[#allocation63_spill] sm:$0xff] %v12742_v19  ;;  %v963_v21 = vand.u32 65535, %v12709_v2  ;;  %v1069_v7 = vand.u32 2139095040, %v12724_v5  ;;  %vm451_vm11 = vcmp.ge.s32.totalorder %v12562_v54, 256  ;;  %v12753_v9 = vadd.s32 4294967040, %v12661_v63 }
 0x1a6   :  { %v709_v26 = vsel %vm707_vm7, %v708_v40, %v12701_v47  ;;  %v795_v44 = vsel %vm793_vm3, %v12439_v29, 2102212464  ;;  %v12761_v31 = vmul.u32 %v964_v56, %v961_v10  ;;  %vm452_vm15 = vcmp.ge.s32.totalorder %v12568_v37, 256 }
 0x1a7   :  { %18806 = vst [vmem:[#allocation64_spill] sm:$0xff] %v12753_v9  ;;  %v987_v2 = vmul.u32 %v985_v53, %v961_v10  ;;  %v12764_v55 = vmul.u32 %v985_v53, %v962_v12  ;;  %v991_v11 = vshll.u32 %v12738_v60, 16  ;;  %v1070_v34 = vshrl.u32 %v1069_v7, 23 }
 0x1a8   :  { %vm453_vm13 = vcmp.ge.s32.totalorder %v12573_v42, 256  ;;  %v12769_v36 = vadd.s32 4294967040, %v12667_v28  ;;  %v794_v40 = vsel %vm790_vm6, %v774_v57, %v12457_v30  ;;  %v12774_v29 = vadd.s32 %v827_v46, %v818_v45 }
 0x1a9   :  { %v18808_v14 = vshll.u32 %v12612_v23, 16  ;;  %v796_v53 = vsel %vm792_vm10, %v12437_v58, %v795_v44  ;;  %v850_v7 = vadd.s32 %v849_v1, %v840_v0  ;;  %v12784_v61 = vmul.u32 %v963_v21, %v962_v12 }
 0x1aa   :  { %18807 = vst [vmem:[#allocation65_spill] sm:$0xff] %v12769_v36  ;;  %v11009_v9 = vadd.s32 4294967169, %v1070_v34  ;;  %v12787_v36 = vadd.s32 4294967040, %v12688_v62  ;;  %v710_v19 = vclz %v709_v26  ;;  %v965_v30 = vmul.u32 %v963_v21, %v961_v10 }
 0x1ab   :  { %v12779_v47 = vadd.s32 %v12631_v16, %v18808_v14  ;;  %v969_v57 = vshll.u32 %v12761_v31, 16  ;;  %v18402_v23 = vshll.u32 %v12764_v55, 16  ;;  %vm995_vm3 = vc.u32 %v987_v2, %v991_v11 }
 0x1ac   :  { %v12791_v14 = vadd.s32 %v991_v11, %v987_v2  ;;  %v1076_v16 = vadd.s32 1, %v11009_v9  ;;  %v12794_v45 = vadd.s32 4294967040, %v12695_v35  ;;  %v512_v58 = vsel %vm448_vm12, %v12698_v39, %v12547_v3 }
 0x1ad   :  { %v797_v46 = vsel %vm791_vm0, %v794_v40, %v796_v53  ;;  %vm853_vm6 = vc.u32 %v12774_v29, %v12779_v47  ;;  %v854_v10 = vadd.s32 1, %v850_v7  ;;  %v971_v0 = vshll.u32 %v12784_v61, 16 }
 0x1ae   :  { %v990_v1 = vmul.u32 %v986_v18, %v962_v12  ;;  %vm1077_vm10 = vcmp.gt.s32.totalorder %v1076_v16, 0  ;;  %vm973_vm5 = vc.u32 %v965_v30, %v969_v57  ;;  %v975_v21 = vadd.s32 %v969_v57, %v965_v30 }
 0x1af   :  { %v996_v9 = vsel %vm995_vm3, 1, %v18790_v43  ;;  %v1078_v26 = vsel %vm1077_vm10, %v1076_v16, 0  ;;  %v12810_v3 = vsel %vm449_vm4, %v12705_v17, %v12552_v8  ;;  %v544_v38 = vcvt.s32.f32 %v512_v58 }
 0x1b0   :  { %v11001_v39 = vadd.s32 4294967294, %v710_v19  ;;  %vm999_vm0 = vc.u32 %v12791_v14, %v18402_v23  ;;  %v12819_v18 = vsel %vm450_vm1, %v12714_v49, %v12557_v4  ;;  %v851_v44 = vmul.u32 %v12477_v33, %v797_v46 }
 0x1b1   :  { %v968_v2 = vmul.u32 %v964_v56, %v962_v12  ;;  %v1080_v11 = vand.u32 31, %v1078_v26  ;;  %v12826_v8 = vsel %vm451_vm11, %v12717_v52, %v12562_v54  ;;  %v855_v17 = vsel %vm853_vm6, %v854_v10, %v850_v7 }
 0x1b2   :  { %v974_v19 = vsel %vm973_vm5, 1, %v18790_v43  ;;  %v998_v34 = vadd.s32 %v996_v9, %v990_v1  ;;  %vm454_vm12 = vcmp.ge.s32.totalorder %v12606_v48, 256  ;;  %v12837_v33 = vsel %vm452_vm15, %v12722_v22, %v12568_v37 }
 0x1b3   :  { %vm977_vm7 = vc.u32 %v975_v21, %v971_v0  ;;  %v1000_v4 = vsel %vm999_vm0, 1, %v18790_v43  ;;  %v12840_v54 = vsub.s32 32, %v1080_v11  ;;  %v12846_v49 = vsel %vm453_vm13, %v12728_v27, %v12573_v42 }
 0x1b4   :  { %v12848_v52 = vmul.f32 0.024543693, %v544_v38  ;;  %vm11002_vm4 = vcmp.lt.s32.totalorder %v11001_v39, 0  ;;  %v928_v56 = vshrl.u32 %v18773_v50, %v12534_v32  ;;  %v12852_v12 = vadd.s32 %v855_v17, %v851_v44 }
 0x1b5   :  { %v976_v37 = vadd.s32 %v974_v19, %v968_v2  ;;  %v992_v22 = vshrl.u32 %v12738_v60, 16  ;;  %v18401_v40 = vand.u32 2147483647, %v12724_v5  ;;  %v978_v53 = vsel %vm977_vm7, 1, %v18790_v43 }
 0x1b6   :  { %18809 = vst [vmem:[#allocation66_spill] sm:$0xff] %v12848_v52  ;;  %v1002_v7 = vadd.s32 %v1000_v4, %v998_v34  ;;  %v1083_v30 = vshll.u32 %v18773_v50, %v1080_v11  ;;  %v1086_v42 = vshll.u32 %v18774_v6, %v1080_v11  ;;  %v1084_v27 = vshrl.u32 %v18774_v6, %v12840_v54 }
 0x1b7   :  { %v1087_v32 = vshrl.u32 %v18775_v59, %v12840_v54  ;;  %v1092_v57 = vshll.u32 %v18776_v51, %v1080_v11  ;;  %v18810_v16 = vmov 920167782   ;;  %vm455_vm1 = vcmp.ge.s32.totalorder %v12637_v20, 256 }
 0x1b8   :  { %v1093_v60 = vshrl.u32 %v18810_v16, %v12840_v54  ;;  %vm456_vm11 = vcmp.ge.s32.totalorder %v12661_v63, 256  ;;  %vm460_vm15 = vcmp.ge.s32.totalorder %v12667_v28, 256  ;;  %v970_v58 = vshrl.u32 %v12761_v31, 16 }
 0x1b9   :  { %v12870_v46 = vshrl.u32 %v1078_v26, 5  ;;  %v1089_v10 = vshll.u32 %v18775_v59, %v1080_v11  ;;  %v1090_v0 = vshrl.u32 %v18776_v51, %v12840_v54  ;;  %vm461_vm13 = vcmp.ge.s32.totalorder %v12688_v62, 256 }
 0x1ba   :  { %v980_v1 = vadd.s32 %v978_v53, %v976_v37  ;;  %v1073_v21 = vand.u32 8388607, %v18401_v40  ;;  %v1095_v9 = vshll.u32 %v18810_v16, %v1080_v11  ;;  %v18811_v38 = vmov 1326507024  }
 0x1bb   :  { %v1096_v44 = vshrl.u32 %v18811_v38, %v12840_v54  ;;  %v857_v31 = vadd.s32 536870912, %v12852_v12  ;;  %v949_v26 = vsel %vm947_vm14, %v12624_v24, 2102212464  ;;  %v994_v2 = vshrl.u32 %v12764_v55, 16 }
 0x1bc   :  { %v1223_v17 = vand.u32 2139095040, %v12848_v52  ;;  %v1003_v19 = vadd.s32 %v1002_v7, %v992_v22  ;;  %v12887_v34 = vor.u32 %v1084_v27, %v1083_v30  ;;  %v12889_v4 = vor.u32 %v1087_v32, %v1086_v42 }
 0x1bd   :  { %v1094_v37 = vor.u32 %v1093_v60, %v1092_v57  ;;  %vm462_vm3 = vcmp.ge.s32.totalorder %v12695_v35, 256  ;;  %v12892_v11 = vor.u32 %v1090_v0, %v1089_v10  ;;  %v1097_v53 = vor.u32 %v1096_v44, %v1095_v9  ;;  %v18815_v9 = vld [vmem:[#allocation65_spill] sm:$0xff] }
 0x1be   :  { %vm1098_vm6 = vcmp.lt.s32.totalorder %v12870_v46, 1  ;;  %vm1101_vm10 = vcmp.lt.s32.totalorder %v12870_v46, 4  ;;  %v972_v24 = vshrl.u32 %v12784_v61, 16  ;;  %v981_v40 = vadd.s32 %v980_v1, %v970_v58 }
 0x1bf   :  { %v1074_v23 = vor.u32 8388608, %v1073_v21  ;;  %vm1100_vm14 = vcmp.lt.s32.totalorder %v12870_v46, 3  ;;  %v12902_v22 = vsel %vm454_vm12, %v12731_v13, %v12606_v48  ;;  %v12905_v7 = vsel %vm11002_vm4, 0, %v11001_v39  ;;  %v18814_v21 = vld [vmem:[#allocation64_spill] sm:$0xff] }
 0x1c0   :  { %v948_v30 = vsel %vm944_vm8, %v928_v56, %v12620_v25  ;;  %v1224_v42 = vshrl.u32 %v1223_v17, 23  ;;  %v12910_v27 = vshrl.u32 %v857_v31, 30  ;;  %vm1099_vm5 = vcmp.lt.s32.totalorder %v12870_v46, 2  ;;  %v18816_v17 = vld [vmem:[#allocation55_spill] sm:$0xff] }
 0x1c1   :  { %v1106_v61 = vsel %vm1098_vm6, %v12887_v34, %v12889_v4  ;;  %v1107_v48 = vsel %vm1101_vm10, %v1094_v37, 920167782  ;;  %v950_v13 = vsel %vm946_vm2, %v12622_v15, %v949_v26  ;;  %v1004_v39 = vadd.s32 %v1003_v19, %v994_v2  ;;  %v18817_v19 = vld [vmem:[#allocation54_spill] sm:$0xff] }
 0x1c2   :  { %v1108_v25 = vsel %vm1100_vm14, %v12892_v11, %v1107_v48  ;;  %v1111_v56 = vsel %vm1101_vm10, %v1097_v53, 1326507024  ;;  %v12927_v32 = vadd.s32 %v981_v40, %v972_v24  ;;  %v18812_v57 = vshll.u32 %v12764_v55, 16  ;;  %v18818_v48 = vld [vmem:[#allocation60_spill] sm:$0xff] }
 0x1c3   :  { %v1110_v15 = vsel %vm1098_vm6, %v12889_v4, %v12892_v11  ;;  %v12938_v58 = vshll.u32 %v1074_v23, 8  ;;  %v718_v10 = vsub.s32 4294967266, %v12905_v7  ;;  %v12943_v0 = vsel %vm1099_vm5, %v1106_v61, %v1108_v25 }
 0x1c4   :  { %v12932_v60 = vadd.s32 %v12791_v14, %v18812_v57  ;;  %v1112_v40 = vsel %vm1100_vm14, %v1094_v37, %v1111_v56  ;;  %v11012_v55 = vadd.s32 4294967169, %v1224_v42  ;;  %v18813_v14 = vld [vmem:[#allocation63_spill] sm:$0xff]  ;;  %v12957_v23 = vsel %vm456_vm11, %v18814_v21, %v12661_v63 }
 0x1c5   :  { %v12951_v1 = vsel %vm455_vm1, %v18813_v14, %v12637_v20  ;;  %v12963_v44 = vsel %vm460_vm15, %v18815_v9, %v12667_v28  ;;  %v859_v31 = vshll.u32 %v12910_v27, 30  ;;  %v12970_v20 = vsel %vm461_vm13, %v12787_v36, %v12688_v62 }
 0x1c6   :  { %v951_v26 = vsel %vm945_vm9, %v948_v30, %v950_v13  ;;  %v1008_v2 = vadd.s32 1, %v1004_v39  ;;  %v1113_v63 = vsel %vm1099_vm5, %v1110_v15, %v1112_v40  ;;  %v698_v37 = vadd.s32 %v18817_v19, %v18816_v17 }
 0x1c7   :  { %vm1007_vm8 = vc.u32 %v12927_v32, %v12932_v60  ;;  %v1115_v28 = vand.u32 65535, %v12938_v58  ;;  %v1140_v53 = vshrl.u32 %v12943_v0, 16  ;;  %v714_v36 = vsub.s32 32, %v12905_v7 }
 0x1c8   :  { %v719_v62 = vadd.s32 127, %v718_v10  ;;  %v1118_v24 = vshrl.u32 %v1113_v63, 16  ;;  %v1230_v41 = vadd.s32 1, %v11012_v55  ;;  %v12987_v30 = vsel %vm462_vm3, %v12794_v45, %v12695_v35  ;;  %v18819_v45 = vld [vmem:[#allocation61_spill] sm:$0xff] }
 0x1c9   :  { %v545_v42 = vcvt.s32.f32 %v12810_v3  ;;  %v12991_v61 = vsub.s32 %v12852_v12, %v859_v31  ;;  %v1005_v13 = vmul.u32 %v18818_v48, %v951_v26  ;;  %v546_v25 = vcvt.s32.f32 %v12819_v18 }
 0x1ca   :  { %v1009_v56 = vsel %vm1007_vm8, %v1008_v2, %v1004_v39  ;;  %v1116_v57 = vshrl.u32 %v12938_v58, 16  ;;  %v1139_v15 = vand.u32 65535, %v12943_v0  ;;  %v1117_v40 = vand.u32 65535, %v1113_v63 }
 0x1cb   :  { %v12998_v55 = vmul.u32 %v1118_v24, %v1115_v28  ;;  %v13000_v35 = vmul.u32 %v1140_v53, %v1115_v28  ;;  %v715_v3 = vshll.u32 %v18819_v45, %v12905_v7  ;;  %v716_v12 = vshrl.u32 %v698_v37, %v714_v36 }
 0x1cc   :  { %v720_v14 = vshll.u32 %v719_v62, 23  ;;  %vm1231_vm9 = vcmp.gt.s32.totalorder %v1230_v41, 0  ;;  %v862_v21 = vsub.s32 0, %v12991_v61  ;;  %v13007_v0 = vadd.s32 %v1009_v56, %v1005_v13 }
 0x1cd   :  { %vm861_vm2 = vcmp.lt.s32.totalorder %v12991_v61, 0  ;;  %v1141_v31 = vmul.u32 %v1139_v15, %v1115_v28  ;;  %v13011_v26 = vmul.u32 %v1139_v15, %v1116_v57  ;;  %v1119_v2 = vmul.u32 %v1117_v40, %v1115_v28 }
 0x1ce   :  { %v1123_v7 = vshll.u32 %v12998_v55, 16  ;;  %v1145_v63 = vshll.u32 %v13000_v35, 16  ;;  %v1232_v17 = vsel %vm1231_vm9, %v1230_v41, 0  ;;  %v717_v36 = vor.u32 %v716_v12, %v715_v3 }
 0x1cf   :  { %v721_v62 = vor.u32 4788187, %v720_v14  ;;  %v863_v56 = vsel %vm861_vm2, %v862_v21, %v12991_v61  ;;  %v1011_v15 = vadd.s32 536870912, %v13007_v0  ;;  %v13021_v28 = vmul.f32 0.024543693, %v545_v42 }
 0x1d0   :  { %v13023_v45 = vmul.f32 0.024543693, %v546_v25  ;;  %v13025_v9 = vmul.u32 %v1117_v40, %v1116_v57  ;;  %v1234_v41 = vand.u32 31, %v1232_v17  ;;  %vm1127_vm0 = vc.u32 %v1119_v2, %v1123_v7 }
 0x1d1   :  { %18820 = vst [vmem:[#allocation63_spill] sm:$0xff] %v13021_v28  ;;  %v18403_v37 = vshll.u32 %v13011_v26, 16  ;;  %vm1149_vm12 = vc.u32 %v1141_v31, %v1145_v63  ;;  %v13028_v3 = vadd.s32 %v1145_v63, %v1141_v31  ;;  %v722_v12 = vand.u32 2147483647, %v721_v62 }
 0x1d2   :  { %18821 = vst [vmem:[#allocation64_spill] sm:$0xff] %v13023_v45  ;;  %v724_v14 = vcvt.s32.f32 %v717_v36  ;;  %v864_v13 = vclz %v863_v56  ;;  %v13030_v48 = vsub.s32 32, %v1234_v41  ;;  %v13032_v21 = vshrl.u32 %v1011_v15, 30 }
 0x1d3   :  { %v1122_v42 = vmul.u32 %v1118_v24, %v1116_v57  ;;  %v1144_v19 = vmul.u32 %v1140_v53, %v1116_v57  ;;  %v18411_v25 = vand.u32 2147483647, %v12848_v52  ;;  %v1125_v40 = vshll.u32 %v13025_v9, 16 }
 0x1d4   :  { %v1128_v39 = vsel %vm1127_vm0, 1, %v18790_v43  ;;  %v1129_v18 = vadd.s32 %v1123_v7, %v1119_v2  ;;  %v1150_v10 = vsel %vm1149_vm12, 1, %v18790_v43  ;;  %vm13041_vm7 = vc.u32 %v13028_v3, %v18403_v37 }
 0x1d5   :  { %v13045_v63 = vshrl.u32 %v1232_v17, 5  ;;  %v1237_v53 = vshll.u32 %v18773_v50, %v1234_v41  ;;  %v1238_v24 = vshrl.u32 %v18774_v6, %v13030_v48  ;;  %v1240_v57 = vshll.u32 %v18774_v6, %v1234_v41 }
 0x1d6   :  { %v1241_v2 = vshrl.u32 %v18775_v59, %v13030_v48  ;;  %v1243_v7 = vshll.u32 %v18775_v59, %v1234_v41  ;;  %v1244_v36 = vshrl.u32 %v18776_v51, %v13030_v48  ;;  %v725_v62 = vmul.f32 %v724_v14, %v722_v12 }
 0x1d7   :  { %v11004_v56 = vadd.s32 4294967294, %v864_v13  ;;  %v1013_v17 = vshll.u32 %v13032_v21, 30  ;;  %v1227_v15 = vand.u32 8388607, %v18411_v25  ;;  %v1130_v37 = vadd.s32 %v1128_v39, %v1122_v42 }
 0x1d8   :  { %vm1131_vm4 = vc.u32 %v1129_v18, %v1125_v40  ;;  %v1152_v5 = vadd.s32 %v1150_v10, %v1144_v19  ;;  %v1246_v45 = vshll.u32 %v18776_v51, %v1234_v41  ;;  %v1154_v6 = vsel %vm13041_vm7, 1, %v18790_v43 }
 0x1d9   :  { %v13063_v59 = vor.u32 %v1238_v24, %v1237_v53  ;;  %v1247_v12 = vshrl.u32 %v18810_v16, %v13030_v48  ;;  %v1249_v13 = vshll.u32 %v18810_v16, %v1234_v41  ;;  %v13068_v14 = vor.u32 %v1241_v2, %v1240_v57  ;;  %v18824_v2 = vld [vmem:[#allocation43_spill] sm:$0xff] }
 0x1da   :  { %v13070_v52 = vor.u32 %v1244_v36, %v1243_v7  ;;  %v1250_v10 = vshrl.u32 %v18811_v38, %v13030_v48  ;;  %vm1255_vm1 = vcmp.lt.s32.totalorder %v13045_v63, 4  ;;  %v1132_v18 = vsel %vm1131_vm4, 1, %v18790_v43 }
 0x1db   :  { %v1248_v39 = vor.u32 %v1247_v12, %v1246_v45  ;;  %vm1252_vm11 = vcmp.lt.s32.totalorder %v13045_v63, 1  ;;  %vm1254_vm15 = vcmp.lt.s32.totalorder %v13045_v63, 3  ;;  %vm11005_vm13 = vcmp.lt.s32.totalorder %v11004_v56, 0 }
 0x1dc   :  { %v13079_v19 = vsub.s32 %v13007_v0, %v1013_v17  ;;  %v1228_v41 = vor.u32 8388608, %v1227_v15  ;;  %v1251_v42 = vor.u32 %v1250_v10, %v1249_v13  ;;  %v1124_v40 = vshrl.u32 %v12998_v55, 16 }
 0x1dd   :  { %v1146_v31 = vshrl.u32 %v13000_v35, 16  ;;  %v1156_v53 = vadd.s32 %v1154_v6, %v1152_v5  ;;  %v1261_v24 = vsel %vm1255_vm1, %v1248_v39, 920167782  ;;  %v1134_v57 = vadd.s32 %v1132_v18, %v1130_v37 }
 0x1de   :  { %vm1253_vm3 = vcmp.lt.s32.totalorder %v13045_v63, 2  ;;  %v1260_v45 = vsel %vm1252_vm11, %v13063_v59, %v13068_v14  ;;  %v1262_v0 = vsel %vm1254_vm15, %v13070_v52, %v1261_v24  ;;  %vm606_vm8 = vcmp.lt.s32.totalorder %v18824_v2, 0 }
 0x1df   :  { %v726_v55 = vxor.u32 2147483648, %v725_v62  ;;  %v13094_v35 = vsel %vm11005_vm13, 0, %v11004_v56  ;;  %v1264_v6 = vsel %vm1252_vm11, %v13068_v14, %v13070_v52  ;;  %v1016_v5 = vsub.s32 0, %v13079_v19 }
 0x1e0   :  { %v1082_v37 = vshrl.u32 %v18773_v50, %v12840_v54  ;;  %v1265_v7 = vsel %vm1255_vm1, %v1251_v42, 1326507024  ;;  %v13105_v36 = vshll.u32 %v1228_v41, 8  ;;  %v1148_v17 = vshrl.u32 %v13011_v26, 16 }
 0x1e1   :  { %v1157_v15 = vadd.s32 %v1156_v53, %v1146_v31  ;;  %v13110_v56 = vsel %vm1253_vm3, %v1260_v45, %v1262_v0  ;;  %v1266_v12 = vsel %vm1254_vm15, %v1248_v39, %v1265_v7  ;;  %vm1015_vm9 = vcmp.lt.s32.totalorder %v13079_v19, 0 }
 0x1e2   :  { %v1126_v13 = vshrl.u32 %v13025_v9, 16  ;;  %v1135_v54 = vadd.s32 %v1134_v57, %v1124_v40  ;;  %v13118_v10 = vsel %vm1253_vm3, %v1264_v6, %v1266_v12  ;;  %v18825_v41 = vcvt.s32.f32 %v12826_v8 }
 0x1e3   :  { %v18827_v31 = vcvt.s32.f32 %v12837_v33  ;;  %v1103_v39 = vsel %vm1101_vm10, %v12892_v11, 2102212464  ;;  %v18829_v9 = vand.u32 2147483647, %v18824_v2  ;;  %v727_v24 = vsel %vm606_vm8, %v726_v55, %v725_v62 }
 0x1e4   :  { %v13123_v42 = vmul.f32 0.024543693, %v18825_v41  ;;  %v1269_v8 = vand.u32 65535, %v13105_v36  ;;  %v1294_v57 = vshrl.u32 %v13110_v56, 16  ;;  %v872_v33 = vsub.s32 4294967266, %v13094_v35 }
 0x1e5   :  { %v13127_v53 = vmul.f32 0.024543693, %v18827_v31  ;;  %vm13134_vm2 = vcmp.le.f32.partialorder %v18829_v9, 0.7853982  ;;  %v1017_v45 = vsel %vm1015_vm9, %v1016_v5, %v13079_v19  ;;  %v1158_v0 = vadd.s32 %v1157_v15, %v1148_v17 }
 0x1e6   :  { %18826 = vst [vmem:[#allocation65_spill] sm:$0xff] %v13123_v42  ;;  %v1272_v11 = vshrl.u32 %v13118_v10, 16  ;;  %v1102_v6 = vsel %vm1098_vm6, %v1082_v37, %v12887_v34  ;;  %v1104_v7 = vsel %vm1100_vm14, %v12889_v4, %v1103_v39  ;;  %v13151_v62 = vadd.s32 %v1135_v54, %v1126_v13 }
 0x1e7   :  { %18828 = vst [vmem:[#allocation55_spill] sm:$0xff] %v13127_v53  ;;  %v18832_v55 = vshll.u32 %v13011_v26, 16  ;;  %v18833_v5 = vcvt.s32.f32 %v12846_v49  ;;  %v18835_v15 = vcvt.s32.f32 %v12902_v22  ;;  %v1270_v34 = vshrl.u32 %v13105_v36, 16 }
 0x1e8   :  { %v1293_v37 = vand.u32 65535, %v13110_v56  ;;  %v18837_v4 = vcvt.s32.f32 %v12951_v1  ;;  %v13175_v26 = vsel %vm13134_vm2, %v18824_v2, %v727_v24  ;;  %v1018_v49 = vclz %v1017_v45 }
 0x1e9   :  { %v13156_v12 = vadd.s32 %v13028_v3, %v18832_v55  ;;  %v13160_v17 = vmul.f32 0.024543693, %v18833_v5  ;;  %v13164_v41 = vmul.f32 0.024543693, %v18835_v15  ;;  %v13177_v3 = vmul.u32 %v1294_v57, %v1269_v8 }
 0x1ea   :  { %v13170_v13 = vmul.f32 0.024543693, %v18837_v4  ;;  %v1105_v22 = vsel %vm1099_vm5, %v1102_v6, %v1104_v7  ;;  %v1162_v54 = vadd.s32 1, %v1158_v0  ;;  %v1271_v31 = vand.u32 65535, %v13118_v10  ;;  %v18843_v4 = vld [vmem:[#allocation57_spill] sm:$0xff] }
 0x1eb   :  { %18834 = vst [vmem:[#allocation54_spill] sm:$0xff] %v13160_v17  ;;  %v13182_v39 = vmul.u32 %v1272_v11, %v1269_v8  ;;  %v852_v1 = vadd.s32 %v12779_v47, %v12774_v29  ;;  %v868_v56 = vsub.s32 32, %v13094_v35  ;;  %v873_v9 = vadd.s32 127, %v872_v33 }
 0x1ec   :  { %18836 = vst [vmem:[#allocation60_spill] sm:$0xff] %v13164_v41  ;;  %vm1161_vm6 = vc.u32 %v13151_v62, %v13156_v12  ;;  %v18839_v24 = vcvt.s32.f32 %v12957_v23  ;;  %v18841_v46 = vcvt.s32.f32 %v12963_v44  ;;  %v1295_v10 = vmul.u32 %v1293_v37, %v1269_v8 }
 0x1ed   :  { %18838 = vst [vmem:[#allocation61_spill] sm:$0xff] %v13170_v13  ;;  %v13197_v7 = vmul.u32 %v1293_v37, %v1270_v34  ;;  %v13201_v47 = vmul.f32 %v13175_v26, %v13175_v26  ;;  %v11007_v29 = vadd.s32 4294967294, %v1018_v49  ;;  %v1159_v33 = vmul.u32 %v12938_v58, %v1105_v22 }
 0x1ee   :  { %v13191_v45 = vmul.f32 0.024543693, %v18839_v24  ;;  %v13195_v6 = vmul.f32 0.024543693, %v18841_v46  ;;  %v1299_v55 = vshll.u32 %v13177_v3, 16  ;;  %v1163_v5 = vsel %vm1161_vm6, %v1162_v54, %v1158_v0 }
 0x1ef   :  { %v1273_v23 = vmul.u32 %v1271_v31, %v1269_v8  ;;  %v13205_v15 = vmul.u32 %v1271_v31, %v1270_v34  ;;  %v1277_v44 = vshll.u32 %v13182_v39, 16  ;;  %v728_v24 = vsub.s32 4, %v18843_v4 }
 0x1f0   :  { %18840 = vst [vmem:[#allocation67_spill] sm:$0xff] %v13191_v45  ;;  %v869_v37 = vshll.u32 %v12991_v61, %v13094_v35  ;;  %v870_v46 = vshrl.u32 %v852_v1, %v868_v56  ;;  %v874_v25 = vshll.u32 %v873_v9, 23  ;;  %v733_v18 = vmul.f32 -0.001358992, %v13201_v47 }
 0x1f1   :  { %18842 = vst [vmem:[#allocation68_spill] sm:$0xff] %v13195_v6  ;;  %v18412_v49 = vshll.u32 %v13197_v7, 16  ;;  %vm1303_vm10 = vc.u32 %v1295_v10, %v1299_v55  ;;  %v13213_v58 = vadd.s32 %v1299_v55, %v1295_v10  ;;  %v740_v8 = vmul.f32 -0.00019511016, %v13201_v47 }
 0x1f2   :  { %vm11008_vm14 = vcmp.lt.s32.totalorder %v11007_v29, 0  ;;  %v13216_v0 = vadd.s32 %v1163_v5, %v1159_v33  ;;  %v1377_v22 = vand.u32 2139095040, %v13021_v28  ;;  %v1279_v54 = vshll.u32 %v13205_v15, 16 }
 0x1f3   :  { %vm1281_vm5 = vc.u32 %v1273_v23, %v1277_v44  ;;  %v1283_v61 = vadd.s32 %v1277_v44, %v1273_v23  ;;  %v1298_v35 = vmul.u32 %v1294_v57, %v1270_v34  ;;  %v871_v31 = vor.u32 %v870_v46, %v869_v37 }
 0x1f4   :  { %v875_v1 = vor.u32 4788187, %v874_v25  ;;  %v1304_v56 = vsel %vm1303_vm10, 1, %v18790_v43  ;;  %v1378_v9 = vshrl.u32 %v1377_v22, 23  ;;  %v18844_v10 = vcvt.s32.f32 %v12970_v20 }
 0x1f5   :  { %v13228_v33 = vsel %vm606_vm8, %v728_v24, %v18843_v4  ;;  %v1276_v5 = vmul.u32 %v1272_v11, %v1270_v34  ;;  %vm1307_vm0 = vc.u32 %v13213_v58, %v18412_v49  ;;  %v734_v57 = vadd.f32 0.041655596, %v733_v18 }
 0x1f6   :  { %v13223_v55 = vmul.f32 0.024543693, %v18844_v10  ;;  %v13234_v25 = vsel %vm11008_vm14, 0, %v11007_v29  ;;  %v1282_v23 = vsel %vm1281_vm5, 1, %v18790_v43  ;;  %v11015_v44 = vadd.s32 4294967169, %v1378_v9 }
 0x1f7   :  { %v741_v20 = vadd.f32 0.008332121, %v740_v8  ;;  %v1165_v37 = vadd.s32 536870912, %v13216_v0  ;;  %vm1285_vm12 = vc.u32 %v1283_v61, %v1279_v54  ;;  %v1306_v46 = vadd.s32 %v1304_v56, %v1298_v35 }
 0x1f8   :  { %18845 = vst [vmem:[#allocation57_spill] sm:$0xff] %v13223_v55  ;;  %v876_v22 = vand.u32 2147483647, %v875_v1  ;;  %v878_v4 = vcvt.s32.f32 %v871_v31  ;;  %v1308_v11 = vsel %vm1307_vm0, 1, %v18790_v43  ;;  %v1384_v34 = vadd.s32 1, %v11015_v44 }
 0x1f9   :  { %v1006_v24 = vadd.s32 %v12932_v60, %v12927_v32  ;;  %v1022_v18 = vsub.s32 32, %v13234_v25  ;;  %v1026_v29 = vsub.s32 4294967266, %v13234_v25  ;;  %v1284_v10 = vadd.s32 %v1282_v23, %v1276_v5 }
 0x1fa   :  { %v735_v9 = vmul.f32 %v734_v57, %v13201_v47  ;;  %v1286_v54 = vsel %vm1285_vm12, 1, %v18790_v43  ;;  %vm1385_vm7 = vcmp.gt.s32.totalorder %v1384_v34, 0  ;;  %v13246_v61 = vshrl.u32 %v1165_v37, 30 }
 0x1fb   :  { %v1300_v35 = vshrl.u32 %v13177_v3, 16  ;;  %v1310_v31 = vadd.s32 %v1308_v11, %v1306_v46  ;;  %v1386_v1 = vsel %vm1385_vm7, %v1384_v34, 0  ;;  %v742_v32 = vmul.f32 %v741_v20, %v13201_v47 }
 0x1fc   :  { %v13250_v60 = vmul.f32 %v878_v4, %v876_v22  ;;  %v1023_v56 = vshll.u32 %v13079_v19, %v13234_v25  ;;  %v1388_v5 = vand.u32 31, %v1386_v1  ;;  %v1024_v57 = vshrl.u32 %v1006_v24, %v1022_v18 }
 0x1fd   :  { %v1027_v23 = vadd.s32 127, %v1026_v29  ;;  %v1278_v44 = vshrl.u32 %v13182_v39, 16  ;;  %v1288_v8 = vadd.s32 %v1286_v54, %v1284_v10  ;;  %v1236_v37 = vshrl.u32 %v18773_v50, %v13030_v48  ;;  %v18848_v54 = vld [vmem:[#allocation53_spill] sm:$0xff] }
 0x1fe   :  { %v1257_v3 = vsel %vm1255_vm1, %v13070_v52, 2102212464  ;;  %v18415_v20 = vand.u32 2147483647, %v13021_v28  ;;  %v13261_v46 = vsub.s32 32, %v1388_v5  ;;  %v1167_v22 = vshll.u32 %v13246_v61, 30 }
 0x1ff   :  { %v1280_v19 = vshrl.u32 %v13205_v15, 16  ;;  %v1302_v25 = vshrl.u32 %v13197_v7, 16  ;;  %v1311_v4 = vadd.s32 %v1310_v31, %v1300_v35  ;;  %v1391_v39 = vshll.u32 %v18773_v50, %v1388_v5 }
 0x200   :  { %v18846_v11 = vmov 2475754826   ;;  %v18847_v52 = vmov 2131351028   ;;  %v1289_v18 = vadd.s32 %v1288_v8, %v1278_v44  ;;  %v13272_v29 = vshrl.u32 %v1386_v1, 5 }
 0x201   :  { %v1392_v48 = vshrl.u32 %v18846_v11, %v13261_v46  ;;  %v1394_v34 = vshll.u32 %v18846_v11, %v1388_v5  ;;  %v1395_v24 = vshrl.u32 %v18847_v52, %v13261_v46  ;;  %v1400_v10 = vshll.u32 %v18776_v51, %v1388_v5 }
 0x202   :  { %v1401_v15 = vshrl.u32 %v18810_v16, %v13261_v46  ;;  %vm760_vm4 = vcmp.lt.s32.totalorder %v18848_v54, 0  ;;  %v1028_v35 = vshll.u32 %v1027_v23, 23  ;;  %v1381_v31 = vand.u32 8388607, %v18415_v20 }
 0x203   :  { %v1397_v49 = vshll.u32 %v18847_v52, %v1388_v5  ;;  %v1398_v2 = vshrl.u32 %v18776_v51, %v13261_v46  ;;  %v13284_v8 = vsub.s32 %v13216_v0, %v1167_v22  ;;  %v1256_v1 = vsel %vm1252_vm11, %v1236_v37, %v13063_v59 }
 0x204   :  { %v1258_v44 = vsel %vm1254_vm15, %v13068_v14, %v1257_v3  ;;  %v1312_v23 = vadd.s32 %v1311_v4, %v1302_v25  ;;  %v13292_v55 = vor.u32 %v1392_v48, %v1391_v39  ;;  %v13294_v20 = vor.u32 %v1395_v24, %v1394_v34 }
 0x205   :  { %v1403_v6 = vshll.u32 %v18810_v16, %v1388_v5  ;;  %v1404_v45 = vshrl.u32 %v18811_v38, %v13261_v46  ;;  %v13299_v0 = vadd.s32 %v1289_v18, %v1280_v19  ;;  %v18849_v22 = vshll.u32 %v13197_v7, 16 }
 0x206   :  { %v1402_v37 = vor.u32 %v1401_v15, %v1400_v10  ;;  %vm1406_vm1 = vcmp.lt.s32.totalorder %v13272_v29, 1  ;;  %v736_v14 = vadd.f32 -0.4999988, %v735_v9  ;;  %v1382_v3 = vor.u32 8388608, %v1381_v31  ;;  %v18850_v9 = vld [vmem:[#allocation64_spill] sm:$0xff] }
 0x207   :  { %v13304_v59 = vadd.s32 %v13213_v58, %v18849_v22  ;;  %v13307_v25 = vor.u32 %v1398_v2, %v1397_v49  ;;  %vm1409_vm11 = vcmp.lt.s32.totalorder %v13272_v29, 4  ;;  %v1025_v5 = vor.u32 %v1024_v57, %v1023_v56 }
 0x208   :  { %v1029_v4 = vor.u32 4788187, %v1028_v35  ;;  %v1259_v19 = vsel %vm1253_vm3, %v1256_v1, %v1258_v44  ;;  %vm1408_vm15 = vcmp.lt.s32.totalorder %v13272_v29, 3  ;;  %v1316_v7 = vadd.s32 1, %v1312_v23 }
 0x209   :  { %v1405_v39 = vor.u32 %v1404_v45, %v1403_v6  ;;  %vm1407_vm13 = vcmp.lt.s32.totalorder %v13272_v29, 2  ;;  %v1414_v58 = vsel %vm1406_vm1, %v13292_v55, %v13294_v20  ;;  %v880_v2 = vxor.u32 2147483648, %v13250_v60 }
 0x20a   :  { %v1170_v49 = vsub.s32 0, %v13284_v8  ;;  %vm1315_vm8 = vc.u32 %v13299_v0, %v13304_v59  ;;  %v1415_v63 = vsel %vm1409_vm11, %v1402_v37, 920167782  ;;  %vm1169_vm3 = vcmp.lt.s32.totalorder %v13284_v8, 0 }
 0x20b   :  { %v1416_v45 = vsel %vm1408_vm15, %v13307_v25, %v1415_v63  ;;  %v13328_v6 = vshll.u32 %v1382_v3, 8  ;;  %v1531_v56 = vand.u32 2139095040, %v18850_v9  ;;  %v743_v57 = vadd.f32 -0.16666654, %v742_v32 }
 0x20c   :  { %v1313_v48 = vmul.u32 %v13105_v36, %v1259_v19  ;;  %v13334_v34 = vsel %vm1407_vm13, %v1414_v58, %v1416_v45  ;;  %v1418_v24 = vsel %vm1406_vm1, %v13294_v20, %v13307_v25  ;;  %v1030_v18 = vand.u32 2147483647, %v1029_v4 }
 0x20d   :  { %v1032_v10 = vcvt.s32.f32 %v1025_v5  ;;  %v1317_v15 = vsel %vm1315_vm8, %v1316_v7, %v1312_v23  ;;  %v1419_v35 = vsel %vm1409_vm11, %v1405_v39, 1326507024  ;;  %v18851_v31 = vand.u32 2147483647, %v18848_v54 }
 0x20e   :  { %v881_v36 = vsel %vm760_vm4, %v880_v2, %v13250_v60  ;;  %v1171_v1 = vsel %vm1169_vm3, %v1170_v49, %v13284_v8  ;;  %v1420_v44 = vsel %vm1408_vm15, %v1402_v37, %v1419_v35  ;;  %v1423_v22 = vand.u32 65535, %v13328_v6 }
 0x20f   :  { %vm13344_vm9 = vcmp.le.f32.partialorder %v18851_v31, 0.7853982  ;;  %v1421_v23 = vsel %vm1407_vm13, %v1418_v24, %v1420_v44  ;;  %v1448_v3 = vshrl.u32 %v13334_v34, 16  ;;  %v1532_v5 = vshrl.u32 %v1531_v56, 23  ;;  %v18859_v24 = vld [vmem:[#allocation58_spill] sm:$0xff] }
 0x210   :  { %v18854_v4 = vcvt.s32.f32 %v12987_v30  ;;  %v13365_v60 = vsel %vm13134_vm2, 0, %v13228_v33  ;;  %v744_v7 = vmul.f32 %v743_v57, %v13201_v47  ;;  %v1318_v37 = vadd.s32 %v1317_v15, %v1313_v48 }
 0x211   :  { %18856 = vst [vmem:[#allocation70_spill] sm:$0xff] %v13365_v60  ;;  %v737_v39 = vmul.f32 %v736_v14, %v13201_v47  ;;  %v18857_v58 = vsub.s32 4, %v12910_v27  ;;  %v1033_v49 = vmul.f32 %v1032_v10, %v1030_v18  ;;  %v1426_v30 = vshrl.u32 %v1421_v23, 16 }
 0x212   :  { %v13360_v19 = vmul.f32 0.024543693, %v18854_v4  ;;  %v13377_v63 = vsel %vm13344_vm9, %v18848_v54, %v881_v36  ;;  %v1172_v40 = vclz %v1171_v1  ;;  %v1424_v33 = vshrl.u32 %v13328_v6, 16 }
 0x213   :  { %v883_v2 = vsel %vm760_vm4, %v18857_v58, %v12910_v27  ;;  %v1425_v45 = vand.u32 65535, %v1421_v23  ;;  %v13380_v56 = vmul.u32 %v1426_v30, %v1423_v22  ;;  %v1447_v47 = vand.u32 65535, %v13334_v34 }
 0x214   :  { %18855 = vst [vmem:[#allocation69_spill] sm:$0xff] %v13360_v19  ;;  %v13383_v14 = vmul.u32 %v1448_v3, %v1423_v22  ;;  %v11018_v57 = vadd.s32 4294967169, %v1532_v5  ;;  %v745_v48 = vadd.f32 1.0, %v744_v7  ;;  %v13386_v27 = vand.u32 3, %v13365_v60 }
 0x215   :  { %vm914_vm2 = vcmp.lt.s32.totalorder %v18859_v24, 0  ;;  %v1319_v18 = vadd.s32 536870912, %v1318_v37  ;;  %v13389_v10 = vadd.f32 1.0, %v737_v39  ;;  %v13393_v15 = vsel %vm13344_vm9, 0, %v883_v2 }
 0x216   :  { %18858 = vst [vmem:[#allocation71_spill] sm:$0xff] %v13386_v27  ;;  %v13397_v35 = vmul.f32 %v13377_v63, %v13377_v63  ;;  %v1034_v34 = vxor.u32 2147483648, %v1033_v49  ;;  %v11010_v31 = vadd.s32 4294967294, %v1172_v40  ;;  %v1427_v36 = vmul.u32 %v1425_v45, %v1423_v22 }
 0x217   :  { %18860 = vst [vmem:[#allocation72_spill] sm:$0xff] %v13389_v10  ;;  %v13399_v1 = vmul.u32 %v1425_v45, %v1424_v33  ;;  %v1431_v44 = vshll.u32 %v13380_v56, 16  ;;  %v1449_v23 = vmul.u32 %v1447_v47, %v1423_v22  ;;  %v13402_v5 = vmul.u32 %v1447_v47, %v1424_v33 }
 0x218   :  { %18861 = vst [vmem:[#allocation73_spill] sm:$0xff] %v13393_v15  ;;  %v1453_v4 = vshll.u32 %v13383_v14, 16  ;;  %v1538_v7 = vadd.s32 1, %v11018_v57  ;;  %v13406_v32 = vmul.f32 %v745_v48, %v13175_v26  ;;  %v13409_v39 = vand.u32 3, %v13393_v15 }
 0x219   :  { %v18864_v58 = vand.u32 2147483647, %v18859_v24  ;;  %v13417_v40 = vshrl.u32 %v1319_v18, 30  ;;  %v13421_v45 = vmul.f32 -0.001358992, %v13397_v35  ;;  %v1035_v26 = vsel %vm914_vm2, %v1034_v34, %v1033_v49 }
 0x21a   :  { %18862 = vst [vmem:[#allocation74_spill] sm:$0xff] %v13406_v32  ;;  %v894_v47 = vmul.f32 -0.00019511016, %v13397_v35  ;;  %vm11011_vm10 = vcmp.lt.s32.totalorder %v11010_v31, 0  ;;  %v1433_v57 = vshll.u32 %v13399_v1, 16  ;;  %vm1435_vm14 = vc.u32 %v1427_v36, %v1431_v44 }
 0x21b   :  { %18863 = vst [vmem:[#allocation75_spill] sm:$0xff] %v13409_v39  ;;  %vm13413_vm6 = vcmp.le.f32.partialorder %v18864_v58, 0.7853982  ;;  %v1437_v48 = vadd.s32 %v1431_v44, %v1427_v36  ;;  %v18425_v58 = vshll.u32 %v13402_v5, 16  ;;  %vm1457_vm5 = vc.u32 %v1449_v23, %v1453_v4 }
 0x21c   :  { %18867 = vst [vmem:[#allocation76_spill] sm:$0xff] %v13417_v40  ;;  %v13428_v18 = vadd.s32 %v1453_v4, %v1449_v23  ;;  %vm1539_vm0 = vcmp.gt.s32.totalorder %v1538_v7, 0  ;;  %v1321_v22 = vshll.u32 %v13417_v40, 30  ;;  %v1430_v15 = vmul.u32 %v1426_v30, %v1424_v33 }
 0x21d   :  { %v18424_v60 = vand.u32 2147483647, %v18850_v9  ;;  %v1540_v54 = vsel %vm1539_vm0, %v1538_v7, 0  ;;  %v13432_v19 = vsel %vm11011_vm10, 0, %v11010_v31  ;;  %v1436_v49 = vsel %vm1435_vm14, 1, %v18790_v43 }
 0x21e   :  { %v1452_v34 = vmul.u32 %v1448_v3, %v1424_v33  ;;  %v1542_v13 = vand.u32 31, %v1540_v54  ;;  %v13435_v41 = vadd.f32 0.008332121, %v894_v47  ;;  %v13440_v36 = vsel %vm13413_vm6, %v18859_v24, %v1035_v26 }
 0x21f   :  { %vm1439_vm12 = vc.u32 %v1437_v48, %v1433_v57  ;;  %v1458_v44 = vsel %vm1457_vm5, 1, %v18790_v43  ;;  %v1160_v30 = vadd.s32 %v13156_v12, %v13151_v62  ;;  %v1176_v31 = vsub.s32 32, %v13432_v19 }
 0x220   :  { %vm1461_vm7 = vc.u32 %v13428_v18, %v18425_v58  ;;  %v13449_v3 = vsub.s32 32, %v1542_v13  ;;  %v1180_v33 = vsub.s32 4294967266, %v13432_v19  ;;  %v13452_v23 = vsub.s32 %v1318_v37, %v1321_v22 }
 0x221   :  { %v1438_v4 = vadd.s32 %v1436_v49, %v1430_v15  ;;  %v1535_v7 = vand.u32 8388607, %v18424_v60  ;;  %v1440_v47 = vsel %vm1439_vm12, 1, %v18790_v43  ;;  %v1460_v26 = vadd.s32 %v1458_v44, %v1452_v34 }
 0x222   :  { %v1545_v62 = vshll.u32 %v18773_v50, %v1542_v13  ;;  %v1548_v12 = vshll.u32 %v18846_v11, %v1542_v13  ;;  %v1462_v57 = vsel %vm1461_vm7, 1, %v18790_v43  ;;  %v1546_v48 = vshrl.u32 %v18846_v11, %v13449_v3 }
 0x223   :  { %v1549_v37 = vshrl.u32 %v18847_v52, %v13449_v3  ;;  %v1554_v15 = vshll.u32 %v18776_v51, %v1542_v13  ;;  %v13465_v22 = vshrl.u32 %v1540_v54, 5  ;;  %v1551_v49 = vshll.u32 %v18847_v52, %v1542_v13 }
 0x224   :  { %v1552_v34 = vshrl.u32 %v18776_v51, %v13449_v3  ;;  %v1555_v44 = vshrl.u32 %v18810_v16, %v13449_v3  ;;  %v1181_v60 = vadd.s32 127, %v1180_v33  ;;  %v1536_v58 = vor.u32 8388608, %v1535_v7 }
 0x225   :  { %v1557_v9 = vshll.u32 %v18810_v16, %v1542_v13  ;;  %v1558_v17 = vshrl.u32 %v18811_v38, %v13449_v3  ;;  %v1390_v28 = vshrl.u32 %v18773_v50, %v13261_v46  ;;  %v1432_v54 = vshrl.u32 %v13380_v56, 16 }
 0x226   :  { %v13478_v40 = vor.u32 %v1546_v48, %v1545_v62  ;;  %v13480_v52 = vor.u32 %v1549_v37, %v1548_v12  ;;  %v1442_v51 = vadd.s32 %v1440_v47, %v1438_v4  ;;  %v1454_v11 = vshrl.u32 %v13383_v14, 16 }
 0x227   :  { %v1464_v53 = vadd.s32 %v1462_v57, %v1460_v26  ;;  %v1556_v33 = vor.u32 %v1555_v44, %v1554_v15  ;;  %vm1323_vm4 = vcmp.lt.s32.totalorder %v13452_v23, 0  ;;  %v1324_v13 = vsub.s32 0, %v13452_v23 }
 0x228   :  { %v13485_v7 = vor.u32 %v1552_v34, %v1551_v49  ;;  %vm1560_vm8 = vcmp.lt.s32.totalorder %v13465_v22, 1  ;;  %v1411_v46 = vsel %vm1409_vm11, %v13307_v25, 2102212464  ;;  %v1559_v56 = vor.u32 %v1558_v17, %v1557_v9 }
 0x229   :  { %vm1562_vm3 = vcmp.lt.s32.totalorder %v13465_v22, 3  ;;  %vm1563_vm9 = vcmp.lt.s32.totalorder %v13465_v22, 4  ;;  %v1434_v14 = vshrl.u32 %v13399_v1, 16  ;;  %vm1561_vm10 = vcmp.lt.s32.totalorder %v13465_v22, 2 }
 0x22a   :  { %v1568_v4 = vsel %vm1560_vm8, %v13478_v40, %v13480_v52  ;;  %v13499_v47 = vshll.u32 %v1536_v58, 8  ;;  %vm750_vm14 = vcmp.eq.s32.totalorder %v13386_v27, 0  ;;  %vm753_vm11 = vcmp.eq.s32.totalorder %v13386_v27, 2  ;;  %v18905_v27 = vld [vmem:[#allocation54_spill] sm:$0xff] }
 0x22b   :  { %v1443_v17 = vadd.s32 %v1442_v51, %v1432_v54  ;;  %v1456_v25 = vshrl.u32 %v13402_v5, 16  ;;  %v1465_v9 = vadd.s32 %v1464_v53, %v1454_v11  ;;  %v1569_v1 = vsel %vm1563_vm9, %v1556_v33, 920167782 }
 0x22c   :  { %v1177_v26 = vshll.u32 %v13284_v8, %v13432_v19  ;;  %v1178_v62 = vshrl.u32 %v1160_v30, %v1176_v31  ;;  %v1570_v58 = vsel %vm1562_vm3, %v13485_v7, %v1569_v1  ;;  %v1572_v12 = vsel %vm1560_vm8, %v13480_v52, %v13485_v7 }
 0x22d   :  { %v1182_v51 = vshll.u32 %v1181_v60, 23  ;;  %v1410_v53 = vsel %vm1406_vm1, %v1390_v28, %v13292_v55  ;;  %v1571_v11 = vsel %vm1561_vm10, %v1568_v4, %v1570_v58  ;;  %v1573_v8 = vsel %vm1563_vm9, %v1559_v56, 1326507024 }
 0x22e   :  { %v1325_v19 = vsel %vm1323_vm4, %v1324_v13, %v13452_v23  ;;  %v1412_v30 = vsel %vm1408_vm15, %v13294_v20, %v1411_v46  ;;  %v1574_v60 = vsel %vm1562_vm3, %v1556_v33, %v1573_v8  ;;  %v1577_v31 = vand.u32 65535, %v13499_v47 }
 0x22f   :  { %v13531_v28 = vadd.s32 %v1443_v17, %v1434_v14  ;;  %v18868_v55 = vshll.u32 %v13402_v5, 16  ;;  %v1466_v48 = vadd.s32 %v1465_v9, %v1456_v25  ;;  %v1575_v37 = vsel %vm1561_vm10, %v1572_v12, %v1574_v60 }
 0x230   :  { %v1578_v15 = vshrl.u32 %v13499_v47, 16  ;;  %v1579_v49 = vand.u32 65535, %v1575_v37  ;;  %v1580_v20 = vshrl.u32 %v1575_v37, 16  ;;  %v1602_v34 = vshrl.u32 %v1571_v11, 16 }
 0x231   :  { %v13536_v57 = vadd.s32 %v13428_v18, %v18868_v55  ;;  %v888_v44 = vadd.f32 0.041655596, %v13421_v45  ;;  %v1179_v54 = vor.u32 %v1178_v62, %v1177_v26  ;;  %v1183_v33 = vor.u32 4788187, %v1182_v51 }
 0x232   :  { %v1326_v13 = vclz %v1325_v19  ;;  %v18438_v46 = vxor.u32 2147483648, %v13406_v32  ;;  %v896_v5 = vmul.f32 %v13435_v41, %v13397_v35  ;;  %v13545_v18 = vmul.u32 %v1580_v20, %v1577_v31 }
 0x233   :  { %v1601_v56 = vand.u32 65535, %v1571_v11  ;;  %v13549_v14 = vmul.f32 %v13440_v36, %v13440_v36  ;;  %v1413_v4 = vsel %vm1407_vm13, %v1410_v53, %v1412_v30  ;;  %vm1469_vm1 = vc.u32 %v13531_v28, %v13536_v57 }
 0x234   :  { %v1470_v45 = vadd.s32 1, %v1466_v48  ;;  %v1581_v17 = vmul.u32 %v1579_v49, %v1577_v31  ;;  %v13555_v25 = vmul.u32 %v1579_v49, %v1578_v15  ;;  %v1585_v9 = vshll.u32 %v13545_v18, 16 }
 0x235   :  { %v13558_v41 = vmul.u32 %v1602_v34, %v1577_v31  ;;  %v889_v1 = vmul.f32 %v888_v44, %v13397_v35  ;;  %v1184_v26 = vand.u32 2147483647, %v1183_v33  ;;  %v1186_v62 = vcvt.s32.f32 %v1179_v54 }
 0x236   :  { %v11013_v58 = vadd.s32 4294967294, %v1326_v13  ;;  %v13566_v29 = vsel %vm750_vm14, %v13389_v10, %v18438_v46  ;;  %v18870_v12 = vxor.u32 2147483648, %v13389_v10  ;;  %v897_v53 = vadd.f32 -0.16666654, %v896_v5 }
 0x237   :  { %18869 = vst [vmem:[#allocation77_spill] sm:$0xff] %v13566_v29  ;;  %v13575_v11 = vmul.u32 %v1601_v56, %v1578_v15  ;;  %v1048_v8 = vmul.f32 -0.00019511016, %v13549_v14  ;;  %v1467_v19 = vmul.u32 %v13328_v6, %v1413_v4  ;;  %v1471_v30 = vsel %vm1469_vm1, %v1470_v45, %v1466_v48 }
 0x238   :  { %v13573_v51 = vsel %vm753_vm11, %v18870_v12, %v13406_v32  ;;  %v1603_v60 = vmul.u32 %v1601_v56, %v1577_v31  ;;  %v1587_v55 = vshll.u32 %v13555_v25, 16  ;;  %vm1589_vm15 = vc.u32 %v1581_v17, %v1585_v9 }
 0x239   :  { %18871 = vst [vmem:[#allocation78_spill] sm:$0xff] %v13573_v51  ;;  %v1591_v37 = vadd.s32 %v1585_v9, %v1581_v17  ;;  %v1607_v49 = vshll.u32 %v13558_v41, 16  ;;  %v890_v44 = vadd.f32 -0.4999988, %v889_v1  ;;  %v1036_v54 = vsub.s32 4, %v13032_v21 }
 0x23a   :  { %v1187_v33 = vmul.f32 %v1186_v62, %v1184_v26  ;;  %vm11014_vm13 = vcmp.lt.s32.totalorder %v11013_v58, 0  ;;  %v898_v13 = vmul.f32 %v897_v53, %v13397_v35  ;;  %v1584_v5 = vmul.u32 %v1580_v20, %v1578_v15  ;;  %v18872_v26 = vld [vmem:[#allocation62_spill] sm:$0xff] }
 0x23b   :  { %v1606_v6 = vmul.u32 %v1602_v34, %v1578_v15  ;;  %v1609_v4 = vshll.u32 %v13575_v11, 16  ;;  %v1041_v48 = vmul.f32 -0.001358992, %v13549_v14  ;;  %v1049_v31 = vadd.f32 0.008332121, %v1048_v8 }
 0x23c   :  { %v13588_v56 = vadd.s32 %v1471_v30, %v1467_v19  ;;  %v1590_v45 = vsel %vm1589_vm15, 1, %v18790_v43  ;;  %v13591_v17 = vsel %vm11014_vm13, 0, %v11013_v58  ;;  %vm1593_vm5 = vc.u32 %v1591_v37, %v1587_v55 }
 0x23d   :  { %vm1611_vm0 = vc.u32 %v1603_v60, %v1607_v49  ;;  %v1613_v9 = vadd.s32 %v1607_v49, %v1603_v60  ;;  %v891_v1 = vmul.f32 %v890_v44, %v13397_v35  ;;  %v13597_v15 = vsel %vm914_vm2, %v1036_v54, %v13032_v21 }
 0x23e   :  { %v1188_v20 = vxor.u32 2147483648, %v1187_v33  ;;  %v1612_v34 = vsel %vm1611_vm0, 1, %v18790_v43  ;;  %vm1068_vm12 = vcmp.lt.s32.totalorder %v18872_v26, 0  ;;  %v1592_v62 = vadd.s32 %v1590_v45, %v1584_v5 }
 0x23f   :  { %v1614_v12 = vadd.s32 %v1612_v34, %v1606_v6  ;;  %vm1615_vm7 = vc.u32 %v1613_v9, %v1609_v4  ;;  %v1334_v58 = vsub.s32 4294967266, %v13591_v17  ;;  %v1473_v53 = vadd.s32 536870912, %v13588_v56 }
 0x240   :  { %v1594_v35 = vsel %vm1593_vm5, 1, %v18790_v43  ;;  %v1616_v8 = vsel %vm1615_vm7, 1, %v18790_v43  ;;  %v899_v21 = vadd.f32 1.0, %v898_v13  ;;  %v1042_v19 = vadd.f32 0.041655596, %v1041_v48 }
 0x241   :  { %v1050_v30 = vmul.f32 %v1049_v31, %v13549_v14  ;;  %v18873_v60 = vand.u32 2147483647, %v18872_v26  ;;  %vm904_vm4 = vcmp.eq.s32.totalorder %v13409_v39, 0  ;;  %vm907_vm14 = vcmp.eq.s32.totalorder %v13409_v39, 2 }
 0x242   :  { %v1189_v37 = vsel %vm1068_vm12, %v1188_v20, %v1187_v33  ;;  %v1608_v49 = vshrl.u32 %v13558_v41, 16  ;;  %v1618_v44 = vadd.s32 %v1616_v8, %v1614_v12  ;;  %v1685_v54 = vand.u32 2139095040, %v13123_v42 }
 0x243   :  { %vm13610_vm2 = vcmp.le.f32.partialorder %v18873_v60, 0.7853982  ;;  %v1314_v13 = vadd.s32 %v13304_v59, %v13299_v0  ;;  %v1330_v5 = vsub.s32 32, %v13591_v17  ;;  %v1586_v6 = vshrl.u32 %v13545_v18, 16 }
 0x244   :  { %v1596_v48 = vadd.s32 %v1594_v35, %v1592_v62  ;;  %v13624_v31 = vadd.f32 1.0, %v891_v1  ;;  %v1335_v45 = vadd.s32 127, %v1334_v58  ;;  %v13626_v34 = vshrl.u32 %v1473_v53, 30 }
 0x245   :  { %v1686_v60 = vshrl.u32 %v1685_v54, 23  ;;  %v13629_v33 = vmul.f32 %v899_v21, %v13377_v63  ;;  %v1043_v41 = vmul.f32 %v1042_v19, %v13549_v14  ;;  %v1051_v20 = vadd.f32 -0.16666654, %v1050_v30 }
 0x246   :  { %18876 = vst [vmem:[#allocation79_spill] sm:$0xff] %v13624_v31  ;;  %v13635_v0 = vsel %vm13610_vm2, %v18872_v26, %v1189_v37  ;;  %v1544_v59 = vshrl.u32 %v18773_v50, %v13449_v3  ;;  %v1610_v18 = vshrl.u32 %v13575_v11, 16  ;;  %v1619_v1 = vadd.s32 %v1618_v44, %v1608_v49 }
 0x247   :  { %18877 = vst [vmem:[#allocation80_spill] sm:$0xff] %v13629_v33  ;;  %v11021_v62 = vadd.s32 4294967169, %v1686_v60  ;;  %v1331_v12 = vshll.u32 %v13452_v23, %v13591_v17  ;;  %v1332_v63 = vshrl.u32 %v1314_v13, %v1330_v5  ;;  %v1588_v58 = vshrl.u32 %v13555_v25, 16 }
 0x248   :  { %v1597_v53 = vadd.s32 %v1596_v48, %v1586_v6  ;;  %v1336_v35 = vshll.u32 %v1335_v45, 23  ;;  %v1475_v8 = vshll.u32 %v13626_v34, 30  ;;  %v1565_v21 = vsel %vm1563_vm9, %v13485_v7, 2102212464 }
 0x249   :  { %v1692_v19 = vadd.s32 1, %v11021_v62  ;;  %v18437_v3 = vxor.u32 2147483648, %v13629_v33  ;;  %v18436_v30 = vxor.u32 2147483648, %v13624_v31  ;;  %v1044_v37 = vadd.f32 -0.4999988, %v1043_v41 }
 0x24a   :  { %v1052_v49 = vmul.f32 %v1051_v20, %v13549_v14  ;;  %v13652_v23 = vmul.f32 %v13635_v0, %v13635_v0  ;;  %v1564_v25 = vsel %vm1560_vm8, %v1544_v59, %v13478_v40  ;;  %v1620_v17 = vadd.s32 %v1619_v1, %v1610_v18 }
 0x24b   :  { %vm1693_vm11 = vcmp.gt.s32.totalorder %v1692_v19, 0  ;;  %v1566_v7 = vsel %vm1562_vm3, %v13480_v52, %v1565_v21  ;;  %v13660_v44 = vadd.s32 %v1597_v53, %v1588_v58  ;;  %v13664_v54 = vadd.s32 %v1613_v9, %v1609_v4 }
 0x24c   :  { %v1694_v13 = vsel %vm1693_vm11, %v1692_v19, 0  ;;  %v1333_v5 = vor.u32 %v1332_v63, %v1331_v12  ;;  %v1337_v6 = vor.u32 4788187, %v1336_v35  ;;  %v13667_v48 = vsub.s32 %v13588_v56, %v1475_v8 }
 0x24d   :  { %v1696_v45 = vand.u32 31, %v1694_v13  ;;  %v13674_v40 = vsel %vm904_vm4, %v13624_v31, %v18437_v3  ;;  %v13681_v52 = vsel %vm907_vm14, %v18436_v30, %v13629_v33  ;;  %v13686_v11 = vsel %vm13413_vm6, 0, %v13597_v15 }
 0x24e   :  { %18878 = vst [vmem:[#allocation81_spill] sm:$0xff] %v13674_v40  ;;  %v18439_v4 = vand.u32 2147483647, %v13123_v42  ;;  %v13690_v56 = vand.u32 3, %v13686_v11  ;;  %v1567_v9 = vsel %vm1561_vm10, %v1564_v25, %v1566_v7  ;;  %v1624_v60 = vadd.s32 1, %v1620_v17 }
 0x24f   :  { %18879 = vst [vmem:[#allocation82_spill] sm:$0xff] %v13681_v52  ;;  %v13694_v41 = vsub.s32 32, %v1696_v45  ;;  %v1045_v20 = vmul.f32 %v1044_v37, %v13549_v14  ;;  %v1053_v59 = vadd.f32 1.0, %v1052_v49  ;;  %v1190_v18 = vsub.s32 4, %v13246_v61  ;;  %v18882_v14 = vld [vmem:[#allocation55_spill] sm:$0xff] }
 0x250   :  { %18880 = vst [vmem:[#allocation83_spill] sm:$0xff] %v13686_v11  ;;  %vm1623_vm6 = vc.u32 %v13660_v44, %v13664_v54  ;;  %v1202_v2 = vmul.f32 -0.00019511016, %v13652_v23  ;;  %v1338_v15 = vand.u32 2147483647, %v1337_v6  ;;  %v1340_v1 = vcvt.s32.f32 %v1333_v5 }
 0x251   :  { %18881 = vst [vmem:[#allocation84_spill] sm:$0xff] %v13690_v56  ;;  %vm1477_vm8 = vcmp.lt.s32.totalorder %v13667_v48, 0  ;;  %v1478_v22 = vsub.s32 0, %v13667_v48  ;;  %v1621_v62 = vmul.u32 %v13499_v47, %v1567_v9  ;;  %v1689_v12 = vand.u32 8388607, %v18439_v4  ;;  %v18888_v9 = vld [vmem:[#allocation66_spill] sm:$0xff] }
 0x252   :  { %v1839_v63 = vand.u32 2139095040, %v18882_v14  ;;  %vm1061_vm3 = vcmp.eq.s32.totalorder %v13690_v56, 2  ;;  %v1625_v58 = vsel %vm1623_vm6, %v1624_v60, %v1620_v17  ;;  %v1699_v53 = vshll.u32 %v18773_v50, %v1696_v45 }
 0x253   :  { %v18883_v35 = vmov 2475754826   ;;  %vm1058_vm9 = vcmp.eq.s32.totalorder %v13690_v56, 0  ;;  %v18884_v19 = vmov 2131351028   ;;  %v13719_v17 = vadd.f32 1.0, %v1045_v20 }
 0x254   :  { %v1700_v8 = vshrl.u32 %v18883_v35, %v13694_v41  ;;  %v1702_v21 = vshll.u32 %v18883_v35, %v1696_v45  ;;  %v1703_v47 = vshrl.u32 %v18884_v19, %v13694_v41  ;;  %v1705_v37 = vshll.u32 %v18884_v19, %v1696_v45 }
 0x255   :  { %v18885_v49 = vmov 2102212464   ;;  %18886 = vst [vmem:[#allocation85_spill] sm:$0xff] %v13719_v17  ;;  %v13722_v5 = vmul.f32 %v1053_v59, %v13440_v36  ;;  %v1195_v6 = vmul.f32 -0.001358992, %v13652_v23  ;;  %vm1222_vm10 = vcmp.lt.s32.totalorder %v18888_v9, 0 }
 0x256   :  { %v1706_v25 = vshrl.u32 %v18885_v49, %v13694_v41  ;;  %v1708_v7 = vshll.u32 %v18885_v49, %v1696_v45  ;;  %v13726_v60 = vshrl.u32 %v1694_v13, 5  ;;  %v1203_v30 = vadd.f32 0.008332121, %v1202_v2 }
 0x257   :  { %18887 = vst [vmem:[#allocation86_spill] sm:$0xff] %v13722_v5  ;;  %v1341_v3 = vmul.f32 %v1340_v1, %v1338_v15  ;;  %v1479_v46 = vsel %vm1477_vm8, %v1478_v22, %v13667_v48  ;;  %v1709_v4 = vshrl.u32 %v18810_v16, %v13694_v41  ;;  %v13733_v20 = vadd.s32 %v1625_v58, %v1621_v62 }
 0x258   :  { %v1690_v31 = vor.u32 8388608, %v1689_v12  ;;  %v13735_v36 = vor.u32 %v1700_v8, %v1699_v53  ;;  %v1840_v59 = vshrl.u32 %v1839_v63, 23  ;;  %v13737_v33 = vor.u32 %v1703_v47, %v1702_v21 }
 0x259   :  { %v13739_v10 = vor.u32 %v1706_v25, %v1705_v37  ;;  %v1710_v13 = vor.u32 %v1709_v4, %v1708_v7  ;;  %v1711_v2 = vshll.u32 %v18810_v16, %v1696_v45  ;;  %v1712_v15 = vshrl.u32 %v18811_v38, %v13694_v41 }
 0x25a   :  { %vm1714_vm1 = vcmp.lt.s32.totalorder %v13726_v60, 1  ;;  %vm1716_vm15 = vcmp.lt.s32.totalorder %v13726_v60, 3  ;;  %vm1717_vm13 = vcmp.lt.s32.totalorder %v13726_v60, 4  ;;  %v1191_v1 = vsel %vm1068_vm12, %v1190_v18, %v13246_v61 }
 0x25b   :  { %v1196_v22 = vadd.f32 0.041655596, %v1195_v6  ;;  %v1204_v62 = vmul.f32 %v1203_v30, %v13652_v23  ;;  %v1723_v4 = vsel %vm1717_vm13, %v1710_v13, 920167782  ;;  %v18446_v45 = vxor.u32 2147483648, %v13719_v17 }
 0x25c   :  { %v1342_v12 = vxor.u32 2147483648, %v1341_v3  ;;  %v1480_v63 = vclz %v1479_v46  ;;  %v11024_v58 = vadd.s32 4294967169, %v1840_v59  ;;  %v1627_v53 = vadd.s32 536870912, %v13733_v20 }
 0x25d   :  { %vm1715_vm5 = vcmp.lt.s32.totalorder %v13726_v60, 2  ;;  %v1722_v61 = vsel %vm1714_vm1, %v13735_v36, %v13737_v33  ;;  %v1724_v30 = vsel %vm1716_vm15, %v13739_v10, %v1723_v4  ;;  %v18447_v18 = vxor.u32 2147483648, %v13722_v5 }
 0x25e   :  { %v18889_v8 = vand.u32 2147483647, %v18888_v9  ;;  %v1713_v21 = vor.u32 %v1712_v15, %v1711_v2  ;;  %v13770_v47 = vshll.u32 %v1690_v31, 8  ;;  %v13777_v37 = vsel %vm1061_vm3, %v18446_v45, %v13722_v5 }
 0x25f   :  { %18892 = vst [vmem:[#allocation87_spill] sm:$0xff] %v13777_v37  ;;  %v13781_v25 = vsel %vm13610_vm2, 0, %v1191_v1  ;;  %v1197_v7 = vmul.f32 %v1196_v22, %v13652_v23  ;;  %v1205_v6 = vadd.f32 -0.16666654, %v1204_v62  ;;  %v13789_v31 = vsel %vm1058_vm9, %v13719_v17, %v18447_v18 }
 0x260   :  { %vm13766_vm0 = vcmp.le.f32.partialorder %v18889_v8, 0.7853982  ;;  %18893 = vst [vmem:[#allocation88_spill] sm:$0xff] %v13781_v25  ;;  %v11016_v59 = vadd.s32 4294967294, %v1480_v63  ;;  %v1725_v2 = vsel %vm1715_vm5, %v1722_v61, %v1724_v30  ;;  %v1732_v15 = vshrl.u32 %v13770_v47, 16 }
 0x261   :  { %18894 = vst [vmem:[#allocation89_spill] sm:$0xff] %v13789_v31  ;;  %v13795_v55 = vand.u32 3, %v13781_v25  ;;  %v1343_v1 = vsel %vm1222_vm10, %v1342_v12, %v1341_v3  ;;  %v13799_v22 = vshrl.u32 %v1627_v53, 30  ;;  %v1846_v62 = vadd.s32 1, %v11024_v58 }
 0x262   :  { %v1726_v4 = vsel %vm1714_vm1, %v13737_v33, %v13739_v10  ;;  %v1727_v63 = vsel %vm1717_vm13, %v1713_v21, 1326507024  ;;  %v1731_v61 = vand.u32 65535, %v13770_v47  ;;  %v1755_v30 = vand.u32 65535, %v1725_v2 }
 0x263   :  { %v13808_v8 = vadd.f32 -0.4999988, %v1197_v7  ;;  %v13811_v45 = vmul.f32 %v1205_v6, %v13652_v23  ;;  %v1728_v3 = vsel %vm1716_vm15, %v1710_v13, %v1727_v63  ;;  %v1756_v12 = vshrl.u32 %v1725_v2, 16 }
 0x264   :  { %v13818_v58 = vsel %vm13766_vm0, %v18888_v9, %v1343_v1  ;;  %vm11017_vm12 = vcmp.lt.s32.totalorder %v11016_v59, 0  ;;  %v1729_v53 = vsel %vm1715_vm5, %v1726_v4, %v1728_v3  ;;  %v1759_v21 = vmul.u32 %v1755_v30, %v1732_v15 }
 0x265   :  { %v1629_v7 = vshll.u32 %v13799_v22, 30  ;;  %v1733_v18 = vand.u32 65535, %v1729_v53  ;;  %v1734_v17 = vshrl.u32 %v1729_v53, 16  ;;  %vm1847_vm7 = vcmp.gt.s32.totalorder %v1846_v62, 0 }
 0x266   :  { %v13825_v6 = vadd.s32 %v13536_v57, %v13531_v28  ;;  %v1698_v13 = vshrl.u32 %v18773_v50, %v13694_v41  ;;  %v1757_v2 = vmul.u32 %v1755_v30, %v1731_v61  ;;  %v1758_v1 = vmul.u32 %v1756_v12, %v1731_v61 }
 0x267   :  { %v13829_v63 = vsel %vm11017_vm12, 0, %v11016_v59  ;;  %v1735_v5 = vmul.u32 %v1733_v18, %v1731_v61  ;;  %v1736_v32 = vmul.u32 %v1734_v17, %v1731_v61  ;;  %v1737_v4 = vmul.u32 %v1733_v18, %v1732_v15 }
 0x268   :  { %v1760_v3 = vmul.u32 %v1756_v12, %v1732_v15  ;;  %v1761_v25 = vshll.u32 %v1758_v1, 16  ;;  %v1763_v11 = vshll.u32 %v1759_v21, 16  ;;  %v1848_v29 = vsel %vm1847_vm7, %v1846_v62, 0 }
 0x269   :  { %v13832_v53 = vsub.s32 %v13733_v20, %v1629_v7  ;;  %v1738_v51 = vmul.u32 %v1734_v17, %v1732_v15  ;;  %v1739_v28 = vshll.u32 %v1736_v32, 16  ;;  %v1741_v57 = vshll.u32 %v1737_v4, 16 }
 0x26a   :  { %v1718_v41 = vsel %vm1714_vm1, %v1698_v13, %v13735_v36  ;;  %v1719_v59 = vsel %vm1717_vm13, %v13739_v10, 2102212464  ;;  %vm1765_vm2 = vc.u32 %v1757_v2, %v1761_v25  ;;  %v1767_v18 = vadd.s32 %v1761_v25, %v1757_v2 }
 0x26b   :  { %vm1743_vm4 = vc.u32 %v1735_v5, %v1739_v28  ;;  %v1745_v61 = vadd.s32 %v1739_v28, %v1735_v5  ;;  %v1766_v62 = vsel %vm1765_vm2, 1, %v18790_v43  ;;  %v1850_v30 = vand.u32 31, %v1848_v29 }
 0x26c   :  { %v1744_v20 = vsel %vm1743_vm4, 1, %v18790_v43  ;;  %v1762_v17 = vshrl.u32 %v1758_v1, 16  ;;  %v1768_v15 = vadd.s32 %v1766_v62, %v1760_v3  ;;  %vm1769_vm14 = vc.u32 %v1767_v18, %v1763_v11 }
 0x26d   :  { %v1740_v12 = vshrl.u32 %v1736_v32, 16  ;;  %v1746_v7 = vadd.s32 %v1744_v20, %v1738_v51  ;;  %vm1747_vm11 = vc.u32 %v1745_v61, %v1741_v57  ;;  %v1770_v36 = vsel %vm1769_vm14, 1, %v18790_v43 }
 0x26e   :  { %v1720_v10 = vsel %vm1716_vm15, %v13737_v33, %v1719_v59  ;;  %v1748_v25 = vsel %vm1747_vm11, 1, %v18790_v43  ;;  %v1764_v5 = vshrl.u32 %v1759_v21, 16  ;;  %v1772_v13 = vadd.s32 %v1770_v36, %v1768_v15 }
 0x26f   :  { %v1484_v2 = vsub.s32 32, %v13829_v63  ;;  %v1742_v28 = vshrl.u32 %v1737_v4, 16  ;;  %v1750_v24 = vadd.s32 %v1748_v25, %v1746_v7  ;;  %v13848_v1 = vsub.s32 32, %v1850_v30 }
 0x270   :  { %v1488_v32 = vsub.s32 4294967266, %v13829_v63  ;;  %vm1631_vm6 = vcmp.lt.s32.totalorder %v13832_v53, 0  ;;  %v1773_v51 = vadd.s32 %v1772_v13, %v1762_v17  ;;  %v18457_v3 = vand.u32 2147483647, %v18882_v14 }
 0x271   :  { %v1632_v57 = vsub.s32 0, %v13832_v53  ;;  %v1721_v33 = vsel %vm1715_vm5, %v1718_v41, %v1720_v10  ;;  %v1751_v21 = vadd.s32 %v1750_v24, %v1740_v12  ;;  %v13856_v59 = vadd.s32 %v1767_v18, %v1763_v11 }
 0x272   :  { %v1774_v61 = vadd.s32 %v1773_v51, %v1764_v5  ;;  %v13858_v4 = vshrl.u32 %v1848_v29, 5  ;;  %v1853_v62 = vshll.u32 %v18773_v50, %v1850_v30  ;;  %v1856_v20 = vshll.u32 %v18883_v35, %v1850_v30 }
 0x273   :  { %v13862_v15 = vadd.s32 %v1751_v21, %v1742_v28  ;;  %v1854_v17 = vshrl.u32 %v18883_v35, %v13848_v1  ;;  %v1857_v7 = vshrl.u32 %v18884_v19, %v13848_v1  ;;  %v1862_v60 = vshll.u32 %v18885_v49, %v1850_v30 }
 0x274   :  { %v1778_v24 = vadd.s32 1, %v1774_v61  ;;  %v1859_v11 = vshll.u32 %v18884_v19, %v1850_v30  ;;  %v1860_v29 = vshrl.u32 %v18885_v49, %v13848_v1  ;;  %v1863_v41 = vshrl.u32 %v18810_v16, %v13848_v1 }
 0x275   :  { %v13876_v18 = vmul.f32 %v13818_v58, %v13818_v58  ;;  %v1485_v12 = vshll.u32 %v13667_v48, %v13829_v63  ;;  %vm1777_vm8 = vc.u32 %v13862_v15, %v13856_v59  ;;  %v1865_v36 = vshll.u32 %v18810_v16, %v1850_v30 }
 0x276   :  { %v1489_v10 = vadd.s32 127, %v1488_v32  ;;  %v1633_v25 = vsel %vm1631_vm6, %v1632_v57, %v13832_v53  ;;  %v1843_v5 = vand.u32 8388607, %v18457_v3  ;;  %v1864_v13 = vor.u32 %v1863_v41, %v1862_v60 }
 0x277   :  { %v1486_v28 = vshrl.u32 %v13825_v6, %v1484_v2  ;;  %v1775_v51 = vmul.u32 %v13770_v47, %v1721_v33  ;;  %v13890_v21 = vor.u32 %v1854_v17, %v1853_v62  ;;  %v1866_v48 = vshrl.u32 %v18811_v38, %v13848_v1  ;;  %v18895_v6 = vld [vmem:[#allocation76_spill] sm:$0xff] }
 0x278   :  { %v1779_v63 = vsel %vm1777_vm8, %v1778_v24, %v1774_v61  ;;  %v13894_v30 = vor.u32 %v1857_v7, %v1856_v20  ;;  %v13896_v32 = vor.u32 %v1860_v29, %v1859_v11  ;;  %vm1871_vm3 = vcmp.lt.s32.totalorder %v13858_v4, 4 }
 0x279   :  { %v1634_v57 = vclz %v1633_v25  ;;  %v1867_v31 = vor.u32 %v1866_v48, %v1865_v36  ;;  %vm1868_vm9 = vcmp.lt.s32.totalorder %v13858_v4, 1  ;;  %vm1870_vm1 = vcmp.lt.s32.totalorder %v13858_v4, 3 }
 0x27a   :  { %v1344_v47 = vsub.s32 4, %v18895_v6  ;;  %v1490_v2 = vshll.u32 %v1489_v10, 23  ;;  %v1844_v33 = vor.u32 8388608, %v1843_v5  ;;  %v1877_v62 = vsel %vm1871_vm3, %v1864_v13, 920167782 }
 0x27b   :  { %v1199_v61 = vmul.f32 %v13808_v8, %v13652_v23  ;;  %v1349_v20 = vmul.f32 -0.001358992, %v13876_v18  ;;  %v1356_v17 = vmul.f32 -0.00019511016, %v13876_v18  ;;  %v13908_v7 = vadd.s32 %v1779_v63, %v1775_v51 }
 0x27c   :  { %vm1869_vm15 = vcmp.lt.s32.totalorder %v13858_v4, 2  ;;  %v1876_v60 = vsel %vm1868_vm9, %v13890_v21, %v13894_v30  ;;  %v1878_v24 = vsel %vm1870_vm1, %v13896_v32, %v1877_v62  ;;  %v1881_v23 = vsel %vm1871_vm3, %v1867_v31, 1326507024 }
 0x27d   :  { %v1207_v8 = vadd.f32 1.0, %v13811_v45  ;;  %v1487_v11 = vor.u32 %v1486_v28, %v1485_v12  ;;  %v11019_v29 = vadd.s32 4294967294, %v1634_v57  ;;  %v1880_v41 = vsel %vm1868_vm9, %v13894_v30, %v13896_v32 }
 0x27e   :  { %v1345_v36 = vsel %vm1222_vm10, %v1344_v47, %v18895_v6  ;;  %v1491_v10 = vor.u32 4788187, %v1490_v2  ;;  %v1882_v25 = vsel %vm1870_vm1, %v1864_v13, %v1881_v23  ;;  %v13930_v5 = vshll.u32 %v1844_v33, 8 }
 0x27f   :  { %v13932_v31 = vadd.f32 1.0, %v1199_v61  ;;  %v1350_v45 = vadd.f32 0.041655596, %v1349_v20  ;;  %v1357_v12 = vadd.f32 0.008332121, %v1356_v17  ;;  %v1879_v28 = vsel %vm1869_vm15, %v1876_v60, %v1878_v24 }
 0x280   :  { %v1781_v51 = vadd.s32 536870912, %v13908_v7  ;;  %v1883_v48 = vsel %vm1869_vm15, %v1880_v41, %v1882_v25  ;;  %v1885_v63 = vand.u32 65535, %v13930_v5  ;;  %v1886_v57 = vshrl.u32 %v13930_v5, 16  ;;  %v18899_v41 = vld [vmem:[#allocation63_spill] sm:$0xff] }
 0x281   :  { %18896 = vst [vmem:[#allocation76_spill] sm:$0xff] %v13932_v31  ;;  %v13942_v13 = vmul.f32 %v1207_v8, %v13635_v0  ;;  %vm1212_vm10 = vcmp.eq.s32.totalorder %v13795_v55, 0  ;;  %v1494_v6 = vcvt.s32.f32 %v1487_v11  ;;  %vm11020_vm13 = vcmp.lt.s32.totalorder %v11019_v29, 0 }
 0x282   :  { %v1887_v47 = vand.u32 65535, %v1883_v48  ;;  %v1492_v2 = vand.u32 2147483647, %v1491_v10  ;;  %v1888_v33 = vshrl.u32 %v1883_v48, 16  ;;  %v1909_v62 = vand.u32 65535, %v1879_v28 }
 0x283   :  { %18897 = vst [vmem:[#allocation90_spill] sm:$0xff] %v13942_v13  ;;  %v1910_v61 = vshrl.u32 %v1879_v28, 16  ;;  %vm1215_vm5 = vcmp.eq.s32.totalorder %v13795_v55, 2  ;;  %v1351_v20 = vmul.f32 %v1350_v45, %v13876_v18  ;;  %v1358_v17 = vmul.f32 %v1357_v12, %v13876_v18 }
 0x284   :  { %v13948_v60 = vmul.u32 %v1887_v47, %v1886_v57  ;;  %v13950_v24 = vsel %vm11020_vm13, 0, %v11019_v29  ;;  %v13952_v0 = vshrl.u32 %v1781_v51, 30  ;;  %v1889_v23 = vmul.u32 %v1887_v47, %v1885_v63 }
 0x285   :  { %v13954_v8 = vmul.u32 %v1888_v33, %v1885_v63  ;;  %v13958_v11 = vsel %vm13766_vm0, 0, %v1345_v36  ;;  %vm1376_vm12 = vcmp.lt.s32.totalorder %v18899_v41, 0  ;;  %v1911_v10 = vmul.u32 %v1909_v62, %v1885_v63 }
 0x286   :  { %18898 = vst [vmem:[#allocation91_spill] sm:$0xff] %v13958_v11  ;;  %v13961_v25 = vmul.u32 %v1910_v61, %v1885_v63  ;;  %v1495_v29 = vmul.f32 %v1494_v6, %v1492_v2  ;;  %vm1211_vm7 = vcmp.lt.s32.totalorder %v13795_v55, 2  ;;  %v1642_v51 = vsub.s32 4294967266, %v13950_v24 }
 0x287   :  { %v1893_v28 = vshll.u32 %v13954_v8, 16  ;;  %v1895_v46 = vshll.u32 %v13948_v60, 16  ;;  %v13969_v36 = vmul.u32 %v1909_v62, %v1886_v57  ;;  %v1352_v47 = vadd.f32 -0.4999988, %v1351_v20 }
 0x288   :  { %v1915_v48 = vshll.u32 %v13961_v25, 16  ;;  %v1359_v63 = vadd.f32 -0.16666654, %v1358_v17  ;;  %v1783_v3 = vshll.u32 %v13952_v0, 30  ;;  %v18900_v12 = vand.u32 2147483647, %v18899_v41 }
 0x289   :  { %vm1897_vm0 = vc.u32 %v1889_v23, %v1893_v28  ;;  %v1892_v2 = vmul.u32 %v1888_v33, %v1886_v57  ;;  %v1899_v45 = vadd.s32 %v1893_v28, %v1889_v23  ;;  %v1914_v37 = vmul.u32 %v1910_v61, %v1886_v57 }
 0x28a   :  { %vm13975_vm2 = vcmp.le.f32.partialorder %v18900_v12, 0.7853982  ;;  %vm1919_vm4 = vc.u32 %v1911_v10, %v1915_v48  ;;  %v1496_v40 = vxor.u32 2147483648, %v1495_v29  ;;  %v1622_v62 = vadd.s32 %v13664_v54, %v13660_v44 }
 0x28b   :  { %v1638_v20 = vsub.s32 32, %v13950_v24  ;;  %v1898_v17 = vsel %vm1897_vm0, 1, %v18790_v43  ;;  %v1643_v52 = vadd.s32 127, %v1642_v51  ;;  %vm1901_vm14 = vc.u32 %v1899_v45, %v1895_v46 }
 0x28c   :  { %v1917_v26 = vshll.u32 %v13969_v36, 16  ;;  %v1920_v12 = vsel %vm1919_vm4, 1, %v18790_v43  ;;  %v18903_v9 = vxor.u32 2147483648, %v13942_v13  ;;  %v18904_v33 = vxor.u32 2147483648, %v13932_v31 }
 0x28d   :  { %v13996_v54 = vand.u32 3, %v13958_v11  ;;  %v13999_v61 = vsub.s32 %v13908_v7, %v1783_v3  ;;  %v1353_v23 = vmul.f32 %v1352_v47, %v13876_v18  ;;  %v1900_v45 = vadd.s32 %v1898_v17, %v1892_v2 }
 0x28e   :  { %v1214_v57 = vsel %vm1212_vm10, %v13932_v31, %v18903_v9  ;;  %v1217_v44 = vsel %vm1215_vm5, %v18904_v33, %v13942_v13  ;;  %v1921_v28 = vadd.s32 %v1915_v48, %v1911_v10  ;;  %v1922_v51 = vadd.s32 %v1920_v12, %v1914_v37 }
 0x28f   :  { %v1360_v46 = vmul.f32 %v1359_v63, %v13876_v18  ;;  %v1497_v9 = vsel %vm1376_vm12, %v1496_v40, %v1495_v29  ;;  %v1902_v31 = vsel %vm1901_vm14, 1, %v18790_v43  ;;  %v1993_v33 = vand.u32 2139095040, %v18905_v27 }
 0x290   :  { %v1639_v13 = vshll.u32 %v13832_v53, %v13950_v24  ;;  %v1640_v11 = vshrl.u32 %v1622_v62, %v1638_v20  ;;  %v1644_v3 = vshll.u32 %v1643_v52, 23  ;;  %vm1923_vm11 = vc.u32 %v1921_v28, %v1917_v26 }
 0x291   :  { %vm1785_vm6 = vcmp.lt.s32.totalorder %v13999_v61, 0  ;;  %v1786_v7 = vsub.s32 0, %v13999_v61  ;;  %v1924_v37 = vsel %vm1923_vm11, 1, %v18790_v43  ;;  %v1994_v18 = vshrl.u32 %v1993_v33, 23 }
 0x292   :  { %v1894_v10 = vshrl.u32 %v13954_v8, 16  ;;  %v1904_v40 = vadd.s32 %v1902_v31, %v1900_v45  ;;  %v1916_v29 = vshrl.u32 %v13961_v25, 16  ;;  %v1926_v48 = vadd.s32 %v1924_v37, %v1922_v51 }
 0x293   :  { %v14016_v47 = vsel %vm1211_vm7, %v1214_v57, %v1217_v44  ;;  %v14018_v53 = vadd.f32 1.0, %v1353_v23  ;;  %v1361_v52 = vadd.f32 1.0, %v1360_v46  ;;  %v11027_v24 = vadd.s32 4294967169, %v1994_v18 }
 0x294   :  { %18906 = vst [vmem:[#allocation92_spill] sm:$0xff] %v14016_v47  ;;  %vm1369_vm8 = vcmp.eq.s32.totalorder %v13996_v54, 2  ;;  %v1498_v63 = vsub.s32 4, %v13626_v34  ;;  %v1641_v2 = vor.u32 %v1640_v11, %v1639_v13  ;;  %v1645_v62 = vor.u32 4788187, %v1644_v3 }
 0x295   :  { %18907 = vst [vmem:[#allocation93_spill] sm:$0xff] %v14018_v53  ;;  %v14025_v31 = vsel %vm13975_vm2, %v18899_v41, %v1497_v9  ;;  %v1787_v55 = vsel %vm1785_vm6, %v1786_v7, %v13999_v61  ;;  %v1852_v8 = vshrl.u32 %v18773_v50, %v13848_v1  ;;  %v2000_v25 = vadd.s32 1, %v11027_v24  ;;  %v18923_v41 = vld [vmem:[#allocation61_spill] sm:$0xff] }
 0x296   :  { %v1896_v20 = vshrl.u32 %v13948_v60, 16  ;;  %v1905_v17 = vadd.s32 %v1904_v40, %v1894_v10  ;;  %v1918_v12 = vshrl.u32 %v13969_v36, 16  ;;  %v1927_v13 = vadd.s32 %v1926_v48, %v1916_v29 }
 0x297   :  { %v14035_v11 = vmul.f32 %v1361_v52, %v13818_v58  ;;  %v18467_v57 = vxor.u32 2147483648, %v14018_v53  ;;  %v1873_v44 = vsel %vm1871_vm3, %v13896_v32, 2102212464  ;;  %vm2001_vm10 = vcmp.gt.s32.totalorder %v2000_v25, 0 }
 0x298   :  { %v14043_v1 = vmul.f32 %v14025_v31, %v14025_v31  ;;  %v1646_v23 = vand.u32 2147483647, %v1645_v62  ;;  %v1648_v60 = vcvt.s32.f32 %v1641_v2  ;;  %v2002_v45 = vsel %vm2001_vm10, %v2000_v25, 0 }
 0x299   :  { %18908 = vst [vmem:[#allocation94_spill] sm:$0xff] %v14035_v11  ;;  %v1788_v51 = vclz %v1787_v55  ;;  %v1872_v58 = vsel %vm1868_vm9, %v1852_v8, %v13890_v21  ;;  %v18469_v36 = vand.u32 2147483647, %v18905_v27  ;;  %v2004_v46 = vand.u32 31, %v2002_v45  ;;  %v18909_v21 = vld [vmem:[#allocation64_spill] sm:$0xff] }
 0x29a   :  { %v1874_v32 = vsel %vm1870_vm1, %v13894_v30, %v1873_v44  ;;  %v14052_v9 = vadd.s32 %v1905_v17, %v1896_v20  ;;  %v14054_v33 = vadd.s32 %v1921_v28, %v1917_v26  ;;  %v1928_v3 = vadd.s32 %v1927_v13, %v1918_v12 }
 0x29b   :  { %vm1366_vm3 = vcmp.eq.s32.totalorder %v13996_v54, 0  ;;  %v14060_v7 = vsel %vm1376_vm12, %v1498_v63, %v13626_v34  ;;  %vm1530_vm9 = vcmp.lt.s32.totalorder %v18909_v21, 0  ;;  %v14063_v37 = vsub.s32 32, %v2004_v46 }
 0x29c   :  { %v18468_v18 = vxor.u32 2147483648, %v14035_v11  ;;  %v14071_v26 = vsel %vm1369_vm8, %v18467_v57, %v14035_v11  ;;  %v1503_v30 = vmul.f32 -0.001358992, %v14043_v1  ;;  %v1510_v28 = vmul.f32 -0.00019511016, %v14043_v1 }
 0x29d   :  { %v1649_v10 = vmul.f32 %v1648_v60, %v1646_v23  ;;  %v11022_v34 = vadd.s32 4294967294, %v1788_v51  ;;  %v1875_v40 = vsel %vm1869_vm15, %v1872_v58, %v1874_v32  ;;  %v1997_v29 = vand.u32 8388607, %v18469_v36 }
 0x29e   :  { %v18910_v48 = vand.u32 2147483647, %v18909_v21  ;;  %vm1931_vm13 = vc.u32 %v14052_v9, %v14054_v33  ;;  %v1932_v24 = vadd.s32 1, %v1928_v3  ;;  %v2016_v63 = vshll.u32 %v18885_v49, %v2004_v46 }
 0x29f   :  { %v2017_v2 = vshrl.u32 %v18810_v16, %v14063_v37  ;;  %v2010_v4 = vshll.u32 %v18883_v35, %v2004_v46  ;;  %v2011_v62 = vshrl.u32 %v18884_v19, %v14063_v37  ;;  %v2013_v55 = vshll.u32 %v18884_v19, %v2004_v46 }
 0x2a0   :  { %vm14081_vm1 = vcmp.le.f32.partialorder %v18910_v48, 0.7853982  ;;  %v2014_v8 = vshrl.u32 %v18885_v49, %v14063_v37  ;;  %v14096_v25 = vshrl.u32 %v2002_v45, 5  ;;  %v2007_v20 = vshll.u32 %v18773_v50, %v2004_v46 }
 0x2a1   :  { %v2008_v17 = vshrl.u32 %v18883_v35, %v14063_v37  ;;  %v2019_v12 = vshll.u32 %v18810_v16, %v2004_v46  ;;  %v1368_v13 = vsel %vm1366_vm3, %v14018_v53, %v18468_v18  ;;  %v1504_v44 = vadd.f32 0.041655596, %v1503_v30 }
 0x2a2   :  { %v1650_v23 = vxor.u32 2147483648, %v1649_v10  ;;  %v1998_v60 = vor.u32 8388608, %v1997_v29  ;;  %vm1365_vm15 = vcmp.lt.s32.totalorder %v13996_v54, 2  ;;  %v1511_v45 = vadd.f32 0.008332121, %v1510_v28 }
 0x2a3   :  { %v1929_v51 = vmul.u32 %v13930_v5, %v1875_v40  ;;  %v2018_v58 = vor.u32 %v2017_v2, %v2016_v63  ;;  %v2020_v32 = vshrl.u32 %v18811_v38, %v14063_v37  ;;  %vm11023_vm5 = vcmp.lt.s32.totalorder %v11022_v34, 0  ;;  %v18913_v2 = vld [vmem:[#allocation60_spill] sm:$0xff] }
 0x2a4   :  { %v1933_v46 = vsel %vm1931_vm13, %v1932_v24, %v1928_v3  ;;  %v14114_v48 = vor.u32 %v2011_v62, %v2010_v4  ;;  %v14116_v57 = vor.u32 %v2014_v8, %v2013_v55  ;;  %v14118_v30 = vor.u32 %v2008_v17, %v2007_v20 }
 0x2a5   :  { %v2021_v29 = vor.u32 %v2020_v32, %v2019_v12  ;;  %vm2022_vm12 = vcmp.lt.s32.totalorder %v14096_v25, 1  ;;  %vm2025_vm7 = vcmp.lt.s32.totalorder %v14096_v25, 4  ;;  %v1651_v5 = vsel %vm1530_vm9, %v1650_v23, %v1649_v10 }
 0x2a6   :  { %v1652_v28 = vsub.s32 4, %v13799_v22  ;;  %vm2024_vm0 = vcmp.lt.s32.totalorder %v14096_v25, 3  ;;  %v14126_v40 = vshll.u32 %v1998_v60, 8  ;;  %v1791_v3 = vsel %vm11023_vm5, 0, %v11022_v34 }
 0x2a7   :  { %v14128_v24 = vadd.s32 %v1933_v46, %v1929_v51  ;;  %v2031_v63 = vsel %vm2025_vm7, %v2018_v58, 920167782  ;;  %v2147_v4 = vand.u32 2139095040, %v18913_v2  ;;  %v1512_v62 = vmul.f32 %v1511_v45, %v14043_v1 }
 0x2a8   :  { %v1776_v55 = vadd.s32 %v13856_v59, %v13862_v15  ;;  %vm2023_vm4 = vcmp.lt.s32.totalorder %v14096_v25, 2  ;;  %v2034_v10 = vsel %vm2022_vm12, %v14114_v48, %v14116_v57  ;;  %v1792_v34 = vsub.s32 32, %v1791_v3 }
 0x2a9   :  { %v2030_v8 = vsel %vm2022_vm12, %v14118_v30, %v14114_v48  ;;  %v2032_v20 = vsel %vm2024_vm0, %v14116_v57, %v2031_v63  ;;  %v2035_v59 = vsel %vm2025_vm7, %v2021_v29, 1326507024  ;;  %v14153_v15 = vsel %vm14081_vm1, %v18909_v21, %v1651_v5 }
 0x2aa   :  { %v1796_v17 = vsub.s32 4294967266, %v1791_v3  ;;  %v2036_v12 = vsel %vm2024_vm0, %v2018_v58, %v2035_v59  ;;  %v2039_v23 = vand.u32 65535, %v14126_v40  ;;  %v1505_v60 = vmul.f32 %v1504_v44, %v14043_v1 }
 0x2ab   :  { %v1935_v45 = vadd.s32 536870912, %v14128_v24  ;;  %v2037_v51 = vsel %vm2023_vm4, %v2034_v10, %v2036_v12  ;;  %v2148_v32 = vshrl.u32 %v2147_v4, 23  ;;  %v2033_v46 = vsel %vm2023_vm4, %v2030_v8, %v2032_v20 }
 0x2ac   :  { %v2040_v29 = vshrl.u32 %v14126_v40, 16  ;;  %v2041_v5 = vand.u32 65535, %v2037_v51  ;;  %v2042_v63 = vshrl.u32 %v2037_v51, 16  ;;  %v1513_v18 = vadd.f32 -0.16666654, %v1512_v62 }
 0x2ad   :  { %v14167_v58 = vmul.f32 %v14153_v15, %v14153_v15  ;;  %v1793_v44 = vshll.u32 %v13999_v61, %v1791_v3  ;;  %v1794_v59 = vshrl.u32 %v1776_v55, %v1792_v34  ;;  %v14173_v10 = vsel %vm1365_vm15, %v1368_v13, %v14071_v26 }
 0x2ae   :  { %18914 = vst [vmem:[#allocation95_spill] sm:$0xff] %v14173_v10  ;;  %v14178_v4 = vsel %vm13975_vm2, 0, %v14060_v7  ;;  %v1797_v8 = vadd.s32 127, %v1796_v17  ;;  %v2044_v20 = vmul.u32 %v2042_v63, %v2039_v23  ;;  %v14183_v62 = vsel %vm1530_vm9, %v1652_v28, %v13799_v22 }
 0x2af   :  { %18915 = vst [vmem:[#allocation96_spill] sm:$0xff] %v14178_v4  ;;  %v14185_v12 = vshrl.u32 %v1935_v45, 30  ;;  %v2063_v61 = vand.u32 65535, %v2033_v46  ;;  %v2064_v3 = vshrl.u32 %v2033_v46, 16  ;;  %v1506_v55 = vadd.f32 -0.4999988, %v1505_v60 }
 0x2b0   :  { %v2043_v54 = vmul.u32 %v2041_v5, %v2039_v23  ;;  %v2045_v26 = vmul.u32 %v2041_v5, %v2040_v29  ;;  %v11030_v13 = vadd.s32 4294967169, %v2148_v32  ;;  %v1514_v34 = vmul.f32 %v1513_v18, %v14043_v1 }
 0x2b1   :  { %v1657_v6 = vmul.f32 -0.001358992, %v14167_v58  ;;  %v1664_v7 = vmul.f32 -0.00019511016, %v14167_v58  ;;  %v14190_v17 = vor.u32 %v1794_v59, %v1793_v44  ;;  %v1798_v51 = vshll.u32 %v1797_v8, 23 }
 0x2b2   :  { %v2046_v36 = vmul.u32 %v2042_v63, %v2040_v29  ;;  %v2047_v22 = vshll.u32 %v2044_v20, 16  ;;  %v2049_v28 = vshll.u32 %v2045_v26, 16  ;;  %v1937_v45 = vshll.u32 %v14185_v12, 30 }
 0x2b3   :  { %v2065_v53 = vmul.u32 %v2063_v61, %v2039_v23  ;;  %v2066_v46 = vmul.u32 %v2064_v3, %v2039_v23  ;;  %v2067_v60 = vmul.u32 %v2063_v61, %v2040_v29  ;;  %v18476_v32 = vand.u32 2147483647, %v18913_v2 }
 0x2b4   :  { %vm2051_vm2 = vc.u32 %v2043_v54, %v2047_v22  ;;  %v2053_v5 = vadd.s32 %v2047_v22, %v2043_v54  ;;  %v2154_v18 = vadd.s32 1, %v11030_v13  ;;  %v2006_v11 = vshrl.u32 %v18773_v50, %v14063_v37 }
 0x2b5   :  { %v2052_v44 = vsel %vm2051_vm2, 1, %v18790_v43  ;;  %v2068_v59 = vmul.u32 %v2064_v3, %v2040_v29  ;;  %v2069_v8 = vshll.u32 %v2066_v46, 16  ;;  %v2048_v63 = vshrl.u32 %v2044_v20, 16 }
 0x2b6   :  { %v2054_v47 = vadd.s32 %v2052_v44, %v2046_v36  ;;  %vm2055_vm14 = vc.u32 %v2053_v5, %v2049_v28  ;;  %v2071_v10 = vshll.u32 %v2067_v60, 16  ;;  %v14198_v56 = vsub.s32 %v14128_v24, %v1937_v45 }
 0x2b7   :  { %v2027_v23 = vsel %vm2025_vm7, %v14116_v57, 2102212464  ;;  %v2056_v61 = vsel %vm2055_vm14, 1, %v18790_v43  ;;  %vm2073_vm11 = vc.u32 %v2065_v53, %v2069_v8  ;;  %v2075_v13 = vadd.s32 %v2069_v8, %v2065_v53 }
 0x2b8   :  { %v2058_v54 = vadd.s32 %v2056_v61, %v2054_v47  ;;  %v2074_v37 = vsel %vm2073_vm11, 1, %v18790_v43  ;;  %vm2155_vm6 = vcmp.gt.s32.totalorder %v2154_v18, 0  ;;  %v2026_v36 = vsel %vm2022_vm12, %v2006_v11, %v14118_v30 }
 0x2b9   :  { %v2050_v29 = vshrl.u32 %v2045_v26, 16  ;;  %v2076_v20 = vadd.s32 %v2074_v37, %v2068_v59  ;;  %v2156_v24 = vsel %vm2155_vm6, %v2154_v18, 0  ;;  %v2028_v3 = vsel %vm2024_vm0, %v14114_v48, %v2027_v23 }
 0x2ba   :  { %v2059_v57 = vadd.s32 %v2058_v54, %v2048_v63  ;;  %v2070_v22 = vshrl.u32 %v2066_v46, 16  ;;  %vm2077_vm8 = vc.u32 %v2075_v13, %v2071_v10  ;;  %v1799_v28 = vor.u32 4788187, %v1798_v51 }
 0x2bb   :  { %v1940_v47 = vsub.s32 0, %v14198_v56  ;;  %v2078_v53 = vsel %vm2077_vm8, 1, %v18790_v43  ;;  %v2158_v45 = vand.u32 31, %v2156_v24  ;;  %v1507_v5 = vmul.f32 %v1506_v55, %v14043_v1 }
 0x2bc   :  { %vm1939_vm10 = vcmp.lt.s32.totalorder %v14198_v56, 0  ;;  %v2072_v11 = vshrl.u32 %v2067_v60, 16  ;;  %v2080_v30 = vadd.s32 %v2078_v53, %v2076_v20  ;;  %v2029_v26 = vsel %vm2023_vm4, %v2026_v36, %v2028_v3 }
 0x2bd   :  { %v14217_v18 = vadd.s32 %v2059_v57, %v2050_v29  ;;  %v14219_v48 = vadd.s32 %v2075_v13, %v2071_v10  ;;  %v14221_v46 = vsub.s32 32, %v2158_v45  ;;  %v1515_v51 = vadd.f32 1.0, %v1514_v34 }
 0x2be   :  { %v1658_v44 = vadd.f32 0.041655596, %v1657_v6  ;;  %v1665_v59 = vadd.f32 0.008332121, %v1664_v7  ;;  %v2081_v8 = vadd.s32 %v2080_v30, %v2070_v22  ;;  %v1800_v63 = vand.u32 2147483647, %v1799_v28 }
 0x2bf   :  { %v1802_v1 = vcvt.s32.f32 %v14190_v17  ;;  %v1941_v55 = vsel %vm1939_vm10, %v1940_v47, %v14198_v56  ;;  %v2151_v60 = vand.u32 8388607, %v18476_v32  ;;  %v2083_v23 = vmul.u32 %v14126_v40, %v2029_v26 }
 0x2c0   :  { %v2082_v25 = vadd.s32 %v2081_v8, %v2072_v11  ;;  %v2164_v10 = vshll.u32 %v18883_v35, %v2158_v45  ;;  %v2170_v61 = vshll.u32 %v18885_v49, %v2158_v45  ;;  %vm2085_vm3 = vc.u32 %v14217_v18, %v14219_v48 }
 0x2c1   :  { %v2165_v34 = vshrl.u32 %v18884_v19, %v14221_v46  ;;  %v2167_v6 = vshll.u32 %v18884_v19, %v2158_v45  ;;  %v2168_v7 = vshrl.u32 %v18885_v49, %v14221_v46  ;;  %v14237_v54 = vshrl.u32 %v2156_v24, 5 }
 0x2c2   :  { %v2086_v17 = vadd.s32 1, %v2082_v25  ;;  %v2171_v40 = vshrl.u32 %v18810_v16, %v14221_v46  ;;  %v2173_v37 = vshll.u32 %v18810_v16, %v2158_v45  ;;  %v1803_v13 = vmul.f32 %v1802_v1, %v1800_v63 }
 0x2c3   :  { %v2161_v36 = vshll.u32 %v18773_v50, %v2158_v45  ;;  %v2162_v29 = vshrl.u32 %v18883_v35, %v14221_v46  ;;  %v2174_v20 = vshrl.u32 %v18811_v38, %v14221_v46  ;;  %v1942_v3 = vclz %v1941_v55 }
 0x2c4   :  { %v2087_v57 = vsel %vm2085_vm3, %v2086_v17, %v2082_v25  ;;  %v2152_v22 = vor.u32 8388608, %v2151_v60  ;;  %v2172_v28 = vor.u32 %v2171_v40, %v2170_v61  ;;  %v14247_v47 = vor.u32 %v2165_v34, %v2164_v10 }
 0x2c5   :  { %v2088_v24 = vadd.s32 %v2087_v57, %v2083_v23  ;;  %v14249_v53 = vor.u32 %v2168_v7, %v2167_v6  ;;  %v2175_v11 = vor.u32 %v2174_v20, %v2173_v37  ;;  %v1659_v30 = vmul.f32 %v1658_v44, %v14167_v58 }
 0x2c6   :  { %vm1684_vm9 = vcmp.lt.s32.totalorder %v13123_v42, 0  ;;  %vm2176_vm13 = vcmp.lt.s32.totalorder %v14237_v54, 1  ;;  %vm2179_vm15 = vcmp.lt.s32.totalorder %v14237_v54, 4  ;;  %v1804_v45 = vxor.u32 2147483648, %v1803_v13 }
 0x2c7   :  { %v2089_v26 = vadd.s32 536870912, %v2088_v24  ;;  %v14255_v8 = vor.u32 %v2162_v29, %v2161_v36  ;;  %vm2178_vm5 = vcmp.lt.s32.totalorder %v14237_v54, 3  ;;  %v11025_v63 = vadd.s32 4294967294, %v1942_v3 }
 0x2c8   :  { %v2185_v1 = vsel %vm2179_vm15, %v2172_v28, 920167782  ;;  %v2189_v55 = vsel %vm2179_vm15, %v2175_v11, 1326507024  ;;  %v14262_v44 = vshll.u32 %v2152_v22, 8  ;;  %v1666_v60 = vmul.f32 %v1665_v59, %v14167_v58 }
 0x2c9   :  { %v14265_v25 = vshrl.u32 %v2089_v26, 30  ;;  %vm2177_vm12 = vcmp.lt.s32.totalorder %v14237_v54, 2  ;;  %v2188_v23 = vsel %vm2176_vm13, %v14247_v47, %v14249_v53  ;;  %v14272_v10 = vadd.f32 1.0, %v1507_v5 }
 0x2ca   :  { %v14275_v61 = vmul.f32 %v1515_v51, %v14025_v31  ;;  %v18919_v34 = vand.u32 2147483647, %v13123_v42  ;;  %v2190_v59 = vsel %vm2178_vm5, %v2172_v28, %v2189_v55  ;;  %v1805_v7 = vsel %vm1684_vm9, %v1804_v45, %v1803_v13 }
 0x2cb   :  { %18916 = vst [vmem:[#allocation97_spill] sm:$0xff] %v14265_v25  ;;  %v2091_v17 = vshll.u32 %v14265_v25, 30  ;;  %v2184_v31 = vsel %vm2176_vm13, %v14255_v8, %v14247_v47  ;;  %v2186_v5 = vsel %vm2178_vm5, %v14249_v53, %v2185_v1  ;;  %vm11026_vm0 = vcmp.lt.s32.totalorder %v11025_v63, 0 }
 0x2cc   :  { %18917 = vst [vmem:[#allocation98_spill] sm:$0xff] %v14272_v10  ;;  %vm14279_vm7 = vcmp.le.f32.partialorder %v18919_v34, 0.7853982  ;;  %v2191_v51 = vsel %vm2177_vm12, %v2188_v23, %v2190_v59  ;;  %v2193_v40 = vand.u32 65535, %v14262_v44  ;;  %v2194_v37 = vshrl.u32 %v14262_v44, 16 }
 0x2cd   :  { %18918 = vst [vmem:[#allocation99_spill] sm:$0xff] %v14275_v61  ;;  %v14300_v13 = vand.u32 3, %v14178_v4  ;;  %v14305_v36 = vsel %vm14081_vm1, 0, %v14183_v62  ;;  %v1660_v29 = vadd.f32 -0.4999988, %v1659_v30  ;;  %v2187_v57 = vsel %vm2177_vm12, %v2184_v31, %v2186_v5 }
 0x2ce   :  { %18922 = vst [vmem:[#allocation100_spill] sm:$0xff] %v14305_v36  ;;  %v1667_v20 = vadd.f32 -0.16666654, %v1666_v60  ;;  %v2195_v22 = vand.u32 65535, %v2191_v51  ;;  %v2196_v28 = vshrl.u32 %v2191_v51, 16  ;;  %v14314_v45 = vsel %vm14279_vm7, %v13123_v42, %v1805_v7 }
 0x2cf   :  { %v1945_v26 = vsel %vm11026_vm0, 0, %v11025_v63  ;;  %v14316_v52 = vsub.s32 %v2088_v24, %v2091_v17  ;;  %v2217_v55 = vand.u32 65535, %v2187_v57  ;;  %v1661_v60 = vmul.f32 %v1660_v29, %v14167_v58 }
 0x2d0   :  { %v2197_v62 = vmul.u32 %v2195_v22, %v2193_v40  ;;  %v2198_v30 = vmul.u32 %v2196_v28, %v2193_v40  ;;  %v2199_v1 = vmul.u32 %v2195_v22, %v2194_v37  ;;  %v1668_v23 = vmul.f32 %v1667_v20, %v14167_v58 }
 0x2d1   :  { %v1930_v34 = vadd.s32 %v14054_v33, %v14052_v9  ;;  %v2218_v59 = vshrl.u32 %v2187_v57, 16  ;;  %v14324_v31 = vmul.f32 %v14314_v45, %v14314_v45  ;;  %v1950_v7 = vsub.s32 4294967266, %v1945_v26 }
 0x2d2   :  { %v2200_v63 = vmul.u32 %v2196_v28, %v2194_v37  ;;  %v2201_v24 = vshll.u32 %v2198_v30, 16  ;;  %v1946_v17 = vsub.s32 32, %v1945_v26  ;;  %v2094_v5 = vsub.s32 0, %v14316_v52 }
 0x2d3   :  { %v2203_v51 = vshll.u32 %v2199_v1, 16  ;;  %v2220_v22 = vmul.u32 %v2218_v59, %v2193_v40  ;;  %vm2093_vm1 = vcmp.lt.s32.totalorder %v14316_v52, 0  ;;  %v2221_v29 = vmul.u32 %v2217_v55, %v2194_v37 }
 0x2d4   :  { %vm2205_vm4 = vc.u32 %v2197_v62, %v2201_v24  ;;  %v2207_v58 = vadd.s32 %v2201_v24, %v2197_v62  ;;  %v1669_v20 = vadd.f32 1.0, %v1668_v23  ;;  %v2219_v33 = vmul.u32 %v2217_v55, %v2193_v40 }
 0x2d5   :  { %v2206_v9 = vsel %vm2205_vm4, 1, %v18790_v43  ;;  %v2223_v57 = vshll.u32 %v2220_v22, 16  ;;  %v1811_v32 = vmul.f32 -0.001358992, %v14324_v31  ;;  %v1818_v28 = vmul.f32 -0.00019511016, %v14324_v31 }
 0x2d6   :  { %v1951_v3 = vadd.s32 127, %v1950_v7  ;;  %v2208_v11 = vadd.s32 %v2206_v9, %v2200_v63  ;;  %v2095_v4 = vsel %vm2093_vm1, %v2094_v5, %v14316_v52  ;;  %vm2209_vm2 = vc.u32 %v2207_v58, %v2203_v51 }
 0x2d7   :  { %v2225_v39 = vshll.u32 %v2221_v29, 16  ;;  %v2301_v21 = vand.u32 2139095040, %v18923_v41  ;;  %v1947_v62 = vshll.u32 %v14198_v56, %v1945_v26  ;;  %v1948_v24 = vshrl.u32 %v1930_v34, %v1946_v17 }
 0x2d8   :  { %v2202_v23 = vshrl.u32 %v2198_v30, 16  ;;  %v2222_v25 = vmul.u32 %v2218_v59, %v2194_v37  ;;  %vm1520_vm14 = vcmp.eq.s32.totalorder %v14300_v13, 0  ;;  %vm1523_vm11 = vcmp.eq.s32.totalorder %v14300_v13, 2 }
 0x2d9   :  { %v2160_v40 = vshrl.u32 %v18773_v50, %v14221_v46  ;;  %v2210_v55 = vsel %vm2209_vm2, 1, %v18790_v43  ;;  %vm2227_vm6 = vc.u32 %v2219_v33, %v2223_v57  ;;  %v2229_v7 = vadd.s32 %v2223_v57, %v2219_v33 }
 0x2da   :  { %v1952_v63 = vshll.u32 %v1951_v3, 23  ;;  %v2096_v5 = vclz %v2095_v4  ;;  %v2181_v56 = vsel %vm2179_vm15, %v14249_v53, 2102212464  ;;  %v2212_v26 = vadd.s32 %v2210_v55, %v2208_v11 }
 0x2db   :  { %v2204_v30 = vshrl.u32 %v2199_v1, 16  ;;  %v2228_v37 = vsel %vm2227_vm6, 1, %v18790_v43  ;;  %vm2231_vm8 = vc.u32 %v2229_v7, %v2225_v39  ;;  %v2302_v34 = vshrl.u32 %v2301_v21, 23 }
 0x2dc   :  { %v1949_v59 = vor.u32 %v1948_v24, %v1947_v62  ;;  %v2213_v17 = vadd.s32 %v2212_v26, %v2202_v23  ;;  %v2224_v51 = vshrl.u32 %v2220_v22, 16  ;;  %v2230_v46 = vadd.s32 %v2228_v37, %v2222_v25 }
 0x2dd   :  { %v2180_v58 = vsel %vm2176_vm13, %v2160_v40, %v14255_v8  ;;  %v2182_v4 = vsel %vm2178_vm5, %v14247_v47, %v2181_v56  ;;  %v2232_v53 = vsel %vm2231_vm8, 1, %v18790_v43  ;;  %v11033_v3 = vadd.s32 4294967169, %v2302_v34 }
 0x2de   :  { %v1953_v11 = vor.u32 4788187, %v1952_v63  ;;  %v11028_v1 = vadd.s32 4294967294, %v2096_v5  ;;  %v2226_v9 = vshrl.u32 %v2221_v29, 16  ;;  %v2234_v33 = vadd.s32 %v2232_v53, %v2230_v46 }
 0x2df   :  { %v14350_v21 = vadd.f32 1.0, %v1661_v60  ;;  %v14352_v57 = vadd.s32 %v2213_v17, %v2204_v30  ;;  %v14354_v25 = vadd.s32 %v2229_v7, %v2225_v39  ;;  %v2308_v22 = vadd.s32 1, %v11033_v3 }
 0x2e0   :  { %v14357_v8 = vmul.f32 %v1669_v20, %v14153_v15  ;;  %v1806_v62 = vsub.s32 4, %v13952_v0  ;;  %v2183_v47 = vsel %vm2177_vm12, %v2180_v58, %v2182_v4  ;;  %v2235_v24 = vadd.s32 %v2234_v33, %v2224_v51 }
 0x2e1   :  { %18924 = vst [vmem:[#allocation101_spill] sm:$0xff] %v14350_v21  ;;  %v1812_v23 = vadd.f32 0.041655596, %v1811_v32  ;;  %v1819_v40 = vadd.f32 0.008332121, %v1818_v28  ;;  %v1956_v29 = vcvt.s32.f32 %v1949_v59  ;;  %vm2309_vm10 = vcmp.gt.s32.totalorder %v2308_v22, 0 }
 0x2e2   :  { %18925 = vst [vmem:[#allocation102_spill] sm:$0xff] %v14357_v8  ;;  %v1954_v60 = vand.u32 2147483647, %v1953_v11  ;;  %vm11029_vm3 = vcmp.lt.s32.totalorder %v11028_v1, 0  ;;  %v2236_v55 = vadd.s32 %v2235_v24, %v2226_v9  ;;  %v2310_v63 = vsel %vm2309_vm10, %v2308_v22, 0 }
 0x2e3   :  { %v2237_v39 = vmul.u32 %v14262_v44, %v2183_v47  ;;  %vm2239_vm13 = vc.u32 %v14352_v57, %v14354_v25  ;;  %v18484_v15 = vand.u32 2147483647, %v18923_v41  ;;  %v2312_v20 = vand.u32 31, %v2310_v63 }
 0x2e4   :  { %v18926_v54 = vxor.u32 2147483648, %v14275_v61  ;;  %v18928_v28 = vxor.u32 2147483648, %v14272_v10  ;;  %v14381_v44 = vand.u32 3, %v14305_v36  ;;  %v2240_v5 = vadd.s32 1, %v2236_v55 }
 0x2e5   :  { %vm1838_vm15 = vcmp.lt.s32.totalorder %v18882_v14, 0  ;;  %v14385_v26 = vsel %vm11029_vm3, 0, %v11028_v1  ;;  %v14387_v30 = vsub.s32 32, %v2312_v20  ;;  %v14393_v34 = vsel %vm1684_vm9, %v1806_v62, %v13952_v0 }
 0x2e6   :  { %v14371_v32 = vsel %vm1520_vm14, %v14272_v10, %v18926_v54  ;;  %v14378_v7 = vsel %vm1523_vm11, %v18928_v28, %v14275_v61  ;;  %v1957_v59 = vmul.f32 %v1956_v29, %v1954_v60  ;;  %v2241_v17 = vsel %vm2239_vm13, %v2240_v5, %v2236_v55 }
 0x2e7   :  { %18927 = vst [vmem:[#allocation103_spill] sm:$0xff] %v14371_v32  ;;  %v14396_v51 = vmul.f32 %v1812_v23, %v14324_v31  ;;  %v14399_v46 = vmul.f32 %v1819_v40, %v14324_v31  ;;  %v18929_v58 = vand.u32 2147483647, %v18882_v14  ;;  %v2242_v53 = vadd.s32 %v2241_v17, %v2237_v39 }
 0x2e8   :  { %v2305_v3 = vand.u32 8388607, %v18484_v15  ;;  %v2104_v0 = vsub.s32 4294967266, %v14385_v26  ;;  %v2318_v11 = vshll.u32 %v18883_v35, %v2312_v20  ;;  %v2319_v1 = vshrl.u32 %v18884_v19, %v14387_v30 }
 0x2e9   :  { %vm14403_vm5 = vcmp.le.f32.partialorder %v18929_v58, 0.7853982  ;;  %v2321_v9 = vshll.u32 %v18884_v19, %v2312_v20  ;;  %v2243_v33 = vadd.s32 536870912, %v2242_v53  ;;  %v2322_v22 = vshrl.u32 %v18885_v49, %v14387_v30 }
 0x2ea   :  { %v2324_v62 = vshll.u32 %v18885_v49, %v2312_v20  ;;  %v2325_v47 = vshrl.u32 %v18810_v16, %v14387_v30  ;;  %v1958_v24 = vxor.u32 2147483648, %v1957_v59  ;;  %v2084_v23 = vadd.s32 %v14219_v48, %v14217_v18 }
 0x2eb   :  { %v14421_v40 = vshrl.u32 %v2310_v63, 5  ;;  %v2327_v29 = vshll.u32 %v18810_v16, %v2312_v20  ;;  %vm1677_vm9 = vcmp.eq.s32.totalorder %v14381_v44, 2  ;;  %v2100_v60 = vsub.s32 32, %v14385_v26 }
 0x2ec   :  { %v14426_v55 = vshrl.u32 %v2243_v33, 30  ;;  %v2306_v39 = vor.u32 8388608, %v2305_v3  ;;  %v2328_v54 = vshrl.u32 %v18811_v38, %v14387_v30  ;;  %v1960_v28 = vsub.s32 4, %v14185_v12 }
 0x2ed   :  { %v2105_v5 = vadd.s32 127, %v2104_v0  ;;  %v2315_v17 = vshll.u32 %v18773_v50, %v2312_v20  ;;  %v2316_v18 = vshrl.u32 %v18883_v35, %v14387_v30  ;;  %v14435_v63 = vor.u32 %v2319_v1, %v2318_v11 }
 0x2ee   :  { %v2245_v48 = vshll.u32 %v14426_v55, 30  ;;  %v14437_v58 = vor.u32 %v2322_v22, %v2321_v9  ;;  %v2326_v33 = vor.u32 %v2325_v47, %v2324_v62  ;;  %v1959_v3 = vsel %vm1838_vm15, %v1958_v24, %v1957_v59  ;;  %v18932_v22 = vld [vmem:[#allocation67_spill] sm:$0xff] }
 0x2ef   :  { %v2329_v15 = vor.u32 %v2328_v54, %v2327_v29  ;;  %vm2330_vm12 = vcmp.lt.s32.totalorder %v14421_v40, 1  ;;  %vm2333_vm0 = vcmp.lt.s32.totalorder %v14421_v40, 4  ;;  %v2101_v20 = vshll.u32 %v14316_v52, %v14385_v26 }
 0x2f0   :  { %v2102_v0 = vshrl.u32 %v2084_v23, %v2100_v60  ;;  %v14445_v37 = vsub.s32 %v2242_v53, %v2245_v48  ;;  %v14447_v56 = vshll.u32 %v2306_v39, 8  ;;  %v2106_v11 = vshll.u32 %v2105_v5, 23 }
 0x2f1   :  { %v14449_v1 = vor.u32 %v2316_v18, %v2315_v17  ;;  %vm2331_vm1 = vcmp.lt.s32.totalorder %v14421_v40, 2  ;;  %vm2332_vm4 = vcmp.lt.s32.totalorder %v14421_v40, 3  ;;  %v2339_v9 = vsel %vm2333_vm0, %v2326_v33, 920167782 }
 0x2f2   :  { %vm2247_vm2 = vcmp.lt.s32.totalorder %v14445_v37, 0  ;;  %v2248_v59 = vsub.s32 0, %v14445_v37  ;;  %v2342_v52 = vsel %vm2330_vm12, %v14435_v63, %v14437_v58  ;;  %v14464_v26 = vsel %vm14403_vm5, %v18882_v14, %v1959_v3 }
 0x2f3   :  { %v2343_v53 = vsel %vm2333_vm0, %v2329_v15, 1326507024  ;;  %v2455_v47 = vand.u32 2139095040, %v18932_v22  ;;  %v2347_v29 = vand.u32 65535, %v14447_v56  ;;  %v2348_v60 = vshrl.u32 %v14447_v56, 16 }
 0x2f4   :  { %v2249_v24 = vsel %vm2247_vm2, %v2248_v59, %v14445_v37  ;;  %v2344_v23 = vsel %vm2332_vm4, %v2326_v33, %v2343_v53  ;;  %v2338_v54 = vsel %vm2330_vm12, %v14449_v1, %v14435_v63  ;;  %v2340_v15 = vsel %vm2332_vm4, %v14437_v58, %v2339_v9 }
 0x2f5   :  { %v2250_v39 = vclz %v2249_v24  ;;  %v2345_v5 = vsel %vm2331_vm1, %v2342_v52, %v2344_v23  ;;  %v2103_v17 = vor.u32 %v2102_v0, %v2101_v20  ;;  %v2107_v18 = vor.u32 4788187, %v2106_v11 }
 0x2f6   :  { %v2349_v48 = vand.u32 65535, %v2345_v5  ;;  %v2350_v33 = vshrl.u32 %v2345_v5, 16  ;;  %v18933_v3 = vxor.u32 2147483648, %v14350_v21  ;;  %v1814_v53 = vadd.f32 -0.4999988, %v14396_v51 }
 0x2f7   :  { %v11031_v24 = vadd.s32 4294967294, %v2250_v39  ;;  %v2456_v62 = vshrl.u32 %v2455_v47, 23  ;;  %v1821_v9 = vadd.f32 -0.16666654, %v14399_v46  ;;  %v2341_v52 = vsel %vm2331_vm1, %v2338_v54, %v2340_v15 }
 0x2f8   :  { %v14489_v59 = vsel %vm1677_vm9, %v18933_v3, %v14357_v8  ;;  %v2352_v20 = vmul.u32 %v2350_v33, %v2347_v29  ;;  %v14495_v0 = vmul.u32 %v2349_v48, %v2348_v60  ;;  %v14500_v11 = vsel %vm14279_vm7, 0, %v14393_v34 }
 0x2f9   :  { %18934 = vst [vmem:[#allocation104_spill] sm:$0xff] %v14489_v59  ;;  %v14505_v23 = vsel %vm1838_vm15, %v1960_v28, %v14185_v12  ;;  %v14509_v51 = vmul.f32 %v14464_v26, %v14464_v26  ;;  %v18936_v46 = vand.u32 2147483647, %v18932_v22  ;;  %v2108_v39 = vand.u32 2147483647, %v2107_v18 }
 0x2fa   :  { %18935 = vst [vmem:[#allocation105_spill] sm:$0xff] %v14500_v11  ;;  %v2110_v54 = vcvt.s32.f32 %v2103_v17  ;;  %v2351_v15 = vmul.u32 %v2349_v48, %v2347_v29  ;;  %v2355_v5 = vshll.u32 %v2352_v20, 16  ;;  %vm11032_vm14 = vcmp.lt.s32.totalorder %v11031_v24, 0 }
 0x2fb   :  { %v14513_v47 = vand.u32 8388607, %v18936_v46  ;;  %v2371_v6 = vand.u32 65535, %v2341_v52  ;;  %v2372_v34 = vshrl.u32 %v2341_v52, 16  ;;  %v11036_v3 = vadd.s32 4294967169, %v2456_v62 }
 0x2fc   :  { %v14516_v10 = vmul.f32 %v1814_v53, %v14324_v31  ;;  %v14519_v12 = vmul.f32 %v1821_v9, %v14324_v31  ;;  %v2354_v28 = vmul.u32 %v2350_v33, %v2348_v60  ;;  %v2357_v61 = vshll.u32 %v14495_v0, 16 }
 0x2fd   :  { %v14523_v46 = vmul.f32 -0.001358992, %v14509_v51  ;;  %v14526_v17 = vmul.f32 -0.00019511016, %v14509_v51  ;;  %v2238_v18 = vadd.s32 %v14354_v25, %v14352_v57  ;;  %v2460_v62 = vor.u32 8388608, %v14513_v47 }
 0x2fe   :  { %v14531_v48 = vmul.f32 %v2110_v54, %v2108_v39  ;;  %v2253_v53 = vsel %vm11032_vm14, 0, %v11031_v24  ;;  %vm2359_vm7 = vc.u32 %v2351_v15, %v2355_v5  ;;  %v2361_v31 = vadd.s32 %v2355_v5, %v2351_v15 }
 0x2ff   :  { %v2360_v33 = vsel %vm2359_vm7, 1, %v18790_v43  ;;  %v2373_v9 = vmul.u32 %v2371_v6, %v2347_v29  ;;  %v2374_v52 = vmul.u32 %v2372_v34, %v2347_v29  ;;  %v2462_v36 = vadd.s32 1, %v11036_v3 }
 0x300   :  { %v2356_v22 = vshrl.u32 %v2352_v20, 16  ;;  %v2362_v14 = vadd.s32 %v2360_v33, %v2354_v28  ;;  %vm2363_vm11 = vc.u32 %v2361_v31, %v2357_v61  ;;  %v2375_v42 = vmul.u32 %v2371_v6, %v2348_v60 }
 0x301   :  { %v2258_v59 = vsub.s32 4294967266, %v2253_v53  ;;  %v2364_v32 = vsel %vm2363_vm11, 1, %v18790_v43  ;;  %v2376_v57 = vmul.u32 %v2372_v34, %v2348_v60  ;;  %v2377_v25 = vshll.u32 %v2374_v52, 16 }
 0x302   :  { %vm1992_vm6 = vcmp.lt.s32.totalorder %v18905_v27, 0  ;;  %v2314_v24 = vshrl.u32 %v18773_v50, %v14387_v30  ;;  %v2335_v39 = vsel %vm2333_vm0, %v14437_v58, 2102212464  ;;  %v2366_v29 = vadd.s32 %v2364_v32, %v2362_v14 }
 0x303   :  { %v2379_v54 = vshll.u32 %v2375_v42, 16  ;;  %v2254_v20 = vsub.s32 32, %v2253_v53  ;;  %vm2381_vm8 = vc.u32 %v2373_v9, %v2377_v25  ;;  %v2383_v61 = vadd.s32 %v2377_v25, %v2373_v9 }
 0x304   :  { %vm2463_vm10 = vcmp.gt.s32.totalorder %v2462_v36, 0  ;;  %v2358_v15 = vshrl.u32 %v14495_v0, 16  ;;  %v2367_v5 = vadd.s32 %v2366_v29, %v2356_v22  ;;  %v2382_v60 = vsel %vm2381_vm8, 1, %v18790_v43 }
 0x305   :  { %v2464_v6 = vsel %vm2463_vm10, %v2462_v36, 0  ;;  %v18937_v34 = vand.u32 2147483647, %v18905_v27  ;;  %v2259_v3 = vadd.s32 127, %v2258_v59  ;;  %v2378_v58 = vshrl.u32 %v2374_v52, 16 }
 0x306   :  { %v2384_v14 = vadd.s32 %v2382_v60, %v2376_v57  ;;  %vm2385_vm13 = vc.u32 %v2383_v61, %v2379_v54  ;;  %v2334_v32 = vsel %vm2330_vm12, %v2314_v24, %v14449_v1  ;;  %v2336_v22 = vsel %vm2332_vm4, %v14435_v63, %v2335_v39 }
 0x307   :  { %vm14545_vm3 = vcmp.le.f32.partialorder %v18937_v34, 0.7853982  ;;  %v2386_v36 = vsel %vm2385_vm13, 1, %v18790_v43  ;;  %v2466_v0 = vand.u32 31, %v2464_v6  ;;  %v2112_v28 = vxor.u32 2147483648, %v14531_v48 }
 0x308   :  { %v2255_v31 = vshll.u32 %v14445_v37, %v2253_v53  ;;  %v2380_v33 = vshrl.u32 %v2375_v42, 16  ;;  %v2388_v59 = vadd.s32 %v2386_v36, %v2384_v14  ;;  %v2256_v9 = vshrl.u32 %v2238_v18, %v2254_v20 }
 0x309   :  { %v14558_v52 = vadd.s32 %v2367_v5, %v2358_v15  ;;  %v14560_v57 = vadd.s32 %v2383_v61, %v2379_v54  ;;  %v14562_v25 = vsub.s32 32, %v2466_v0  ;;  %v2260_v1 = vshll.u32 %v2259_v3, 23 }
 0x30a   :  { %v2337_v63 = vsel %vm2331_vm1, %v2334_v32, %v2336_v22  ;;  %v2389_v24 = vadd.s32 %v2388_v59, %v2378_v58  ;;  %v14566_v39 = vshrl.u32 %v2464_v6, 5  ;;  %v2469_v29 = vshll.u32 %v18773_v50, %v2466_v0 }
 0x30b   :  { %v2470_v42 = vshrl.u32 %v18883_v35, %v14562_v25  ;;  %v2472_v37 = vshll.u32 %v18883_v35, %v2466_v0  ;;  %v2473_v18 = vshrl.u32 %v18884_v19, %v14562_v25  ;;  %v2475_v54 = vshll.u32 %v18884_v19, %v2466_v0 }
 0x30c   :  { %v2390_v53 = vadd.s32 %v2389_v24, %v2380_v33  ;;  %v2476_v40 = vshrl.u32 %v18885_v49, %v14562_v25  ;;  %v2478_v20 = vshll.u32 %v18885_v49, %v2466_v0  ;;  %v2257_v61 = vor.u32 %v2256_v9, %v2255_v31 }
 0x30d   :  { %v2391_v15 = vmul.u32 %v14447_v56, %v2337_v63  ;;  %vm2393_vm15 = vc.u32 %v14558_v52, %v14560_v57  ;;  %v2479_v5 = vshrl.u32 %v18810_v16, %v14562_v25  ;;  %v2113_v60 = vsel %vm1992_vm6, %v2112_v28, %v14531_v48 }
 0x30e   :  { %v2261_v6 = vor.u32 4788187, %v2260_v1  ;;  %v2394_v34 = vadd.s32 1, %v2390_v53  ;;  %v2481_v3 = vshll.u32 %v18810_v16, %v2466_v0  ;;  %v14587_v58 = vor.u32 %v2470_v42, %v2469_v29 }
 0x30f   :  { %v14589_v14 = vor.u32 %v2473_v18, %v2472_v37  ;;  %v2480_v32 = vor.u32 %v2479_v5, %v2478_v20  ;;  %v2482_v56 = vshrl.u32 %v18811_v38, %v14562_v25  ;;  %v1966_v22 = vadd.f32 0.041655596, %v14523_v46 }
 0x310   :  { %v2395_v36 = vsel %vm2393_vm15, %v2394_v34, %v2390_v53  ;;  %v14594_v31 = vor.u32 %v2476_v40, %v2475_v54  ;;  %vm2484_vm9 = vcmp.lt.s32.totalorder %v14566_v39, 1  ;;  %v14600_v48 = vsel %vm14545_vm3, %v18905_v27, %v2113_v60 }
 0x311   :  { %v2264_v0 = vcvt.s32.f32 %v2257_v61  ;;  %v2396_v28 = vadd.s32 %v2395_v36, %v2391_v15  ;;  %vm2486_vm12 = vcmp.lt.s32.totalorder %v14566_v39, 3  ;;  %v2262_v33 = vand.u32 2147483647, %v2261_v6 }
 0x312   :  { %v2483_v59 = vor.u32 %v2482_v56, %v2481_v3  ;;  %vm2485_vm0 = vcmp.lt.s32.totalorder %v14566_v39, 2  ;;  %vm2487_vm1 = vcmp.lt.s32.totalorder %v14566_v39, 4  ;;  %v2492_v9 = vsel %vm2484_vm9, %v14587_v58, %v14589_v14 }
 0x313   :  { %v2397_v46 = vadd.s32 536870912, %v2396_v28  ;;  %v2493_v1 = vsel %vm2487_vm1, %v2480_v32, 920167782  ;;  %v14613_v63 = vshll.u32 %v2460_v62, 8  ;;  %v14616_v24 = vand.u32 3, %v14500_v11 }
 0x314   :  { %v14621_v29 = vsel %vm14403_vm5, 0, %v14505_v23  ;;  %v1973_v42 = vadd.f32 0.008332121, %v14526_v17  ;;  %v2494_v37 = vsel %vm2486_vm12, %v14594_v31, %v2493_v1  ;;  %v14628_v18 = vadd.f32 1.0, %v14516_v10 }
 0x315   :  { %18940 = vst [vmem:[#allocation106_spill] sm:$0xff] %v14621_v29  ;;  %v14630_v47 = vshrl.u32 %v2397_v46, 30  ;;  %v2495_v62 = vsel %vm2485_vm0, %v2492_v9, %v2494_v37  ;;  %v2496_v4 = vsel %vm2484_vm9, %v14589_v14, %v14594_v31  ;;  %v14639_v23 = vadd.f32 1.0, %v14519_v12 }
 0x316   :  { %18941 = vst [vmem:[#allocation107_spill] sm:$0xff] %v14628_v18  ;;  %v14643_v17 = vmul.f32 %v14600_v48, %v14600_v48  ;;  %v2265_v53 = vmul.f32 %v2264_v0, %v2262_v33  ;;  %v2497_v10 = vsel %vm2487_vm1, %v2483_v59, 1326507024  ;;  %v1967_v54 = vmul.f32 %v1966_v22, %v14509_v51 }
 0x317   :  { %v2399_v40 = vshll.u32 %v14630_v47, 30  ;;  %v2498_v20 = vsel %vm2486_vm12, %v2480_v32, %v2497_v10  ;;  %v2501_v61 = vand.u32 65535, %v14613_v63  ;;  %v1974_v12 = vmul.f32 %v1973_v42, %v14509_v51 }
 0x318   :  { %v2499_v15 = vsel %vm2485_vm0, %v2496_v4, %v2498_v20  ;;  %v2502_v5 = vshrl.u32 %v14613_v63, 16  ;;  %v2526_v60 = vshrl.u32 %v2495_v62, 16  ;;  %vm2146_vm5 = vcmp.lt.s32.totalorder %v18913_v2, 0 }
 0x319   :  { %v14657_v6 = vsub.s32 %v2396_v28, %v2399_v40  ;;  %v2503_v34 = vand.u32 65535, %v2499_v15  ;;  %v2504_v3 = vshrl.u32 %v2499_v15, 16  ;;  %v2126_v56 = vmul.f32 -0.00019511016, %v14643_v17 }
 0x31a   :  { %v18942_v32 = vand.u32 2147483647, %v18913_v2  ;;  %v2266_v36 = vxor.u32 2147483648, %v2265_v53  ;;  %v2525_v0 = vand.u32 65535, %v2495_v62  ;;  %v14668_v28 = vadd.f32 -0.4999988, %v1967_v54 }
 0x31b   :  { %vm2401_vm2 = vcmp.lt.s32.totalorder %v14657_v6, 0  ;;  %v2402_v33 = vsub.s32 0, %v14657_v6  ;;  %v2505_v59 = vmul.u32 %v2503_v34, %v2501_v61  ;;  %v2506_v46 = vmul.u32 %v2504_v3, %v2501_v61 }
 0x31c   :  { %vm14662_vm4 = vcmp.le.f32.partialorder %v18942_v32, 0.7853982  ;;  %v1975_v9 = vadd.f32 -0.16666654, %v1974_v12  ;;  %v2507_v1 = vmul.u32 %v2503_v34, %v2502_v5  ;;  %v14670_v42 = vmul.u32 %v2526_v60, %v2501_v61 }
 0x31d   :  { %v2119_v37 = vmul.f32 -0.001358992, %v14643_v17  ;;  %v2403_v4 = vsel %vm2401_vm2, %v2402_v33, %v14657_v6  ;;  %v2508_v10 = vmul.u32 %v2504_v3, %v2502_v5  ;;  %v2509_v40 = vshll.u32 %v2506_v46, 16 }
 0x31e   :  { %v2127_v20 = vadd.f32 0.008332121, %v2126_v56  ;;  %v2267_v62 = vsel %vm2146_vm5, %v2266_v36, %v2265_v53  ;;  %v2404_v15 = vclz %v2403_v4  ;;  %v2511_v32 = vshll.u32 %v2507_v1, 16 }
 0x31f   :  { %vm2513_vm14 = vc.u32 %v2505_v59, %v2509_v40  ;;  %v2515_v11 = vadd.s32 %v2509_v40, %v2505_v59  ;;  %v2527_v54 = vmul.u32 %v2525_v0, %v2501_v61  ;;  %v2529_v49 = vmul.u32 %v2525_v0, %v2502_v5 }
 0x320   :  { %v2392_v12 = vadd.s32 %v14560_v57, %v14558_v52  ;;  %v11034_v34 = vadd.s32 4294967294, %v2404_v15  ;;  %v2514_v19 = vsel %vm2513_vm14, 1, %v18790_v43  ;;  %v2531_v33 = vshll.u32 %v14670_v42, 16 }
 0x321   :  { %v14683_v3 = vsel %vm14662_vm4, %v18913_v2, %v2267_v62  ;;  %v2468_v53 = vshrl.u32 %v18773_v50, %v14562_v25  ;;  %v2516_v56 = vadd.s32 %v2514_v19, %v2508_v10  ;;  %vm2517_vm7 = vc.u32 %v2515_v11, %v2511_v32 }
 0x322   :  { %vm11035_vm11 = vcmp.lt.s32.totalorder %v11034_v34, 0  ;;  %v2510_v61 = vshrl.u32 %v2506_v46, 16  ;;  %v2518_v36 = vsel %vm2517_vm7, 1, %v18790_v43  ;;  %v2530_v52 = vmul.u32 %v2526_v60, %v2502_v5 }
 0x323   :  { %v2407_v57 = vsel %vm11035_vm11, 0, %v11034_v34  ;;  %v2520_v0 = vadd.s32 %v2518_v36, %v2516_v56  ;;  %v2533_v59 = vshll.u32 %v2529_v49, 16  ;;  %vm2535_vm8 = vc.u32 %v2527_v54, %v2531_v33 }
 0x324   :  { %v14690_v4 = vmul.f32 %v14683_v3, %v14683_v3  ;;  %v2408_v40 = vsub.s32 32, %v2407_v57  ;;  %v2412_v62 = vsub.s32 4294967266, %v2407_v57  ;;  %v2489_v19 = vsel %vm2487_vm1, %v14594_v31, 2102212464 }
 0x325   :  { %v2409_v11 = vshll.u32 %v14657_v6, %v2407_v57  ;;  %v2512_v25 = vshrl.u32 %v2507_v1, 16  ;;  %v2536_v46 = vsel %vm2535_vm8, 1, %v18790_v43  ;;  %v2537_v5 = vadd.s32 %v2531_v33, %v2527_v54 }
 0x326   :  { %v2410_v60 = vshrl.u32 %v2392_v12, %v2408_v40  ;;  %v2413_v10 = vadd.s32 127, %v2412_v62  ;;  %v2521_v15 = vadd.s32 %v2520_v0, %v2510_v61  ;;  %v2538_v32 = vadd.s32 %v2536_v46, %v2530_v52  ;;  %v18946_v40 = vld [vmem:[#allocation97_spill] sm:$0xff] }
 0x327   :  { %vm1828_vm10 = vcmp.eq.s32.totalorder %v14616_v24, 0  ;;  %vm1831_vm13 = vcmp.eq.s32.totalorder %v14616_v24, 2  ;;  %v1976_v34 = vmul.f32 %v1975_v9, %v14509_v51  ;;  %v2120_v56 = vadd.f32 0.041655596, %v2119_v37 }
 0x328   :  { %v2532_v36 = vshrl.u32 %v14670_v42, 16  ;;  %vm2539_vm15 = vc.u32 %v2537_v5, %v2533_v59  ;;  %v2414_v31 = vshll.u32 %v2413_v10, 23  ;;  %v2488_v6 = vsel %vm2484_vm9, %v2468_v53, %v14587_v58 }
 0x329   :  { %v2490_v1 = vsel %vm2486_vm12, %v14589_v14, %v2489_v19  ;;  %v2540_v54 = vsel %vm2539_vm15, 1, %v18790_v43  ;;  %v2128_v12 = vmul.f32 %v2127_v20, %v14643_v17  ;;  %v2411_v33 = vor.u32 %v2410_v60, %v2409_v11 }
 0x32a   :  { %v2534_v61 = vshrl.u32 %v2529_v49, 16  ;;  %v2542_v9 = vadd.s32 %v2540_v54, %v2538_v32  ;;  %v2280_v37 = vmul.f32 -0.00019511016, %v14690_v4  ;;  %v2415_v42 = vor.u32 4788187, %v2414_v31  ;;  %v18949_v31 = vld [vmem:[#allocation68_spill] sm:$0xff] }
 0x32b   :  { %v14710_v52 = vadd.s32 %v2521_v15, %v2512_v25  ;;  %v14712_v57 = vadd.s32 %v2537_v5, %v2533_v59  ;;  %v14716_v58 = vmul.f32 %v14639_v23, %v14314_v45  ;;  %v2273_v14 = vmul.f32 -0.001358992, %v14690_v4 }
 0x32c   :  { %v2491_v53 = vsel %vm2485_vm0, %v2488_v6, %v2490_v1  ;;  %v2543_v20 = vadd.s32 %v2542_v9, %v2532_v36  ;;  %v1969_v49 = vmul.f32 %v14668_v28, %v14509_v51  ;;  %v1977_v0 = vadd.f32 1.0, %v1976_v34 }
 0x32d   :  { %18945 = vst [vmem:[#allocation108_spill] sm:$0xff] %v14716_v58  ;;  %v2114_v62 = vsub.s32 4, %v18946_v40  ;;  %v2121_v19 = vmul.f32 %v2120_v56, %v14643_v17  ;;  %vm1674_vm9 = vcmp.eq.s32.totalorder %v14381_v44, 0  ;;  %vm1827_vm12 = vcmp.lt.s32.totalorder %v14616_v24, 2 }
 0x32e   :  { %v2129_v45 = vadd.f32 -0.16666654, %v2128_v12  ;;  %v2416_v23 = vand.u32 2147483647, %v2415_v42  ;;  %v2418_v59 = vcvt.s32.f32 %v2411_v33  ;;  %v2544_v11 = vadd.s32 %v2543_v20, %v2534_v61 }
 0x32f   :  { %v18497_v39 = vxor.u32 2147483648, %v14628_v18  ;;  %v2281_v25 = vadd.f32 0.008332121, %v2280_v37  ;;  %v2545_v46 = vmul.u32 %v14613_v63, %v2491_v53  ;;  %vm2547_vm0 = vc.u32 %v14710_v52, %v14712_v57 }
 0x330   :  { %v18498_v51 = vxor.u32 2147483648, %v14716_v58  ;;  %v1980_v28 = vand.u32 3, %v14621_v29  ;;  %v2274_v5 = vadd.f32 0.041655596, %v2273_v14  ;;  %v2548_v60 = vadd.s32 1, %v2544_v11 }
 0x331   :  { %v14733_v10 = vadd.f32 1.0, %v1969_v49  ;;  %v14736_v15 = vmul.f32 %v1977_v0, %v14464_v26  ;;  %v2115_v32 = vsel %vm1992_vm6, %v2114_v62, %v18946_v40  ;;  %v2122_v34 = vadd.f32 -0.4999988, %v2121_v19 }
 0x332   :  { %v2130_v63 = vmul.f32 %v2129_v45, %v14643_v17  ;;  %v2419_v56 = vmul.f32 %v2418_v59, %v2416_v23  ;;  %v2549_v36 = vsel %vm2547_vm0, %v2548_v60, %v2544_v11  ;;  %v3071_v6 = vand.u32 2139095040, %v18949_v31 }
 0x333   :  { %18947 = vst [vmem:[#allocation97_spill] sm:$0xff] %v14733_v10  ;;  %v1830_v1 = vsel %vm1828_vm10, %v14628_v18, %v18498_v51  ;;  %v1833_v26 = vsel %vm1831_vm13, %v18497_v39, %v14716_v58  ;;  %v2282_v54 = vmul.f32 %v2281_v25, %v14690_v4  ;;  %v2550_v12 = vadd.s32 %v2549_v36, %v2545_v46 }
 0x334   :  { %18948 = vst [vmem:[#allocation109_spill] sm:$0xff] %v14736_v15  ;;  %vm1981_vm6 = vcmp.lt.s32.totalorder %v1980_v28, 2  ;;  %vm1982_vm1 = vcmp.eq.s32.totalorder %v1980_v28, 0  ;;  %vm1985_vm2 = vcmp.eq.s32.totalorder %v1980_v28, 2  ;;  %v2275_v33 = vmul.f32 %v2274_v5, %v14690_v4 }
 0x335   :  { %v18499_v61 = vxor.u32 2147483648, %v14733_v10  ;;  %v14758_v9 = vsel %vm14545_vm3, 0, %v2115_v32  ;;  %v2123_v37 = vmul.f32 %v2122_v34, %v14643_v17  ;;  %v2551_v42 = vadd.s32 536870912, %v2550_v12 }
 0x336   :  { %18950 = vst [vmem:[#allocation110_spill] sm:$0xff] %v14758_v9  ;;  %vm1519_vm14 = vcmp.lt.s32.totalorder %v14300_v13, 2  ;;  %vm1673_vm7 = vcmp.lt.s32.totalorder %v14381_v44, 2  ;;  %v18500_v14 = vxor.u32 2147483648, %v14736_v15  ;;  %v2131_v53 = vadd.f32 1.0, %v2130_v63 }
 0x337   :  { %v2420_v20 = vxor.u32 2147483648, %v2419_v56  ;;  %v3072_v49 = vshrl.u32 %v3071_v6, 23  ;;  %v2268_v0 = vsub.s32 4, %v14426_v55  ;;  %v2283_v40 = vadd.f32 -0.16666654, %v2282_v54 }
 0x338   :  { %vm2300_vm11 = vcmp.lt.s32.totalorder %v18923_v41, 0  ;;  %v14766_v30 = vshrl.u32 %v2551_v42, 30  ;;  %v1984_v17 = vsel %vm1982_vm1, %v14733_v10, %v18500_v14  ;;  %v1987_v62 = vsel %vm1985_vm2, %v18499_v61, %v14736_v15  ;;  %v18968_v61 = vld [vmem:[#allocation67_spill] sm:$0xff] }
 0x339   :  { %v2134_v19 = vand.u32 3, %v14758_v9  ;;  %v2276_v45 = vadd.f32 -0.4999988, %v2275_v33  ;;  %v18951_v23 = vxor.u32 2147483648, %v14357_v8  ;;  %v1834_v11 = vsel %vm1827_vm12, %v1830_v1, %v1833_v26  ;;  %v19004_v15 = vld [vmem:[#allocation75_spill] sm:$0xff] }
 0x33a   :  { %v14784_v25 = vadd.f32 1.0, %v2123_v37  ;;  %v2553_v46 = vshll.u32 %v14766_v30, 30  ;;  %v14788_v5 = vmul.f32 %v2131_v53, %v14600_v48  ;;  %v18954_v60 = vand.u32 2147483647, %v18923_v41 }
 0x33b   :  { %v1676_v59 = vsel %vm1674_vm9, %v14350_v21, %v18951_v23  ;;  %v2421_v34 = vsel %vm2300_vm11, %v2420_v20, %v2419_v56  ;;  %v11048_v63 = vadd.s32 4294967169, %v3072_v49  ;;  %v1988_v24 = vsel %vm1981_vm6, %v1984_v17, %v1987_v62  ;;  %v18960_v62 = vld [vmem:[#allocation104_spill] sm:$0xff]  ;;  %v18961_v23 = vld [vmem:[#allocation65_spill] sm:$0xff] }
 0x33c   :  { %18952 = vst [vmem:[#allocation111_spill] sm:$0xff] %v14784_v25  ;;  %vm14792_vm3 = vcmp.le.f32.partialorder %v18954_v60, 0.7853982  ;;  %v2269_v36 = vsel %vm2146_vm5, %v2268_v0, %v14426_v55  ;;  %v2284_v6 = vmul.f32 %v2283_v40, %v14690_v4  ;;  %v2554_v48 = vsub.s32 %v2550_v12, %v2553_v46  ;;  %v18959_v40 = vld [vmem:[#allocation103_spill] sm:$0xff] }
 0x33d   :  { %18953 = vst [vmem:[#allocation112_spill] sm:$0xff] %v14788_v5  ;;  %vm2135_vm8 = vcmp.lt.s32.totalorder %v2134_v19, 2  ;;  %vm2136_vm10 = vcmp.eq.s32.totalorder %v2134_v19, 0  ;;  %vm2139_vm13 = vcmp.eq.s32.totalorder %v2134_v19, 2  ;;  %v2277_v1 = vmul.f32 %v2276_v45, %v14690_v4  ;;  %v18962_v46 = vld [vmem:[#allocation55_spill] sm:$0xff] }
 0x33e   :  { %v18501_v26 = vxor.u32 2147483648, %v14784_v25  ;;  %v14808_v56 = vsel %vm14792_vm3, %v18923_v41, %v2421_v34  ;;  %vm2555_vm15 = vcmp.lt.s32.totalorder %v2554_v48, 0  ;;  %v2556_v28 = vsub.s32 0, %v2554_v48 }
 0x33f   :  { %v18502_v54 = vxor.u32 2147483648, %v14788_v5  ;;  %v14813_v55 = vsel %vm14662_vm4, 0, %v2269_v36  ;;  %v2422_v12 = vsub.s32 4, %v14630_v47  ;;  %v3078_v33 = vadd.s32 1, %v11048_v63  ;;  %v18964_v63 = vld [vmem:[#allocation57_spill] sm:$0xff] }
 0x340   :  { %18957 = vst [vmem:[#allocation113_spill] sm:$0xff] %v14813_v55  ;;  %v2141_v4 = vsel %vm2139_vm13, %v18501_v26, %v14788_v5  ;;  %v2285_v37 = vadd.f32 1.0, %v2284_v6  ;;  %v14820_v42 = vand.u32 3, %v14813_v55  ;;  %v2557_v53 = vsel %vm2555_vm15, %v2556_v28, %v2554_v48  ;;  %v18977_v26 = vld [vmem:[#allocation30_spill] sm:$0xff] }
 0x341   :  { %v2138_v20 = vsel %vm2136_vm10, %v14784_v25, %v18502_v54  ;;  %v14825_v49 = vadd.f32 1.0, %v2277_v1  ;;  %v14829_v22 = vmul.f32 %v14808_v56, %v14808_v56  ;;  %v2558_v0 = vclz %v2557_v53 }
 0x342   :  { %v14835_v17 = vsel %vm1519_vm14, %v18959_v40, %v14378_v7  ;;  %v14840_v45 = vsel %vm1673_vm7, %v1676_v59, %v18960_v62  ;;  %vm18535_vm5 = vweird.f32 %v18961_v23  ;;  %vm18544_vm4 = vweird.f32 %v18962_v46  ;;  %v18987_v23 = vld [vmem:[#allocation12_spill] sm:$0xff]  ;;  %v18989_v46 = vld [vmem:[#allocation10_spill] sm:$0xff] }
 0x343   :  { %18958 = vst [vmem:[#allocation114_spill] sm:$0xff] %v14825_v49  ;;  %v14846_v60 = vsel %vm18535_vm5, nan, %v1834_v11  ;;  %v2423_v34 = vsel %vm2300_vm11, %v2422_v12, %v14630_v47  ;;  %v11037_v13 = vadd.s32 4294967294, %v2558_v0  ;;  %vm3079_vm9 = vcmp.gt.s32.totalorder %v3078_v33, 0  ;;  %v18967_v0 = vld [vmem:[#allocation20_spill] sm:$0xff] }
 0x344   :  { %v14853_v7 = vsel %vm18544_vm4, nan, %v1988_v24  ;;  %v14856_v44 = vsel %vm2135_vm8, %v2138_v20, %v2141_v4  ;;  %v14859_v59 = vmul.f32 %v2285_v37, %v14683_v3  ;;  %v3225_v36 = vand.u32 2139095040, %v18964_v63  ;;  %v18966_v37 = vld [vmem:[#allocation13_spill] sm:$0xff]  ;;  %v18981_v20 = vld [vmem:[#allocation15_spill] sm:$0xff] }
 0x345   :  { %vm2293_vm12 = vcmp.eq.s32.totalorder %v14820_v42, 2  ;;  %v2434_v47 = vmul.f32 -0.00019511016, %v14829_v22  ;;  %v2546_v6 = vadd.s32 %v14712_v57, %v14710_v52  ;;  %vm11038_vm0 = vcmp.lt.s32.totalorder %v11037_v13, 0  ;;  %v18983_v52 = vld [vmem:[#allocation14_spill] sm:$0xff] }
 0x346   :  { %18963 = vst [vmem:[#allocation103_spill] sm:$0xff] %v14859_v59  ;;  %v14869_v19 = vsel %vm14792_vm3, 0, %v2423_v34  ;;  %v2427_v24 = vmul.f32 -0.001358992, %v14829_v22  ;;  %v2561_v3 = vsel %vm11038_vm0, 0, %v11037_v13  ;;  %v3080_v1 = vsel %vm3079_vm9, %v3078_v33, 0 }
 0x347   :  { %18965 = vst [vmem:[#allocation104_spill] sm:$0xff] %v14869_v19  ;;  %v2562_v28 = vsub.s32 32, %v2561_v3  ;;  %v2563_v12 = vshll.u32 %v2554_v48, %v2561_v3  ;;  %v2566_v4 = vsub.s32 4294967266, %v2561_v3  ;;  %v3058_v53 = vand.u32 3, %v18966_v37  ;;  %v18969_v33 = vld [vmem:[#allocation28_spill] sm:$0xff] }
 0x348   :  { %v2904_v40 = vand.u32 3, %v18967_v0  ;;  %v3226_v57 = vshrl.u32 %v3225_v36, 23  ;;  %v2435_v62 = vadd.f32 0.008332121, %v2434_v47  ;;  %v3082_v39 = vand.u32 31, %v3080_v1  ;;  %v18973_v36 = vld [vmem:[#allocation23_spill] sm:$0xff] }
 0x349   :  { %v2564_v32 = vshrl.u32 %v2546_v6, %v2562_v28  ;;  %v2567_v34 = vadd.s32 127, %v2566_v4  ;;  %v2428_v51 = vadd.f32 0.041655596, %v2427_v24  ;;  %vm2454_vm6 = vcmp.lt.s32.totalorder %v18968_v61, 0  ;;  %v18975_v6 = vld [vmem:[#allocation22_spill] sm:$0xff] }
 0x34a   :  { %v2750_v13 = vand.u32 3, %v18969_v33  ;;  %vm2906_vm1 = vcmp.eq.s32.totalorder %v2904_v40, 0  ;;  %vm2909_vm2 = vcmp.eq.s32.totalorder %v2904_v40, 2  ;;  %v18970_v48 = vand.u32 2147483647, %v18968_v61 }
 0x34b   :  { %v2565_v37 = vor.u32 %v2564_v32, %v2563_v12  ;;  %v2568_v0 = vshll.u32 %v2567_v34, 23  ;;  %vm2905_vm7 = vcmp.lt.s32.totalorder %v2904_v40, 2  ;;  %vm3060_vm11 = vcmp.eq.s32.totalorder %v3058_v53, 0  ;;  %v18979_v32 = vld [vmem:[#allocation29_spill] sm:$0xff] }
 0x34c   :  { %vm14880_vm14 = vcmp.le.f32.partialorder %v18970_v48, 0.7853982  ;;  %vm2752_vm3 = vcmp.eq.s32.totalorder %v2750_v13, 0  ;;  %vm2755_vm8 = vcmp.eq.s32.totalorder %v2750_v13, 2  ;;  %v18974_v47 = vxor.u32 2147483648, %v18973_v36 }
 0x34d   :  { %v18976_v28 = vxor.u32 2147483648, %v18975_v6  ;;  %v2436_v33 = vmul.f32 %v2435_v62, %v14829_v22  ;;  %v2569_v48 = vor.u32 4788187, %v2568_v0  ;;  %v2572_v14 = vcvt.s32.f32 %v2565_v37 }
 0x34e   :  { %v2908_v24 = vsel %vm2906_vm1, %v18975_v6, %v18974_v47  ;;  %vm2751_vm10 = vcmp.lt.s32.totalorder %v2750_v13, 2  ;;  %v18978_v12 = vxor.u32 2147483648, %v18977_v26  ;;  %v18980_v34 = vxor.u32 2147483648, %v18979_v32 }
 0x34f   :  { %v2911_v4 = vsel %vm2909_vm2, %v18976_v28, %v18973_v36  ;;  %vm3059_vm13 = vcmp.lt.s32.totalorder %v3058_v53, 2  ;;  %v18982_v47 = vxor.u32 2147483648, %v18981_v20  ;;  %v2570_v6 = vand.u32 2147483647, %v2569_v48 }
 0x350   :  { %v2754_v40 = vsel %vm2752_vm3, %v18979_v32, %v18978_v12  ;;  %v2757_v54 = vsel %vm2755_vm8, %v18980_v34, %v18977_v26  ;;  %v2912_v36 = vsel %vm2905_vm7, %v2908_v24, %v2911_v4  ;;  %vm3063_vm15 = vcmp.eq.s32.totalorder %v3058_v53, 2 }
 0x351   :  { %v3062_v11 = vsel %vm3060_vm11, %v18983_v52, %v18982_v47  ;;  %v14900_v62 = vsub.s32 32, %v3082_v39  ;;  %v18984_v13 = vxor.u32 2147483648, %v14825_v49  ;;  %v18985_v26 = vxor.u32 2147483648, %v18983_v52 }
 0x352   :  { %v18986_v28 = vand.u32 2147483647, %v18949_v31  ;;  %v11051_v32 = vadd.s32 4294967169, %v3226_v57  ;;  %v2573_v48 = vmul.f32 %v2572_v14, %v2570_v6  ;;  %v2758_v24 = vsel %vm2751_vm10, %v2754_v40, %v2757_v54  ;;  %v18991_v54 = vld [vmem:[#allocation21_spill] sm:$0xff] }
 0x353   :  { %v14907_v37 = vsel %vm2293_vm12, %v18984_v13, %v14859_v59  ;;  %v3065_v0 = vsel %vm3063_vm15, %v18985_v26, %v18981_v20  ;;  %v14914_v4 = vshrl.u32 %v3080_v1, 5  ;;  %v2429_v34 = vmul.f32 %v2428_v51, %v14829_v22 }
 0x354   :  { %v3075_v12 = vand.u32 8388607, %v18986_v28  ;;  %v3066_v53 = vsel %vm3059_vm13, %v3062_v11, %v3065_v0  ;;  %v2437_v47 = vadd.f32 -0.16666654, %v2436_v33  ;;  %vm18988_vm9 = vweird.f32 %v18987_v23 }
 0x355   :  { %v2913_v13 = vsel %vm18988_vm9, nan, %v2912_v36  ;;  %vm18990_vm12 = vweird.f32 %v18989_v46  ;;  %v2574_v52 = vxor.u32 2147483648, %v2573_v48  ;;  %v3088_v20 = vshll.u32 %v18883_v35, %v3082_v39 }
 0x356   :  { %v3067_v21 = vsel %vm18990_vm12, nan, %v3066_v53  ;;  %v3097_v26 = vshll.u32 %v18810_v16, %v3082_v39  ;;  %v3098_v14 = vshrl.u32 %v18811_v38, %v14900_v62  ;;  %vm18992_vm0 = vweird.f32 %v18991_v54 }
 0x357   :  { %10494 = vmatpush.msra.mxu0 %v3067_v21  ;;  %v2759_v11 = vsel %vm18992_vm0, nan, %v2758_v24  ;;  %v18993_v51 = vmov 2131351028   ;;  %v18994_v23 = vmov 2102212464   ;;  %v3095_v46 = vshrl.u32 %v18810_v16, %v14900_v62 }
 0x358   :  { %v3089_v1 = vshrl.u32 %v18993_v51, %v14900_v62  ;;  %v3094_v57 = vshll.u32 %v18994_v23, %v3082_v39  ;;  %vm2290_vm1 = vcmp.eq.s32.totalorder %v14820_v42, 0  ;;  %v2575_v33 = vsel %vm2454_vm6, %v2574_v52, %v2573_v48 }
 0x359   :  { %v2576_v40 = vsub.s32 4, %v14766_v30  ;;  %v3091_v21 = vshll.u32 %v18993_v51, %v3082_v39  ;;  %v3092_v6 = vshrl.u32 %v18994_v23, %v14900_v62  ;;  %10495 = vmatpush.msra.mxu0 %v2913_v13  ;;  %v2430_v36 = vadd.f32 -0.4999988, %v2429_v34 }
 0x35a   :  { %v2438_v0 = vmul.f32 %v2437_v47, %v14829_v22  ;;  %v14943_v28 = vsel %vm14880_vm14, %v18968_v61, %v2575_v33  ;;  %v3076_v24 = vor.u32 8388608, %v3075_v12  ;;  %v3085_v53 = vshll.u32 %v18773_v50, %v3082_v39 }
 0x35b   :  { %v2580_v48 = vmul.f32 %v14943_v28, %v14943_v28  ;;  %v3086_v52 = vshrl.u32 %v18883_v35, %v14900_v62  ;;  %v3099_v54 = vor.u32 %v3098_v14, %v3097_v26  ;;  %10496 = vmatpush.msra.mxu0 %v2759_v11  ;;  %v14950_v13 = vor.u32 %v3089_v1, %v3088_v20 }
 0x35c   :  { %v3096_v34 = vor.u32 %v3095_v46, %v3094_v57  ;;  %vm3103_vm2 = vcmp.lt.s32.totalorder %v14914_v4, 4  ;;  %v3232_v47 = vadd.s32 1, %v11051_v32  ;;  %v2577_v12 = vsel %vm2454_vm6, %v2576_v40, %v14766_v30 }
 0x35d   :  { %v2581_v33 = vmul.f32 -0.001358992, %v2580_v48  ;;  %v2588_v8 = vmul.f32 -0.00019511016, %v2580_v48  ;;  %v14956_v18 = vor.u32 %v3092_v6, %v3091_v21  ;;  %vm2289_vm7 = vcmp.lt.s32.totalorder %v14820_v42, 2 }
 0x35e   :  { %v2431_v39 = vmul.f32 %v2430_v36, %v14829_v22  ;;  %v2439_v26 = vadd.f32 1.0, %v2438_v0  ;;  %vm3100_vm11 = vcmp.lt.s32.totalorder %v14914_v4, 1  ;;  %vm3102_vm3 = vcmp.lt.s32.totalorder %v14914_v4, 3 }
 0x35f   :  { %v2582_v20 = vadd.f32 0.041655596, %v2581_v33  ;;  %v2589_v14 = vadd.f32 0.008332121, %v2588_v8  ;;  %v14962_v32 = vor.u32 %v3086_v52, %v3085_v53  ;;  %v3113_v30 = vsel %vm3103_vm2, %v3099_v54, 1326507024 }
 0x360   :  { %v2442_v11 = vand.u32 3, %v14869_v19  ;;  %v3109_v1 = vsel %vm3103_vm2, %v3096_v34, 920167782  ;;  %v14969_v57 = vshll.u32 %v3076_v24, 8  ;;  %vm3233_vm6 = vcmp.gt.s32.totalorder %v3232_v47, 0 }
 0x361   :  { %v14973_v22 = vsel %vm14880_vm14, 0, %v2577_v12  ;;  %v2583_v46 = vmul.f32 %v2582_v20, %v2580_v48  ;;  %v2590_v40 = vmul.f32 %v2589_v14, %v2580_v48  ;;  %vm3101_vm8 = vcmp.lt.s32.totalorder %v14914_v4, 2 }
 0x362   :  { %18995 = vst [vmem:[#allocation13_spill] sm:$0xff] %v14973_v22  ;;  %v14976_v8 = vadd.f32 1.0, %v2431_v39  ;;  %v14979_v21 = vmul.f32 %v2439_v26, %v14808_v56  ;;  %v3112_v6 = vsel %vm3100_vm11, %v14950_v13, %v14956_v18  ;;  %v3114_v36 = vsel %vm3102_vm3, %v3096_v34, %v3113_v30 }
 0x363   :  { %vm18545_vm14 = vweird.f32 %v18905_v27  ;;  %vm18546_vm10 = vweird.f32 %v18913_v2  ;;  %v2584_v3 = vadd.f32 -0.4999988, %v2583_v46  ;;  %v2591_v0 = vadd.f32 -0.16666654, %v2590_v40  ;;  %v19001_v27 = vld [vmem:[#allocation64_spill] sm:$0xff] }
 0x364   :  { %18996 = vst [vmem:[#allocation20_spill] sm:$0xff] %v14976_v8  ;;  %v3108_v56 = vsel %vm3100_vm11, %v14962_v32, %v14950_v13  ;;  %v3110_v24 = vsel %vm3102_vm3, %v14956_v18, %v3109_v1  ;;  %v18998_v53 = vxor.u32 2147483648, %v14859_v59  ;;  %vm2444_vm13 = vcmp.eq.s32.totalorder %v2442_v11, 0 }
 0x365   :  { %18997 = vst [vmem:[#allocation28_spill] sm:$0xff] %v14979_v21  ;;  %v2596_v54 = vand.u32 3, %v14973_v22  ;;  %v3234_v34 = vsel %vm3233_vm6, %v3232_v47, 0  ;;  %vm2447_vm15 = vcmp.eq.s32.totalorder %v2442_v11, 2  ;;  %v2585_v12 = vmul.f32 %v2584_v3, %v2580_v48 }
 0x366   :  { %v2292_v52 = vsel %vm2290_vm1, %v14825_v49, %v18998_v53  ;;  %v2592_v33 = vmul.f32 %v2591_v0, %v2580_v48  ;;  %v15005_v39 = vsel %vm3101_vm8, %v3112_v6, %v3114_v36  ;;  %vm2443_vm9 = vcmp.lt.s32.totalorder %v2442_v11, 2  ;;  %v19008_v49 = vld [vmem:[#allocation69_spill] sm:$0xff] }
 0x367   :  { %v18513_v26 = vxor.u32 2147483648, %v14979_v21  ;;  %v18512_v20 = vxor.u32 2147483648, %v14976_v8  ;;  %v15011_v14 = vsel %vm3101_vm8, %v3108_v56, %v3110_v24  ;;  %v15013_v30 = vadd.f32 1.0, %v2585_v12 }
 0x368   :  { %v2593_v1 = vadd.f32 1.0, %v2592_v33  ;;  %v3117_v47 = vand.u32 65535, %v14969_v57  ;;  %v3236_v46 = vand.u32 31, %v3234_v34  ;;  %vm2601_vm12 = vcmp.eq.s32.totalorder %v2596_v54, 2 }
 0x369   :  { %18999 = vst [vmem:[#allocation23_spill] sm:$0xff] %v15013_v30  ;;  %v2446_v48 = vsel %vm2444_vm13, %v14976_v8, %v18513_v26  ;;  %v2449_v40 = vsel %vm2447_vm15, %v18512_v20, %v14979_v21  ;;  %v3120_v6 = vshrl.u32 %v15005_v39, 16  ;;  %v2296_v36 = vsel %vm2289_vm7, %v2292_v52, %v14907_v37 }
 0x36a   :  { %v15027_v3 = vmul.f32 %v2593_v1, %v14943_v28  ;;  %v18511_v0 = vxor.u32 2147483648, %v15013_v30  ;;  %v3142_v56 = vshrl.u32 %v15011_v14, 16  ;;  %vm2597_vm0 = vcmp.lt.s32.totalorder %v2596_v54, 2 }
 0x36b   :  { %vm2598_vm1 = vcmp.eq.s32.totalorder %v2596_v54, 0  ;;  %v3118_v24 = vshrl.u32 %v14969_v57, 16  ;;  %v3119_v53 = vand.u32 65535, %v15005_v39  ;;  %v2450_v12 = vsel %vm2443_vm9, %v2446_v48, %v2449_v40 }
 0x36c   :  { %19000 = vst [vmem:[#allocation22_spill] sm:$0xff] %v15027_v3  ;;  %v18514_v33 = vxor.u32 2147483648, %v15027_v3  ;;  %v2603_v42 = vsel %vm2601_vm12, %v18511_v0, %v15027_v3  ;;  %v15038_v37 = vsub.s32 32, %v3236_v46  ;;  %v2143_v28 = vsel %vm18545_vm14, nan, %v14856_v44 }
 0x36d   :  { %v2297_v52 = vsel %vm18546_vm10, nan, %v2296_v36  ;;  %vm18548_vm7 = vweird.f32 %v18923_v41  ;;  %v15046_v39 = vmul.u32 %v3120_v6, %v3117_v47  ;;  %v3141_v1 = vand.u32 65535, %v15011_v14 }
 0x36e   :  { %v2600_v11 = vsel %vm2598_vm1, %v15013_v30, %v18514_v33  ;;  %v15052_v48 = vmul.u32 %v3142_v56, %v3117_v47  ;;  %v2451_v44 = vsel %vm18548_vm7, nan, %v2450_v12  ;;  %vm18547_vm6 = vweird.f32 %v18968_v61 }
 0x36f   :  { %v2604_v36 = vsel %vm2597_vm0, %v2600_v11, %v2603_v42  ;;  %v3121_v0 = vmul.u32 %v3119_v53, %v3117_v47  ;;  %v15061_v26 = vmul.u32 %v3119_v53, %v3118_v24  ;;  %v3251_v33 = vshll.u32 %v18810_v16, %v3236_v46  ;;  %v19002_v11 = vld [vmem:[#allocation63_spill] sm:$0xff] }
 0x370   :  { %v2605_v20 = vsel %vm18547_vm6, nan, %v2604_v36  ;;  %v3252_v14 = vshrl.u32 %v18811_v38, %v15038_v37  ;;  %vm18550_vm13 = vweird.f32 %v19001_v27  ;;  %v3125_v40 = vshll.u32 %v15046_v39, 16 }
 0x371   :  { %v15068_v12 = vshrl.u32 %v3234_v34, 5  ;;  %v3248_v54 = vshll.u32 %v18994_v23, %v3236_v46  ;;  %v3249_v42 = vshrl.u32 %v18810_v16, %v15038_v37  ;;  %10497 = vmatpush.msra.mxu0 %v2605_v20  ;;  %vm18549_vm15 = vweird.f32 %v19002_v11 }
 0x372   :  { %v3143_v53 = vmul.u32 %v3141_v1, %v3117_v47  ;;  %v15074_v36 = vmul.u32 %v3141_v1, %v3118_v24  ;;  %v3147_v2 = vshll.u32 %v15052_v48, 16  ;;  %v19003_v58 = vand.u32 2147483647, %v18964_v63  ;;  %v19005_v47 = vld [vmem:[#allocation84_spill] sm:$0xff] }
 0x373   :  { %v3242_v41 = vshll.u32 %v18883_v35, %v3236_v46  ;;  %v3243_v34 = vshrl.u32 %v18993_v51, %v15038_v37  ;;  %v3245_v10 = vshll.u32 %v18993_v51, %v3236_v46  ;;  %v3246_v20 = vshrl.u32 %v18994_v23, %v15038_v37  ;;  %10498 = vmatpush.msra.mxu0 %v2451_v44 }
 0x374   :  { %v3229_v61 = vand.u32 8388607, %v19003_v58  ;;  %vm903_vm9 = vcmp.lt.s32.totalorder %v19004_v15, 2  ;;  %vm1057_vm12 = vcmp.lt.s32.totalorder %v19005_v47, 2  ;;  %v3127_v1 = vshll.u32 %v15061_v26, 16 }
 0x375   :  { %v3239_v25 = vshll.u32 %v18773_v50, %v3236_v46  ;;  %v3240_v58 = vshrl.u32 %v18883_v35, %v15038_v37  ;;  %v3253_v5 = vor.u32 %v3252_v14, %v3251_v33  ;;  %vm15091_vm0 = vc.u32 %v3121_v0, %v3125_v40  ;;  %10499 = vmatpush.msra.mxu0 %v2297_v52  ;;  %v19009_v14 = vld [vmem:[#allocation71_spill] sm:$0xff]  ;;  %v19011_v52 = vld [vmem:[#allocation66_spill] sm:$0xff] }
 0x376   :  { %v3131_v3 = vadd.s32 %v3125_v40, %v3121_v0  ;;  %v3250_v8 = vor.u32 %v3249_v42, %v3248_v54  ;;  %vm3257_vm1 = vcmp.lt.s32.totalorder %v15068_v12, 4  ;;  %v3149_v44 = vshll.u32 %v15074_v36, 16 }
 0x377   :  { %vm3151_vm5 = vc.u32 %v3143_v53, %v3147_v2  ;;  %v15097_v21 = vadd.s32 %v3147_v2, %v3143_v53  ;;  %v3379_v46 = vand.u32 2139095040, %v19008_v49  ;;  %v3124_v59 = vmul.u32 %v3120_v6, %v3118_v24  ;;  %10500 = vmatpush.msra.mxu0 %v2143_v28 }
 0x378   :  { %v3146_v22 = vmul.u32 %v3142_v56, %v3118_v24  ;;  %v15100_v19 = vor.u32 %v3243_v34, %v3242_v41  ;;  %v15102_v33 = vor.u32 %v3246_v20, %v3245_v10  ;;  %vm749_vm4 = vcmp.lt.s32.totalorder %v19009_v14, 2  ;;  %v19014_v34 = vld [vmem:[#allocation82_spill] sm:$0xff]  ;;  %v19015_v20 = vld [vmem:[#allocation81_spill] sm:$0xff] }
 0x379   :  { %v15105_v0 = vor.u32 %v3240_v58, %v3239_v25  ;;  %vm3254_vm14 = vcmp.lt.s32.totalorder %v15068_v12, 1  ;;  %vm3256_vm10 = vcmp.lt.s32.totalorder %v15068_v12, 3  ;;  %v3267_v2 = vsel %vm3257_vm1, %v3253_v5, 1326507024  ;;  %10501 = vmatpush.msra.mxu0 %v14853_v7  ;;  %v19010_v7 = vld [vmem:[#allocation59_spill] sm:$0xff] }
 0x37a   :  { %v3130_v6 = vsel %vm15091_vm0, 1, %v18790_v43  ;;  %v3152_v41 = vsel %vm3151_vm5, 1, %v18790_v43  ;;  %v3230_v10 = vor.u32 8388608, %v3229_v61  ;;  %v3263_v56 = vsel %vm3257_vm1, %v3250_v8, 920167782  ;;  %v19016_v58 = vld [vmem:[#allocation87_spill] sm:$0xff] }
 0x37b   :  { %v1681_v25 = vsel %vm18550_vm13, nan, %v14840_v45  ;;  %vm3133_vm6 = vc.u32 %v3131_v3, %v3127_v1  ;;  %vm3155_vm7 = vc.u32 %v15097_v21, %v3149_v44  ;;  %v3380_v5 = vshrl.u32 %v3379_v46, 23  ;;  %10502 = vmatpush.msra.mxu0 %v14846_v60  ;;  %v19017_v46 = vld [vmem:[#allocation89_spill] sm:$0xff] }
 0x37c   :  { %v1527_v30 = vsel %vm18549_vm15, nan, %v14835_v17  ;;  %vm3255_vm5 = vcmp.lt.s32.totalorder %v15068_v12, 2  ;;  %v3266_v61 = vsel %vm3254_vm14, %v15100_v19, %v15102_v33  ;;  %v3268_v45 = vsel %vm3256_vm10, %v3250_v8, %v3267_v2  ;;  %v19048_v12 = vld [vmem:[#allocation37_spill] sm:$0xff] }
 0x37d   :  { %vm367_vm0 = vcmp.lt.s32.totalorder %v19010_v7, 0  ;;  %v3132_v3 = vadd.s32 %v3130_v6, %v3124_v59  ;;  %v3154_v24 = vadd.s32 %v3152_v41, %v3146_v22  ;;  %v3262_v17 = vsel %vm3254_vm14, %v15105_v0, %v15100_v19  ;;  %10503 = vmatpush.msra.mxu0 %v1681_v25  ;;  %v19012_v59 = vld [vmem:[#allocation62_spill] sm:$0xff]  ;;  %v19013_v22 = vld [vmem:[#allocation95_spill] sm:$0xff]  ;;  %v19018_v6 = vld [vmem:[#allocation92_spill] sm:$0xff] }
 0x37e   :  { %v3264_v28 = vsel %vm3256_vm10, %v15102_v33, %v3263_v56  ;;  %vm18579_vm15 = vweird.f32 %v19011_v52  ;;  %v3134_v40 = vsel %vm3133_vm6, 1, %v18790_v43  ;;  %v3156_v8 = vsel %vm3155_vm7, 1, %v18790_v43 }
 0x37f   :  { %v15146_v60 = vshll.u32 %v3230_v10, 8  ;;  %vm18568_vm13 = vweird.f32 %v19012_v59  ;;  %v1373_v54 = vsel %vm18579_vm15, nan, %v19013_v22  ;;  %v15154_v42 = vsel %vm3255_vm5, %v3266_v61, %v3268_v45  ;;  %10504 = vmatpush.msra.mxu0 %v1527_v30  ;;  %v19019_v61 = vld [vmem:[#allocation43_spill] sm:$0xff]  ;;  %v19020_v45 = vld [vmem:[#allocation58_spill] sm:$0xff] }
 0x380   :  { %v11054_v53 = vadd.s32 4294967169, %v3380_v5  ;;  %v910_v1 = vsel %vm903_vm9, %v19015_v20, %v19014_v34  ;;  %v1064_v2 = vsel %vm1057_vm12, %v19017_v46, %v19016_v58  ;;  %v1219_v41 = vsel %vm18568_vm13, nan, %v19018_v6  ;;  %v19021_v34 = vld [vmem:[#allocation53_spill] sm:$0xff] }
 0x381   :  { %v15169_v10 = vsel %vm3255_vm5, %v3262_v17, %v3264_v28  ;;  %v3126_v56 = vshrl.u32 %v15046_v39, 16  ;;  %v3136_v25 = vadd.s32 %v3134_v40, %v3132_v3  ;;  %v3148_v15 = vshrl.u32 %v15052_v48, 16  ;;  %10505 = vmatpush.msra.mxu0 %v1373_v54  ;;  %v19022_v17 = vld [vmem:[#allocation78_spill] sm:$0xff]  ;;  %v19023_v48 = vld [vmem:[#allocation77_spill] sm:$0xff] }
 0x382   :  { %v3158_v5 = vadd.s32 %v3156_v8, %v3154_v24  ;;  %vm18581_vm7 = vweird.f32 %v19019_v61  ;;  %vm18576_vm6 = vweird.f32 %v19020_v45  ;;  %v3271_v47 = vand.u32 65535, %v15146_v60 }
 0x383   :  { %v18551_v22 = vshrl.u32 %v15154_v42, 16  ;;  %vm18580_vm9 = vweird.f32 %v19021_v34  ;;  %v1065_v30 = vsel %vm18576_vm6, nan, %v1064_v2  ;;  %v3296_v39 = vshrl.u32 %v15169_v10, 16  ;;  %10506 = vmatpush.msra.mxu0 %v1219_v41  ;;  %v19025_v41 = vld [vmem:[#allocation49_spill] sm:$0xff] }
 0x384   :  { %v3386_v3 = vadd.s32 1, %v11054_v53  ;;  %v756_v24 = vsel %vm749_vm4, %v19023_v48, %v19022_v17  ;;  %v911_v28 = vsel %vm18580_vm9, nan, %v910_v1  ;;  %v3084_v40 = vshrl.u32 %v18773_v50, %v14900_v62  ;;  %v19024_v62 = vld [vmem:[#allocation48_spill] sm:$0xff] }
 0x385   :  { %v3105_v8 = vsel %vm3103_vm2, %v14956_v18, 2102212464  ;;  %v3128_v54 = vshrl.u32 %v15061_v26, 16  ;;  %v3137_v20 = vadd.s32 %v3136_v25, %v3126_v56  ;;  %v3150_v53 = vshrl.u32 %v15074_v36, 16  ;;  %10507 = vmatpush.msra.mxu0 %v1065_v30  ;;  %v19026_v25 = vld [vmem:[#allocation50_spill] sm:$0xff] }
 0x386   :  { %v3159_v58 = vadd.s32 %v3158_v5, %v3148_v15  ;;  %v3272_v14 = vshrl.u32 %v15146_v60, 16  ;;  %v3273_v46 = vand.u32 65535, %v15154_v42  ;;  %v15198_v1 = vmul.u32 %v18551_v22, %v3271_v47  ;;  %v19027_v5 = vld [vmem:[#allocation56_spill] sm:$0xff] }
 0x387   :  { %vm3387_vm4 = vcmp.gt.s32.totalorder %v3386_v3, 0  ;;  %v244_v2 = vfloor.f32 %v19024_v62  ;;  %v757_v18 = vsel %vm18581_vm7, nan, %v756_v24  ;;  %v3295_v26 = vand.u32 65535, %v15169_v10  ;;  %10508 = vmatpush.msra.mxu0 %v911_v28 }
 0x388   :  { %v15204_v6 = vmul.u32 %v3296_v39, %v3271_v47  ;;  %v245_v56 = vfloor.f32 %v19025_v41  ;;  %v246_v15 = vfloor.f32 %v19026_v25  ;;  %v431_v17 = vsel %vm367_vm0, %v19027_v5, %v19010_v7 }
 0x389   :  { %v3104_v30 = vsel %vm3100_vm11, %v3084_v40, %v14962_v32  ;;  %v3106_v10 = vsel %vm3102_vm3, %v14950_v13, %v3105_v8  ;;  %v15218_v48 = vadd.s32 %v3137_v20, %v3128_v54  ;;  %v15223_v24 = vadd.s32 %v15097_v21, %v3149_v44  ;;  %10509 = vmatpush.msra.mxu0 %v757_v18  ;;  %v19028_v32 = vld [vmem:[#allocation51_spill] sm:$0xff]  ;;  %v19029_v8 = vld [vmem:[#allocation52_spill] sm:$0xff] }
 0x38a   :  { %v3388_v62 = vsel %vm3387_vm4, %v3386_v3, 0  ;;  %v3160_v41 = vadd.s32 %v3159_v58, %v3150_v53  ;;  %v3275_v25 = vmul.u32 %v3273_v46, %v3271_v47  ;;  %v15225_v7 = vmul.u32 %v3273_v46, %v3272_v14  ;;  %v19030_v54 = vld [vmem:[#allocation44_spill] sm:$0xff]  ;;  %v19032_v3 = vld [vmem:[#allocation45_spill] sm:$0xff]  ;;  %v19034_v46 = vld [vmem:[#allocation46_spill] sm:$0xff] }
 0x38b   :  { %v3279_v5 = vshll.u32 %v15198_v1, 16  ;;  %v247_v28 = vfloor.f32 %v19028_v32  ;;  %v3297_v40 = vmul.u32 %v3295_v26, %v3271_v47  ;;  %v15229_v22 = vmul.u32 %v3295_v26, %v3272_v14 }
 0x38c   :  { %v3301_v13 = vshll.u32 %v15204_v6, 16  ;;  %v248_v36 = vfloor.f32 %v19029_v8  ;;  %v19031_v21 = vfloor.f32 %v19030_v54  ;;  %v19033_v20 = vfloor.f32 %v19032_v3 }
 0x38d   :  { %v3390_v58 = vand.u32 31, %v3388_v62  ;;  %v19035_v18 = vfloor.f32 %v19034_v46  ;;  %vm463_vm2 = vcmp.ge.s32.totalorder %v431_v17, 256  ;;  %v10987_v47 = vadd.s32 4294967040, %v431_v17 }
 0x38e   :  { %v15235_v44 = vcvt.f32.s32 %v19031_v21  ;;  %v15239_v53 = vcvt.f32.s32 %v19033_v20  ;;  %v3107_v26 = vsel %vm3101_vm8, %v3104_v30, %v3106_v10  ;;  %vm3163_vm11 = vc.u32 %v15218_v48, %v15223_v24  ;;  %v19036_v20 = vld [vmem:[#allocation47_spill] sm:$0xff] }
 0x38f   :  { %v15243_v59 = vcvt.f32.s32 %v19035_v18  ;;  %v3164_v32 = vadd.s32 1, %v3160_v41  ;;  %v3281_v8 = vshll.u32 %v15225_v7, 16  ;;  %vm3283_vm3 = vc.u32 %v3275_v25, %v3279_v5 }
 0x390   :  { %v3285_v54 = vadd.s32 %v3279_v5, %v3275_v25  ;;  %vm3305_vm12 = vc.u32 %v3297_v40, %v3301_v13  ;;  %v15251_v3 = vadd.s32 %v3301_v13, %v3297_v40  ;;  %v19037_v46 = vfloor.f32 %v19036_v20 }
 0x391   :  { %v15257_v45 = vcvt.f32.s32 %v244_v2  ;;  %v15259_v4 = vcvt.f32.s32 %v245_v56  ;;  %v15261_v30 = vsub.s32 32, %v3390_v58  ;;  %v527_v10 = vsel %vm463_vm2, %v10987_v47, %v431_v17 }
 0x392   :  { %v15255_v18 = vcvt.f32.s32 %v19037_v46  ;;  %v3161_v52 = vmul.u32 %v14969_v57, %v3107_v26  ;;  %v19038_v25 = vshrl.u32 %v15154_v42, 16  ;;  %v3300_v21 = vmul.u32 %v3296_v39, %v3272_v14 }
 0x393   :  { %v15266_v34 = vcvt.f32.s32 %v246_v15  ;;  %v3165_v40 = vsel %vm3163_vm11, %v3164_v32, %v3160_v41  ;;  %v3284_v2 = vsel %vm3283_vm3, 1, %v18790_v43  ;;  %v3306_v56 = vsel %vm3305_vm12, 1, %v18790_v43 }
 0x394   :  { %v3278_v5 = vmul.u32 %v19038_v25, %v3272_v14  ;;  %v15273_v13 = vcvt.f32.s32 %v247_v28  ;;  %v15275_v20 = vcvt.f32.s32 %v248_v36  ;;  %vm3287_vm8 = vc.u32 %v3285_v54, %v3281_v8 }
 0x395   :  { %v19039_v57 = vshll.u32 %v15229_v22, 16  ;;  %v559_v42 = vcvt.s32.f32 %v527_v10  ;;  %v18558_v39 = vand.u32 2147483647, %v19008_v49  ;;  %v3405_v14 = vshll.u32 %v18810_v16, %v3390_v58 }
 0x396   :  { %v3406_v15 = vshrl.u32 %v18811_v38, %v15261_v30  ;;  %v15284_v17 = vadd.s32 %v3165_v40, %v3161_v52  ;;  %v3286_v41 = vadd.s32 %v3284_v2, %v3278_v5  ;;  %v3308_v28 = vadd.s32 %v3306_v56, %v3300_v21 }
 0x397   :  { %vm3309_vm0 = vc.u32 %v15251_v3, %v19039_v57  ;;  %v15286_v47 = vshrl.u32 %v3388_v62, 5  ;;  %v3288_v36 = vsel %vm3287_vm8, 1, %v18790_v43  ;;  %v3402_v32 = vshll.u32 %v18994_v23, %v3390_v58 }
 0x398   :  { %v3310_v26 = vsel %vm3309_vm0, 1, %v18790_v43  ;;  %v3403_v8 = vshrl.u32 %v18810_v16, %v15261_v30  ;;  %v3396_v54 = vshll.u32 %v18883_v35, %v3390_v58  ;;  %v3397_v46 = vshrl.u32 %v18993_v51, %v15261_v30 }
 0x399   :  { %v3399_v52 = vshll.u32 %v18993_v51, %v3390_v58  ;;  %v3400_v62 = vshrl.u32 %v18994_v23, %v15261_v30  ;;  %v15299_v21 = vmul.f32 0.024543693, %v559_v42  ;;  %v3302_v10 = vshrl.u32 %v15204_v6, 16 }
 0x39a   :  { %v3383_v25 = vand.u32 8388607, %v18558_v39  ;;  %v3407_v5 = vor.u32 %v3406_v15, %v3405_v14  ;;  %v3312_v40 = vadd.s32 %v3310_v26, %v3308_v28  ;;  %v3393_v2 = vshll.u32 %v18773_v50, %v3390_v58 }
 0x39b   :  { %19040 = vst [vmem:[#allocation30_spill] sm:$0xff] %v15299_v21  ;;  %v3394_v56 = vshrl.u32 %v18883_v35, %v15261_v30  ;;  %vm3411_vm4 = vcmp.lt.s32.totalorder %v15286_v47, 4  ;;  %v304_v57 = vmul.u32 256, %v15235_v44  ;;  %v3280_v61 = vshrl.u32 %v15198_v1, 16 }
 0x39c   :  { %v3290_v42 = vadd.s32 %v3288_v36, %v3286_v41  ;;  %v3404_v11 = vor.u32 %v3403_v8, %v3402_v32  ;;  %v3167_v6 = vadd.s32 536870912, %v15284_v17  ;;  %v3238_v39 = vshrl.u32 %v18773_v50, %v15038_v37 }
 0x39d   :  { %v15313_v14 = vor.u32 %v3397_v46, %v3396_v54  ;;  %v15315_v15 = vor.u32 %v3400_v62, %v3399_v52  ;;  %vm3408_vm2 = vcmp.lt.s32.totalorder %v15286_v47, 1  ;;  %vm3410_vm11 = vcmp.lt.s32.totalorder %v15286_v47, 3 }
 0x39e   :  { %v3421_v44 = vsel %vm3411_vm4, %v3407_v5, 1326507024  ;;  %v3533_v1 = vand.u32 2139095040, %v15299_v21  ;;  %v3304_v58 = vshrl.u32 %v15229_v22, 16  ;;  %v3313_v41 = vadd.s32 %v3312_v40, %v3302_v10 }
 0x39f   :  { %v3384_v28 = vor.u32 8388608, %v3383_v25  ;;  %v15323_v36 = vor.u32 %v3394_v56, %v3393_v2  ;;  %v305_v37 = vmul.u32 256, %v15239_v53  ;;  %v3282_v26 = vshrl.u32 %v15225_v7, 16 }
 0x3a0   :  { %v3291_v32 = vadd.s32 %v3290_v42, %v3280_v61  ;;  %v3417_v8 = vsel %vm3411_vm4, %v3404_v11, 920167782  ;;  %v3259_v54 = vsel %vm3257_vm1, %v15102_v33, 2102212464  ;;  %vm18582_vm3 = vcmp.lt.s32.totalorder %v15286_v47, 2 }
 0x3a1   :  { %v3420_v46 = vsel %vm3408_vm2, %v15313_v14, %v15315_v15  ;;  %v3422_v53 = vsel %vm3410_vm11, %v3404_v11, %v3421_v44  ;;  %v306_v7 = vmul.u32 256, %v15243_v59  ;;  %v15340_v61 = vshrl.u32 %v3167_v6, 30 }
 0x3a2   :  { %v3258_v52 = vsel %vm3254_vm14, %v3238_v39, %v15105_v0  ;;  %v3534_v62 = vshrl.u32 %v3533_v1, 23  ;;  %v3314_v33 = vadd.s32 %v3313_v41, %v3304_v58  ;;  %v3416_v10 = vsel %vm3408_vm2, %v15323_v36, %v15313_v14 }
 0x3a3   :  { %19041 = vst [vmem:[#allocation29_spill] sm:$0xff] %v15340_v61  ;;  %v3418_v25 = vsel %vm3410_vm11, %v15315_v15, %v3417_v8  ;;  %v15352_v11 = vshll.u32 %v3384_v28, 8  ;;  %v3260_v59 = vsel %vm3256_vm10, %v15100_v19, %v3259_v54  ;;  %v15357_v5 = vadd.s32 %v3291_v32, %v3282_v26  ;;  %v19047_v26 = vld [vmem:[#allocation36_spill] sm:$0xff]  ;;  %v19049_v54 = vld [vmem:[#allocation38_spill] sm:$0xff] }
 0x3a4   :  { %v19043_v0 = vshll.u32 %v15229_v22, 16  ;;  %v15366_v40 = vsel %vm18582_vm3, %v3420_v46, %v3422_v53  ;;  %v307_v2 = vmul.u32 256, %v15255_v18  ;;  %v308_v56 = vmul.u32 256, %v15257_v45 }
 0x3a5   :  { %19042 = vst [vmem:[#allocation15_spill] sm:$0xff] %v15357_v5  ;;  %v309_v42 = vmul.u32 256, %v15259_v4  ;;  %v310_v6 = vmul.u32 256, %v15266_v34  ;;  %v311_v19 = vmul.u32 256, %v15273_v13  ;;  %v3169_v44 = vshll.u32 %v15340_v61, 30  ;;  %v19045_v34 = vld [vmem:[#allocation34_spill] sm:$0xff] }
 0x3a6   :  { %v15362_v39 = vadd.s32 %v15251_v3, %v19043_v0  ;;  %v15376_v22 = vsel %vm18582_vm3, %v3416_v10, %v3418_v25  ;;  %v11057_v3 = vadd.s32 4294967169, %v3534_v62  ;;  %v3261_v1 = vsel %vm3255_vm5, %v3258_v52, %v3260_v59  ;;  %v19046_v13 = vld [vmem:[#allocation35_spill] sm:$0xff]  ;;  %v19052_v0 = vld [vmem:[#allocation40_spill] sm:$0xff] }
 0x3a7   :  { %v3318_v58 = vadd.s32 1, %v3314_v33  ;;  %v3425_v18 = vand.u32 65535, %v15352_v11  ;;  %v3428_v45 = vshrl.u32 %v15366_v40, 16  ;;  %v312_v4 = vmul.u32 256, %v15275_v20  ;;  %v19050_v20 = vld [vmem:[#allocation39_spill] sm:$0xff] }
 0x3a8   :  { %19044 = vst [vmem:[#allocation14_spill] sm:$0xff] %v15362_v39  ;;  %v336_v41 = vsub.s32 %v19045_v34, %v304_v57  ;;  %v15385_v28 = vsub.s32 %v19046_v13, %v305_v37  ;;  %vm3317_vm14 = vc.u32 %v15357_v5, %v15362_v39  ;;  %v15390_v32 = vsub.s32 %v19047_v26, %v306_v7 }
 0x3a9   :  { %v15393_v8 = vsub.s32 %v19048_v12, %v307_v2  ;;  %v15396_v46 = vsub.s32 %v19049_v54, %v308_v56  ;;  %v3450_v53 = vshrl.u32 %v15376_v22, 16  ;;  %v15400_v52 = vsub.s32 %v19050_v20, %v309_v42  ;;  %v19053_v56 = vld [vmem:[#allocation41_spill] sm:$0xff]  ;;  %v19054_v42 = vld [vmem:[#allocation42_spill] sm:$0xff] }
 0x3aa   :  { %v15403_v57 = vsub.s32 %v15284_v17, %v3169_v44  ;;  %v3315_v37 = vmul.u32 %v15146_v60, %v3261_v1  ;;  %v3540_v62 = vadd.s32 1, %v11057_v3  ;;  %v3319_v10 = vsel %vm3317_vm14, %v3318_v58, %v3314_v33 }
 0x3ab   :  { %v3426_v7 = vshrl.u32 %v15352_v11, 16  ;;  %v3427_v25 = vand.u32 65535, %v15366_v40  ;;  %v15408_v59 = vmul.u32 %v3428_v45, %v3425_v18  ;;  %v15411_v2 = vsub.s32 %v19052_v0, %v310_v6 }
 0x3ac   :  { %19051 = vst [vmem:[#allocation12_spill] sm:$0xff] %v15403_v57  ;;  %v15414_v34 = vsub.s32 %v19053_v56, %v311_v19  ;;  %v15417_v13 = vsub.s32 %v19054_v42, %v312_v4  ;;  %vm3541_vm10 = vcmp.gt.s32.totalorder %v3540_v62, 0  ;;  %v400_v17 = vadd.s32 256, %v336_v41 }
 0x3ad   :  { %v3449_v60 = vand.u32 65535, %v15376_v22  ;;  %v15420_v33 = vmul.u32 %v3450_v53, %v3425_v18  ;;  %v3542_v44 = vsel %vm3541_vm10, %v3540_v62, 0  ;;  %vm368_vm1 = vcmp.lt.s32.totalorder %v336_v41, 0 }
 0x3ae   :  { %vm3171_vm5 = vcmp.lt.s32.totalorder %v15403_v57, 0  ;;  %v3172_v40 = vsub.s32 0, %v15403_v57  ;;  %v15424_v6 = vadd.s32 %v3319_v10, %v3315_v37  ;;  %v3429_v3 = vmul.u32 %v3427_v25, %v3425_v18 }
 0x3af   :  { %v15426_v19 = vmul.u32 %v3427_v25, %v3426_v7  ;;  %v3433_v1 = vshll.u32 %v15408_v59, 16  ;;  %v3544_v58 = vand.u32 31, %v3542_v44  ;;  %v15430_v4 = vadd.s32 256, %v15385_v28 }
 0x3b0   :  { %v15433_v22 = vadd.s32 256, %v15390_v32  ;;  %v15436_v26 = vadd.s32 256, %v15393_v8  ;;  %v15439_v12 = vadd.s32 256, %v15396_v46  ;;  %v432_v54 = vsel %vm368_vm1, %v400_v17, %v336_v41 }
 0x3b1   :  { %v3451_v20 = vmul.u32 %v3449_v60, %v3425_v18  ;;  %v15441_v37 = vmul.u32 %v3449_v60, %v3426_v7  ;;  %v3455_v62 = vshll.u32 %v15420_v33, 16  ;;  %v15445_v10 = vadd.s32 256, %v15400_v52 }
 0x3b2   :  { %v15448_v25 = vadd.s32 256, %v15411_v2  ;;  %v3173_v0 = vsel %vm3171_vm5, %v3172_v40, %v15403_v57  ;;  %v3321_v56 = vadd.s32 536870912, %v15424_v6  ;;  %v3435_v42 = vshll.u32 %v15426_v19, 16 }
 0x3b3   :  { %vm3437_vm12 = vc.u32 %v3429_v3, %v3433_v1  ;;  %v3439_v18 = vadd.s32 %v3433_v1, %v3429_v3  ;;  %v15455_v41 = vsub.s32 32, %v3544_v58  ;;  %v15458_v17 = vadd.s32 256, %v15414_v34 }
 0x3b4   :  { %v15461_v60 = vadd.s32 256, %v15417_v13  ;;  %vm464_vm8 = vcmp.ge.s32.totalorder %v432_v54, 256  ;;  %v10988_v27 = vadd.s32 4294967040, %v432_v54  ;;  %v3432_v55 = vmul.u32 %v3428_v45, %v3426_v7 }
 0x3b5   :  { %19055 = vst [vmem:[#allocation10_spill] sm:$0xff] %v15455_v41  ;;  %v18569_v9 = vshll.u32 %v15441_v37, 16  ;;  %vm3459_vm0 = vc.u32 %v3451_v20, %v3455_v62  ;;  %v15464_v40 = vadd.s32 %v3455_v62, %v3451_v20  ;;  %v3174_v29 = vclz %v3173_v0 }
 0x3b6   :  { %v15466_v49 = vshrl.u32 %v3321_v56, 30  ;;  %v3438_v3 = vsel %vm3437_vm12, 1, %v18790_v43  ;;  %vm15470_vm14 = vc.u32 %v3439_v18, %v3435_v42  ;;  %v3454_v63 = vmul.u32 %v3450_v53, %v3426_v7 }
 0x3b7   :  { %v3556_v31 = vshll.u32 %v18994_v23, %v3544_v58  ;;  %v3557_v45 = vshrl.u32 %v18810_v16, %v15455_v41  ;;  %v3460_v20 = vsel %vm3459_vm0, 1, %v18790_v43  ;;  %v15478_v62 = vshrl.u32 %v3542_v44, 5 }
 0x3b8   :  { %v3559_v0 = vshll.u32 %v18810_v16, %v3544_v58  ;;  %v3560_v56 = vshrl.u32 %v18811_v38, %v15455_v41  ;;  %vm369_vm10 = vcmp.lt.s32.totalorder %v15385_v28, 0  ;;  %vm370_vm1 = vcmp.lt.s32.totalorder %v15390_v32, 0 }
 0x3b9   :  { %v3440_v42 = vadd.s32 %v3438_v3, %v3432_v55  ;;  %vm3463_vm5 = vc.u32 %v15464_v40, %v18569_v9  ;;  %v3547_v53 = vshll.u32 %v18773_v50, %v3544_v58  ;;  %v3550_v7 = vshll.u32 %v18883_v35, %v3544_v58 }
 0x3ba   :  { %vm371_vm12 = vcmp.lt.s32.totalorder %v15393_v8, 0  ;;  %vm372_vm0 = vcmp.lt.s32.totalorder %v15396_v46, 0  ;;  %vm373_vm13 = vcmp.lt.s32.totalorder %v15400_v52, 0  ;;  %v3548_v44 = vshrl.u32 %v18883_v35, %v15455_v41 }
 0x3bb   :  { %v3551_v55 = vshrl.u32 %v18993_v51, %v15455_v41  ;;  %v3553_v18 = vshll.u32 %v18993_v51, %v3544_v58  ;;  %v3554_v3 = vshrl.u32 %v18994_v23, %v15455_v41  ;;  %v11049_v9 = vadd.s32 4294967294, %v3174_v29 }
 0x3bc   :  { %v3442_v1 = vsel %vm15470_vm14, 1, %v18790_v43  ;;  %v3462_v38 = vadd.s32 %v3460_v20, %v3454_v63  ;;  %v3558_v16 = vor.u32 %v3557_v45, %v3556_v31  ;;  %v3464_v39 = vsel %vm3463_vm5, 1, %v18790_v43 }
 0x3bd   :  { %v19058_v5 = vand.u32 2147483647, %v15299_v21  ;;  %v3561_v57 = vor.u32 %v3560_v56, %v3559_v0  ;;  %vm3565_vm6 = vcmp.lt.s32.totalorder %v15478_v62, 4  ;;  %v528_v58 = vsel %vm464_vm8, %v10988_v27, %v432_v54 }
 0x3be   :  { %v3323_v51 = vshll.u32 %v15466_v49, 30  ;;  %v3434_v29 = vshrl.u32 %v15408_v59, 16  ;;  %v3456_v41 = vshrl.u32 %v15420_v33, 16  ;;  %vm374_vm14 = vcmp.lt.s32.totalorder %v15411_v2, 0 }
 0x3bf   :  { %v3537_v35 = vand.u32 8388607, %v19058_v5  ;;  %vm375_vm15 = vcmp.lt.s32.totalorder %v15414_v34, 0  ;;  %vm376_vm5 = vcmp.lt.s32.totalorder %v15417_v13, 0  ;;  %v3444_v31 = vadd.s32 %v3442_v1, %v3440_v42 }
 0x3c0   :  { %v15514_v63 = vor.u32 %v3548_v44, %v3547_v53  ;;  %v15516_v61 = vor.u32 %v3551_v55, %v3550_v7  ;;  %v15518_v5 = vor.u32 %v3554_v3, %v3553_v18  ;;  %v3466_v27 = vadd.s32 %v3464_v39, %v3462_v38 }
 0x3c1   :  { %vm3562_vm8 = vcmp.lt.s32.totalorder %v15478_v62, 1  ;;  %vm3564_vm9 = vcmp.lt.s32.totalorder %v15478_v62, 3  ;;  %v3571_v59 = vsel %vm3565_vm6, %v3558_v16, 920167782  ;;  %v560_v33 = vcvt.s32.f32 %v528_v58 }
 0x3c2   :  { %vm11050_vm7 = vcmp.lt.s32.totalorder %v11049_v9, 0  ;;  %v3538_v54 = vor.u32 8388608, %v3537_v35  ;;  %v3575_v1 = vsel %vm3565_vm6, %v3561_v57, 1326507024  ;;  %v15527_v45 = vsub.s32 %v15424_v6, %v3323_v51 }
 0x3c3   :  { %v3392_v20 = vshrl.u32 %v18773_v50, %v15261_v30  ;;  %v3413_v38 = vsel %vm3411_vm4, %v15315_v15, 2102212464  ;;  %v3436_v39 = vshrl.u32 %v15426_v19, 16  ;;  %v3458_v0 = vshrl.u32 %v15441_v37, 16 }
 0x3c4   :  { %vm3563_vm3 = vcmp.lt.s32.totalorder %v15478_v62, 2  ;;  %v3570_v35 = vsel %vm3562_vm8, %v15514_v63, %v15516_v61  ;;  %v3572_v51 = vsel %vm3564_vm9, %v15518_v5, %v3571_v59  ;;  %v3445_v30 = vadd.s32 %v3444_v31, %v3434_v29 }
 0x3c5   :  { %v3467_v57 = vadd.s32 %v3466_v27, %v3456_v41  ;;  %v3574_v15 = vsel %vm3562_vm8, %v15516_v61, %v15518_v5  ;;  %v3576_v6 = vsel %vm3564_vm9, %v3558_v16, %v3575_v1  ;;  %v433_v19 = vsel %vm369_vm10, %v15430_v4, %v15385_v28 }
 0x3c6   :  { %v15558_v56 = vsel %vm370_vm1, %v15433_v22, %v15390_v32  ;;  %v15560_v41 = vmul.f32 0.024543693, %v560_v33  ;;  %v15562_v42 = vshll.u32 %v3538_v54, 8  ;;  %v15568_v16 = vsel %vm371_vm12, %v15436_v26, %v15393_v8 }
 0x3c7   :  { %v15574_v28 = vsel %vm372_vm0, %v15439_v12, %v15396_v46  ;;  %v15580_v32 = vsel %vm373_vm13, %v15445_v10, %v15400_v52  ;;  %v15584_v4 = vsel %vm3563_vm3, %v3570_v35, %v3572_v51  ;;  %v15587_v22 = vsel %vm11050_vm7, 0, %v11049_v9 }
 0x3c8   :  { %19059 = vst [vmem:[#allocation21_spill] sm:$0xff] %v15560_v41  ;;  %v3412_v8 = vsel %vm3408_vm2, %v3392_v20, %v15323_v36  ;;  %v3414_v46 = vsel %vm3410_vm11, %v15313_v14, %v3413_v38  ;;  %v15597_v26 = vsel %vm3563_vm3, %v3574_v15, %v3576_v6  ;;  %v3326_v52 = vsub.s32 0, %v15527_v45 }
 0x3c9   :  { %v15600_v12 = vadd.s32 %v3445_v30, %v3436_v39  ;;  %v19060_v10 = vshll.u32 %v15441_v37, 16  ;;  %v3468_v53 = vadd.s32 %v3467_v57, %v3458_v0  ;;  %vm3325_vm13 = vcmp.lt.s32.totalorder %v15527_v45, 0 }
 0x3ca   :  { %v3579_v36 = vand.u32 65535, %v15562_v42  ;;  %v3604_v14 = vshrl.u32 %v15584_v4, 16  ;;  %v3687_v7 = vand.u32 2139095040, %v15560_v41  ;;  %v15615_v44 = vsel %vm374_vm14, %v15448_v25, %v15411_v2 }
 0x3cb   :  { %v15605_v9 = vadd.s32 %v15464_v40, %v19060_v10  ;;  %v15621_v37 = vsel %vm375_vm15, %v15458_v17, %v15414_v34  ;;  %v15627_v40 = vsel %vm376_vm5, %v15461_v60, %v15417_v13  ;;  %v3582_v55 = vshrl.u32 %v15597_v26, 16 }
 0x3cc   :  { %vm465_vm7 = vcmp.ge.s32.totalorder %v433_v19, 256  ;;  %v10989_v18 = vadd.s32 4294967040, %v433_v19  ;;  %v10990_v3 = vadd.s32 4294967040, %v15558_v56  ;;  %v3182_v2 = vsub.s32 4294967266, %v15587_v22 }
 0x3cd   :  { %vm466_vm4 = vcmp.ge.s32.totalorder %v15558_v56, 256  ;;  %v3327_v25 = vsel %vm3325_vm13, %v3326_v52, %v15527_v45  ;;  %vm19061_vm15 = vcmp.lt.s32.totalorder %v15286_v47, 2  ;;  %vm3471_vm2 = vc.u32 %v15600_v12, %v15605_v9 }
 0x3ce   :  { %v3415_v34 = vsel %vm19061_vm15, %v3412_v8, %v3414_v46  ;;  %v3472_v13 = vadd.s32 1, %v3468_v53  ;;  %v3580_v17 = vshrl.u32 %v15562_v42, 16  ;;  %v3603_v60 = vand.u32 65535, %v15584_v4  ;;  %v19062_v46 = vld [vmem:[#allocation12_spill] sm:$0xff] }
 0x3cf   :  { %v15640_v58 = vmul.u32 %v3604_v14, %v3579_v36  ;;  %v3688_v29 = vshrl.u32 %v3687_v7, 23  ;;  %v10991_v31 = vadd.s32 4294967040, %v15568_v16  ;;  %v10992_v27 = vadd.s32 4294967040, %v15574_v28 }
 0x3d0   :  { %v3581_v59 = vand.u32 65535, %v15597_v26  ;;  %v15645_v33 = vmul.u32 %v3582_v55, %v3579_v36  ;;  %vm467_vm11 = vcmp.ge.s32.totalorder %v15568_v16, 256  ;;  %vm468_vm10 = vcmp.ge.s32.totalorder %v15574_v28, 256 }
 0x3d1   :  { %v10993_v47 = vadd.s32 4294967040, %v15580_v32  ;;  %v3162_v54 = vadd.s32 %v15223_v24, %v15218_v48  ;;  %v3178_v1 = vsub.s32 32, %v15587_v22  ;;  %v11060_v20 = vadd.s32 4294967169, %v3688_v29 }
 0x3d2   :  { %vm469_vm1 = vcmp.ge.s32.totalorder %v15580_v32, 256  ;;  %v3183_v38 = vadd.s32 127, %v3182_v2  ;;  %v3328_v39 = vclz %v3327_v25  ;;  %v3469_v0 = vmul.u32 %v15352_v11, %v3415_v34 }
 0x3d3   :  { %v3473_v35 = vsel %vm3471_vm2, %v3472_v13, %v3468_v53  ;;  %v3605_v51 = vmul.u32 %v3603_v60, %v3579_v36  ;;  %v15658_v30 = vmul.u32 %v3603_v60, %v3580_v17  ;;  %v3609_v57 = vshll.u32 %v15640_v58, 16 }
 0x3d4   :  { %v3694_v15 = vadd.s32 1, %v11060_v20  ;;  %v15662_v48 = vadd.s32 4294967040, %v15615_v44  ;;  %v3583_v24 = vmul.u32 %v3581_v59, %v3579_v36  ;;  %v15664_v6 = vmul.u32 %v3581_v59, %v3580_v17 }
 0x3d5   :  { %v3587_v4 = vshll.u32 %v15645_v33, 16  ;;  %v15668_v11 = vadd.s32 4294967040, %v15621_v37  ;;  %v529_v8 = vsel %vm465_vm7, %v10989_v18, %v433_v19  ;;  %v3179_v26 = vshll.u32 %v19062_v46, %v15587_v22 }
 0x3d6   :  { %vm3695_vm12 = vcmp.gt.s32.totalorder %v3694_v15, 0  ;;  %v3180_v52 = vshrl.u32 %v3162_v54, %v3178_v1  ;;  %v3184_v10 = vshll.u32 %v3183_v38, 23  ;;  %v15673_v53 = vadd.s32 %v3473_v35, %v3469_v0  ;;  %v19064_v0 = vld [vmem:[#allocation15_spill] sm:$0xff]  ;;  %v19065_v35 = vld [vmem:[#allocation14_spill] sm:$0xff] }
 0x3d7   :  { %v3696_v7 = vsel %vm3695_vm12, %v3694_v15, 0  ;;  %v11052_v2 = vadd.s32 4294967294, %v3328_v39  ;;  %v18583_v36 = vshll.u32 %v15658_v30, 16  ;;  %vm3613_vm0 = vc.u32 %v3605_v51, %v3609_v57 }
 0x3d8   :  { %v15676_v25 = vadd.s32 %v3609_v57, %v3605_v51  ;;  %v3589_v34 = vshll.u32 %v15664_v6, 16  ;;  %vm3591_vm14 = vc.u32 %v3583_v24, %v3587_v4  ;;  %v3593_v13 = vadd.s32 %v3587_v4, %v3583_v24 }
 0x3d9   :  { %v3698_v19 = vand.u32 31, %v3696_v7  ;;  %v15680_v18 = vadd.s32 4294967040, %v15627_v40  ;;  %v15685_v22 = vsel %vm466_vm4, %v10990_v3, %v15558_v56  ;;  %v561_v60 = vcvt.s32.f32 %v529_v8 }
 0x3da   :  { %v3608_v29 = vmul.u32 %v3604_v14, %v3580_v17  ;;  %v15687_v59 = vor.u32 %v3180_v52, %v3179_v26  ;;  %v3475_v54 = vadd.s32 536870912, %v15673_v53  ;;  %v3586_v1 = vmul.u32 %v3582_v55, %v3580_v17 }
 0x3db   :  { %v3614_v20 = vsel %vm3613_vm0, 1, %v18790_v43  ;;  %v15691_v38 = vor.u32 4788187, %v3184_v10  ;;  %vm11053_vm5 = vcmp.lt.s32.totalorder %v11052_v2, 0  ;;  %v3592_v39 = vsel %vm3591_vm14, 1, %v18790_v43 }
 0x3dc   :  { %vm3617_vm13 = vc.u32 %v15676_v25, %v18583_v36  ;;  %v15700_v56 = vsel %vm467_vm11, %v10991_v31, %v15568_v16  ;;  %v15705_v14 = vsel %vm468_vm10, %v10992_v27, %v15574_v28  ;;  %vm3595_vm7 = vc.u32 %v3593_v13, %v3589_v34 }
 0x3dd   :  { %v15707_v55 = vsub.s32 32, %v3698_v19  ;;  %v15712_v3 = vsel %vm469_vm1, %v10993_v47, %v15580_v32  ;;  %v15714_v17 = vmul.f32 0.024543693, %v561_v60  ;;  %v15718_v51 = vadd.s32 %v19065_v35, %v19064_v0 }
 0x3de   :  { %v3616_v16 = vadd.s32 %v3614_v20, %v3608_v29  ;;  %v15720_v31 = vsel %vm11053_vm5, 0, %v11052_v2  ;;  %v15722_v57 = vshrl.u32 %v3475_v54, 30  ;;  %v3594_v28 = vadd.s32 %v3592_v39, %v3586_v1 }
 0x3df   :  { %19063 = vst [vmem:[#allocation75_spill] sm:$0xff] %v15714_v17  ;;  %v3618_v27 = vsel %vm3617_vm13, 1, %v18790_v43  ;;  %v3186_v15 = vand.u32 2147483647, %v15691_v38  ;;  %v3188_v24 = vcvt.s32.f32 %v15687_v59  ;;  %v3596_v47 = vsel %vm3595_vm7, 1, %v18790_v43 }
 0x3e0   :  { %19066 = vst [vmem:[#allocation84_spill] sm:$0xff] %v15722_v57  ;;  %v3610_v4 = vshrl.u32 %v15640_v58, 16  ;;  %v18588_v8 = vand.u32 2147483647, %v15560_v41  ;;  %v19067_v46 = vmov 920167782   ;;  %v3620_v2 = vadd.s32 %v3618_v27, %v3616_v16 }
 0x3e1   :  { %v3713_v26 = vshll.u32 %v19067_v46, %v3698_v19  ;;  %v19068_v52 = vmov 1326507024   ;;  %vm470_vm4 = vcmp.ge.s32.totalorder %v15615_v44, 256  ;;  %v15735_v34 = vshrl.u32 %v3696_v7, 5  ;;  %v19069_v58 = vld [vmem:[#allocation10_spill] sm:$0xff] }
 0x3e2   :  { %v3714_v10 = vshrl.u32 %v19068_v52, %v15707_v55  ;;  %v3710_v13 = vshll.u32 %v18994_v23, %v3698_v19  ;;  %v3711_v60 = vshrl.u32 %v19067_v46, %v15707_v55  ;;  %v3477_v29 = vshll.u32 %v15722_v57, 30 }
 0x3e3   :  { %v3546_v59 = vshrl.u32 %v18773_v50, %v19069_v58  ;;  %v3588_v54 = vshrl.u32 %v15645_v33, 16  ;;  %v3598_v1 = vadd.s32 %v3596_v47, %v3594_v28  ;;  %v19070_v20 = vmov 2475754826  }
 0x3e4   :  { %v3704_v38 = vshll.u32 %v19070_v20, %v3698_v19  ;;  %v19071_v39 = vmov 2131351028   ;;  %v3708_v35 = vshrl.u32 %v18994_v23, %v15707_v55  ;;  %v3612_v16 = vshrl.u32 %v15658_v30, 16 }
 0x3e5   :  { %v3705_v0 = vshrl.u32 %v19071_v39, %v15707_v55  ;;  %v3707_v7 = vshll.u32 %v19071_v39, %v3698_v19  ;;  %v3701_v27 = vshll.u32 %v18773_v50, %v3698_v19  ;;  %v3702_v58 = vshrl.u32 %v19070_v20, %v15707_v55 }
 0x3e6   :  { %v3715_v32 = vor.u32 %v3714_v10, %v3713_v26  ;;  %vm471_vm15 = vcmp.ge.s32.totalorder %v15621_v37, 256  ;;  %v3621_v33 = vadd.s32 %v3620_v2, %v3610_v4  ;;  %v3691_v28 = vand.u32 8388607, %v18588_v8 }
 0x3e7   :  { %v3712_v47 = vor.u32 %v3711_v60, %v3710_v13  ;;  %vm3719_vm2 = vcmp.lt.s32.totalorder %v15735_v34, 4  ;;  %v3336_v36 = vsub.s32 4294967266, %v15720_v31  ;;  %v3590_v21 = vshrl.u32 %v15664_v6, 16 }
 0x3e8   :  { %v3599_v57 = vadd.s32 %v3598_v1, %v3588_v54  ;;  %v3841_v19 = vand.u32 2139095040, %v15714_v17  ;;  %vm472_vm11 = vcmp.ge.s32.totalorder %v15627_v40, 256  ;;  %v3566_v26 = vsel %vm3562_vm8, %v3546_v59, %v15514_v63 }
 0x3e9   :  { %v3567_v4 = vsel %vm3565_vm6, %v15518_v5, 2102212464  ;;  %v15768_v10 = vor.u32 %v3705_v0, %v3704_v38  ;;  %v15770_v2 = vor.u32 %v3708_v35, %v3707_v7  ;;  %v15772_v13 = vor.u32 %v3702_v58, %v3701_v27 }
 0x3ea   :  { %vm3716_vm10 = vcmp.lt.s32.totalorder %v15735_v34, 1  ;;  %vm3718_vm1 = vcmp.lt.s32.totalorder %v15735_v34, 3  ;;  %v3729_v6 = vsel %vm3719_vm2, %v3715_v32, 1326507024  ;;  %v15779_v60 = vsub.s32 %v15673_v53, %v3477_v29 }
 0x3eb   :  { %v3622_v63 = vadd.s32 %v3621_v33, %v3612_v16  ;;  %v3692_v59 = vor.u32 8388608, %v3691_v28  ;;  %v3725_v5 = vsel %vm3719_vm2, %v3712_v47, 920167782  ;;  %v3568_v54 = vsel %vm3564_vm9, %v15516_v61, %v3567_v4  ;;  %v19075_v28 = vld [vmem:[#allocation68_spill] sm:$0xff] }
 0x3ec   :  { %v15786_v1 = vadd.s32 %v3599_v57, %v3590_v21  ;;  %v19072_v38 = vshll.u32 %v15658_v30, 16  ;;  %v3842_v32 = vshrl.u32 %v3841_v19, 23  ;;  %v3337_v7 = vadd.s32 127, %v3336_v36 }
 0x3ed   :  { %vm3717_vm6 = vcmp.lt.s32.totalorder %v15735_v34, 2  ;;  %v3728_v53 = vsel %vm3716_vm10, %v15768_v10, %v15770_v2  ;;  %v3730_v29 = vsel %vm3718_vm1, %v3712_v47, %v3729_v6  ;;  %v15804_v21 = vsel %vm470_vm4, %v15662_v48, %v15615_v44 }
 0x3ee   :  { %v15791_v0 = vadd.s32 %v15676_v25, %v19072_v38  ;;  %v3189_v61 = vmul.f32 %v3188_v24, %v3186_v15  ;;  %v3724_v30 = vsel %vm3716_vm10, %v15772_v13, %v15768_v10  ;;  %v3726_v36 = vsel %vm3718_vm1, %v15770_v2, %v3725_v5 }
 0x3ef   :  { %v3480_v25 = vsub.s32 0, %v15779_v60  ;;  %v3569_v57 = vsel %vm3563_vm3, %v3566_v26, %v3568_v54  ;;  %v3626_v35 = vadd.s32 1, %v3622_v63  ;;  %v15816_v16 = vshll.u32 %v3692_v59, 8 }
 0x3f0   :  { %vm3479_vm9 = vcmp.lt.s32.totalorder %v15779_v60, 0  ;;  %vm3625_vm8 = vc.u32 %v15786_v1, %v15791_v0  ;;  %v15823_v44 = vsel %vm3717_vm6, %v3728_v53, %v3730_v29  ;;  %v11063_v48 = vadd.s32 4294967169, %v3842_v32 }
 0x3f1   :  { %v3333_v15 = vshll.u32 %v15527_v45, %v15720_v31  ;;  %v19073_v24 = vsub.s32 32, %v15720_v31  ;;  %v3338_v27 = vshll.u32 %v3337_v7, 23  ;;  %v15832_v58 = vsel %vm3717_vm6, %v3724_v30, %v3726_v36 }
 0x3f2   :  { %v15838_v33 = vsel %vm471_vm15, %v15668_v11, %v15621_v37  ;;  %vm3070_vm3 = vcmp.lt.s32.totalorder %v19075_v28, 0  ;;  %v3190_v47 = vxor.u32 2147483648, %v3189_v61  ;;  %v3623_v45 = vmul.u32 %v15562_v42, %v3569_v57 }
 0x3f3   :  { %v3334_v62 = vshrl.u32 %v15718_v51, %v19073_v24  ;;  %19074 = vst [vmem:[#allocation71_spill] sm:$0xff] %v15838_v33  ;;  %v3481_v31 = vsel %vm3479_vm9, %v3480_v25, %v15779_v60  ;;  %v3627_v19 = vsel %vm3625_vm8, %v3626_v35, %v3622_v63  ;;  %v3733_v51 = vand.u32 65535, %v15816_v16 }
 0x3f4   :  { %v3736_v26 = vshrl.u32 %v15823_v44, 16  ;;  %v15849_v4 = vsel %vm472_vm11, %v15680_v18, %v15627_v40  ;;  %v562_v37 = vcvt.s32.f32 %v15685_v22  ;;  %v3758_v11 = vshrl.u32 %v15832_v58, 16 }
 0x3f5   :  { %19076 = vst [vmem:[#allocation59_spill] sm:$0xff] %v15849_v4  ;;  %v3848_v6 = vadd.s32 1, %v11063_v48  ;;  %v563_v42 = vcvt.s32.f32 %v15700_v56  ;;  %v19077_v59 = vand.u32 2147483647, %v19075_v28  ;;  %v3335_v5 = vor.u32 %v3334_v62, %v3333_v15 }
 0x3f6   :  { %v3339_v54 = vor.u32 4788187, %v3338_v27  ;;  %v3191_v38 = vsel %vm3070_vm3, %v3190_v47, %v3189_v61  ;;  %v3482_v40 = vclz %v3481_v31  ;;  %v15862_v18 = vadd.s32 %v3627_v19, %v3623_v45 }
 0x3f7   :  { %vm15856_vm12 = vcmp.le.f32.partialorder %v19077_v59, 0.7853982  ;;  %v3735_v22 = vand.u32 65535, %v15823_v44  ;;  %v3734_v56 = vshrl.u32 %v15816_v16, 16  ;;  %v15867_v7 = vmul.u32 %v3736_v26, %v3733_v51 }
 0x3f8   :  { %v3757_v53 = vand.u32 65535, %v15832_v58  ;;  %v15872_v36 = vmul.u32 %v3758_v11, %v3733_v51  ;;  %vm3849_vm0 = vcmp.gt.s32.totalorder %v3848_v6, 0  ;;  %v15877_v61 = vsel %vm15856_vm12, %v19075_v28, %v3191_v38 }
 0x3f9   :  { %v3340_v25 = vand.u32 2147483647, %v3339_v54  ;;  %v3342_v57 = vcvt.s32.f32 %v3335_v5  ;;  %v3850_v35 = vsel %vm3849_vm0, %v3848_v6, 0  ;;  %v11055_v44 = vadd.s32 4294967294, %v3482_v40 }
 0x3fa   :  { %v3629_v48 = vadd.s32 536870912, %v15862_v18  ;;  %v3737_v15 = vmul.u32 %v3735_v22, %v3733_v51  ;;  %v18589_v24 = vand.u32 2147483647, %v15714_v17  ;;  %v15881_v62 = vmul.u32 %v3735_v22, %v3734_v56 }
 0x3fb   :  { %v3741_v27 = vshll.u32 %v15867_v7, 16  ;;  %v15884_v58 = vmul.u32 %v3757_v53, %v3734_v56  ;;  %v3852_v47 = vand.u32 31, %v3850_v35  ;;  %v3759_v19 = vmul.u32 %v3757_v53, %v3733_v51 }
 0x3fc   :  { %v3763_v6 = vshll.u32 %v15872_v36, 16  ;;  %v15889_v59 = vmul.f32 0.024543693, %v562_v37  ;;  %v15891_v5 = vmul.f32 0.024543693, %v563_v42  ;;  %v15895_v54 = vmul.f32 %v15877_v61, %v15877_v61  ;;  %v19086_v37 = vld [vmem:[#allocation57_spill] sm:$0xff] }
 0x3fd   :  { %v15897_v38 = vsub.s32 32, %v3852_v47  ;;  %v15899_v40 = vmul.f32 %v3342_v57, %v3340_v25  ;;  %vm11056_vm14 = vcmp.lt.s32.totalorder %v11055_v44, 0  ;;  %v15901_v22 = vshrl.u32 %v3629_v48, 30 }
 0x3fe   :  { %19080 = vst [vmem:[#allocation95_spill] sm:$0xff] %v15889_v59  ;;  %v3845_v51 = vand.u32 8388607, %v18589_v24  ;;  %v3743_v53 = vshll.u32 %v15881_v62, 16  ;;  %vm15906_vm5 = vc.u32 %v3737_v15, %v3741_v27  ;;  %v3747_v42 = vadd.s32 %v3741_v27, %v3737_v15 }
 0x3ff   :  { %19081 = vst [vmem:[#allocation82_spill] sm:$0xff] %v15891_v5  ;;  %vm3767_vm13 = vc.u32 %v3759_v19, %v3763_v6  ;;  %v15911_v31 = vadd.s32 %v3763_v6, %v3759_v19  ;;  %v3858_v25 = vshll.u32 %v19070_v20, %v3852_v47  ;;  %v3864_v57 = vshll.u32 %v18994_v23, %v3852_v47 }
 0x400   :  { %19082 = vst [vmem:[#allocation81_spill] sm:$0xff] %v15901_v22  ;;  %v3859_v48 = vshrl.u32 %v19071_v39, %v15897_v38  ;;  %v3861_v24 = vshll.u32 %v19071_v39, %v3852_v47  ;;  %v3862_v45 = vshrl.u32 %v18994_v23, %v15897_v38  ;;  %v3865_v15 = vshrl.u32 %v19067_v46, %v15897_v38 }
 0x401   :  { %v3762_v27 = vmul.u32 %v3758_v11, %v3734_v56  ;;  %v15922_v30 = vshrl.u32 %v3850_v35, 5  ;;  %v3867_v19 = vshll.u32 %v19067_v46, %v3852_v47  ;;  %v3868_v6 = vshrl.u32 %v19068_v52, %v15897_v38 }
 0x402   :  { %v3740_v29 = vmul.u32 %v3736_v26, %v3734_v56  ;;  %v3768_v32 = vsel %vm3767_vm13, 1, %v18790_v43  ;;  %v3855_v8 = vshll.u32 %v18773_v50, %v3852_v47  ;;  %v3856_v17 = vshrl.u32 %v19070_v20, %v15897_v38 }
 0x403   :  { %v3746_v41 = vsel %vm15906_vm5, 1, %v18790_v43  ;;  %v19085_v11 = vshll.u32 %v15884_v58, 16  ;;  %v3866_v35 = vor.u32 %v3865_v15, %v3864_v57  ;;  %v3869_v4 = vor.u32 %v3868_v6, %v3867_v19 }
 0x404   :  { %vm3749_vm4 = vc.u32 %v3747_v42, %v3743_v53  ;;  %v3846_v33 = vor.u32 8388608, %v3845_v51  ;;  %v15937_v26 = vor.u32 %v3859_v48, %v3858_v25  ;;  %v15939_v56 = vor.u32 %v3862_v45, %v3861_v24 }
 0x405   :  { %vm3771_vm7 = vc.u32 %v15911_v31, %v19085_v11  ;;  %v15942_v47 = vsel %vm11056_vm14, 0, %v11055_v44  ;;  %v3770_v39 = vadd.s32 %v3768_v32, %v3762_v27  ;;  %vm3870_vm15 = vcmp.lt.s32.totalorder %v15922_v30, 1 }
 0x406   :  { %vm3873_vm11 = vcmp.lt.s32.totalorder %v15922_v30, 4  ;;  %vm3224_vm9 = vcmp.lt.s32.totalorder %v19086_v37, 0  ;;  %v3748_v20 = vadd.s32 %v3746_v41, %v3740_v29  ;;  %v3772_v57 = vsel %vm3771_vm7, 1, %v18790_v43 }
 0x407   :  { %v15948_v15 = vor.u32 %v3856_v17, %v3855_v8  ;;  %vm3872_vm8 = vcmp.lt.s32.totalorder %v15922_v30, 3  ;;  %v3631_v24 = vshll.u32 %v15901_v22, 30  ;;  %v3750_v45 = vsel %vm3749_vm4, 1, %v18790_v43 }
 0x408   :  { %v3879_v32 = vsel %vm3873_vm11, %v3866_v35, 920167782  ;;  %v3883_v44 = vsel %vm3873_vm11, %v3869_v4, 1326507024  ;;  %v3490_v51 = vsub.s32 4294967266, %v15942_v47  ;;  %vm3871_vm0 = vcmp.lt.s32.totalorder %v15922_v30, 2 }
 0x409   :  { %v3882_v41 = vsel %vm3870_vm15, %v15937_v26, %v15939_v56  ;;  %v15963_v17 = vshll.u32 %v3846_v33, 8  ;;  %v3700_v8 = vshrl.u32 %v18773_v50, %v15707_v55  ;;  %v3764_v29 = vshrl.u32 %v15872_v36, 16 }
 0x40a   :  { %v3774_v53 = vadd.s32 %v3772_v57, %v3770_v39  ;;  %v3884_v4 = vsel %vm3872_vm8, %v3866_v35, %v3883_v44  ;;  %v19087_v42 = vand.u32 2147483647, %v19086_v37  ;;  %v3742_v48 = vshrl.u32 %v15867_v7, 16 }
 0x40b   :  { %v3752_v27 = vadd.s32 %v3750_v45, %v3748_v20  ;;  %v3878_v55 = vsel %vm3870_vm15, %v15948_v15, %v15937_v26  ;;  %v3880_v39 = vsel %vm3872_vm8, %v15939_v56, %v3879_v32  ;;  %v3197_v33 = vmul.f32 -0.001358992, %v15895_v54 }
 0x40c   :  { %vm15972_vm14 = vcmp.le.f32.partialorder %v19087_v42, 0.7853982  ;;  %v3344_v36 = vxor.u32 2147483648, %v15899_v40  ;;  %v15987_v19 = vsub.s32 %v15862_v18, %v3631_v24  ;;  %v3885_v7 = vsel %vm3871_vm0, %v3882_v41, %v3884_v4 }
 0x40d   :  { %v3470_v20 = vadd.s32 %v15605_v9, %v15600_v12  ;;  %v3486_v6 = vsub.s32 32, %v15942_v47  ;;  %v3721_v11 = vsel %vm3719_vm2, %v15770_v2, 2102212464  ;;  %v3887_v35 = vand.u32 65535, %v15963_v17 }
 0x40e   :  { %v3766_v57 = vshrl.u32 %v15884_v58, 16  ;;  %v3775_v45 = vadd.s32 %v3774_v53, %v3764_v29  ;;  %v3881_v18 = vsel %vm3871_vm0, %v3878_v55, %v3880_v39  ;;  %v3890_v24 = vshrl.u32 %v3885_v7, 16 }
 0x40f   :  { %v3491_v32 = vadd.s32 127, %v3490_v51  ;;  %v3720_v12 = vsel %vm3716_vm10, %v3700_v8, %v15772_v13  ;;  %v3744_v9 = vshrl.u32 %v15881_v62, 16  ;;  %v3753_v44 = vadd.s32 %v3752_v27, %v3742_v48 }
 0x410   :  { %vm3633_vm5 = vcmp.lt.s32.totalorder %v15987_v19, 0  ;;  %v3634_v2 = vsub.s32 0, %v15987_v19  ;;  %v3722_v41 = vsel %vm3718_vm1, %v15768_v10, %v3721_v11  ;;  %v3888_v29 = vshrl.u32 %v15963_v17, 16  ;;  %v19091_v11 = vld [vmem:[#allocation29_spill] sm:$0xff] }
 0x411   :  { %v3889_v53 = vand.u32 65535, %v3885_v7  ;;  %v16011_v4 = vmul.u32 %v3890_v24, %v3887_v35  ;;  %v3911_v51 = vand.u32 65535, %v3881_v18  ;;  %v3912_v42 = vshrl.u32 %v3881_v18, 16 }
 0x412   :  { %v3204_v13 = vmul.f32 -0.00019511016, %v15895_v54  ;;  %v3345_v62 = vsel %vm3224_vm9, %v3344_v36, %v15899_v40  ;;  %v3487_v8 = vshll.u32 %v15779_v60, %v15942_v47  ;;  %v3776_v48 = vadd.s32 %v3775_v45, %v3766_v57 }
 0x413   :  { %v3488_v27 = vshrl.u32 %v3470_v20, %v3486_v6  ;;  %v16019_v55 = vadd.s32 %v3753_v44, %v3744_v9  ;;  %v19090_v10 = vshll.u32 %v15884_v58, 16  ;;  %v16026_v7 = vmul.u32 %v3912_v42, %v3887_v35 }
 0x414   :  { %v3192_v18 = vsub.s32 4, %v19091_v11  ;;  %v3492_v22 = vshll.u32 %v3491_v32, 23  ;;  %v3635_v40 = vsel %vm3633_vm5, %v3634_v2, %v15987_v19  ;;  %v3723_v60 = vsel %vm3717_vm6, %v3720_v12, %v3722_v41 }
 0x415   :  { %v16024_v39 = vadd.s32 %v15911_v31, %v19090_v10  ;;  %v3891_v47 = vmul.u32 %v3889_v53, %v3887_v35  ;;  %v16034_v36 = vmul.u32 %v3889_v53, %v3888_v29  ;;  %v3895_v58 = vshll.u32 %v16011_v4, 16 }
 0x416   :  { %v16037_v20 = vmul.u32 %v3911_v51, %v3888_v29  ;;  %v3198_v31 = vadd.f32 0.041655596, %v3197_v33  ;;  %v3205_v6 = vadd.f32 0.008332121, %v3204_v13  ;;  %v16042_v57 = vsel %vm15972_vm14, %v19086_v37, %v3345_v62 }
 0x417   :  { %v3780_v45 = vadd.s32 1, %v3776_v48  ;;  %v3489_v32 = vor.u32 %v3488_v27, %v3487_v8  ;;  %vm3779_vm2 = vc.u32 %v16019_v55, %v16024_v39  ;;  %v3913_v34 = vmul.u32 %v3911_v51, %v3887_v35 }
 0x418   :  { %v3917_v12 = vshll.u32 %v16026_v7, 16  ;;  %v3493_v9 = vor.u32 4788187, %v3492_v22  ;;  %v3636_v44 = vclz %v3635_v40  ;;  %v3777_v2 = vmul.u32 %v15816_v16, %v3723_v60 }
 0x419   :  { %v3995_v33 = vand.u32 2139095040, %v15889_v59  ;;  %v3897_v41 = vshll.u32 %v16034_v36, 16  ;;  %vm3899_vm10 = vc.u32 %v3891_v47, %v3895_v58  ;;  %v3901_v53 = vadd.s32 %v3895_v58, %v3891_v47 }
 0x41a   :  { %v3206_v62 = vmul.f32 %v3205_v6, %v15895_v54  ;;  %v16054_v8 = vmul.f32 %v16042_v57, %v16042_v57  ;;  %v3781_v35 = vsel %vm3779_vm2, %v3780_v45, %v3776_v48  ;;  %v3916_v51 = vmul.u32 %v3912_v42, %v3888_v29 }
 0x41b   :  { %v3496_v22 = vcvt.s32.f32 %v3489_v32  ;;  %v3894_v27 = vmul.u32 %v3890_v24, %v3888_v29  ;;  %vm3921_vm1 = vc.u32 %v3913_v34, %v3917_v12  ;;  %v16056_v16 = vadd.s32 %v3917_v12, %v3913_v34 }
 0x41c   :  { %v11058_v10 = vadd.s32 4294967294, %v3636_v44  ;;  %v3900_v40 = vsel %vm3899_vm10, 1, %v18790_v43  ;;  %v3922_v60 = vsel %vm3921_vm1, 1, %v18790_v43  ;;  %v3996_v47 = vshrl.u32 %v3995_v33, 23 }
 0x41d   :  { %v3494_v58 = vand.u32 2147483647, %v3493_v9  ;;  %v16060_v13 = vadd.s32 %v3781_v35, %v3777_v2  ;;  %vm3903_vm6 = vc.u32 %v3901_v53, %v3897_v41  ;;  %v19092_v6 = vshll.u32 %v16037_v20, 16 }
 0x41e   :  { %v19093_v42 = vcvt.s32.f32 %v15705_v14  ;;  %v3193_v29 = vsel %vm3070_vm3, %v3192_v18, %v19091_v11  ;;  %v3199_v48 = vmul.f32 %v3198_v31, %v15895_v54  ;;  %v3924_v45 = vadd.s32 %v3922_v60, %v3916_v51 }
 0x41f   :  { %vm3925_vm13 = vc.u32 %v16056_v16, %v19092_v6  ;;  %v3207_v32 = vadd.f32 -0.16666654, %v3206_v62  ;;  %v3351_v34 = vmul.f32 -0.001358992, %v16054_v8  ;;  %v3902_v12 = vadd.s32 %v3900_v40, %v3894_v27  ;;  %v19098_v6 = vld [vmem:[#allocation69_spill] sm:$0xff] }
 0x420   :  { %v16067_v24 = vmul.f32 0.024543693, %v19093_v42  ;;  %v3926_v9 = vsel %vm3925_vm13, 1, %v18790_v43  ;;  %v3358_v44 = vmul.f32 -0.00019511016, %v16054_v8  ;;  %vm11059_vm7 = vcmp.lt.s32.totalorder %v11058_v10, 0 }
 0x421   :  { %v3904_v14 = vsel %vm3903_vm6, 1, %v18790_v43  ;;  %v11066_v2 = vadd.s32 4294967169, %v3996_v47  ;;  %v19095_v33 = vcvt.s32.f32 %v15712_v3  ;;  %v16083_v11 = vsel %vm15856_vm12, 0, %v3193_v29 }
 0x422   :  { %19094 = vst [vmem:[#allocation87_spill] sm:$0xff] %v16067_v24  ;;  %v3497_v18 = vmul.f32 %v3496_v22, %v3494_v58  ;;  %v3783_v31 = vadd.s32 536870912, %v16060_v13  ;;  %v3200_v53 = vadd.f32 -0.4999988, %v3199_v48  ;;  %v16087_v62 = vand.u32 3, %v16083_v11 }
 0x423   :  { %v16079_v41 = vmul.f32 0.024543693, %v19095_v33  ;;  %19097 = vst [vmem:[#allocation92_spill] sm:$0xff] %v16083_v11  ;;  %v3918_v35 = vshrl.u32 %v16026_v7, 16  ;;  %v3928_v51 = vadd.s32 %v3926_v9, %v3924_v45  ;;  %v3208_v27 = vmul.f32 %v3207_v32, %v15895_v54 }
 0x424   :  { %v3639_v40 = vsel %vm11059_vm7, 0, %v11058_v10  ;;  %v3896_v3 = vshrl.u32 %v16011_v4, 16  ;;  %v3906_v60 = vadd.s32 %v3904_v14, %v3902_v12  ;;  %v3352_v47 = vadd.f32 0.041655596, %v3351_v34 }
 0x425   :  { %19096 = vst [vmem:[#allocation89_spill] sm:$0xff] %v16079_v41  ;;  %v3359_v63 = vadd.f32 0.008332121, %v3358_v44  ;;  %vm3378_vm3 = vcmp.lt.s32.totalorder %v19098_v6, 0  ;;  %v4002_v22 = vadd.s32 1, %v11066_v2  ;;  %v3346_v58 = vsub.s32 4, %v15466_v49 }
 0x426   :  { %v19099_v42 = vand.u32 2147483647, %v19098_v6  ;;  %v3498_v7 = vxor.u32 2147483648, %v3497_v18  ;;  %v16100_v48 = vshrl.u32 %v3783_v31, 30  ;;  %v3644_v10 = vsub.s32 4294967266, %v3639_v40 }
 0x427   :  { %v3854_v4 = vshrl.u32 %v18773_v50, %v15897_v38  ;;  %v3920_v45 = vshrl.u32 %v16037_v20, 16  ;;  %v3929_v32 = vadd.s32 %v3928_v51, %v3918_v35  ;;  %v3201_v34 = vmul.f32 %v3200_v53, %v15895_v54 }
 0x428   :  { %vm16096_vm12 = vcmp.le.f32.partialorder %v19099_v42, 0.7853982  ;;  %v3209_v12 = vadd.f32 1.0, %v3208_v27  ;;  %v3898_v9 = vshrl.u32 %v16034_v36, 16  ;;  %v3907_v44 = vadd.s32 %v3906_v60, %v3896_v3 }
 0x429   :  { %v3353_v14 = vmul.f32 %v3352_v47, %v16054_v8  ;;  %v3360_v2 = vmul.f32 %v3359_v63, %v16054_v8  ;;  %v3875_v33 = vsel %vm3873_vm11, %v15939_v56, 2102212464  ;;  %vm4003_vm4 = vcmp.gt.s32.totalorder %v4002_v22, 0 }
 0x42a   :  { %v3347_v38 = vsel %vm3224_vm9, %v3346_v58, %v15466_v49  ;;  %v3624_v54 = vadd.s32 %v15791_v0, %v15786_v1  ;;  %v3640_v31 = vsub.s32 32, %v3639_v40  ;;  %v3785_v36 = vshll.u32 %v16100_v48, 30 }
 0x42b   :  { %v3499_v53 = vsel %vm3378_vm3, %v3498_v7, %v3497_v18  ;;  %v3645_v35 = vadd.s32 127, %v3644_v10  ;;  %v3874_v51 = vsel %vm3870_vm15, %v3854_v4, %v15948_v15  ;;  %v3930_v56 = vadd.s32 %v3929_v32, %v3920_v45 }
 0x42c   :  { %v3876_v27 = vsel %vm3872_vm8, %v15937_v26, %v3875_v33  ;;  %v16126_v49 = vadd.s32 %v3907_v44, %v3898_v9  ;;  %v19102_v1 = vshll.u32 %v16037_v20, 16  ;;  %v4004_v3 = vsel %vm4003_vm4, %v4002_v22, 0 }
 0x42d   :  { %v16133_v60 = vadd.f32 1.0, %v3201_v34  ;;  %v16136_v18 = vmul.f32 %v3209_v12, %v15877_v61  ;;  %v3354_v47 = vadd.f32 -0.4999988, %v3353_v14  ;;  %v3361_v15 = vadd.f32 -0.16666654, %v3360_v2  ;;  %v19109_v2 = vld [vmem:[#allocation84_spill] sm:$0xff] }
 0x42e   :  { %v16131_v0 = vadd.s32 %v16056_v16, %v19102_v1  ;;  %v16141_v63 = vsel %vm16096_vm12, %v19098_v6, %v3499_v53  ;;  %v3641_v26 = vshll.u32 %v15987_v19, %v3639_v40  ;;  %v3642_v58 = vshrl.u32 %v3624_v54, %v3640_v31 }
 0x42f   :  { %19103 = vst [vmem:[#allocation78_spill] sm:$0xff] %v16133_v60  ;;  %v16145_v20 = vsub.s32 %v16060_v13, %v3785_v36  ;;  %v3646_v16 = vshll.u32 %v3645_v35, 23  ;;  %v3877_v22 = vsel %vm3871_vm0, %v3874_v51, %v3876_v27  ;;  %v3934_v42 = vadd.s32 1, %v3930_v56 }
 0x430   :  { %19104 = vst [vmem:[#allocation77_spill] sm:$0xff] %v16136_v18  ;;  %v4006_v61 = vand.u32 31, %v4004_v3  ;;  %vm3214_vm15 = vcmp.eq.s32.totalorder %v16087_v62, 0  ;;  %vm3217_vm11 = vcmp.eq.s32.totalorder %v16087_v62, 2  ;;  %v16153_v7 = vsel %vm15972_vm14, 0, %v3347_v38 }
 0x431   :  { %19105 = vst [vmem:[#allocation48_spill] sm:$0xff] %v16153_v7  ;;  %vm3933_vm9 = vc.u32 %v16126_v49, %v16131_v0  ;;  %v18601_v19 = vxor.u32 2147483648, %v16136_v18  ;;  %v18600_v13 = vxor.u32 2147483648, %v16133_v60  ;;  %v3355_v30 = vmul.f32 %v3354_v47, %v16054_v8 }
 0x432   :  { %v16162_v40 = vmul.f32 %v16141_v63, %v16141_v63  ;;  %v3362_v10 = vmul.f32 %v3361_v15, %v16054_v8  ;;  %v3643_v4 = vor.u32 %v3642_v58, %v3641_v26  ;;  %v3788_v25 = vsub.s32 0, %v16145_v20 }
 0x433   :  { %v3931_v45 = vmul.u32 %v15963_v17, %v3877_v22  ;;  %v3647_v32 = vor.u32 4788187, %v3646_v16  ;;  %vm3787_vm8 = vcmp.lt.s32.totalorder %v16145_v20, 0  ;;  %v3935_v34 = vsel %vm3933_vm9, %v3934_v42, %v3930_v56  ;;  %v19110_v42 = vld [vmem:[#allocation30_spill] sm:$0xff] }
 0x434   :  { %v16168_v12 = vsub.s32 32, %v4006_v61  ;;  %v19106_v9 = vcvt.s32.f32 %v15804_v21  ;;  %v16179_v8 = vsel %vm3214_vm15, %v16133_v60, %v18601_v19  ;;  %v16186_v17 = vsel %vm3217_vm11, %v18600_v13, %v16136_v18 }
 0x435   :  { %v16189_v14 = vand.u32 3, %v16153_v7  ;;  %v16191_v21 = vadd.f32 1.0, %v3355_v30  ;;  %v3500_v33 = vsub.s32 4, %v19109_v2  ;;  %v3505_v38 = vmul.f32 -0.001358992, %v16162_v40 }
 0x436   :  { %v16172_v44 = vmul.f32 0.024543693, %v19106_v9  ;;  %v3512_v54 = vmul.f32 -0.00019511016, %v16162_v40  ;;  %v3363_v31 = vadd.f32 1.0, %v3362_v10  ;;  %v3650_v36 = vcvt.s32.f32 %v3643_v4 }
 0x437   :  { %19108 = vst [vmem:[#allocation50_spill] sm:$0xff] %v16191_v21  ;;  %v3789_v53 = vsel %vm3787_vm8, %v3788_v25, %v16145_v20  ;;  %v16197_v35 = vadd.s32 %v3935_v34, %v3931_v45  ;;  %v3648_v51 = vand.u32 2147483647, %v3647_v32  ;;  %v18609_v56 = vand.u32 2147483647, %v15889_v59 }
 0x438   :  { %19107 = vst [vmem:[#allocation49_spill] sm:$0xff] %v16172_v44  ;;  %v4021_v27 = vshll.u32 %v19067_v46, %v4006_v61  ;;  %v4022_v1 = vshrl.u32 %v19068_v52, %v16168_v12  ;;  %v16203_v47 = vshrl.u32 %v4004_v3, 5  ;;  %v4018_v15 = vshll.u32 %v18994_v23, %v4006_v61 }
 0x439   :  { %v4019_v26 = vshrl.u32 %v19067_v46, %v16168_v12  ;;  %v4149_v58 = vand.u32 2139095040, %v15891_v5  ;;  %vm3371_vm0 = vcmp.eq.s32.totalorder %v16189_v14, 2  ;;  %v3506_v16 = vadd.f32 0.041655596, %v3505_v38 }
 0x43a   :  { %v3513_v22 = vadd.f32 0.008332121, %v3512_v54  ;;  %vm3532_vm14 = vcmp.lt.s32.totalorder %v19110_v42, 0  ;;  %v3790_v30 = vclz %v3789_v53  ;;  %v19111_v10 = vmov 2475754826  }
 0x43b   :  { %v4012_v4 = vshll.u32 %v19111_v10, %v4006_v61  ;;  %v3937_v25 = vadd.s32 536870912, %v16197_v35  ;;  %v19112_v3 = vmov 2131351028   ;;  %v4016_v34 = vshrl.u32 %v18994_v23, %v16168_v12 }
 0x43c   :  { %v4013_v45 = vshrl.u32 %v19112_v3, %v16168_v12  ;;  %v4015_v32 = vshll.u32 %v19112_v3, %v4006_v61  ;;  %vm3368_vm5 = vcmp.eq.s32.totalorder %v16189_v14, 0  ;;  %v3651_v9 = vmul.f32 %v3650_v36, %v3648_v51 }
 0x43d   :  { %v4009_v38 = vshll.u32 %v18773_v50, %v4006_v61  ;;  %v4010_v54 = vshrl.u32 %v19111_v10, %v16168_v12  ;;  %v4023_v53 = vor.u32 %v4022_v1, %v4021_v27  ;;  %vm3213_vm2 = vcmp.lt.s32.totalorder %v16087_v62, 2 }
 0x43e   :  { %v19113_v13 = vand.u32 2147483647, %v19110_v42  ;;  %v3999_v60 = vand.u32 8388607, %v18609_v56  ;;  %v4020_v18 = vor.u32 %v4019_v26, %v4018_v15  ;;  %vm4027_vm1 = vcmp.lt.s32.totalorder %v16203_v47, 4 }
 0x43f   :  { %v4150_v36 = vshrl.u32 %v4149_v58, 23  ;;  %v3501_v61 = vsel %vm3378_vm3, %v3500_v33, %v19109_v2  ;;  %v3507_v51 = vmul.f32 %v3506_v16, %v16162_v40  ;;  %v3514_v27 = vmul.f32 %v3513_v22, %v16162_v40 }
 0x440   :  { %vm16225_vm10 = vcmp.le.f32.partialorder %v19113_v13, 0.7853982  ;;  %v11061_v1 = vadd.s32 4294967294, %v3790_v30  ;;  %v16238_v13 = vmul.f32 %v3363_v31, %v16042_v57  ;;  %vm3367_vm6 = vcmp.lt.s32.totalorder %v16189_v14, 2 }
 0x441   :  { %v16241_v7 = vshrl.u32 %v3937_v25, 30  ;;  %v16243_v15 = vor.u32 %v4013_v45, %v4012_v4  ;;  %v16245_v26 = vor.u32 %v4016_v34, %v4015_v32  ;;  %v16247_v58 = vor.u32 %v4010_v54, %v4009_v38 }
 0x442   :  { %19116 = vst [vmem:[#allocation56_spill] sm:$0xff] %v16238_v13  ;;  %vm4024_vm13 = vcmp.lt.s32.totalorder %v16203_v47, 1  ;;  %vm4026_vm7 = vcmp.lt.s32.totalorder %v16203_v47, 3  ;;  %v4037_v2 = vsel %vm4027_vm1, %v4023_v53, 1326507024  ;;  %v3652_v33 = vxor.u32 2147483648, %v3651_v9 }
 0x443   :  { %19117 = vst [vmem:[#allocation51_spill] sm:$0xff] %v16241_v7  ;;  %v4000_v57 = vor.u32 8388608, %v3999_v60  ;;  %v4033_v31 = vsel %vm4027_vm1, %v4020_v18, 920167782  ;;  %v11069_v16 = vadd.s32 4294967169, %v4150_v36  ;;  %v18607_v22 = vxor.u32 2147483648, %v16191_v21 }
 0x444   :  { %v3508_v30 = vadd.f32 -0.4999988, %v3507_v51  ;;  %v3515_v4 = vadd.f32 -0.16666654, %v3514_v27  ;;  %vm11062_vm3 = vcmp.lt.s32.totalorder %v11061_v1, 0  ;;  %v3939_v25 = vshll.u32 %v16241_v7, 30 }
 0x445   :  { %vm4025_vm4 = vcmp.lt.s32.totalorder %v16203_v47, 2  ;;  %v4036_v45 = vsel %vm4024_vm13, %v16243_v15, %v16245_v26  ;;  %v4038_v60 = vsel %vm4026_vm7, %v4020_v18, %v4037_v2  ;;  %v18608_v32 = vxor.u32 2147483648, %v16238_v13 }
 0x446   :  { %v16267_v34 = vsel %vm16096_vm12, 0, %v3501_v61  ;;  %v4032_v38 = vsel %vm4024_vm13, %v16247_v58, %v16243_v15  ;;  %v4034_v54 = vsel %vm4026_vm7, %v16245_v26, %v4033_v31  ;;  %v3373_v18 = vsel %vm3371_vm0, %v18607_v22, %v16238_v13 }
 0x447   :  { %19118 = vst [vmem:[#allocation52_spill] sm:$0xff] %v16267_v34  ;;  %v3653_v29 = vsel %vm3532_vm14, %v3652_v33, %v3651_v9  ;;  %v16283_v53 = vshll.u32 %v4000_v57, 8  ;;  %v4156_v36 = vadd.s32 1, %v11069_v16  ;;  %v3516_v61 = vmul.f32 %v3515_v4, %v16162_v40 }
 0x448   :  { %v16287_v51 = vand.u32 3, %v16267_v34  ;;  %v3793_v27 = vsel %vm11062_vm3, 0, %v11061_v1  ;;  %v16291_v2 = vsel %vm4025_vm4, %v4036_v45, %v4038_v60  ;;  %v3370_v31 = vsel %vm3368_vm5, %v16191_v21, %v18608_v32  ;;  %v19119_v1 = vld [vmem:[#allocation71_spill] sm:$0xff] }
 0x449   :  { %v3509_v9 = vmul.f32 %v3508_v30, %v16162_v40  ;;  %v16300_v33 = vsub.s32 %v16197_v35, %v3939_v25  ;;  %v16304_v57 = vsel %vm4025_vm4, %v4032_v38, %v4034_v54  ;;  %v19120_v16 = vcvt.s32.f32 %v19119_v1  ;;  %v19122_v45 = vld [vmem:[#allocation59_spill] sm:$0xff] }
 0x44a   :  { %v19123_v60 = vcvt.s32.f32 %v19122_v45  ;;  %v16318_v40 = vsel %vm3213_vm2, %v16179_v8, %v16186_v17  ;;  %v16323_v35 = vsel %vm16225_vm10, %v19110_v42, %v3653_v29  ;;  %v3798_v30 = vsub.s32 4294967266, %v3793_v27  ;;  %v19128_v17 = vld [vmem:[#allocation81_spill] sm:$0xff] }
 0x44b   :  { %v16308_v4 = vmul.f32 0.024543693, %v19120_v16  ;;  %19125 = vst [vmem:[#allocation46_spill] sm:$0xff] %v16318_v40  ;;  %v4041_v25 = vand.u32 65535, %v16283_v53  ;;  %v4044_v38 = vshrl.u32 %v16291_v2, 16  ;;  %vm4157_vm12 = vcmp.gt.s32.totalorder %v4156_v36, 0 }
 0x44c   :  { %v16312_v22 = vmul.f32 0.024543693, %v19123_v60  ;;  %v16329_v54 = vsel %vm3367_vm6, %v3370_v31, %v3373_v18  ;;  %v3517_v1 = vadd.f32 1.0, %v3516_v61  ;;  %vm3522_vm15 = vcmp.eq.s32.totalorder %v16287_v51, 0 }
 0x44d   :  { %19121 = vst [vmem:[#allocation44_spill] sm:$0xff] %v16308_v4  ;;  %v4066_v62 = vshrl.u32 %v16304_v57, 16  ;;  %v16333_v8 = vadd.f32 1.0, %v3509_v9  ;;  %v3654_v29 = vsub.s32 4, %v19128_v17  ;;  %v3778_v16 = vadd.s32 %v16024_v39, %v16019_v55 }
 0x44e   :  { %19124 = vst [vmem:[#allocation45_spill] sm:$0xff] %v16312_v22  ;;  %v3942_v45 = vsub.s32 0, %v16300_v33  ;;  %v16341_v60 = vmul.f32 %v16323_v35, %v16323_v35  ;;  %v3794_v14 = vsub.s32 32, %v3793_v27  ;;  %vm3941_vm11 = vcmp.lt.s32.totalorder %v16300_v33, 0 }
 0x44f   :  { %19126 = vst [vmem:[#allocation47_spill] sm:$0xff] %v16329_v54  ;;  %v4158_v18 = vsel %vm4157_vm12, %v4156_v36, 0  ;;  %v3799_v61 = vadd.s32 127, %v3798_v30  ;;  %v4042_v31 = vshrl.u32 %v16283_v53, 16  ;;  %v4043_v9 = vand.u32 65535, %v16291_v2 }
 0x450   :  { %19127 = vst [vmem:[#allocation34_spill] sm:$0xff] %v16333_v8  ;;  %v16346_v32 = vmul.u32 %v4044_v38, %v4041_v25  ;;  %v16349_v56 = vmul.f32 %v3517_v1, %v16141_v63  ;;  %vm3525_vm9 = vcmp.eq.s32.totalorder %v16287_v51, 2  ;;  %v4065_v55 = vand.u32 65535, %v16304_v57 }
 0x451   :  { %v16353_v39 = vmul.u32 %v4066_v62, %v4041_v25  ;;  %v3655_v36 = vsel %vm3532_vm14, %v3654_v29, %v19128_v17  ;;  %v3943_v30 = vsel %vm3941_vm11, %v3942_v45, %v16300_v33  ;;  %v4160_v2 = vand.u32 31, %v4158_v18 }
 0x452   :  { %19129 = vst [vmem:[#allocation35_spill] sm:$0xff] %v16349_v56  ;;  %v3659_v13 = vmul.f32 -0.001358992, %v16341_v60  ;;  %v3666_v63 = vmul.f32 -0.00019511016, %v16341_v60  ;;  %v3795_v1 = vshll.u32 %v16145_v20, %v3793_v27  ;;  %v3796_v34 = vshrl.u32 %v3778_v16, %v3794_v14 }
 0x453   :  { %v3800_v11 = vshll.u32 %v3799_v61, 23  ;;  %v4045_v57 = vmul.u32 %v4043_v9, %v4041_v25  ;;  %v16363_v40 = vmul.u32 %v4043_v9, %v4042_v31  ;;  %v4049_v21 = vshll.u32 %v16346_v32, 16 }
 0x454   :  { %v18621_v54 = vxor.u32 2147483648, %v16349_v56  ;;  %v3944_v28 = vclz %v3943_v30  ;;  %v4067_v17 = vmul.u32 %v4065_v55, %v4041_v25  ;;  %v4071_v29 = vshll.u32 %v16353_v39, 16 }
 0x455   :  { %v19130_v45 = vxor.u32 2147483648, %v16333_v8  ;;  %v16377_v20 = vsel %vm16225_vm10, 0, %v3655_v36  ;;  %v16379_v27 = vmul.u32 %v4065_v55, %v4042_v31  ;;  %v16381_v16 = vsub.s32 32, %v4160_v2 }
 0x456   :  { %19131 = vst [vmem:[#allocation36_spill] sm:$0xff] %v16377_v20  ;;  %v16388_v25 = vsel %vm3522_vm15, %v16333_v8, %v18621_v54  ;;  %v16390_v14 = vadd.f32 0.041655596, %v3659_v13  ;;  %v3667_v61 = vadd.f32 0.008332121, %v3666_v63  ;;  %v16393_v9 = vand.u32 3, %v16377_v20 }
 0x457   :  { %v16373_v37 = vsel %vm3525_vm9, %v19130_v45, %v16349_v56  ;;  %v3797_v19 = vor.u32 %v3796_v34, %v3795_v1  ;;  %v3801_v36 = vor.u32 4788187, %v3800_v11  ;;  %v4051_v55 = vshll.u32 %v16363_v40, 16 }
 0x458   :  { %v4055_v30 = vadd.s32 %v4049_v21, %v4045_v57  ;;  %v11064_v45 = vadd.s32 4294967294, %v3944_v28  ;;  %vm4053_vm8 = vc.u32 %v4045_v57, %v4049_v21  ;;  %vm4075_vm0 = vc.u32 %v4067_v17, %v4071_v29 }
 0x459   :  { %v18633_v22 = vshll.u32 %v16379_v27, 16  ;;  %v16398_v54 = vadd.s32 %v4071_v29, %v4067_v17  ;;  %v4175_v13 = vshll.u32 %v19067_v46, %v4160_v2  ;;  %v4176_v63 = vshrl.u32 %v19068_v52, %v16381_v16 }
 0x45a   :  { %v4048_v8 = vmul.u32 %v4044_v38, %v4042_v31  ;;  %v16403_v34 = vshrl.u32 %v4158_v18, 5  ;;  %v4172_v11 = vshll.u32 %v18994_v23, %v4160_v2  ;;  %v4173_v28 = vshrl.u32 %v19067_v46, %v16381_v16 }
 0x45b   :  { %v4054_v21 = vsel %vm4053_vm8, 1, %v18790_v43  ;;  %vm16409_vm14 = vc.u32 %v4055_v30, %v4051_v55  ;;  %v4070_v57 = vmul.u32 %v4066_v62, %v4042_v31  ;;  %v4076_v17 = vsel %vm4075_vm0, 1, %v18790_v43 }
 0x45c   :  { %v4166_v29 = vshll.u32 %v19111_v10, %v4160_v2  ;;  %v4167_v38 = vshrl.u32 %v19112_v3, %v16381_v16  ;;  %v4169_v18 = vshll.u32 %v19112_v3, %v4160_v2  ;;  %v4170_v56 = vshrl.u32 %v18994_v23, %v16381_v16  ;;  %v19135_v3 = vld [vmem:[#allocation21_spill] sm:$0xff] }
 0x45d   :  { %vm4079_vm5 = vc.u32 %v16398_v54, %v18633_v22  ;;  %v4163_v55 = vshll.u32 %v18773_v50, %v4160_v2  ;;  %v4164_v62 = vshrl.u32 %v19111_v10, %v16381_v16  ;;  %v4177_v31 = vor.u32 %v4176_v63, %v4175_v13 }
 0x45e   :  { %v3804_v30 = vcvt.s32.f32 %v3797_v19  ;;  %v19134_v20 = vand.u32 2147483647, %v15891_v5  ;;  %v4174_v59 = vor.u32 %v4173_v28, %v4172_v11  ;;  %vm4181_vm2 = vcmp.lt.s32.totalorder %v16403_v34, 4 }
 0x45f   :  { %v3802_v44 = vand.u32 2147483647, %v3801_v36  ;;  %vm11065_vm10 = vcmp.lt.s32.totalorder %v11064_v45, 0  ;;  %v4056_v7 = vadd.s32 %v4054_v21, %v4048_v8  ;;  %v4078_v42 = vadd.s32 %v4076_v17, %v4070_v57 }
 0x460   :  { %v4153_v4 = vand.u32 8388607, %v19134_v20  ;;  %vm3686_vm6 = vcmp.lt.s32.totalorder %v19135_v3, 0  ;;  %v4058_v2 = vsel %vm16409_vm14, 1, %v18790_v43  ;;  %v4080_v22 = vsel %vm4079_vm5, 1, %v18790_v43 }
 0x461   :  { %v16434_v13 = vor.u32 %v4167_v38, %v4166_v29  ;;  %v16436_v19 = vor.u32 %v4170_v56, %v4169_v18  ;;  %v16438_v20 = vor.u32 %v4164_v62, %v4163_v55  ;;  %vm4178_vm3 = vcmp.lt.s32.totalorder %v16403_v34, 1 }
 0x462   :  { %vm4180_vm12 = vcmp.lt.s32.totalorder %v16403_v34, 3  ;;  %v4191_v8 = vsel %vm4181_vm2, %v4177_v31, 1326507024  ;;  %v3668_v36 = vmul.f32 %v3667_v61, %v16341_v60  ;;  %v16445_v63 = vsel %vm11065_vm10, 0, %v11064_v45 }
 0x463   :  { %v4154_v11 = vor.u32 8388608, %v4153_v4  ;;  %v4187_v28 = vsel %vm4181_vm2, %v4174_v59, 920167782  ;;  %v19136_v56 = vand.u32 2147483647, %v19135_v3  ;;  %v3805_v1 = vmul.f32 %v3804_v30, %v3802_v44 }
 0x464   :  { %v4050_v57 = vshrl.u32 %v16346_v32, 16  ;;  %v4072_v17 = vshrl.u32 %v16353_v39, 16  ;;  %v4082_v29 = vadd.s32 %v4080_v22, %v4078_v42  ;;  %v4060_v38 = vadd.s32 %v4058_v2, %v4056_v7 }
 0x465   :  { %vm16451_vm15 = vcmp.le.f32.partialorder %v19136_v56, 0.7853982  ;;  %vm4179_vm11 = vcmp.lt.s32.totalorder %v16403_v34, 2  ;;  %v4190_v4 = vsel %vm4178_vm3, %v16434_v13, %v16436_v19  ;;  %v4192_v61 = vsel %vm4180_vm12, %v4174_v59, %v4191_v8 }
 0x466   :  { %vm3521_vm9 = vcmp.lt.s32.totalorder %v16287_v51, 2  ;;  %v3952_v44 = vsub.s32 4294967266, %v16445_v63  ;;  %v4186_v42 = vsel %vm4178_vm3, %v16438_v20, %v16434_v13  ;;  %v4188_v7 = vsel %vm4180_vm12, %v16436_v19, %v4187_v28 }
 0x467   :  { %v4303_v22 = vand.u32 2139095040, %v16067_v24  ;;  %v3661_v32 = vmul.f32 %v16390_v14, %v16341_v60  ;;  %v3669_v39 = vadd.f32 -0.16666654, %v3668_v36  ;;  %v3932_v59 = vadd.s32 %v16131_v0, %v16126_v49 }
 0x468   :  { %v16478_v45 = vshll.u32 %v4154_v11, 8  ;;  %v3806_v18 = vxor.u32 2147483648, %v3805_v1  ;;  %v4074_v55 = vshrl.u32 %v16379_v27, 16  ;;  %v4083_v62 = vadd.s32 %v4082_v29, %v4072_v17 }
 0x469   :  { %v16483_v31 = vsel %vm4179_vm11, %v4190_v4, %v4192_v61  ;;  %v4008_v30 = vshrl.u32 %v18773_v50, %v16168_v12  ;;  %v4052_v2 = vshrl.u32 %v16363_v40, 16  ;;  %v4061_v14 = vadd.s32 %v4060_v38, %v4050_v57 }
 0x46a   :  { %v16490_v8 = vsel %vm4179_vm11, %v4186_v42, %v4188_v7  ;;  %v3948_v49 = vsub.s32 32, %v16445_v63  ;;  %v3953_v0 = vadd.s32 127, %v3952_v44  ;;  %v4029_v36 = vsel %vm4027_vm1, %v16245_v26, 2102212464 }
 0x46b   :  { %v4304_v11 = vshrl.u32 %v4303_v22, 23  ;;  %v3662_v28 = vadd.f32 -0.4999988, %v3661_v32  ;;  %v3670_v56 = vmul.f32 %v3669_v39, %v16341_v60  ;;  %v4195_v12 = vand.u32 65535, %v16478_v45 }
 0x46c   :  { %v4198_v40 = vshrl.u32 %v16483_v31, 16  ;;  %vm18687_vm8 = vweird.f32 %v19098_v6  ;;  %v3807_v57 = vsel %vm3686_vm6, %v3806_v18, %v3805_v1  ;;  %v4084_v17 = vadd.s32 %v4083_v62, %v4074_v55 }
 0x46d   :  { %v4220_v29 = vshrl.u32 %v16490_v8, 16  ;;  %v11072_v38 = vadd.s32 4294967169, %v4304_v11  ;;  %v4028_v26 = vsel %vm4024_vm13, %v4008_v30, %v16247_v58  ;;  %v4030_v4 = vsel %vm4026_vm7, %v16243_v15, %v4029_v36 }
 0x46e   :  { %v16509_v61 = vadd.s32 %v4061_v14, %v4052_v2  ;;  %v19139_v44 = vshll.u32 %v16379_v27, 16  ;;  %v3949_v1 = vshll.u32 %v16300_v33, %v16445_v63  ;;  %v3950_v7 = vshrl.u32 %v3932_v59, %v3948_v49 }
 0x46f   :  { %v3954_v22 = vshll.u32 %v3953_v0, 23  ;;  %v4310_v32 = vadd.s32 1, %v11072_v38  ;;  %v16521_v58 = vsel %vm16451_vm15, %v19135_v3, %v3807_v57  ;;  %v4196_v15 = vshrl.u32 %v16478_v45, 16 }
 0x470   :  { %v16514_v42 = vadd.s32 %v16398_v54, %v19139_v44  ;;  %v4197_v39 = vand.u32 65535, %v16483_v31  ;;  %v16525_v18 = vmul.u32 %v4198_v40, %v4195_v12  ;;  %v4031_v54 = vsel %vm4025_vm4, %v4028_v26, %v4030_v4 }
 0x471   :  { %v4088_v27 = vadd.s32 1, %v4084_v17  ;;  %v4219_v33 = vand.u32 65535, %v16490_v8  ;;  %v16530_v63 = vmul.u32 %v4220_v29, %v4195_v12  ;;  %v3528_v59 = vsel %vm3521_vm9, %v16388_v25, %v16373_v37 }
 0x472   :  { %v3663_v55 = vmul.f32 %v3662_v28, %v16341_v60  ;;  %v3671_v62 = vadd.f32 1.0, %v3670_v56  ;;  %vm4087_vm1 = vc.u32 %v16509_v61, %v16514_v42  ;;  %v16541_v47 = vmul.f32 %v16521_v58, %v16521_v58 }
 0x473   :  { %v3951_v31 = vor.u32 %v3950_v7, %v3949_v1  ;;  %v3955_v30 = vor.u32 4788187, %v3954_v22  ;;  %vm4311_vm13 = vcmp.gt.s32.totalorder %v4310_v32, 0  ;;  %v4085_v2 = vmul.u32 %v16283_v53, %v4031_v54 }
 0x474   :  { %v4199_v14 = vmul.u32 %v4197_v39, %v4195_v12  ;;  %v16544_v8 = vmul.u32 %v4197_v39, %v4196_v15  ;;  %v4203_v37 = vshll.u32 %v16525_v18, 16  ;;  %v4089_v51 = vsel %vm4087_vm1, %v4088_v27, %v4084_v17 }
 0x475   :  { %v4221_v60 = vmul.u32 %v4219_v33, %v4195_v12  ;;  %v16547_v25 = vmul.u32 %v4219_v33, %v4196_v15  ;;  %v4225_v49 = vshll.u32 %v16530_v63, 16  ;;  %v16552_v0 = vsel %vm18687_vm8, nan, %v3528_v59 }
 0x476   :  { %19140 = vst [vmem:[#allocation37_spill] sm:$0xff] %v16552_v0  ;;  %v16554_v36 = vadd.f32 1.0, %v3663_v55  ;;  %vm3676_vm7 = vcmp.eq.s32.totalorder %v16393_v9, 0  ;;  %v4312_v53 = vsel %vm4311_vm13, %v4310_v32, 0  ;;  %v16558_v11 = vmul.f32 %v3671_v62, %v16323_v35  ;;  %v19152_v0 = vld [vmem:[#allocation30_spill] sm:$0xff] }
 0x477   :  { %v3813_v28 = vmul.f32 -0.001358992, %v16541_v47  ;;  %v3956_v56 = vand.u32 2147483647, %v3955_v30  ;;  %v3958_v12 = vcvt.s32.f32 %v3951_v31  ;;  %v16561_v57 = vadd.s32 %v4089_v51, %v4085_v2  ;;  %v19145_v31 = vld [vmem:[#allocation75_spill] sm:$0xff] }
 0x478   :  { %19141 = vst [vmem:[#allocation38_spill] sm:$0xff] %v16554_v36  ;;  %v4205_v17 = vshll.u32 %v16544_v8, 16  ;;  %vm16564_vm4 = vc.u32 %v4199_v14, %v4203_v37  ;;  %v4209_v26 = vadd.s32 %v4203_v37, %v4199_v14  ;;  %v18636_v4 = vshll.u32 %v16547_v25, 16 }
 0x479   :  { %19142 = vst [vmem:[#allocation39_spill] sm:$0xff] %v16558_v11  ;;  %vm4229_vm0 = vc.u32 %v4221_v60, %v4225_v49  ;;  %v16569_v44 = vadd.s32 %v4225_v49, %v4221_v60  ;;  %v4314_v35 = vand.u32 31, %v4312_v53  ;;  %vm3679_vm14 = vcmp.eq.s32.totalorder %v16393_v9, 2 }
 0x47a   :  { %v18634_v1 = vxor.u32 2147483648, %v16554_v36  ;;  %v3808_v7 = vsub.s32 4, %v16100_v48  ;;  %v3820_v22 = vmul.f32 -0.00019511016, %v16541_v47  ;;  %v3814_v32 = vadd.f32 0.041655596, %v3813_v28 }
 0x47b   :  { %v3959_v39 = vmul.f32 %v3958_v12, %v3956_v56  ;;  %v4202_v54 = vmul.u32 %v4198_v40, %v4196_v15  ;;  %v4224_v27 = vmul.u32 %v4220_v29, %v4196_v15  ;;  %v18635_v33 = vxor.u32 2147483648, %v16558_v11 }
 0x47c   :  { %v4091_v59 = vadd.s32 536870912, %v16561_v57  ;;  %v4208_v55 = vsel %vm16564_vm4, 1, %v18790_v43  ;;  %v4230_v62 = vsel %vm4229_vm0, 1, %v18790_v43  ;;  %vm3840_vm5 = vcmp.lt.s32.totalorder %v19145_v31, 0 }
 0x47d   :  { %vm4211_vm10 = vc.u32 %v4209_v26, %v4205_v17  ;;  %vm4233_vm9 = vc.u32 %v16569_v44, %v18636_v4  ;;  %v16585_v30 = vsub.s32 32, %v4314_v35  ;;  %v16592_v40 = vsel %vm3676_vm7, %v16554_v36, %v18635_v33 }
 0x47e   :  { %v16599_v29 = vsel %vm3679_vm14, %v18634_v1, %v16558_v11  ;;  %v16604_v15 = vsel %vm3686_vm6, %v3808_v7, %v16100_v48  ;;  %v3821_v2 = vadd.f32 0.008332121, %v3820_v22  ;;  %v3815_v14 = vmul.f32 %v3814_v32, %v16541_v47 }
 0x47f   :  { %v3960_v37 = vxor.u32 2147483648, %v3959_v39  ;;  %v4210_v51 = vadd.s32 %v4208_v55, %v4202_v54  ;;  %v4232_v60 = vadd.s32 %v4230_v62, %v4224_v27  ;;  %v19146_v49 = vand.u32 2147483647, %v19145_v31 }
 0x480   :  { %v16613_v56 = vshrl.u32 %v4091_v59, 30  ;;  %v4212_v12 = vsel %vm4211_vm10, 1, %v18790_v43  ;;  %v4234_v17 = vsel %vm4233_vm9, 1, %v18790_v43  ;;  %v4326_v38 = vshll.u32 %v18994_v23, %v4314_v35 }
 0x481   :  { %vm16609_vm1 = vcmp.le.f32.partialorder %v19146_v49, 0.7853982  ;;  %v4327_v26 = vshrl.u32 %v19067_v46, %v16585_v30  ;;  %v4329_v7 = vshll.u32 %v19067_v46, %v4314_v35  ;;  %v4330_v22 = vshrl.u32 %v19068_v52, %v16585_v30 }
 0x482   :  { %19149 = vst [vmem:[#allocation40_spill] sm:$0xff] %v16613_v56  ;;  %vm3675_vm6 = vcmp.lt.s32.totalorder %v16393_v9, 2  ;;  %v4204_v32 = vshrl.u32 %v16525_v18, 16  ;;  %v4226_v54 = vshrl.u32 %v16530_v63, 16  ;;  %v16627_v27 = vshrl.u32 %v4312_v53, 5 }
 0x483   :  { %v4457_v59 = vand.u32 2139095040, %v16079_v41  ;;  %v4214_v55 = vadd.s32 %v4212_v12, %v4210_v51  ;;  %v4236_v62 = vadd.s32 %v4234_v17, %v4232_v60  ;;  %v4317_v49 = vshll.u32 %v18773_v50, %v4314_v35 }
 0x484   :  { %v4320_v1 = vshll.u32 %v19111_v10, %v4314_v35  ;;  %v4318_v33 = vshrl.u32 %v19111_v10, %v16585_v30  ;;  %v19150_v4 = vmov 2131351028   ;;  %v4324_v63 = vshrl.u32 %v18994_v23, %v16585_v30 }
 0x485   :  { %v4321_v48 = vshrl.u32 %v19150_v4, %v16585_v30  ;;  %v4323_v18 = vshll.u32 %v19150_v4, %v4314_v35  ;;  %v3816_v53 = vadd.f32 -0.4999988, %v3815_v14  ;;  %v3822_v6 = vmul.f32 %v3821_v2, %v16541_v47 }
 0x486   :  { %v4328_v51 = vor.u32 %v4327_v26, %v4326_v38  ;;  %v4331_v60 = vor.u32 %v4330_v22, %v4329_v7  ;;  %v3961_v12 = vsel %vm3840_vm5, %v3960_v37, %v3959_v39  ;;  %v19151_v17 = vand.u32 2147483647, %v16067_v24 }
 0x487   :  { %vm4335_vm13 = vcmp.lt.s32.totalorder %v16627_v27, 4  ;;  %v4458_v11 = vshrl.u32 %v4457_v59, 23  ;;  %vm18688_vm7 = vweird.f32 %v19152_v0  ;;  %v4093_v35 = vshll.u32 %v16613_v56, 30 }
 0x488   :  { %v4307_v36 = vand.u32 8388607, %v19151_v17  ;;  %v4206_v5 = vshrl.u32 %v16544_v8, 16  ;;  %v4215_v14 = vadd.s32 %v4214_v55, %v4204_v32  ;;  %v4228_v2 = vshrl.u32 %v16547_v25, 16 }
 0x489   :  { %v4237_v38 = vadd.s32 %v4236_v62, %v4226_v54  ;;  %v16649_v26 = vor.u32 %v4318_v33, %v4317_v49  ;;  %v16651_v7 = vor.u32 %v4321_v48, %v4320_v1  ;;  %v16653_v39 = vor.u32 %v4324_v63, %v4323_v18 }
 0x48a   :  { %vm4332_vm4 = vcmp.lt.s32.totalorder %v16627_v27, 1  ;;  %vm4334_vm0 = vcmp.lt.s32.totalorder %v16627_v27, 3  ;;  %v4341_v37 = vsel %vm4335_vm13, %v4328_v51, 920167782  ;;  %v4345_v8 = vsel %vm4335_vm13, %v4331_v60, 1326507024 }
 0x48b   :  { %v3823_v22 = vadd.f32 -0.16666654, %v3822_v6  ;;  %v4162_v32 = vshrl.u32 %v18773_v50, %v16381_v16  ;;  %v4308_v33 = vor.u32 8388608, %v4307_v36  ;;  %v11075_v54 = vadd.s32 4294967169, %v4458_v11 }
 0x48c   :  { %v16666_v1 = vsel %vm16609_vm1, %v19145_v31, %v3961_v12  ;;  %v16669_v48 = vsub.s32 %v16561_v57, %v4093_v35  ;;  %v4183_v59 = vsel %vm4181_vm2, %v16436_v19, 2102212464  ;;  %vm4333_vm14 = vcmp.lt.s32.totalorder %v16627_v27, 2 }
 0x48d   :  { %v4340_v6 = vsel %vm4332_vm4, %v16649_v26, %v16651_v7  ;;  %v4342_v16 = vsel %vm4334_vm0, %v16653_v39, %v4341_v37  ;;  %v4344_v36 = vsel %vm4332_vm4, %v16651_v7, %v16653_v39  ;;  %v4346_v11 = vsel %vm4334_vm0, %v4328_v51, %v4345_v8 }
 0x48e   :  { %v3682_v19 = vsel %vm3675_vm6, %v16592_v40, %v16599_v29  ;;  %v16692_v57 = vadd.s32 %v4215_v14, %v4206_v5  ;;  %v19153_v55 = vshll.u32 %v16547_v25, 16  ;;  %v4238_v49 = vadd.s32 %v4237_v38, %v4228_v2 }
 0x48f   :  { %v4182_v18 = vsel %vm4178_vm3, %v4162_v32, %v16438_v20  ;;  %v4184_v63 = vsel %vm4180_vm12, %v16434_v13, %v4183_v59  ;;  %v16705_v51 = vshll.u32 %v4308_v33, 8  ;;  %v4464_v9 = vadd.s32 1, %v11075_v54 }
 0x490   :  { %v16697_v62 = vadd.s32 %v16569_v44, %v19153_v55  ;;  %v3824_v5 = vmul.f32 %v3823_v22, %v16541_v47  ;;  %v16710_v25 = vmul.f32 %v16666_v1, %v16666_v1  ;;  %v16714_v44 = vsel %vm4333_vm14, %v4340_v6, %v4342_v16  ;;  %v19157_v6 = vld [vmem:[#allocation51_spill] sm:$0xff] }
 0x491   :  { %v16718_v20 = vsel %vm4333_vm14, %v4344_v36, %v4346_v11  ;;  %v16722_v13 = vsel %vm18688_vm7, nan, %v3682_v19  ;;  %v16727_v40 = vsel %vm16451_vm15, 0, %v16604_v15  ;;  %v3817_v29 = vmul.f32 %v3816_v53, %v16541_v47 }
 0x492   :  { %19154 = vst [vmem:[#allocation41_spill] sm:$0xff] %v16697_v62  ;;  %v4096_v60 = vsub.s32 0, %v16669_v48  ;;  %vm4095_vm2 = vcmp.lt.s32.totalorder %v16669_v48, 0  ;;  %v4185_v12 = vsel %vm4179_vm11, %v4182_v18, %v4184_v63  ;;  %vm4241_vm3 = vc.u32 %v16692_v57, %v16697_v62 }
 0x493   :  { %19155 = vst [vmem:[#allocation42_spill] sm:$0xff] %v16722_v13  ;;  %v4242_v17 = vadd.s32 1, %v4238_v49  ;;  %v4349_v35 = vand.u32 65535, %v16705_v51  ;;  %v18645_v14 = vshrl.u32 %v16718_v20, 16  ;;  %v4374_v21 = vshrl.u32 %v16714_v44, 16 }
 0x494   :  { %19156 = vst [vmem:[#allocation12_spill] sm:$0xff] %v16727_v40  ;;  %vm4465_vm12 = vcmp.gt.s32.totalorder %v4464_v9, 0  ;;  %v3825_v15 = vadd.f32 1.0, %v3824_v5  ;;  %v3967_v47 = vmul.f32 -0.001358992, %v16710_v25  ;;  %v16742_v34 = vsel %vm4095_vm2, %v4096_v60, %v16669_v48 }
 0x495   :  { %v3974_v53 = vmul.f32 -0.00019511016, %v16710_v25  ;;  %v4466_v2 = vsel %vm4465_vm12, %v4464_v9, 0  ;;  %v4239_v38 = vmul.u32 %v16478_v45, %v4185_v12  ;;  %v4350_v37 = vshrl.u32 %v16705_v51, 16 }
 0x496   :  { %v18644_v8 = vand.u32 2147483647, %v16079_v41  ;;  %v4243_v22 = vsel %vm4241_vm3, %v4242_v17, %v4238_v49  ;;  %v4351_v32 = vand.u32 65535, %v16718_v20  ;;  %v4373_v33 = vand.u32 65535, %v16714_v44 }
 0x497   :  { %v4468_v54 = vand.u32 31, %v4466_v2  ;;  %v16750_v59 = vand.u32 3, %v16727_v40  ;;  %v16755_v36 = vmul.u32 %v18645_v14, %v4349_v35  ;;  %v16757_v45 = vmul.u32 %v4374_v21, %v4349_v35 }
 0x498   :  { %v16759_v11 = vadd.f32 1.0, %v3817_v29  ;;  %v16762_v19 = vmul.f32 %v3825_v15, %v16521_v58  ;;  %v3968_v55 = vadd.f32 0.041655596, %v3967_v47  ;;  %v3975_v18 = vadd.f32 0.008332121, %v3974_v53 }
 0x499   :  { %v16764_v49 = vsub.s32 32, %v4468_v54  ;;  %v4098_v63 = vclz %v16742_v34  ;;  %v16767_v9 = vadd.s32 %v4243_v22, %v4239_v38  ;;  %v4461_v5 = vand.u32 8388607, %v18644_v8 }
 0x49a   :  { %19158 = vst [vmem:[#allocation15_spill] sm:$0xff] %v16759_v11  ;;  %v4353_v44 = vmul.u32 %v4351_v32, %v4349_v35  ;;  %v16771_v60 = vmul.u32 %v4351_v32, %v4350_v37  ;;  %v4375_v12 = vmul.u32 %v4373_v33, %v4349_v35  ;;  %v16773_v29 = vmul.u32 %v4373_v33, %v4350_v37 }
 0x49b   :  { %19159 = vst [vmem:[#allocation14_spill] sm:$0xff] %v16762_v19  ;;  %v4357_v58 = vshll.u32 %v16755_v36, 16  ;;  %v4379_v17 = vshll.u32 %v16757_v45, 16  ;;  %v4474_v15 = vshll.u32 %v19111_v10, %v4468_v54  ;;  %v4480_v47 = vshll.u32 %v18994_v23, %v4468_v54 }
 0x49c   :  { %v4475_v53 = vshrl.u32 %v19150_v4, %v16764_v49  ;;  %v4477_v34 = vshll.u32 %v19150_v4, %v4468_v54  ;;  %v4478_v38 = vshrl.u32 %v18994_v23, %v16764_v49  ;;  %v4481_v35 = vshrl.u32 %v19067_v46, %v16764_v49 }
 0x49d   :  { %v4462_v22 = vor.u32 8388608, %v4461_v5  ;;  %v16786_v32 = vshrl.u32 %v4466_v2, 5  ;;  %v4483_v33 = vshll.u32 %v19067_v46, %v4468_v54  ;;  %v4484_v8 = vshrl.u32 %v19068_v52, %v16764_v49 }
 0x49e   :  { %v4245_v16 = vadd.s32 536870912, %v16767_v9  ;;  %v18656_v14 = vshll.u32 %v16773_v29, 16  ;;  %v4471_v0 = vshll.u32 %v18773_v50, %v4468_v54  ;;  %v4472_v40 = vshrl.u32 %v19111_v10, %v16764_v49 }
 0x49f   :  { %vm4383_vm15 = vc.u32 %v4375_v12, %v4379_v17  ;;  %v16796_v13 = vadd.s32 %v4379_v17, %v4375_v12  ;;  %v4482_v5 = vor.u32 %v4481_v35, %v4480_v47  ;;  %v4485_v2 = vor.u32 %v4484_v8, %v4483_v33 }
 0x4a0   :  { %v4359_v41 = vshll.u32 %v16771_v60, 16  ;;  %vm4361_vm11 = vc.u32 %v4353_v44, %v4357_v58  ;;  %v16799_v24 = vor.u32 %v4475_v53, %v4474_v15  ;;  %v16801_v3 = vor.u32 %v4478_v38, %v4477_v34 }
 0x4a1   :  { %v4363_v56 = vadd.s32 %v4357_v58, %v4353_v44  ;;  %v4378_v62 = vmul.u32 %v4374_v21, %v4350_v37  ;;  %vm4486_vm10 = vcmp.lt.s32.totalorder %v16786_v32, 1  ;;  %vm4489_vm9 = vcmp.lt.s32.totalorder %v16786_v32, 4 }
 0x4a2   :  { %v16805_v54 = vshrl.u32 %v4245_v16, 30  ;;  %v4384_v12 = vsel %vm4383_vm15, 1, %v18790_v43  ;;  %v16808_v17 = vor.u32 %v4472_v40, %v4471_v0  ;;  %vm4488_vm6 = vcmp.lt.s32.totalorder %v16786_v32, 3 }
 0x4a3   :  { %v19161_v8 = vshrl.u32 %v16718_v20, 16  ;;  %vm4387_vm2 = vc.u32 %v16796_v13, %v18656_v14  ;;  %v4495_v21 = vsel %vm4489_vm9, %v4482_v5, 920167782  ;;  %v4499_v16 = vsel %vm4489_vm9, %v4485_v2, 1326507024 }
 0x4a4   :  { %19160 = vst [vmem:[#allocation10_spill] sm:$0xff] %v16805_v54  ;;  %v4362_v44 = vsel %vm4361_vm11, 1, %v18790_v43  ;;  %vm4487_vm3 = vcmp.lt.s32.totalorder %v16786_v32, 2  ;;  %v4498_v0 = vsel %vm4486_vm10, %v16799_v24, %v16801_v3  ;;  %v16826_v20 = vshll.u32 %v4462_v22, 8 }
 0x4a5   :  { %v4356_v15 = vmul.u32 %v19161_v8, %v4350_v37  ;;  %v3969_v40 = vmul.f32 %v3968_v55, %v16710_v25  ;;  %vm4365_vm12 = vc.u32 %v4363_v56, %v4359_v41  ;;  %v4386_v37 = vadd.s32 %v4384_v12, %v4378_v62 }
 0x4a6   :  { %v4500_v58 = vsel %vm4488_vm6, %v4482_v5, %v4499_v16  ;;  %v3976_v47 = vmul.f32 %v3975_v18, %v16710_v25  ;;  %v4388_v53 = vsel %vm4387_vm2, 1, %v18790_v43  ;;  %v4494_v34 = vsel %vm4486_vm10, %v16808_v17, %v16799_v24 }
 0x4a7   :  { %v4496_v38 = vsel %vm4488_vm6, %v16801_v3, %v4495_v21  ;;  %v19162_v41 = vsub.s32 4, %v19157_v6  ;;  %v11067_v62 = vadd.s32 4294967294, %v4098_v63  ;;  %v4364_v55 = vadd.s32 %v4362_v44, %v4356_v15 }
 0x4a8   :  { %v4501_v18 = vsel %vm4487_vm3, %v4498_v0, %v4500_v58  ;;  %v4247_v22 = vshll.u32 %v16805_v54, 30  ;;  %v4366_v33 = vsel %vm4365_vm12, 1, %v18790_v43  ;;  %v4503_v5 = vand.u32 65535, %v16826_v20 }
 0x4a9   :  { %v16845_v56 = vsel %vm3840_vm5, %v19162_v41, %v19157_v6  ;;  %v4380_v2 = vshrl.u32 %v16757_v45, 16  ;;  %v4390_v12 = vadd.s32 %v4388_v53, %v4386_v37  ;;  %v4497_v6 = vsel %vm4487_vm3, %v4494_v34, %v4496_v38 }
 0x4aa   :  { %v4506_v8 = vshrl.u32 %v4501_v18, 16  ;;  %v16857_v15 = vadd.f32 -0.4999988, %v3969_v40  ;;  %v3977_v21 = vadd.f32 -0.16666654, %v3976_v47  ;;  %v4086_v16 = vadd.s32 %v16514_v42, %v16509_v61 }
 0x4ab   :  { %vm11068_vm5 = vcmp.lt.s32.totalorder %v11067_v62, 0  ;;  %v4358_v44 = vshrl.u32 %v16755_v36, 16  ;;  %v4368_v0 = vadd.s32 %v4366_v33, %v4364_v55  ;;  %v4504_v58 = vshrl.u32 %v16826_v20, 16 }
 0x4ac   :  { %v4505_v45 = vand.u32 65535, %v4501_v18  ;;  %v16863_v37 = vmul.u32 %v4506_v8, %v4503_v5  ;;  %v4527_v53 = vand.u32 65535, %v4497_v6  ;;  %v4528_v34 = vshrl.u32 %v4497_v6, 16 }
 0x4ad   :  { %v16866_v38 = vsub.s32 %v16767_v9, %v4247_v22  ;;  %v4316_v40 = vshrl.u32 %v18773_v50, %v16585_v30  ;;  %v4382_v47 = vshrl.u32 %v16773_v29, 16  ;;  %v4391_v61 = vadd.s32 %v4390_v12, %v4380_v2 }
 0x4ae   :  { %vm3830_vm15 = vcmp.eq.s32.totalorder %v16750_v59, 0  ;;  %vm3833_vm11 = vcmp.eq.s32.totalorder %v16750_v59, 2  ;;  %v3978_v42 = vmul.f32 %v3977_v21, %v16710_v25  ;;  %v4101_v36 = vsel %vm11068_vm5, 0, %v11067_v62 }
 0x4af   :  { %v4337_v41 = vsel %vm4335_vm13, %v16653_v39, 2102212464  ;;  %v16877_v55 = vmul.u32 %v4528_v34, %v4503_v5  ;;  %v4102_v9 = vsub.s32 32, %v4101_v36  ;;  %v4103_v18 = vshll.u32 %v16669_v48, %v4101_v36 }
 0x4b0   :  { %v4360_v30 = vshrl.u32 %v16771_v60, 16  ;;  %v4369_v22 = vadd.s32 %v4368_v0, %v4358_v44  ;;  %v4507_v33 = vmul.u32 %v4505_v45, %v4503_v5  ;;  %v16881_v2 = vmul.u32 %v4505_v45, %v4504_v58  ;;  %v19163_v0 = vld [vmem:[#allocation49_spill] sm:$0xff] }
 0x4b1   :  { %v4511_v12 = vshll.u32 %v16863_v37, 16  ;;  %v16884_v6 = vmul.u32 %v4527_v53, %v4504_v58  ;;  %v4250_v62 = vsub.s32 0, %v16866_v38  ;;  %v4336_v39 = vsel %vm4332_vm4, %v4316_v40, %v16649_v26 }
 0x4b2   :  { %v4338_v48 = vsel %vm4334_vm0, %v16651_v7, %v4337_v41  ;;  %v4392_v21 = vadd.s32 %v4391_v61, %v4382_v47  ;;  %vm4249_vm13 = vcmp.lt.s32.totalorder %v16866_v38, 0  ;;  %v4529_v60 = vmul.u32 %v4527_v53, %v4503_v5 }
 0x4b3   :  { %v4533_v44 = vshll.u32 %v16877_v55, 16  ;;  %v4611_v45 = vand.u32 2139095040, %v19163_v0  ;;  %v4104_v35 = vshrl.u32 %v4086_v16, %v4102_v9  ;;  %v4106_v63 = vsub.s32 4294967266, %v4101_v36 }
 0x4b4   :  { %v16896_v14 = vadd.s32 %v4369_v22, %v4360_v30  ;;  %v19164_v54 = vshll.u32 %v16773_v29, 16  ;;  %vm3829_vm4 = vcmp.lt.s32.totalorder %v16750_v59, 2  ;;  %v4513_v7 = vshll.u32 %v16881_v2, 16 }
 0x4b5   :  { %vm4515_vm0 = vc.u32 %v4507_v33, %v4511_v12  ;;  %v4517_v40 = vadd.s32 %v4511_v12, %v4507_v33  ;;  %v4535_v5 = vshll.u32 %v16884_v6, 16  ;;  %v4251_v53 = vsel %vm4249_vm13, %v4250_v62, %v16866_v38 }
 0x4b6   :  { %v16901_v26 = vadd.s32 %v16796_v13, %v19164_v54  ;;  %v4339_v16 = vsel %vm4333_vm14, %v4336_v39, %v4338_v48  ;;  %v4396_v47 = vadd.s32 1, %v4392_v21  ;;  %v4510_v61 = vmul.u32 %v4506_v8, %v4504_v58 }
 0x4b7   :  { %v4532_v36 = vmul.u32 %v4528_v34, %v4504_v58  ;;  %vm4537_vm2 = vc.u32 %v4529_v60, %v4533_v44  ;;  %v16909_v29 = vadd.s32 %v4533_v44, %v4529_v60  ;;  %v4612_v13 = vshrl.u32 %v4611_v45, 23 }
 0x4b8   :  { %v4107_v54 = vadd.s32 127, %v4106_v63  ;;  %vm4395_vm12 = vc.u32 %v16896_v14, %v16901_v26  ;;  %v4516_v41 = vsel %vm4515_vm0, 1, %v18790_v43  ;;  %v4538_v9 = vsel %vm4537_vm2, 1, %v18790_v43 }
 0x4b9   :  { %v4252_v30 = vclz %v4251_v53  ;;  %vm4519_vm5 = vc.u32 %v4517_v40, %v4513_v7  ;;  %vm4541_vm14 = vc.u32 %v16909_v29, %v4535_v5  ;;  %v11078_v27 = vadd.s32 4294967169, %v4612_v13 }
 0x4ba   :  { %v19165_v8 = vxor.u32 2147483648, %v16762_v19  ;;  %v19166_v58 = vxor.u32 2147483648, %v16759_v11  ;;  %v16931_v22 = vsel %vm16609_vm1, 0, %v16845_v56  ;;  %v4393_v33 = vmul.u32 %v16705_v51, %v4339_v16 }
 0x4bb   :  { %19167 = vst [vmem:[#allocation29_spill] sm:$0xff] %v16931_v22  ;;  %v4397_v12 = vsel %vm4395_vm12, %v4396_v47, %v4392_v21  ;;  %v4518_v62 = vadd.s32 %v4516_v41, %v4510_v61  ;;  %v4540_v39 = vadd.s32 %v4538_v9, %v4532_v36  ;;  %v4618_v48 = vadd.s32 1, %v11078_v27 }
 0x4bc   :  { %v3832_v63 = vsel %vm3830_vm15, %v16759_v11, %v19165_v8  ;;  %v3835_v34 = vsel %vm3833_vm11, %v19166_v58, %v16762_v19  ;;  %v3971_v60 = vmul.f32 %v16857_v15, %v16710_v25  ;;  %v3979_v44 = vadd.f32 1.0, %v3978_v42 }
 0x4bd   :  { %v4520_v45 = vsel %vm4519_vm5, 1, %v18790_v43  ;;  %v4542_v7 = vsel %vm4541_vm14, 1, %v18790_v43  ;;  %v16938_v40 = vor.u32 %v4104_v35, %v4103_v18  ;;  %v4108_v53 = vshll.u32 %v4107_v54, 23 }
 0x4be   :  { %v11070_v28 = vadd.s32 4294967294, %v4252_v30  ;;  %vm4619_vm1 = vcmp.gt.s32.totalorder %v4618_v48, 0  ;;  %v16940_v56 = vadd.s32 %v4397_v12, %v4393_v33  ;;  %v4512_v51 = vshrl.u32 %v16863_v37, 16 }
 0x4bf   :  { %v18661_v21 = vand.u32 2147483647, %v19163_v0  ;;  %v4620_v16 = vsel %vm4619_vm1, %v4618_v48, 0  ;;  %v4522_v47 = vadd.s32 %v4520_v45, %v4518_v62  ;;  %v4534_v25 = vshrl.u32 %v16877_v55, 16 }
 0x4c0   :  { %v4544_v15 = vadd.s32 %v4542_v7, %v4540_v39  ;;  %v4622_v42 = vand.u32 31, %v4620_v16  ;;  %v16947_v61 = vsel %vm3829_vm4, %v3832_v63, %v3835_v34  ;;  %v16949_v35 = vadd.f32 1.0, %v3971_v60 }
 0x4c1   :  { %v16952_v18 = vmul.f32 %v3979_v44, %v16666_v1  ;;  %v16955_v36 = vand.u32 3, %v16931_v22  ;;  %v4109_v37 = vor.u32 4788187, %v4108_v53  ;;  %v4112_v13 = vcvt.s32.f32 %v16938_v40 }
 0x4c2   :  { %19168 = vst [vmem:[#allocation84_spill] sm:$0xff] %v16949_v35  ;;  %vm11071_vm15 = vcmp.lt.s32.totalorder %v11070_v28, 0  ;;  %v16958_v54 = vsub.s32 32, %v4622_v42  ;;  %v4399_v55 = vadd.s32 536870912, %v16940_v56  ;;  %v4470_v59 = vshrl.u32 %v18773_v50, %v16764_v49 }
 0x4c3   :  { %19169 = vst [vmem:[#allocation71_spill] sm:$0xff] %v16952_v18  ;;  %v4491_v41 = vsel %vm4489_vm9, %v16801_v3, 2102212464  ;;  %v4615_v1 = vand.u32 8388607, %v18661_v21  ;;  %v4514_v9 = vshrl.u32 %v16881_v2, 16  ;;  %v4523_v30 = vadd.s32 %v4522_v47, %v4512_v51 }
 0x4c4   :  { %v4536_v27 = vshrl.u32 %v16884_v6, 16  ;;  %v4545_v8 = vadd.s32 %v4544_v15, %v4534_v25  ;;  %v4628_v63 = vshll.u32 %v19111_v10, %v4622_v42  ;;  %v4629_v58 = vshrl.u32 %v19150_v4, %v16958_v54 }
 0x4c5   :  { %v4631_v49 = vshll.u32 %v19150_v4, %v4622_v42  ;;  %v4634_v34 = vshll.u32 %v18994_v23, %v4622_v42  ;;  %v4632_v3 = vshrl.u32 %v18994_v23, %v16958_v54  ;;  %v4635_v33 = vshrl.u32 %v19067_v46, %v16958_v54 }
 0x4c6   :  { %v4637_v2 = vshll.u32 %v19067_v46, %v4622_v42  ;;  %v4638_v12 = vshrl.u32 %v19068_v52, %v16958_v54  ;;  %v4110_v62 = vand.u32 2147483647, %v4109_v37  ;;  %v16983_v39 = vsel %vm11071_vm15, 0, %v11070_v28 }
 0x4c7   :  { %v4490_v48 = vsel %vm4486_vm10, %v4470_v59, %v16808_v17  ;;  %v16988_v60 = vshrl.u32 %v4620_v16, 5  ;;  %v16990_v44 = vshrl.u32 %v4399_v55, 30  ;;  %v16992_v45 = vadd.s32 %v4523_v30, %v4514_v9 }
 0x4c8   :  { %v16997_v7 = vadd.s32 %v16909_v29, %v4535_v5  ;;  %v4616_v40 = vor.u32 8388608, %v4615_v1  ;;  %v4492_v53 = vsel %vm4488_vm6, %v16799_v24, %v4491_v41  ;;  %v4546_v28 = vadd.s32 %v4545_v8, %v4536_v27  ;;  %v19170_v5 = vld [vmem:[#allocation41_spill] sm:$0xff]  ;;  %v19172_v41 = vld [vmem:[#allocation44_spill] sm:$0xff] }
 0x4c9   :  { %v4625_v51 = vshll.u32 %v18773_v50, %v4622_v42  ;;  %v4626_v17 = vshrl.u32 %v19111_v10, %v16958_v54  ;;  %v17005_v16 = vor.u32 %v4629_v58, %v4628_v63  ;;  %v17007_v47 = vor.u32 %v4632_v3, %v4631_v49 }
 0x4ca   :  { %v4636_v25 = vor.u32 %v4635_v33, %v4634_v34  ;;  %v4639_v6 = vor.u32 %v4638_v12, %v4637_v2  ;;  %v4240_v29 = vadd.s32 %v19170_v5, %v16692_v57  ;;  %v4260_v15 = vsub.s32 4294967266, %v16983_v39  ;;  %v19171_v57 = vld [vmem:[#allocation95_spill] sm:$0xff]  ;;  %v19173_v12 = vld [vmem:[#allocation40_spill] sm:$0xff] }
 0x4cb   :  { %vm4640_vm10 = vcmp.lt.s32.totalorder %v16988_v60, 1  ;;  %vm4643_vm9 = vcmp.lt.s32.totalorder %v16988_v60, 4  ;;  %vm3984_vm6 = vcmp.eq.s32.totalorder %v16955_v36, 0  ;;  %vm3987_vm11 = vcmp.eq.s32.totalorder %v16955_v36, 2 }
 0x4cc   :  { %v4401_v24 = vshll.u32 %v16990_v44, 30  ;;  %v4493_v42 = vsel %vm4487_vm3, %v4490_v48, %v4492_v53  ;;  %vm4549_vm13 = vc.u32 %v16992_v45, %v16997_v7  ;;  %v17021_v37 = vshll.u32 %v4616_v40, 8 }
 0x4cd   :  { %vm3994_vm4 = vcmp.lt.s32.totalorder %v19171_v57, 0  ;;  %v4550_v55 = vadd.s32 1, %v4546_v28  ;;  %v17024_v59 = vor.u32 %v4626_v17, %v4625_v51  ;;  %vm4642_vm0 = vcmp.lt.s32.totalorder %v16988_v60, 3 }
 0x4ce   :  { %v4765_v1 = vand.u32 2139095040, %v19172_v41  ;;  %vm4641_vm2 = vcmp.lt.s32.totalorder %v16988_v60, 2  ;;  %v4649_v32 = vsel %vm4643_vm9, %v4636_v25, 920167782  ;;  %v4652_v9 = vsel %vm4640_vm10, %v17005_v16, %v17007_v47 }
 0x4cf   :  { %v4653_v30 = vsel %vm4643_vm9, %v4639_v6, 1326507024  ;;  %v4113_v27 = vmul.f32 %v4112_v13, %v4110_v62  ;;  %v4256_v8 = vsub.s32 32, %v16983_v39  ;;  %v4261_v63 = vadd.s32 127, %v4260_v15 }
 0x4d0   :  { %v4547_v58 = vmul.u32 %v16826_v20, %v4493_v42  ;;  %v17040_v49 = vsub.s32 %v16940_v56, %v4401_v24  ;;  %v4654_v34 = vsel %vm4642_vm0, %v4636_v25, %v4653_v30  ;;  %v4657_v3 = vand.u32 65535, %v17021_v37 }
 0x4d1   :  { %v4658_v33 = vshrl.u32 %v17021_v37, 16  ;;  %v4551_v2 = vsel %vm4549_vm13, %v4550_v55, %v4546_v28  ;;  %v4648_v13 = vsel %vm4640_vm10, %v17024_v59, %v17005_v16  ;;  %v4650_v20 = vsel %vm4642_vm0, %v17007_v47, %v4649_v32 }
 0x4d2   :  { %v4655_v56 = vsel %vm4641_vm2, %v4652_v9, %v4654_v34  ;;  %v4116_v62 = vsub.s32 4, %v19173_v12  ;;  %v4766_v53 = vshrl.u32 %v4765_v1, 23  ;;  %v18660_v51 = vxor.u32 2147483648, %v16952_v18 }
 0x4d3   :  { %v4659_v48 = vand.u32 65535, %v4655_v56  ;;  %v4660_v40 = vshrl.u32 %v4655_v56, 16  ;;  %v18659_v28 = vxor.u32 2147483648, %v16949_v35  ;;  %v4114_v17 = vxor.u32 2147483648, %v4113_v27 }
 0x4d4   :  { %v4257_v25 = vshll.u32 %v16866_v38, %v16983_v39  ;;  %v4258_v6 = vshrl.u32 %v4240_v29, %v4256_v8  ;;  %v17063_v5 = vadd.s32 %v4551_v2, %v4547_v58  ;;  %v4651_v15 = vsel %vm4641_vm2, %v4648_v13, %v4650_v20 }
 0x4d5   :  { %v4662_v24 = vmul.u32 %v4660_v40, %v4657_v3  ;;  %v4262_v42 = vshll.u32 %v4261_v63, 23  ;;  %vm4403_vm3 = vcmp.lt.s32.totalorder %v17040_v49, 0  ;;  %v4404_v55 = vsub.s32 0, %v17040_v49 }
 0x4d6   :  { %v4663_v1 = vmul.u32 %v4659_v48, %v4658_v33  ;;  %v4661_v32 = vmul.u32 %v4659_v48, %v4657_v3  ;;  %v4681_v30 = vand.u32 65535, %v4651_v15  ;;  %v11081_v34 = vadd.s32 4294967169, %v4766_v53 }
 0x4d7   :  { %v4665_v9 = vshll.u32 %v4662_v24, 16  ;;  %v3986_v38 = vsel %vm3984_vm6, %v16949_v35, %v18660_v51  ;;  %v3989_v39 = vsel %vm3987_vm11, %v18659_v28, %v16952_v18  ;;  %v4117_v29 = vsel %vm3994_vm4, %v4116_v62, %v19173_v12  ;;  %v19186_v18 = vld [vmem:[#allocation10_spill] sm:$0xff] }
 0x4d8   :  { %v4682_v8 = vshrl.u32 %v4651_v15, 16  ;;  %v4115_v63 = vsel %vm3994_vm4, %v4114_v17, %v4113_v27  ;;  %v17084_v58 = vor.u32 %v4258_v6, %v4257_v25  ;;  %v4553_v2 = vadd.s32 536870912, %v17063_v5  ;;  %v19177_v25 = vld [vmem:[#allocation21_spill] sm:$0xff] }
 0x4d9   :  { %v4664_v13 = vmul.u32 %v4660_v40, %v4658_v33  ;;  %vm3983_vm12 = vcmp.lt.s32.totalorder %v16955_v36, 2  ;;  %v17088_v20 = vor.u32 4788187, %v4262_v42  ;;  %v4405_v56 = vsel %vm4403_vm3, %v4404_v55, %v17040_v49 }
 0x4da   :  { %v4624_v12 = vshrl.u32 %v18773_v50, %v16958_v54  ;;  %v4667_v62 = vshll.u32 %v4663_v1, 16  ;;  %v19174_v48 = vand.u32 2147483647, %v19171_v57  ;;  %v4645_v40 = vsel %vm4643_vm9, %v17007_v47, 2102212464 }
 0x4db   :  { %vm4669_vm14 = vc.u32 %v4661_v32, %v4665_v9  ;;  %v4683_v53 = vmul.u32 %v4681_v30, %v4657_v3  ;;  %v4772_v17 = vadd.s32 1, %v11081_v34  ;;  %vm18689_vm1 = vweird.f32 %v19177_v25 }
 0x4dc   :  { %vm17097_vm5 = vcmp.le.f32.partialorder %v19174_v48, 0.7853982  ;;  %v4670_v6 = vsel %vm4669_vm14, 1, %v18790_v43  ;;  %v4671_v15 = vadd.s32 %v4665_v9, %v4661_v32  ;;  %v4684_v54 = vmul.u32 %v4682_v8, %v4657_v3 }
 0x4dd   :  { %v4685_v42 = vmul.u32 %v4681_v30, %v4658_v33  ;;  %v4406_v55 = vclz %v4405_v56  ;;  %v17106_v28 = vshrl.u32 %v4553_v2, 30  ;;  %v4666_v48 = vshrl.u32 %v4662_v24, 16 }
 0x4de   :  { %v4672_v51 = vadd.s32 %v4670_v6, %v4664_v13  ;;  %vm4673_vm15 = vc.u32 %v4671_v15, %v4667_v62  ;;  %v4686_v21 = vmul.u32 %v4682_v8, %v4658_v33  ;;  %v4687_v11 = vshll.u32 %v4684_v54, 16 }
 0x4df   :  { %v4689_v19 = vshll.u32 %v4685_v42, 16  ;;  %v4644_v47 = vsel %vm4640_vm10, %v4624_v12, %v17024_v59  ;;  %v4646_v34 = vsel %vm4642_vm0, %v17005_v16, %v4645_v40  ;;  %v4668_v32 = vshrl.u32 %v4663_v1, 16 }
 0x4e0   :  { %v4674_v3 = vsel %vm4673_vm15, 1, %v18790_v43  ;;  %vm4691_vm9 = vc.u32 %v4683_v53, %v4687_v11  ;;  %v4693_v30 = vadd.s32 %v4687_v11, %v4683_v53  ;;  %vm4773_vm6 = vcmp.gt.s32.totalorder %v4772_v17, 0 }
 0x4e1   :  { %v4676_v9 = vadd.s32 %v4674_v3, %v4672_v51  ;;  %v11073_v24 = vadd.s32 4294967294, %v4406_v55  ;;  %v4692_v33 = vsel %vm4691_vm9, 1, %v18790_v43  ;;  %v18666_v8 = vand.u32 2147483647, %v19172_v41 }
 0x4e2   :  { %v4774_v2 = vsel %vm4773_vm6, %v4772_v17, 0  ;;  %v4688_v56 = vshrl.u32 %v4684_v54, 16  ;;  %v4694_v59 = vadd.s32 %v4692_v33, %v4686_v21  ;;  %vm4695_vm10 = vc.u32 %v4693_v30, %v4689_v19 }
 0x4e3   :  { %v4677_v13 = vadd.s32 %v4676_v9, %v4666_v48  ;;  %v4555_v12 = vshll.u32 %v17106_v28, 30  ;;  %v4647_v16 = vsel %vm4641_vm2, %v4644_v47, %v4646_v34  ;;  %v4696_v51 = vsel %vm4695_vm10, 1, %v18790_v43 }
 0x4e4   :  { %v4776_v1 = vand.u32 31, %v4774_v2  ;;  %v4690_v62 = vshrl.u32 %v4685_v42, 16  ;;  %v17123_v40 = vadd.s32 %v4693_v30, %v4689_v19  ;;  %v4698_v53 = vadd.s32 %v4696_v51, %v4694_v59  ;;  %v19180_v30 = vld [vmem:[#allocation82_spill] sm:$0xff] }
 0x4e5   :  { %v17121_v11 = vadd.s32 %v4677_v13, %v4668_v32  ;;  %v17128_v17 = vsel %vm18689_vm1, nan, %v16947_v61  ;;  %v17132_v21 = vsel %vm3983_vm12, %v3986_v38, %v3989_v39  ;;  %v17136_v60 = vsel %vm17097_vm5, 0, %v4117_v29 }
 0x4e6   :  { %19178 = vst [vmem:[#allocation59_spill] sm:$0xff] %v17128_v17  ;;  %v17138_v6 = vsub.s32 32, %v4776_v1  ;;  %v17143_v19 = vsel %vm17097_vm5, %v19171_v57, %v4115_v63  ;;  %v4264_v15 = vand.u32 2147483647, %v17088_v20  ;;  %v4266_v61 = vcvt.s32.f32 %v17084_v58 }
 0x4e7   :  { %19179 = vst [vmem:[#allocation81_spill] sm:$0xff] %v17136_v60  ;;  %v4699_v54 = vadd.s32 %v4698_v53, %v4688_v56  ;;  %vm11074_vm11 = vcmp.lt.s32.totalorder %v11073_v24, 0  ;;  %v17148_v36 = vsub.s32 %v17063_v5, %v4555_v12  ;;  %v4701_v38 = vmul.u32 %v17021_v37, %v4647_v16 }
 0x4e8   :  { %v4769_v39 = vand.u32 8388607, %v18666_v8  ;;  %vm4703_vm13 = vc.u32 %v17121_v11, %v17123_v40  ;;  %v4782_v63 = vshll.u32 %v19111_v10, %v4776_v1  ;;  %v4788_v20 = vshll.u32 %v18994_v23, %v4776_v1 }
 0x4e9   :  { %v4700_v29 = vadd.s32 %v4699_v54, %v4690_v62  ;;  %v4783_v58 = vshrl.u32 %v19150_v4, %v17138_v6  ;;  %v4785_v27 = vshll.u32 %v19150_v4, %v4776_v1  ;;  %v4786_v5 = vshrl.u32 %v18994_v23, %v17138_v6 }
 0x4ea   :  { %v4789_v37 = vshrl.u32 %v19067_v46, %v17138_v6  ;;  %v17164_v55 = vshrl.u32 %v4774_v2, 5  ;;  %v4791_v48 = vshll.u32 %v19067_v46, %v4776_v1  ;;  %v4792_v47 = vshrl.u32 %v19068_v52, %v17138_v6 }
 0x4eb   :  { %v4704_v42 = vadd.s32 1, %v4700_v29  ;;  %v17170_v34 = vsel %vm11074_vm11, 0, %v11073_v24  ;;  %v4770_v32 = vor.u32 8388608, %v4769_v39  ;;  %v4779_v3 = vshll.u32 %v18773_v50, %v4776_v1 }
 0x4ec   :  { %v4780_v9 = vshrl.u32 %v19111_v10, %v17138_v6  ;;  %vm18690_vm4 = vweird.f32 %v19145_v31  ;;  %vm4148_vm0 = vcmp.lt.s32.totalorder %v19180_v30, 0  ;;  %v4558_v33 = vsub.s32 0, %v17148_v36 }
 0x4ed   :  { %v4705_v2 = vsel %vm4703_vm13, %v4704_v42, %v4700_v29  ;;  %v4790_v13 = vor.u32 %v4789_v37, %v4788_v20  ;;  %v4793_v56 = vor.u32 %v4792_v47, %v4791_v48  ;;  %vm4557_vm2 = vcmp.lt.s32.totalorder %v17148_v36, 0 }
 0x4ee   :  { %v4706_v24 = vadd.s32 %v4705_v2, %v4701_v38  ;;  %v17182_v59 = vor.u32 %v4783_v58, %v4782_v63  ;;  %v17184_v12 = vor.u32 %v4786_v5, %v4785_v27  ;;  %v17188_v16 = vmul.f32 %v17143_v19, %v17143_v19 }
 0x4ef   :  { %v4267_v51 = vmul.f32 %v4266_v61, %v4264_v15  ;;  %vm4794_vm3 = vcmp.lt.s32.totalorder %v17164_v55, 1  ;;  %vm4797_vm12 = vcmp.lt.s32.totalorder %v17164_v55, 4  ;;  %v4414_v1 = vsub.s32 4294967266, %v17170_v34 }
 0x4f0   :  { %v4707_v62 = vadd.s32 536870912, %v4706_v24  ;;  %v17193_v53 = vor.u32 %v4780_v9, %v4779_v3  ;;  %vm4796_vm5 = vcmp.lt.s32.totalorder %v17164_v55, 3  ;;  %v19181_v54 = vand.u32 2147483647, %v19180_v30 }
 0x4f1   :  { %v4559_v39 = vsel %vm4557_vm2, %v4558_v33, %v17148_v36  ;;  %v4803_v15 = vsel %vm4797_vm12, %v4790_v13, 920167782  ;;  %v4807_v61 = vsel %vm4797_vm12, %v4793_v56, 1326507024  ;;  %v17207_v29 = vshll.u32 %v4770_v32, 8 }
 0x4f2   :  { %vm17198_vm14 = vcmp.le.f32.partialorder %v19181_v54, 0.7853982  ;;  %v4121_v63 = vmul.f32 -0.001358992, %v17188_v16  ;;  %v17210_v20 = vshrl.u32 %v4707_v62, 30  ;;  %vm4795_vm15 = vcmp.lt.s32.totalorder %v17164_v55, 2 }
 0x4f3   :  { %v4806_v58 = vsel %vm4794_vm3, %v17182_v59, %v17184_v12  ;;  %v4128_v27 = vmul.f32 -0.00019511016, %v17188_v16  ;;  %v4268_v5 = vxor.u32 2147483648, %v4267_v51  ;;  %v4394_v37 = vadd.s32 %v16901_v26, %v16896_v14 }
 0x4f4   :  { %19184 = vst [vmem:[#allocation51_spill] sm:$0xff] %v17210_v20  ;;  %v4808_v42 = vsel %vm4796_vm5, %v4790_v13, %v4807_v61  ;;  %v4410_v48 = vsub.s32 32, %v17170_v34  ;;  %v4560_v47 = vclz %v4559_v39  ;;  %v4802_v32 = vsel %vm4794_vm3, %v17193_v53, %v17182_v59 }
 0x4f5   :  { %v4804_v3 = vsel %vm4796_vm5, %v17184_v12, %v4803_v15  ;;  %v4415_v9 = vadd.s32 127, %v4414_v1  ;;  %v4809_v33 = vsel %vm4795_vm15, %v4806_v58, %v4808_v42  ;;  %v4811_v14 = vand.u32 65535, %v17207_v29 }
 0x4f6   :  { %v4812_v26 = vshrl.u32 %v17207_v29, 16  ;;  %v17237_v2 = vsel %vm18690_vm4, nan, %v17132_v21  ;;  %v4122_v13 = vadd.f32 0.041655596, %v4121_v63  ;;  %v17240_v56 = vand.u32 3, %v17136_v60 }
 0x4f7   :  { %19185 = vst [vmem:[#allocation49_spill] sm:$0xff] %v17237_v2  ;;  %v4709_v62 = vshll.u32 %v17210_v20, 30  ;;  %v4129_v54 = vadd.f32 0.008332121, %v4128_v27  ;;  %v4805_v1 = vsel %vm4795_vm15, %v4802_v32, %v4804_v3  ;;  %v4813_v39 = vand.u32 65535, %v4809_v33 }
 0x4f8   :  { %v4814_v15 = vshrl.u32 %v4809_v33, 16  ;;  %v4269_v61 = vsel %vm4148_vm0, %v4268_v5, %v4267_v51  ;;  %v4411_v58 = vshll.u32 %v17040_v49, %v17170_v34  ;;  %v4412_v21 = vshrl.u32 %v4394_v37, %v4410_v48 }
 0x4f9   :  { %v11076_v42 = vadd.s32 4294967294, %v4560_v47  ;;  %v4416_v63 = vshll.u32 %v4415_v9, 23  ;;  %v4815_v8 = vmul.u32 %v4813_v39, %v4811_v14  ;;  %v17249_v31 = vmul.u32 %v4813_v39, %v4812_v26 }
 0x4fa   :  { %v4816_v25 = vmul.u32 %v4814_v15, %v4811_v14  ;;  %v4123_v27 = vmul.f32 %v4122_v13, %v17188_v16  ;;  %v17252_v35 = vsub.s32 %v4706_v24, %v4709_v62  ;;  %v4835_v32 = vand.u32 65535, %v4805_v1 }
 0x4fb   :  { %v4836_v3 = vshrl.u32 %v4805_v1, 16  ;;  %v4130_v33 = vmul.f32 %v4129_v54, %v17188_v16  ;;  %v4818_v5 = vmul.u32 %v4814_v15, %v4812_v26  ;;  %v17259_v49 = vsel %vm17198_vm14, %v19180_v30, %v4269_v61 }
 0x4fc   :  { %v4819_v60 = vshll.u32 %v4816_v25, 16  ;;  %vm11077_vm9 = vcmp.lt.s32.totalorder %v11076_v42, 0  ;;  %v4821_v34 = vshll.u32 %v17249_v31, 16  ;;  %v4413_v48 = vor.u32 %v4412_v21, %v4411_v58  ;;  %v19187_v21 = vld [vmem:[#allocation45_spill] sm:$0xff] }
 0x4fd   :  { %v4838_v37 = vmul.u32 %v4836_v3, %v4811_v14  ;;  %v4417_v24 = vor.u32 4788187, %v4416_v63  ;;  %v4124_v9 = vadd.f32 -0.4999988, %v4123_v27  ;;  %v4712_v13 = vsub.s32 0, %v17252_v35 }
 0x4fe   :  { %vm4823_vm6 = vc.u32 %v4815_v8, %v4819_v60  ;;  %v4825_v47 = vadd.s32 %v4819_v60, %v4815_v8  ;;  %v4839_v54 = vmul.u32 %v4835_v32, %v4812_v26  ;;  %v17266_v1 = vmul.f32 %v17259_v49, %v17259_v49 }
 0x4ff   :  { %v4824_v62 = vsel %vm4823_vm6, 1, %v18790_v43  ;;  %v17268_v39 = vsel %vm11077_vm9, 0, %v11076_v42  ;;  %vm4711_vm10 = vcmp.lt.s32.totalorder %v17252_v35, 0  ;;  %v4837_v61 = vmul.u32 %v4835_v32, %v4811_v14 }
 0x500   :  { %v4826_v15 = vadd.s32 %v4824_v62, %v4818_v5  ;;  %vm4827_vm11 = vc.u32 %v4825_v47, %v4821_v34  ;;  %v4841_v58 = vshll.u32 %v4838_v37, 16  ;;  %v4919_v8 = vand.u32 2139095040, %v19187_v21 }
 0x501   :  { %v4418_v60 = vand.u32 2147483647, %v4417_v24  ;;  %v4420_v63 = vcvt.s32.f32 %v4413_v48  ;;  %v4548_v27 = vadd.s32 %v16997_v7, %v16992_v45  ;;  %v4820_v51 = vshrl.u32 %v4816_v25, 16 }
 0x502   :  { %v4713_v22 = vsel %vm4711_vm10, %v4712_v13, %v17252_v35  ;;  %v4828_v17 = vsel %vm4827_vm11, 1, %v18790_v43  ;;  %v4840_v42 = vmul.u32 %v4836_v3, %v4812_v26  ;;  %v4843_v2 = vshll.u32 %v4839_v54, 16 }
 0x503   :  { %v4564_v20 = vsub.s32 32, %v17268_v39  ;;  %v4568_v5 = vsub.s32 4294967266, %v17268_v39  ;;  %v4778_v14 = vshrl.u32 %v18773_v50, %v17138_v6  ;;  %v4830_v32 = vadd.s32 %v4828_v17, %v4826_v15 }
 0x504   :  { %v4799_v34 = vsel %vm4797_vm12, %v17184_v12, 2102212464  ;;  %vm4845_vm13 = vc.u32 %v4837_v61, %v4841_v58  ;;  %v4847_v45 = vadd.s32 %v4841_v58, %v4837_v61  ;;  %v4920_v7 = vshrl.u32 %v4919_v8, 23 }
 0x505   :  { %v4714_v25 = vclz %v4713_v22  ;;  %v4822_v48 = vshrl.u32 %v17249_v31, 16  ;;  %v4831_v26 = vadd.s32 %v4830_v32, %v4820_v51  ;;  %v4846_v3 = vsel %vm4845_vm13, 1, %v18790_v43  ;;  %v19188_v31 = vld [vmem:[#allocation87_spill] sm:$0xff] }
 0x506   :  { %v4842_v24 = vshrl.u32 %v4838_v37, 16  ;;  %v4848_v47 = vadd.s32 %v4846_v3, %v4840_v42  ;;  %vm4849_vm2 = vc.u32 %v4847_v45, %v4843_v2  ;;  %v11084_v13 = vadd.s32 4294967169, %v4920_v7 }
 0x507   :  { %v4569_v62 = vadd.s32 127, %v4568_v5  ;;  %v4798_v17 = vsel %vm4794_vm3, %v4778_v14, %v17193_v53  ;;  %v4800_v6 = vsel %vm4796_vm5, %v17182_v59, %v4799_v34  ;;  %v4850_v22 = vsel %vm4849_vm2, 1, %v18790_v43 }
 0x508   :  { %v4131_v12 = vadd.f32 -0.16666654, %v4130_v33  ;;  %vm4302_vm12 = vcmp.lt.s32.totalorder %v19188_v31, 0  ;;  %v4844_v51 = vshrl.u32 %v4839_v54, 16  ;;  %v4852_v15 = vadd.s32 %v4850_v22, %v4848_v47 }
 0x509   :  { %v4926_v37 = vadd.s32 1, %v11084_v13  ;;  %v4275_v61 = vmul.f32 -0.001358992, %v17266_v1  ;;  %v11079_v58 = vadd.s32 4294967294, %v4714_v25  ;;  %v17294_v8 = vadd.s32 %v4831_v26, %v4822_v48 }
 0x50a   :  { %v17296_v42 = vadd.s32 %v4847_v45, %v4843_v2  ;;  %v4421_v53 = vmul.f32 %v4420_v63, %v4418_v60  ;;  %v4801_v5 = vsel %vm4795_vm15, %v4798_v17, %v4800_v6  ;;  %v4853_v59 = vadd.s32 %v4852_v15, %v4842_v24 }
 0x50b   :  { %vm4927_vm3 = vcmp.gt.s32.totalorder %v4926_v37, 0  ;;  %v4565_v33 = vshll.u32 %v17148_v36, %v17268_v39  ;;  %v4566_v14 = vshrl.u32 %v4548_v27, %v4564_v20  ;;  %v4570_v54 = vshll.u32 %v4569_v62, 23 }
 0x50c   :  { %v4928_v32 = vsel %vm4927_vm3, %v4926_v37, 0  ;;  %v19189_v34 = vsub.s32 4, %v19186_v18  ;;  %v4854_v2 = vadd.s32 %v4853_v59, %v4844_v51  ;;  %v18677_v60 = vand.u32 2147483647, %v19187_v21 }
 0x50d   :  { %v4930_v55 = vand.u32 31, %v4928_v32  ;;  %v17311_v63 = vmul.f32 %v4124_v9, %v17188_v16  ;;  %v19190_v45 = vand.u32 2147483647, %v19188_v31  ;;  %vm11080_vm15 = vcmp.lt.s32.totalorder %v11079_v58, 0 }
 0x50e   :  { %v17307_v7 = vsel %vm4148_vm0, %v19189_v34, %v19186_v18  ;;  %v4855_v20 = vmul.u32 %v17207_v29, %v4801_v5  ;;  %vm4857_vm0 = vc.u32 %v17294_v8, %v17296_v42  ;;  %v17323_v18 = vmul.f32 %v4131_v12, %v17188_v16 }
 0x50f   :  { %vm17315_vm5 = vcmp.le.f32.partialorder %v19190_v45, 0.7853982  ;;  %v4282_v39 = vmul.f32 -0.00019511016, %v17266_v1  ;;  %v4858_v27 = vadd.s32 1, %v4854_v2  ;;  %v17326_v9 = vsub.s32 32, %v4930_v55 }
 0x510   :  { %v17328_v25 = vadd.f32 0.041655596, %v4275_v61  ;;  %v4422_v48 = vxor.u32 2147483648, %v4421_v53  ;;  %v4567_v26 = vor.u32 %v4566_v14, %v4565_v33  ;;  %v4571_v3 = vor.u32 4788187, %v4570_v54 }
 0x511   :  { %v17330_v24 = vsel %vm11080_vm15, 0, %v11079_v58  ;;  %v4859_v47 = vsel %vm4857_vm0, %v4858_v27, %v4854_v2  ;;  %v4923_v29 = vand.u32 8388607, %v18677_v60  ;;  %v4936_v13 = vshll.u32 %v19111_v10, %v4930_v55 }
 0x512   :  { %v4860_v16 = vadd.s32 %v4859_v47, %v4855_v20  ;;  %v4937_v62 = vshrl.u32 %v19150_v4, %v17326_v9  ;;  %v4939_v17 = vshll.u32 %v19150_v4, %v4930_v55  ;;  %v4942_v6 = vshll.u32 %v18994_v23, %v4930_v55 }
 0x513   :  { %v4940_v22 = vshrl.u32 %v18994_v23, %v17326_v9  ;;  %v4943_v12 = vshrl.u32 %v19067_v46, %v17326_v9  ;;  %v4945_v51 = vshll.u32 %v19067_v46, %v4930_v55  ;;  %v4946_v15 = vshrl.u32 %v19068_v52, %v17326_v9 }
 0x514   :  { %v4283_v37 = vadd.f32 0.008332121, %v4282_v39  ;;  %v4423_v61 = vsel %vm4302_vm12, %v4422_v48, %v4421_v53  ;;  %v4861_v58 = vadd.s32 536870912, %v4860_v16  ;;  %v17348_v5 = vshrl.u32 %v4928_v32, 5 }
 0x515   :  { %v4572_v59 = vand.u32 2147483647, %v4571_v3  ;;  %v4574_v33 = vcvt.s32.f32 %v4567_v26  ;;  %v4722_v14 = vsub.s32 4294967266, %v17330_v24  ;;  %v4924_v54 = vor.u32 8388608, %v4923_v29 }
 0x516   :  { %v4702_v34 = vadd.s32 %v17123_v40, %v17121_v11  ;;  %v17353_v2 = vshrl.u32 %v4861_v58, 30  ;;  %v4933_v45 = vshll.u32 %v18773_v50, %v4930_v55  ;;  %v4934_v20 = vshrl.u32 %v19111_v10, %v17326_v9 }
 0x517   :  { %v17358_v39 = vor.u32 %v4937_v62, %v4936_v13  ;;  %v17360_v53 = vor.u32 %v4940_v22, %v4939_v17  ;;  %v4944_v32 = vor.u32 %v4943_v12, %v4942_v6  ;;  %v4947_v27 = vor.u32 %v4946_v15, %v4945_v51 }
 0x518   :  { %19193 = vst [vmem:[#allocation41_spill] sm:$0xff] %v17353_v2  ;;  %v4718_v48 = vsub.s32 32, %v17330_v24  ;;  %v4863_v26 = vshll.u32 %v17353_v2, 30  ;;  %vm4948_vm9 = vcmp.lt.s32.totalorder %v17348_v5, 1  ;;  %vm4951_vm6 = vcmp.lt.s32.totalorder %v17348_v5, 4 }
 0x519   :  { %v4284_v11 = vmul.f32 %v4283_v37, %v17266_v1  ;;  %v17370_v40 = vsel %vm17315_vm5, %v19188_v31, %v4423_v61  ;;  %v4723_v55 = vadd.s32 127, %v4722_v14  ;;  %v17372_v3 = vshll.u32 %v4924_v54, 8 }
 0x51a   :  { %19194 = vst [vmem:[#allocation44_spill] sm:$0xff] %v17370_v40  ;;  %v4575_v47 = vmul.f32 %v4574_v33, %v4572_v59  ;;  %v4864_v29 = vsub.s32 %v4860_v16, %v4863_v26  ;;  %v17374_v13 = vor.u32 %v4934_v20, %v4933_v45  ;;  %vm4950_vm10 = vcmp.lt.s32.totalorder %v17348_v5, 3 }
 0x51b   :  { %vm4949_vm11 = vcmp.lt.s32.totalorder %v17348_v5, 2  ;;  %v4957_v62 = vsel %vm4951_vm6, %v4944_v32, 920167782  ;;  %v4960_v17 = vsel %vm4948_vm9, %v17358_v39, %v17360_v53  ;;  %v4961_v6 = vsel %vm4951_vm6, %v4947_v27, 1326507024  ;;  %v19195_v27 = vld [vmem:[#allocation89_spill] sm:$0xff] }
 0x51c   :  { %v4719_v16 = vshll.u32 %v17252_v35, %v17330_v24  ;;  %v4720_v22 = vshrl.u32 %v4702_v34, %v4718_v48  ;;  %vm4865_vm13 = vcmp.lt.s32.totalorder %v4864_v29, 0  ;;  %v4866_v12 = vsub.s32 0, %v4864_v29 }
 0x51d   :  { %v4724_v51 = vshll.u32 %v4723_v55, 23  ;;  %v4962_v15 = vsel %vm4950_vm10, %v4944_v32, %v4961_v6  ;;  %v4965_v37 = vand.u32 65535, %v17372_v3  ;;  %v4966_v61 = vshrl.u32 %v17372_v3, 16 }
 0x51e   :  { %v4867_v58 = vsel %vm4865_vm13, %v4866_v12, %v4864_v29  ;;  %v4956_v59 = vsel %vm4948_vm9, %v17374_v13, %v17358_v39  ;;  %v4958_v35 = vsel %vm4950_vm10, %v17360_v53, %v4957_v62  ;;  %v4963_v24 = vsel %vm4949_vm11, %v4960_v17, %v4962_v15 }
 0x51f   :  { %v17402_v33 = vadd.f32 1.0, %v17323_v18  ;;  %v4868_v14 = vclz %v4867_v58  ;;  %v4967_v54 = vand.u32 65535, %v4963_v24  ;;  %v4968_v34 = vshrl.u32 %v4963_v24, 16 }
 0x520   :  { %v17406_v45 = vmul.f32 %v17328_v25, %v17266_v1  ;;  %v17408_v20 = vadd.f32 -0.16666654, %v4284_v11  ;;  %v17412_v32 = vmul.f32 %v17370_v40, %v17370_v40  ;;  %vm4456_vm2 = vcmp.lt.s32.totalorder %v19195_v27, 0 }
 0x521   :  { %v4576_v48 = vxor.u32 2147483648, %v4575_v47  ;;  %v11082_v26 = vadd.s32 4294967294, %v4868_v14  ;;  %v4959_v18 = vsel %vm4949_vm11, %v4956_v59, %v4958_v35  ;;  %v4970_v55 = vmul.u32 %v4968_v34, %v4965_v37 }
 0x522   :  { %v4721_v62 = vor.u32 %v4720_v22, %v4719_v16  ;;  %v4725_v17 = vor.u32 4788187, %v4724_v51  ;;  %v4856_v25 = vadd.s32 %v17296_v42, %v17294_v8  ;;  %v17419_v6 = vmul.u32 %v4967_v54, %v4966_v61 }
 0x523   :  { %vm11083_vm3 = vcmp.lt.s32.totalorder %v11082_v26, 0  ;;  %v4969_v11 = vmul.u32 %v4967_v54, %v4965_v37  ;;  %v4973_v12 = vshll.u32 %v4970_v55, 16  ;;  %v4989_v15 = vand.u32 65535, %v4959_v18 }
 0x524   :  { %v4429_v58 = vmul.f32 -0.001358992, %v17412_v32  ;;  %v4436_v24 = vmul.f32 -0.00019511016, %v17412_v32  ;;  %v4871_v14 = vsel %vm11083_vm3, 0, %v11082_v26  ;;  %v4990_v60 = vshrl.u32 %v4959_v18, 16 }
 0x525   :  { %v19196_v59 = vand.u32 2147483647, %v19195_v27  ;;  %v4872_v22 = vsub.s32 32, %v4871_v14  ;;  %v4873_v8 = vshll.u32 %v4864_v29, %v4871_v14  ;;  %v4876_v42 = vsub.s32 4294967266, %v4871_v14 }
 0x526   :  { %v4972_v51 = vmul.u32 %v4968_v34, %v4966_v61  ;;  %v4577_v35 = vsel %vm4456_vm2, %v4576_v48, %v4575_v47  ;;  %v4726_v54 = vand.u32 2147483647, %v4725_v17  ;;  %v4728_v52 = vcvt.s32.f32 %v4721_v62 }
 0x527   :  { %vm17425_vm15 = vcmp.le.f32.partialorder %v19196_v59, 0.7853982  ;;  %v4975_v46 = vshll.u32 %v17419_v6, 16  ;;  %v4874_v23 = vshrl.u32 %v4856_v25, %v4872_v22  ;;  %v4877_v26 = vadd.s32 127, %v4876_v42 }
 0x528   :  { %vm4977_vm0 = vc.u32 %v4969_v11, %v4973_v12  ;;  %v4991_v18 = vmul.u32 %v4989_v15, %v4965_v37  ;;  %v4979_v4 = vadd.s32 %v4973_v12, %v4969_v11  ;;  %v4992_v10 = vmul.u32 %v4990_v60, %v4965_v37 }
 0x529   :  { %v4978_v59 = vsel %vm4977_vm0, 1, %v18790_v43  ;;  %v4993_v21 = vmul.u32 %v4989_v15, %v4966_v61  ;;  %v4875_v2 = vor.u32 %v4874_v23, %v4873_v8  ;;  %v4878_v29 = vshll.u32 %v4877_v26, 23 }
 0x52a   :  { %v4974_v14 = vshrl.u32 %v4970_v55, 16  ;;  %v4980_v34 = vadd.s32 %v4978_v59, %v4972_v51  ;;  %vm4981_vm13 = vc.u32 %v4979_v4, %v4975_v46  ;;  %v4994_v40 = vmul.u32 %v4990_v60, %v4966_v61 }
 0x52b   :  { %v4995_v47 = vshll.u32 %v4992_v10, 16  ;;  %v4997_v48 = vshll.u32 %v4993_v21, 16  ;;  %v4879_v62 = vor.u32 4788187, %v4878_v29  ;;  %v4882_v17 = vcvt.s32.f32 %v4875_v2 }
 0x52c   :  { %v4932_v25 = vshrl.u32 %v18773_v50, %v17326_v9  ;;  %v4982_v22 = vsel %vm4981_vm13, 1, %v18790_v43  ;;  %v4953_v37 = vsel %vm4951_vm6, %v17360_v53, 2102212464  ;;  %v4729_v55 = vmul.f32 %v4728_v52, %v4726_v54 }
 0x52d   :  { %v4984_v11 = vadd.s32 %v4982_v22, %v4980_v34  ;;  %vm4999_vm3 = vc.u32 %v4991_v18, %v4995_v47  ;;  %v5001_v23 = vadd.s32 %v4995_v47, %v4991_v18  ;;  %v4880_v12 = vand.u32 2147483647, %v4879_v62 }
 0x52e   :  { %v4976_v46 = vshrl.u32 %v17419_v6, 16  ;;  %v5000_v4 = vsel %vm4999_vm3, 1, %v18790_v43  ;;  %v4996_v2 = vshrl.u32 %v4992_v10, 16  ;;  %v4952_v15 = vsel %vm4948_vm9, %v4932_v25, %v17374_v13 }
 0x52f   :  { %v4985_v60 = vadd.s32 %v4984_v11, %v4974_v14  ;;  %v5002_v61 = vadd.s32 %v5000_v4, %v4994_v40  ;;  %vm5003_vm0 = vc.u32 %v5001_v23, %v4997_v48  ;;  %v4883_v9 = vmul.f32 %v4882_v17, %v4880_v12 }
 0x530   :  { %v4954_v53 = vsel %vm4950_vm10, %v17358_v39, %v4953_v37  ;;  %v5004_v52 = vsel %vm5003_vm0, 1, %v18790_v43  ;;  %v4437_v8 = vadd.f32 0.008332121, %v4436_v24  ;;  %v17451_v6 = vsel %vm17425_vm15, %v19195_v27, %v4577_v35 }
 0x531   :  { %v4998_v10 = vshrl.u32 %v4993_v21, 16  ;;  %v5006_v40 = vadd.s32 %v5004_v52, %v5002_v61  ;;  %v17454_v42 = vadd.f32 1.0, %v17311_v63  ;;  %vm4138_vm6 = vcmp.eq.s32.totalorder %v17240_v56, 0 }
 0x532   :  { %vm4141_vm9 = vcmp.eq.s32.totalorder %v17240_v56, 2  ;;  %v4278_v13 = vadd.f32 -0.4999988, %v17406_v45  ;;  %v17459_v39 = vadd.s32 %v4985_v60, %v4976_v46  ;;  %v17461_v51 = vadd.s32 %v5001_v23, %v4997_v48 }
 0x533   :  { %v4430_v24 = vadd.f32 0.041655596, %v4429_v58  ;;  %v4730_v54 = vxor.u32 2147483648, %v4729_v55  ;;  %v4955_v35 = vsel %vm4949_vm11, %v4952_v15, %v4954_v53  ;;  %v5007_v21 = vadd.s32 %v5006_v40, %v4996_v2 }
 0x534   :  { %v4286_v63 = vmul.f32 %v17408_v20, %v17266_v1  ;;  %v17469_v26 = vmul.f32 %v17451_v6, %v17451_v6  ;;  %vm4610_vm10 = vcmp.lt.s32.totalorder %v19163_v0, 0  ;;  %v4884_v45 = vxor.u32 2147483648, %v4883_v9 }
 0x535   :  { %v17474_v18 = vmul.f32 %v17402_v33, %v17143_v19  ;;  %v4438_v58 = vmul.f32 %v4437_v8, %v17412_v32  ;;  %vm4764_vm13 = vcmp.lt.s32.totalorder %v19172_v41, 0  ;;  %v5008_v5 = vadd.s32 %v5007_v21, %v4998_v10 }
 0x536   :  { %v17481_v20 = vsel %vm17198_vm14, 0, %v17307_v7  ;;  %v4279_v59 = vmul.f32 %v4278_v13, %v17266_v1  ;;  %v5009_v29 = vmul.u32 %v17372_v3, %v4955_v35  ;;  %vm5011_vm11 = vc.u32 %v17459_v39, %v17461_v51 }
 0x537   :  { %v4431_v19 = vmul.f32 %v4430_v24, %v17412_v32  ;;  %v19199_v33 = vand.u32 2147483647, %v19163_v0  ;;  %v4731_v38 = vsel %vm4610_vm10, %v4730_v54, %v4729_v55  ;;  %v5012_v7 = vadd.s32 1, %v5008_v5 }
 0x538   :  { %v4287_v34 = vadd.f32 1.0, %v4286_v63  ;;  %v4590_v1 = vmul.f32 -0.00019511016, %v17469_v26  ;;  %v19202_v3 = vand.u32 2147483647, %v19172_v41  ;;  %v4885_v48 = vsel %vm4764_vm13, %v4884_v45, %v4883_v9 }
 0x539   :  { %vm17490_vm3 = vcmp.le.f32.partialorder %v19199_v33, 0.7853982  ;;  %v18693_v62 = vxor.u32 2147483648, %v17474_v18  ;;  %v18692_v17 = vxor.u32 2147483648, %v17454_v42  ;;  %v4439_v25 = vadd.f32 -0.16666654, %v4438_v58 }
 0x53a   :  { %vm17499_vm14 = vcmp.le.f32.partialorder %v19202_v3, 0.7853982  ;;  %v5013_v22 = vsel %vm5011_vm11, %v5012_v7, %v5008_v5  ;;  %v4290_v37 = vand.u32 3, %v17481_v20  ;;  %v4424_v11 = vsub.s32 4, %v16990_v44 }
 0x53b   :  { %v17512_v23 = vsel %vm17490_vm3, %v19163_v0, %v4731_v38  ;;  %v5014_v55 = vadd.s32 %v5013_v22, %v5009_v29  ;;  %v17514_v12 = vadd.f32 1.0, %v4279_v59  ;;  %v4432_v46 = vadd.f32 -0.4999988, %v4431_v19 }
 0x53c   :  { %v4583_v4 = vmul.f32 -0.001358992, %v17469_v26  ;;  %v17520_v60 = vsel %vm17499_vm14, %v19172_v41, %v4885_v48  ;;  %vm4137_vm0 = vcmp.lt.s32.totalorder %v17240_v56, 2  ;;  %v17524_v2 = vmul.f32 %v4287_v34, %v17259_v49 }
 0x53d   :  { %v4591_v61 = vadd.f32 0.008332121, %v4590_v1  ;;  %v5015_v9 = vadd.s32 536870912, %v5014_v55  ;;  %v4140_v15 = vsel %vm4138_vm6, %v17454_v42, %v18693_v62  ;;  %v4143_v53 = vsel %vm4141_vm9, %v18692_v17, %v17474_v18  ;;  %v19217_v17 = vld [vmem:[#allocation33_spill] sm:$0xff] }
 0x53e   :  { %v4440_v52 = vmul.f32 %v4439_v25, %v17412_v32  ;;  %v17539_v49 = vmul.f32 %v17512_v23, %v17512_v23  ;;  %vm18691_vm11 = vweird.f32 %v19171_v57  ;;  %vm4295_vm8 = vcmp.eq.s32.totalorder %v4290_v37, 2  ;;  %v19205_v25 = vld [vmem:[#allocation44_spill] sm:$0xff] }
 0x53f   :  { %v4425_v8 = vsel %vm4302_vm12, %v4424_v11, %v16990_v44  ;;  %v17547_v10 = vmul.f32 %v17520_v60, %v17520_v60  ;;  %v17549_v40 = vshrl.u32 %v5015_v9, 30  ;;  %vm4292_vm6 = vcmp.eq.s32.totalorder %v4290_v37, 0 }
 0x540   :  { %v18694_v13 = vxor.u32 2147483648, %v17514_v12  ;;  %v4433_v24 = vmul.f32 %v4432_v46, %v17412_v32  ;;  %v4584_v54 = vadd.f32 0.041655596, %v4583_v4  ;;  %vm4291_vm9 = vcmp.lt.s32.totalorder %v4290_v37, 2 }
 0x541   :  { %v18695_v35 = vxor.u32 2147483648, %v17524_v2  ;;  %v4592_v21 = vmul.f32 %v4591_v61, %v17469_v26  ;;  %v5017_v63 = vshll.u32 %v17549_v40, 30  ;;  %v17561_v45 = vsel %vm17315_vm5, 0, %v4425_v8 }
 0x542   :  { %v4297_v44 = vsel %vm4295_vm8, %v18694_v13, %v17524_v2  ;;  %v4441_v58 = vadd.f32 1.0, %v4440_v52  ;;  %v4744_v5 = vmul.f32 -0.00019511016, %v17539_v49  ;;  %v4578_v59 = vsub.s32 4, %v17106_v28  ;;  %v19219_v13 = vld [vmem:[#allocation32_spill] sm:$0xff] }
 0x543   :  { %v4294_v32 = vsel %vm4292_vm6, %v17514_v12, %v18695_v35  ;;  %v4898_v29 = vmul.f32 -0.00019511016, %v17547_v10  ;;  %v5018_v19 = vsub.s32 %v5014_v55, %v5017_v63  ;;  %v4144_v33 = vsel %vm4137_vm0, %v4140_v15, %v4143_v53 }
 0x544   :  { %v17571_v38 = vadd.f32 1.0, %v4433_v24  ;;  %v17574_v36 = vand.u32 3, %v17561_v45  ;;  %v4585_v7 = vmul.f32 %v4584_v54, %v17469_v26  ;;  %v4593_v34 = vadd.f32 -0.16666654, %v4592_v21 }
 0x545   :  { %v4737_v1 = vmul.f32 -0.001358992, %v17539_v49  ;;  %vm5019_vm8 = vcmp.lt.s32.totalorder %v5018_v19, 0  ;;  %v5020_v3 = vsub.s32 0, %v5018_v19  ;;  %vm18708_vm12 = vweird.f32 %v19180_v30 }
 0x546   :  { %v4298_v48 = vsel %vm4291_vm9, %v4294_v32, %v4297_v44  ;;  %v17581_v22 = vmul.f32 %v4441_v58, %v19205_v25  ;;  %v4745_v56 = vadd.f32 0.008332121, %v4744_v5  ;;  %v4579_v11 = vsel %vm4456_vm2, %v4578_v59, %v17106_v28  ;;  %v19206_v59 = vld [vmem:[#allocation51_spill] sm:$0xff] }
 0x547   :  { %v4891_v55 = vmul.f32 -0.001358992, %v17547_v10  ;;  %v4899_v46 = vadd.f32 0.008332121, %v4898_v29  ;;  %v5021_v4 = vsel %vm5019_vm8, %v5020_v3, %v5018_v19  ;;  %v17589_v61 = vsel %vm18691_vm11, nan, %v4144_v33 }
 0x548   :  { %vm4449_vm5 = vcmp.eq.s32.totalorder %v17574_v36, 2  ;;  %v4586_v37 = vadd.f32 -0.4999988, %v4585_v7  ;;  %v5022_v9 = vclz %v5021_v4  ;;  %v17594_v15 = vsel %vm18708_vm12, nan, %v4298_v48 }
 0x549   :  { %v18696_v53 = vxor.u32 2147483648, %v17571_v38  ;;  %v4594_v28 = vmul.f32 %v4593_v34, %v17469_v26  ;;  %v4738_v52 = vadd.f32 0.041655596, %v4737_v1  ;;  %v18697_v8 = vxor.u32 2147483648, %v17581_v22  ;;  %v19207_v1 = vld [vmem:[#allocation16_spill] sm:$0xff] }
 0x54a   :  { %v17601_v24 = vsel %vm17425_vm15, 0, %v4579_v11  ;;  %v4746_v54 = vmul.f32 %v4745_v56, %v17539_v49  ;;  %v11085_v21 = vadd.s32 4294967294, %v5022_v9  ;;  %v4892_v58 = vadd.f32 0.041655596, %v4891_v55 }
 0x54b   :  { %v17607_v63 = vsel %vm4449_vm5, %v18696_v53, %v17581_v22  ;;  %v17610_v44 = vand.u32 3, %v17601_v24  ;;  %v4900_v5 = vmul.f32 %v4899_v46, %v17547_v10  ;;  %v4587_v32 = vmul.f32 %v4586_v37, %v17469_v26  ;;  %v19208_v46 = vld [vmem:[#allocation25_spill] sm:$0xff]  ;;  %v19209_v37 = vld [vmem:[#allocation31_spill] sm:$0xff] }
 0x54c   :  { %v4732_v16 = vsub.s32 4, %v19206_v59  ;;  %v5010_v29 = vadd.s32 %v17461_v51, %v17459_v39  ;;  %vm11086_vm2 = vcmp.lt.s32.totalorder %v11085_v21, 0  ;;  %vm4446_vm15 = vcmp.eq.s32.totalorder %v17574_v36, 0 }
 0x54d   :  { %v4595_v33 = vadd.f32 1.0, %v4594_v28  ;;  %v4739_v7 = vmul.f32 %v4738_v52, %v17539_v49  ;;  %v5025_v34 = vsel %vm11086_vm2, 0, %v11085_v21  ;;  %v5522_v3 = vand.u32 3, %v19207_v1  ;;  %v19210_v28 = vld [vmem:[#allocation19_spill] sm:$0xff]  ;;  %v19215_v1 = vld [vmem:[#allocation26_spill] sm:$0xff] }
 0x54e   :  { %v4747_v48 = vadd.f32 -0.16666654, %v4746_v54  ;;  %v5026_v25 = vsub.s32 32, %v5025_v34  ;;  %v5027_v56 = vshll.u32 %v5018_v19, %v5025_v34  ;;  %v5030_v11 = vsub.s32 4294967266, %v5025_v34  ;;  %v19212_v19 = vld [vmem:[#allocation18_spill] sm:$0xff] }
 0x54f   :  { %v4893_v26 = vmul.f32 %v4892_v58, %v17547_v10  ;;  %v4901_v55 = vadd.f32 -0.16666654, %v4900_v5  ;;  %v5368_v4 = vand.u32 3, %v19208_v46  ;;  %vm5524_vm0 = vcmp.eq.s32.totalorder %v5522_v3, 0  ;;  %v19213_v5 = vld [vmem:[#allocation27_spill] sm:$0xff] }
 0x550   :  { %vm4445_vm6 = vcmp.lt.s32.totalorder %v17574_v36, 2  ;;  %v5028_v39 = vshrl.u32 %v5010_v29, %v5026_v25  ;;  %v5031_v51 = vadd.s32 127, %v5030_v11  ;;  %vm5523_vm9 = vcmp.lt.s32.totalorder %v5522_v3, 2 }
 0x551   :  { %vm5527_vm8 = vcmp.eq.s32.totalorder %v5522_v3, 2  ;;  %v5214_v9 = vand.u32 3, %v19209_v37  ;;  %vm5370_vm5 = vcmp.eq.s32.totalorder %v5368_v4, 0  ;;  %vm5373_vm2 = vcmp.eq.s32.totalorder %v5368_v4, 2 }
 0x552   :  { %v19211_v52 = vxor.u32 2147483648, %v19210_v28  ;;  %v5029_v21 = vor.u32 %v5028_v39, %v5027_v56  ;;  %v5032_v58 = vshll.u32 %v5031_v51, 23  ;;  %vm5369_vm7 = vcmp.lt.s32.totalorder %v5368_v4, 2 }
 0x553   :  { %v19214_v34 = vxor.u32 2147483648, %v19213_v5  ;;  %vm5215_vm1 = vcmp.lt.s32.totalorder %v5214_v9, 2  ;;  %vm5216_vm4 = vcmp.eq.s32.totalorder %v5214_v9, 0  ;;  %vm5219_vm11 = vcmp.eq.s32.totalorder %v5214_v9, 2 }
 0x554   :  { %v5526_v54 = vsel %vm5524_vm0, %v19212_v19, %v19211_v52  ;;  %v19216_v29 = vxor.u32 2147483648, %v19215_v1  ;;  %v5033_v11 = vor.u32 4788187, %v5032_v58  ;;  %v5036_v37 = vcvt.s32.f32 %v5029_v21 }
 0x555   :  { %v5372_v46 = vsel %vm5370_vm5, %v19215_v1, %v19214_v34  ;;  %v19218_v62 = vxor.u32 2147483648, %v19217_v17  ;;  %v19220_v56 = vxor.u32 2147483648, %v19219_v13  ;;  %v4740_v39 = vadd.f32 -0.4999988, %v4739_v7  ;;  %v19225_v7 = vld [vmem:[#allocation11_spill] sm:$0xff] }
 0x556   :  { %v5375_v25 = vsel %vm5373_vm2, %v19216_v29, %v19213_v5  ;;  %v4748_v51 = vmul.f32 %v4747_v48, %v17539_v49  ;;  %v19221_v9 = vxor.u32 2147483648, %v19212_v19  ;;  %v19222_v5 = vld [vmem:[#allocation41_spill] sm:$0xff]  ;;  %v5034_v21 = vand.u32 2147483647, %v5033_v11 }
 0x557   :  { %v5218_v52 = vsel %vm5216_vm4, %v19219_v13, %v19218_v62  ;;  %v5221_v4 = vsel %vm5219_vm11, %v19220_v56, %v19217_v17  ;;  %v5376_v34 = vsel %vm5369_vm7, %v5372_v46, %v5375_v25  ;;  %v4886_v58 = vsub.s32 4, %v19222_v5  ;;  %v19223_v13 = vld [vmem:[#allocation17_spill] sm:$0xff] }
 0x558   :  { %v5529_v1 = vsel %vm5527_vm8, %v19221_v9, %v19210_v28  ;;  %v5222_v29 = vsel %vm5215_vm1, %v5218_v52, %v5221_v4  ;;  %v4894_v62 = vadd.f32 -0.4999988, %v4893_v26  ;;  %v4902_v53 = vmul.f32 %v4901_v55, %v17547_v10  ;;  %v19227_v46 = vld [vmem:[#allocation45_spill] sm:$0xff] }
 0x559   :  { %v5530_v35 = vsel %vm5523_vm9, %v5526_v54, %v5529_v1  ;;  %vm19224_vm4 = vweird.f32 %v19223_v13  ;;  %vm19226_vm11 = vweird.f32 %v19225_v7  ;;  %v4448_v28 = vsel %vm4446_vm15, %v17571_v38, %v18697_v8 }
 0x55a   :  { %v5377_v17 = vsel %vm19224_vm4, nan, %v5376_v34  ;;  %v5531_v48 = vsel %vm19226_vm11, nan, %v5530_v35  ;;  %v17656_v19 = vadd.f32 1.0, %v4587_v32  ;;  %v4733_v3 = vsel %vm4610_vm10, %v4732_v16, %v19206_v59  ;;  %v19228_v35 = vld [vmem:[#allocation24_spill] sm:$0xff] }
 0x55b   :  { %v5037_v26 = vmul.f32 %v5036_v37, %v5034_v21  ;;  %10514 = vmatpush.msra.mxu1 %v5531_v48  ;;  %v4741_v55 = vmul.f32 %v4740_v39, %v17539_v49  ;;  %v4749_v54 = vadd.f32 1.0, %v4748_v51  ;;  %vm4918_vm7 = vcmp.lt.s32.totalorder %v19227_v46, 0 }
 0x55c   :  { %vm19229_vm1 = vweird.f32 %v19228_v35  ;;  %v17666_v11 = vmul.f32 %v4595_v33, %v17451_v6  ;;  %v4887_v32 = vsel %vm4764_vm13, %v4886_v58, %v19222_v5  ;;  %v19230_v52 = vand.u32 2147483647, %v19227_v46 }
 0x55d   :  { %v5223_v25 = vsel %vm19229_vm1, nan, %v5222_v29  ;;  %v5038_v49 = vxor.u32 2147483648, %v5037_v26  ;;  %10515 = vmatpush.msra.mxu1 %v5377_v17  ;;  %v4452_v16 = vsel %vm4445_vm6, %v4448_v28, %v17607_v63  ;;  %v17682_v6 = vsel %vm17490_vm3, 0, %v4733_v3 }
 0x55e   :  { %vm17673_vm10 = vcmp.le.f32.partialorder %v19230_v52, 0.7853982  ;;  %v4895_v33 = vmul.f32 %v4894_v62, %v17547_v10  ;;  %v4903_v37 = vadd.f32 1.0, %v4902_v53  ;;  %vm4600_vm13 = vcmp.eq.s32.totalorder %v17610_v44, 0 }
 0x55f   :  { %vm4603_vm15 = vcmp.eq.s32.totalorder %v17610_v44, 2  ;;  %v4752_v56 = vand.u32 3, %v17682_v6  ;;  %v5039_v4 = vsel %vm4918_vm7, %v5038_v49, %v5037_v26  ;;  %10516 = vmatpush.msra.mxu1 %v5223_v25  ;;  %v17690_v39 = vadd.f32 1.0, %v4741_v55 }
 0x560   :  { %v17693_v36 = vmul.f32 %v4749_v54, %v17512_v23  ;;  %v17697_v14 = vsel %vm17499_vm14, 0, %v4887_v32  ;;  %v5042_v10 = vsel %vm17673_vm10, %v19227_v46, %v5039_v4  ;;  %v18701_v53 = vxor.u32 2147483648, %v17666_v11 }
 0x561   :  { %v18700_v63 = vxor.u32 2147483648, %v17656_v19  ;;  %v4906_v51 = vand.u32 3, %v17697_v14  ;;  %v5044_v34 = vmul.f32 %v5042_v10, %v5042_v10  ;;  %vm18709_vm3 = vweird.f32 %v19188_v31 }
 0x562   :  { %vm4599_vm0 = vcmp.lt.s32.totalorder %v17610_v44, 2  ;;  %v17707_v23 = vadd.f32 1.0, %v4895_v33  ;;  %v17710_v47 = vmul.f32 %v4903_v37, %v17520_v60  ;;  %v5040_v9 = vsub.s32 4, %v17549_v40 }
 0x563   :  { %v4602_v1 = vsel %vm4600_vm13, %v17656_v19, %v18701_v53  ;;  %v4605_v5 = vsel %vm4603_vm15, %v18700_v63, %v17666_v11  ;;  %v5045_v58 = vmul.f32 -0.001358992, %v5044_v34  ;;  %v5052_v21 = vmul.f32 -0.00019511016, %v5044_v34 }
 0x564   :  { %vm4754_vm14 = vcmp.eq.s32.totalorder %v4752_v56, 0  ;;  %v18705_v60 = vxor.u32 2147483648, %v17693_v36  ;;  %vm4757_vm6 = vcmp.eq.s32.totalorder %v4752_v56, 2  ;;  %v18704_v29 = vxor.u32 2147483648, %v17690_v39 }
 0x565   :  { %vm4908_vm9 = vcmp.eq.s32.totalorder %v4906_v51, 0  ;;  %vm4911_vm8 = vcmp.eq.s32.totalorder %v4906_v51, 2  ;;  %v5046_v62 = vadd.f32 0.041655596, %v5045_v58  ;;  %v5053_v13 = vadd.f32 0.008332121, %v5052_v21 }
 0x566   :  { %vm4753_vm5 = vcmp.lt.s32.totalorder %v4752_v56, 2  ;;  %v18703_v17 = vxor.u32 2147483648, %v17710_v47  ;;  %v18702_v7 = vxor.u32 2147483648, %v17707_v23  ;;  %v5041_v48 = vsel %vm4918_vm7, %v5040_v9, %v17549_v40  ;;  %v19233_v40 = vld [vmem:[#allocation70_spill] sm:$0xff]  ;;  %v19235_v56 = vld [vmem:[#allocation83_spill] sm:$0xff] }
 0x567   :  { %v4756_v28 = vsel %vm4754_vm14, %v17690_v39, %v18705_v60  ;;  %v4759_v3 = vsel %vm4757_vm6, %v18704_v29, %v17693_v36  ;;  %v5047_v26 = vmul.f32 %v5046_v62, %v5044_v34  ;;  %v5054_v55 = vmul.f32 %v5053_v13, %v5044_v34  ;;  %v19254_v60 = vld [vmem:[#allocation86_spill] sm:$0xff] }
 0x568   :  { %vm4907_vm2 = vcmp.lt.s32.totalorder %v4906_v51, 2  ;;  %v4910_v54 = vsel %vm4908_vm9, %v17707_v23, %v18703_v17  ;;  %v4913_v35 = vsel %vm4911_vm8, %v18702_v7, %v17710_v47  ;;  %v5676_v25 = vadd.s32 3, %v19233_v40  ;;  %v19234_v51 = vld [vmem:[#allocation73_spill] sm:$0xff]  ;;  %v19250_v7 = vld [vmem:[#allocation79_spill] sm:$0xff] }
 0x569   :  { %v4606_v32 = vsel %vm4599_vm0, %v4602_v1, %v4605_v5  ;;  %v17747_v52 = vsel %vm17673_vm10, 0, %v5041_v48  ;;  %v5048_v49 = vadd.f32 -0.4999988, %v5047_v26  ;;  %v5055_v33 = vadd.f32 -0.16666654, %v5054_v55 }
 0x56a   :  { %vm18710_vm4 = vweird.f32 %v19195_v27  ;;  %v4760_v37 = vsel %vm4753_vm5, %v4756_v28, %v4759_v3  ;;  %v5060_v4 = vand.u32 3, %v17747_v52  ;;  %v5831_v9 = vadd.s32 3, %v19234_v51 }
 0x56b   :  { %v17755_v58 = vsel %vm18709_vm3, nan, %v4452_v16  ;;  %v4914_v44 = vsel %vm4907_vm2, %v4910_v54, %v4913_v35  ;;  %v5049_v1 = vmul.f32 %v5048_v49, %v5044_v34  ;;  %v5056_v5 = vmul.f32 %v5055_v33, %v5044_v34  ;;  %v19236_v54 = vld [vmem:[#allocation88_spill] sm:$0xff]  ;;  %v19238_v49 = vld [vmem:[#allocation106_spill] sm:$0xff] }
 0x56c   :  { %v17759_v59 = vsel %vm18710_vm4, nan, %v4606_v32  ;;  %vm18711_vm11 = vweird.f32 %v19163_v0  ;;  %v17762_v21 = vand.u32 3, %v5676_v25  ;;  %v5986_v62 = vadd.s32 3, %v19235_v56 }
 0x56d   :  { %v4761_v13 = vsel %vm18711_vm11, nan, %v4760_v37  ;;  %vm18715_vm7 = vweird.f32 %v19172_v41  ;;  %v17768_v16 = vadd.f32 1.0, %v5049_v1  ;;  %v5057_v48 = vadd.f32 1.0, %v5056_v5  ;;  %v19239_v37 = vld [vmem:[#allocation91_spill] sm:$0xff]  ;;  %v19241_v1 = vld [vmem:[#allocation113_spill] sm:$0xff] }
 0x56e   :  { %v4915_v34 = vsel %vm18715_vm7, nan, %v4914_v44  ;;  %vm18714_vm1 = vweird.f32 %v19227_v46  ;;  %vm5065_vm10 = vcmp.eq.s32.totalorder %v5060_v4, 2  ;;  %v17773_v28 = vand.u32 3, %v5831_v9  ;;  %v19240_v9 = vld [vmem:[#allocation110_spill] sm:$0xff] }
 0x56f   :  { %v17775_v3 = vmul.f32 %v5057_v48, %v5042_v10  ;;  %vm5061_vm13 = vcmp.lt.s32.totalorder %v5060_v4, 2  ;;  %vm5062_vm15 = vcmp.eq.s32.totalorder %v5060_v4, 0  ;;  %v18698_v26 = vxor.u32 2147483648, %v17768_v16  ;;  %v19237_v10 = vld [vmem:[#allocation105_spill] sm:$0xff] }
 0x570   :  { %vm5679_vm0 = vcmp.eq.s32.totalorder %v17762_v21, 0  ;;  %vm5682_vm14 = vcmp.eq.s32.totalorder %v17762_v21, 2  ;;  %v17780_v55 = vand.u32 3, %v5986_v62  ;;  %v6141_v35 = vadd.s32 3, %v19236_v54  ;;  %v19242_v62 = vld [vmem:[#allocation74_spill] sm:$0xff]  ;;  %v19244_v54 = vld [vmem:[#allocation72_spill] sm:$0xff] }
 0x571   :  { %v18699_v40 = vxor.u32 2147483648, %v17775_v3  ;;  %v5067_v25 = vsel %vm5065_vm10, %v18698_v26, %v17775_v3  ;;  %v6761_v32 = vadd.s32 3, %v19237_v10  ;;  %v6916_v33 = vadd.s32 3, %v19238_v49  ;;  %v19246_v26 = vld [vmem:[#allocation96_spill] sm:$0xff] }
 0x572   :  { %vm5834_vm6 = vcmp.eq.s32.totalorder %v17773_v28, 0  ;;  %v6296_v51 = vadd.s32 3, %v19239_v37  ;;  %v7071_v44 = vadd.s32 3, %v19240_v9  ;;  %v7226_v5 = vadd.s32 3, %v19241_v1  ;;  %v19247_v1 = vld [vmem:[#allocation100_spill] sm:$0xff] }
 0x573   :  { %v5064_v56 = vsel %vm5062_vm15, %v17768_v16, %v18699_v40  ;;  %v19243_v48 = vxor.u32 2147483648, %v19242_v62  ;;  %v19245_v10 = vxor.u32 2147483648, %v19244_v54  ;;  %v6451_v37 = vadd.s32 3, %v19246_v26 }
 0x574   :  { %v5068_v9 = vsel %vm5061_vm13, %v5064_v56, %v5067_v25  ;;  %vm5837_vm9 = vcmp.eq.s32.totalorder %v17773_v28, 2  ;;  %vm5989_vm8 = vcmp.eq.s32.totalorder %v17780_v55, 0  ;;  %v6606_v40 = vadd.s32 3, %v19247_v1  ;;  %v19251_v25 = vld [vmem:[#allocation104_spill] sm:$0xff] }
 0x575   :  { %v17799_v8 = vsel %vm5679_vm0, %v19244_v54, %v19243_v48  ;;  %v17804_v49 = vsel %vm5682_vm14, %v19245_v10, %v19242_v62  ;;  %v5069_v63 = vsel %vm18714_vm1, nan, %v5068_v9  ;;  %v19248_v48 = vld [vmem:[#allocation80_spill] sm:$0xff]  ;;  %v17818_v62 = vand.u32 3, %v6761_v32  ;;  %v19252_v10 = vld [vmem:[#allocation13_spill] sm:$0xff] }
 0x576   :  { %v19249_v53 = vxor.u32 2147483648, %v19248_v48  ;;  %v17820_v54 = vand.u32 3, %v6916_v33  ;;  %v7072_v4 = vand.u32 3, %v7071_v44  ;;  %v7227_v26 = vand.u32 3, %v7226_v5  ;;  %10517 = vmatpush.msra.mxu1 %v5069_v63 }
 0x577   :  { %v7381_v56 = vadd.s32 3, %v19251_v25  ;;  %v7536_v29 = vadd.s32 3, %v19252_v10  ;;  %v19253_v1 = vxor.u32 2147483648, %v19250_v7  ;;  %v19255_v43 = vxor.u32 2147483648, %v19254_v60 }
 0x578   :  { %v17816_v17 = vsel %vm5834_vm6, %v19250_v7, %v19249_v53  ;;  %v19256_v53 = vld [vmem:[#allocation85_spill] sm:$0xff]  ;;  %v17834_v32 = vand.u32 3, %v6141_v35  ;;  %v17836_v33 = vand.u32 3, %v6296_v51  ;;  %v17838_v44 = vand.u32 3, %v6451_v37  ;;  %10518 = vmatpush.msra.mxu1 %v4915_v34  ;;  %v19259_v51 = vld [vmem:[#allocation114_spill] sm:$0xff] }
 0x579   :  { %v17827_v9 = vsel %vm5837_vm9, %v19253_v1, %v19248_v48  ;;  %v17832_v50 = vsel %vm5989_vm8, %v19256_v53, %v19255_v43  ;;  %v17840_v5 = vand.u32 3, %v6606_v40  ;;  %vm7229_vm5 = vcmp.eq.s32.totalorder %v7227_v26, 0  ;;  %v19257_v43 = vld [vmem:[#allocation103_spill] sm:$0xff]  ;;  %v19261_v48 = vld [vmem:[#allocation28_spill] sm:$0xff] }
 0x57a   :  { %vm7232_vm2 = vcmp.eq.s32.totalorder %v7227_v26, 2  ;;  %vm6764_vm10 = vcmp.eq.s32.totalorder %v17818_v62, 0  ;;  %vm6919_vm13 = vcmp.eq.s32.totalorder %v17820_v54, 0  ;;  %v7382_v63 = vand.u32 3, %v7381_v56  ;;  %10519 = vmatpush.msra.mxu1 %v4761_v13 }
 0x57b   :  { %v7537_v7 = vand.u32 3, %v7536_v29  ;;  %vm5992_vm15 = vcmp.eq.s32.totalorder %v17780_v55, 2  ;;  %vm7074_vm0 = vcmp.eq.s32.totalorder %v7072_v4, 0  ;;  %vm7077_vm14 = vcmp.eq.s32.totalorder %v7072_v4, 2  ;;  %v19263_v29 = vld [vmem:[#allocation20_spill] sm:$0xff] }
 0x57c   :  { %vm7228_vm6 = vcmp.lt.s32.totalorder %v7227_v26, 2  ;;  %v19258_v35 = vxor.u32 2147483648, %v19257_v43  ;;  %v19260_v40 = vxor.u32 2147483648, %v19259_v51  ;;  %vm7383_vm9 = vcmp.lt.s32.totalorder %v7382_v63, 2  ;;  %10520 = vmatpush.msra.mxu1 %v17759_v59 }
 0x57d   :  { %vm7384_vm8 = vcmp.eq.s32.totalorder %v7382_v63, 0  ;;  %vm7387_vm12 = vcmp.eq.s32.totalorder %v7382_v63, 2  ;;  %v19262_v25 = vxor.u32 2147483648, %v19261_v48  ;;  %v19264_v10 = vxor.u32 2147483648, %v19263_v29  ;;  %v19268_v63 = vld [vmem:[#allocation112_spill] sm:$0xff] }
 0x57e   :  { %v7231_v37 = vsel %vm7229_vm5, %v19259_v51, %v19258_v35  ;;  %v7234_v34 = vsel %vm7232_vm2, %v19260_v40, %v19257_v43  ;;  %vm7538_vm3 = vcmp.lt.s32.totalorder %v7537_v7, 2  ;;  %vm7539_vm4 = vcmp.eq.s32.totalorder %v7537_v7, 0  ;;  %v19265_v35 = vld [vmem:[#allocation22_spill] sm:$0xff]  ;;  %v19267_v51 = vld [vmem:[#allocation23_spill] sm:$0xff]  ;;  %10521 = vmatpush.msra.mxu1 %v17755_v58 }
 0x57f   :  { %v7386_v56 = vsel %vm7384_vm8, %v19263_v29, %v19262_v25  ;;  %v7389_v1 = vsel %vm7387_vm12, %v19264_v10, %v19261_v48  ;;  %vm6922_vm5 = vcmp.eq.s32.totalorder %v17820_v54, 2  ;;  %v19266_v43 = vxor.u32 2147483648, %v19265_v35  ;;  %v19270_v25 = vld [vmem:[#allocation111_spill] sm:$0xff] }
 0x580   :  { %v7390_v13 = vsel %vm7383_vm9, %v7386_v56, %v7389_v1  ;;  %vm7542_vm2 = vcmp.eq.s32.totalorder %v7537_v7, 2  ;;  %vm7073_vm11 = vcmp.lt.s32.totalorder %v7072_v4, 2  ;;  %v19269_v57 = vxor.u32 2147483648, %v19268_v63  ;;  %v19273_v1 = vld [vmem:[#allocation57_spill] sm:$0xff]  ;;  %10522 = vmatpush.msra.mxu1 %v17594_v15  ;;  %v19288_v4 = vld [vmem:[#allocation102_spill] sm:$0xff] }
 0x581   :  { %v7541_v40 = vsel %vm7539_vm4, %v19267_v51, %v19266_v43  ;;  %v19271_v48 = vxor.u32 2147483648, %v19270_v25  ;;  %v19272_v59 = vxor.u32 2147483648, %v19267_v51  ;;  %vm5678_vm12 = vcmp.lt.s32.totalorder %v17762_v21, 2  ;;  %v19274_v43 = vld [vmem:[#allocation109_spill] sm:$0xff]  ;;  %v19320_v21 = vld [vmem:[#allocation63_spill] sm:$0xff] }
 0x582   :  { %v7076_v30 = vsel %vm7074_vm0, %v19270_v25, %v19269_v57  ;;  %vm6767_vm4 = vcmp.eq.s32.totalorder %v17818_v62, 2  ;;  %vm6918_vm9 = vcmp.lt.s32.totalorder %v17820_v54, 2  ;;  %v7235_v10 = vsel %vm7228_vm6, %v7231_v37, %v7234_v34  ;;  %v19276_v51 = vld [vmem:[#allocation97_spill] sm:$0xff]  ;;  %v19280_v34 = vld [vmem:[#allocation67_spill] sm:$0xff]  ;;  %10523 = vmatpush.msra.mxu1 %v17589_v61 }
 0x583   :  { %v7079_v29 = vsel %vm7077_vm14, %v19271_v48, %v19268_v63  ;;  %v7544_v56 = vsel %vm7542_vm2, %v19272_v59, %v19265_v35  ;;  %vm18717_vm0 = vweird.f32 %v19273_v1  ;;  %vm5833_vm14 = vcmp.lt.s32.totalorder %v17773_v28, 2  ;;  %v19278_v7 = vld [vmem:[#allocation61_spill] sm:$0xff]  ;;  %v19282_v48 = vld [vmem:[#allocation108_spill] sm:$0xff]  ;;  %v19323_v28 = vld [vmem:[#allocation43_spill] sm:$0xff] }
 0x584   :  { %v7545_v57 = vsel %vm7538_vm3, %v7541_v40, %v7544_v56  ;;  %vm5988_vm8 = vcmp.lt.s32.totalorder %v17780_v55, 2  ;;  %v19275_v35 = vxor.u32 2147483648, %v19274_v43  ;;  %v19277_v63 = vxor.u32 2147483648, %v19276_v51  ;;  %v19284_v56 = vld [vmem:[#allocation107_spill] sm:$0xff]  ;;  %v19325_v55 = vld [vmem:[#allocation48_spill] sm:$0xff] }
 0x585   :  { %vm19279_vm3 = vweird.f32 %v19278_v7  ;;  %vm19281_vm6 = vweird.f32 %v19280_v34  ;;  %vm6144_vm2 = vcmp.eq.s32.totalorder %v17834_v32, 0  ;;  %vm6609_vm1 = vcmp.eq.s32.totalorder %v17840_v5, 0  ;;  %v19292_v7 = vld [vmem:[#allocation54_spill] sm:$0xff] }
 0x586   :  { %v6921_v58 = vsel %vm6919_vm13, %v19276_v51, %v19275_v35  ;;  %v6924_v26 = vsel %vm6922_vm5, %v19277_v63, %v19274_v43  ;;  %v7391_v37 = vsel %vm19279_vm3, nan, %v7390_v13  ;;  %v7546_v40 = vsel %vm19281_vm6, nan, %v7545_v57  ;;  %v19286_v43 = vld [vmem:[#allocation60_spill] sm:$0xff]  ;;  %v19290_v51 = vld [vmem:[#allocation101_spill] sm:$0xff] }
 0x587   :  { %vm6612_vm13 = vcmp.eq.s32.totalorder %v17840_v5, 2  ;;  %v7080_v25 = vsel %vm7073_vm11, %v7076_v30, %v7079_v29  ;;  %10537 = vmatpush.msra.mxu2 %v7546_v40  ;;  %vm6763_vm7 = vcmp.lt.s32.totalorder %v17818_v62, 2  ;;  %v19283_v59 = vxor.u32 2147483648, %v19282_v48  ;;  %v19294_v40 = vld [vmem:[#allocation49_spill] sm:$0xff]  ;;  %v19303_v62 = vld [vmem:[#allocation90_spill] sm:$0xff] }
 0x588   :  { %v19285_v15 = vxor.u32 2147483648, %v19284_v56  ;;  %vm19287_vm5 = vweird.f32 %v19286_v43  ;;  %vm6147_vm11 = vcmp.eq.s32.totalorder %v17834_v32, 2  ;;  %vm6454_vm3 = vcmp.eq.s32.totalorder %v17838_v44, 0  ;;  %10524 = vmatpush.msra.mxu1 %v19294_v40  ;;  %v19302_v43 = vld [vmem:[#allocation59_spill] sm:$0xff] }
 0x589   :  { %v6766_v13 = vsel %vm6764_vm10, %v19284_v56, %v19283_v59  ;;  %v7236_v35 = vsel %vm19287_vm5, nan, %v7235_v10  ;;  %vm6457_vm6 = vcmp.eq.s32.totalorder %v17838_v44, 2  ;;  %v6925_v30 = vsel %vm6918_vm9, %v6921_v58, %v6924_v26  ;;  %10538 = vmatpush.msra.mxu2 %v7391_v37  ;;  %v19296_v37 = vld [vmem:[#allocation99_spill] sm:$0xff] }
 0x58a   :  { %v6769_v57 = vsel %vm6767_vm4, %v19285_v15, %v19282_v48  ;;  %vm6608_vm10 = vcmp.lt.s32.totalorder %v17840_v5, 2  ;;  %v19289_v29 = vxor.u32 2147483648, %v19288_v4  ;;  %v19291_v10 = vxor.u32 2147483648, %v19290_v51  ;;  %v19298_v48 = vld [vmem:[#allocation98_spill] sm:$0xff]  ;;  %v19300_v15 = vld [vmem:[#allocation55_spill] sm:$0xff]  ;;  %10525 = vmatpush.msra.mxu1 %v19302_v43 }
 0x58b   :  { %vm19293_vm4 = vweird.f32 %v19292_v7  ;;  %v19295_v54 = vxor.u32 2147483648, %v19256_v53  ;;  %vm6299_vm9 = vcmp.eq.s32.totalorder %v17836_v33, 0  ;;  %vm6302_vm5 = vcmp.eq.s32.totalorder %v17836_v33, 2  ;;  %10539 = vmatpush.msra.mxu2 %v7236_v35  ;;  %v19309_v7 = vld [vmem:[#allocation93_spill] sm:$0xff]  ;;  %v19315_v5 = vld [vmem:[#allocation47_spill] sm:$0xff] }
 0x58c   :  { %v6611_v63 = vsel %vm6609_vm1, %v19290_v51, %v19289_v29  ;;  %v6614_v61 = vsel %vm6612_vm13, %v19291_v10, %v19288_v4  ;;  %v7081_v34 = vsel %vm19293_vm4, nan, %v7080_v25  ;;  %v6770_v26 = vsel %vm6763_vm7, %v6766_v13, %v6769_v57  ;;  %v19305_v57 = vld [vmem:[#allocation76_spill] sm:$0xff] }
 0x58d   :  { %v5994_v58 = vsel %vm5992_vm15, %v19295_v54, %v19254_v60  ;;  %vm6453_vm1 = vcmp.lt.s32.totalorder %v17838_v44, 2  ;;  %v19297_v25 = vxor.u32 2147483648, %v19296_v37  ;;  %v19299_v53 = vxor.u32 2147483648, %v19298_v48  ;;  %10540 = vmatpush.msra.mxu2 %v7081_v34  ;;  %v19316_v34 = vld [vmem:[#allocation46_spill] sm:$0xff] }
 0x58e   :  { %vm19301_vm15 = vweird.f32 %v19300_v15  ;;  %vm6143_vm13 = vcmp.lt.s32.totalorder %v17834_v32, 2  ;;  %v19304_v13 = vxor.u32 2147483648, %v19303_v62  ;;  %v19306_v4 = vxor.u32 2147483648, %v19305_v57  ;;  %v19314_v15 = vld [vmem:[#allocation68_spill] sm:$0xff] }
 0x58f   :  { %v6456_v59 = vsel %vm6454_vm3, %v19298_v48, %v19297_v25  ;;  %v6459_v56 = vsel %vm6457_vm6, %v19299_v53, %v19296_v37  ;;  %v6926_v60 = vsel %vm19301_vm15, nan, %v6925_v30  ;;  %v6615_v51 = vsel %vm6608_vm10, %v6611_v63, %v6614_v61  ;;  %v19307_v30 = vld [vmem:[#allocation94_spill] sm:$0xff]  ;;  %v19311_v25 = vld [vmem:[#allocation65_spill] sm:$0xff]  ;;  %v19326_v32 = vld [vmem:[#allocation52_spill] sm:$0xff] }
 0x590   :  { %v6146_v35 = vsel %vm6144_vm2, %v19305_v57, %v19304_v13  ;;  %v6149_v29 = vsel %vm6147_vm11, %v19306_v4, %v19303_v62  ;;  %vm6298_vm7 = vcmp.lt.s32.totalorder %v17836_v33, 2  ;;  %v19308_v10 = vxor.u32 2147483648, %v19307_v30  ;;  %v19313_v53 = vld [vmem:[#allocation42_spill] sm:$0xff]  ;;  %10541 = vmatpush.msra.mxu2 %v6926_v60  ;;  %v19317_v62 = vld [vmem:[#allocation64_spill] sm:$0xff]  ;;  %v19319_v57 = vld [vmem:[#allocation37_spill] sm:$0xff] }
 0x591   :  { %v19310_v54 = vxor.u32 2147483648, %v19309_v7  ;;  %vm19312_vm2 = vweird.f32 %v19311_v25  ;;  %10526 = vmatpush.msra.mxu1 %v19313_v53  ;;  %vm18716_vm11 = vweird.f32 %v19314_v15  ;;  %v3375_v63 = vsel %vm18717_vm0, nan, %v19315_v5  ;;  %v19322_v60 = vld [vmem:[#allocation92_spill] sm:$0xff]  ;;  %v18008_v33 = vld [vmem:[#allocation2] sm:$0xff] }
 0x592   :  { %v6301_v40 = vsel %vm6299_vm9, %v19309_v7, %v19308_v10  ;;  %v6771_v48 = vsel %vm19312_vm2, nan, %v6770_v26  ;;  %v6460_v61 = vsel %vm6453_vm1, %v6456_v59, %v6459_v56  ;;  %v3221_v43 = vsel %vm18716_vm11, nan, %v19316_v34  ;;  %10510 = vmatmul.f32.vlgmr.msra.gmra.mxu0 %v18008_v33  ;;  %v19337_v5 = vld [vmem:[#allocation29_spill] sm:$0xff] }
 0x593   :  { %v6304_v37 = vsel %vm6302_vm5, %v19310_v54, %v19307_v30  ;;  %v5685_v26 = vsel %vm5678_vm12, %v17799_v8, %v17804_v49  ;;  %vm19318_vm3 = vweird.f32 %v19317_v62  ;;  %10527 = vmatpush.msra.mxu1 %v19319_v57  ;;  %v5840_v44 = vsel %vm5833_vm14, %v17816_v17, %v17827_v9  ;;  %10542 = vmatpush.msra.mxu2 %v6771_v48  ;;  %v19329_v30 = vld [vmem:[#allocation66_spill] sm:$0xff] }
 0x594   :  { %v6616_v13 = vsel %vm19318_vm3, nan, %v6615_v51  ;;  %v5995_v59 = vsel %vm5988_vm8, %v17832_v50, %v5994_v58  ;;  %v6150_v56 = vsel %vm6143_vm13, %v6146_v35, %v6149_v29  ;;  %v6305_v8 = vsel %vm6298_vm7, %v6301_v40, %v6304_v37  ;;  %v19327_v35 = vld [vmem:[#allocation53_spill] sm:$0xff]  ;;  %v18016_v54 = vld [vmem:[#allocation2 + $0x8] sm:$0xff] }
 0x595   :  { %vm19321_vm12 = vweird.f32 %v19320_v21  ;;  %v8156_v4 = vadd.s32 3, %v19322_v60  ;;  %v9241_v51 = vadd.s32 3, %v17481_v20  ;;  %v9396_v17 = vadd.s32 3, %v17561_v45  ;;  %10528 = vmatpush.msra.mxu1 %v3375_v63  ;;  %10543 = vmatpush.msra.mxu2 %v6616_v13  ;;  %v19331_v20 = vld [vmem:[#allocation36_spill] sm:$0xff]  ;;  %v19333_v37 = vld [vmem:[#allocation58_spill] sm:$0xff] }
 0x596   :  { %v6461_v49 = vsel %vm19321_vm12, nan, %v6460_v61  ;;  %vm19324_vm14 = vweird.f32 %v19323_v28  ;;  %v8311_v9 = vadd.s32 3, %v19325_v55  ;;  %v8466_v58 = vadd.s32 3, %v19326_v32  ;;  %v19332_v45 = vld [vmem:[#allocation12_spill] sm:$0xff]  ;;  %v19335_v48 = vld [vmem:[#allocation62_spill] sm:$0xff]  ;;  %v19338_v61 = vld [vmem:[#allocation81_spill] sm:$0xff] }
 0x597   :  { %v5686_v50 = vsel %vm19324_vm14, nan, %v5685_v26  ;;  %vm19328_vm8 = vweird.f32 %v19327_v35  ;;  %vm19330_vm6 = vweird.f32 %v19329_v30  ;;  %v8621_v7 = vadd.s32 3, %v19331_v20  ;;  %10529 = vmatpush.msra.mxu1 %v3221_v43  ;;  %10544 = vmatpush.msra.mxu2 %v6461_v49 }
 0x598   :  { %v5841_v29 = vsel %vm19328_vm8, nan, %v5840_v44  ;;  %v6306_v10 = vsel %vm19330_vm6, nan, %v6305_v8  ;;  %v8776_v40 = vadd.s32 3, %v19332_v45  ;;  %vm19334_vm10 = vweird.f32 %v19333_v37  ;;  %10530 = vmatmul.f32.vlgmr.msra.gmra.mxu1 %v18016_v54 }
 0x599   :  { %v5996_v25 = vsel %vm19334_vm10, nan, %v5995_v59  ;;  %vm19336_vm4 = vweird.f32 %v19335_v48  ;;  %v8931_v63 = vadd.s32 3, %v19337_v5  ;;  %v9086_v34 = vadd.s32 3, %v19338_v61  ;;  %10545 = vmatpush.msra.mxu2 %v6306_v10 }
 0x59a   :  { %v6151_v53 = vsel %vm19336_vm4, nan, %v6150_v56  ;;  %v18026_v26 = vand.u32 3, %v8156_v4  ;;  %v18028_v62 = vand.u32 3, %v9241_v51  ;;  %v18030_v43 = vand.u32 3, %v9396_v17 }
 0x59b   :  { %v9551_v13 = vadd.s32 3, %v17601_v24  ;;  %v18033_v57 = vand.u32 3, %v8311_v9  ;;  %v18035_v44 = vand.u32 3, %v8466_v58  ;;  %v9706_v59 = vadd.s32 3, %v17682_v6  ;;  %10546 = vmatpush.msra.mxu2 %v6151_v53 }
 0x59c   :  { %v9861_v56 = vadd.s32 3, %v17697_v14  ;;  %v18039_v8 = vand.u32 3, %v8621_v7  ;;  %v18041_v21 = vand.u32 3, %v8776_v40  ;;  %v10016_v60 = vadd.s32 3, %v17747_v52  ;;  %v19339_v14 = vld [vmem:[#allocation9_spill] sm:$0xff] }
 0x59d   :  { %v9552_v49 = vand.u32 3, %v9551_v13  ;;  %v18044_v4 = vand.u32 3, %v8931_v63  ;;  %v18046_v51 = vand.u32 3, %v9086_v34  ;;  %v9707_v24 = vand.u32 3, %v9706_v59  ;;  %10547 = vmatpush.msra.mxu2 %v5996_v25 }
 0x59e   :  { %v9862_v17 = vand.u32 3, %v9861_v56  ;;  %vm9244_vm9 = vcmp.eq.s32.totalorder %v18028_v62, 0  ;;  %vm9247_vm5 = vcmp.eq.s32.totalorder %v18028_v62, 2  ;;  %vm9399_vm1 = vcmp.eq.s32.totalorder %v18030_v43, 0 }
 0x59f   :  { %v10017_v6 = vand.u32 3, %v10016_v60  ;;  %vm9402_vm15 = vcmp.eq.s32.totalorder %v18030_v43, 2  ;;  %vm9553_vm13 = vcmp.lt.s32.totalorder %v9552_v49, 2  ;;  %vm9709_vm7 = vcmp.eq.s32.totalorder %v9707_v24, 0  ;;  %10548 = vmatpush.msra.mxu2 %v5841_v29 }
 0x5a0   :  { %v10575_v52 = vmul.u32 256, %v19339_v14  ;;  %vm9554_vm2 = vcmp.eq.s32.totalorder %v9552_v49, 0  ;;  %vm9557_vm3 = vcmp.eq.s32.totalorder %v9552_v49, 2  ;;  %vm9712_vm12 = vcmp.eq.s32.totalorder %v9707_v24, 2  ;;  %v19358_v49 = vld [vmem:[#allocation71_spill] sm:$0xff] }
 0x5a1   :  { %vm9863_vm14 = vcmp.lt.s32.totalorder %v9862_v17, 2  ;;  %vm9708_vm8 = vcmp.lt.s32.totalorder %v9707_v24, 2  ;;  %v19340_v28 = vxor.u32 2147483648, %v17693_v36  ;;  %vm9864_vm6 = vcmp.eq.s32.totalorder %v9862_v17, 0  ;;  %10549 = vmatpush.msra.mxu2 %v5686_v50  ;;  %v19373_v14 = vld [vmem:[#allocation95_spill] sm:$0xff] }
 0x5a2   :  { %vm9867_vm10 = vcmp.eq.s32.totalorder %v9862_v17, 2  ;;  %v19341_v9 = vxor.u32 2147483648, %v17690_v39  ;;  %v19342_v58 = vxor.u32 2147483648, %v17710_v47  ;;  %v19343_v30 = vxor.u32 2147483648, %v17707_v23  ;;  %10550 = vmatmul.f32.vlgmr.msra.gmra.mxu2 %v18008_v33 }
 0x5a3   :  { %v9711_v55 = vsel %vm9709_vm7, %v17690_v39, %v19340_v28  ;;  %vm10018_vm4 = vcmp.lt.s32.totalorder %v10017_v6, 2  ;;  %v19344_v20 = vxor.u32 2147483648, %v17666_v11  ;;  %vm10019_vm7 = vcmp.eq.s32.totalorder %v10017_v6, 0  ;;  %v19363_v28 = vld [vmem:[#allocation14_spill] sm:$0xff] }
 0x5a4   :  { %v9714_v32 = vsel %vm9712_vm12, %v19341_v9, %v17693_v36  ;;  %v9866_v35 = vsel %vm9864_vm6, %v17707_v23, %v19342_v58  ;;  %v9869_v10 = vsel %vm9867_vm10, %v19343_v30, %v17710_v47  ;;  %vm10022_vm11 = vcmp.eq.s32.totalorder %v10017_v6, 2  ;;  %v19365_v9 = vld [vmem:[#allocation15_spill] sm:$0xff] }
 0x5a5   :  { %v9556_v7 = vsel %vm9554_vm2, %v17656_v19, %v19344_v20  ;;  %v9870_v45 = vsel %vm9863_vm14, %v9866_v35, %v9869_v10  ;;  %vm8624_vm0 = vcmp.eq.s32.totalorder %v18039_v8, 0  ;;  %v19345_v39 = vxor.u32 2147483648, %v17656_v19  ;;  %v19367_v35 = vld [vmem:[#allocation82_spill] sm:$0xff] }
 0x5a6   :  { %v19346_v29 = vxor.u32 2147483648, %v17775_v3  ;;  %v19347_v47 = vxor.u32 2147483648, %v17768_v16  ;;  %v10578_v50 = vcvt.s32.f32 %v10575_v52  ;;  %vm9398_vm2 = vcmp.lt.s32.totalorder %v18030_v43, 2 }
 0x5a7   :  { %v9559_v36 = vsel %vm9557_vm3, %v19345_v39, %v17666_v11  ;;  %v19348_v37 = vxor.u32 2147483648, %v17581_v22  ;;  %v9715_v11 = vsel %vm9708_vm8, %v9711_v55, %v9714_v32  ;;  %vm19351_vm3 = vweird.f32 %v19227_v46 }
 0x5a8   :  { %v10021_v23 = vsel %vm10019_vm7, %v17768_v16, %v19346_v29  ;;  %v10024_v40 = vsel %vm10022_vm11, %v19347_v47, %v17775_v3  ;;  %v19349_v16 = vxor.u32 2147483648, %v17571_v38  ;;  %vm19350_vm11 = vweird.f32 %v19172_v41  ;;  %v19375_v47 = vld [vmem:[#allocation35_spill] sm:$0xff] }
 0x5a9   :  { %v9401_v19 = vsel %vm9399_vm1, %v17571_v38, %v19348_v37  ;;  %v10025_v25 = vsel %vm10018_vm4, %v10021_v23, %v10024_v40  ;;  %v9871_v33 = vsel %vm19350_vm11, nan, %v9870_v45  ;;  %v10579_v53 = vmul.f32 0.00390625, %v10578_v50  ;;  %v19377_v50 = vld [vmem:[#allocation34_spill] sm:$0xff] }
 0x5aa   :  { %v9404_v3 = vsel %vm9402_vm15, %v19349_v16, %v17581_v22  ;;  %v10026_v48 = vsel %vm19351_vm3, nan, %v10025_v25  ;;  %vm9089_vm12 = vcmp.eq.s32.totalorder %v18046_v51, 0  ;;  %vm9092_vm1 = vcmp.eq.s32.totalorder %v18046_v51, 2  ;;  %v19379_v25 = vld [vmem:[#allocation75_spill] sm:$0xff] }
 0x5ab   :  { %vm9243_vm14 = vcmp.lt.s32.totalorder %v18028_v62, 2  ;;  %v9560_v5 = vsel %vm9553_vm13, %v9556_v7, %v9559_v36  ;;  %10557 = vmatpush.msra.mxu3 %v10026_v48  ;;  %v19352_v38 = vxor.u32 2147483648, %v17524_v2  ;;  %v19353_v22 = vxor.u32 2147483648, %v17514_v12  ;;  %v19371_v7 = vld [vmem:[#allocation38_spill] sm:$0xff]  ;;  %v19381_v48 = vld [vmem:[#allocation56_spill] sm:$0xff] }
 0x5ac   :  { %vm19354_vm15 = vweird.f32 %v19163_v0  ;;  %v10580_v61 = vfloor.f32 %v10579_v53  ;;  %vm8934_vm8 = vcmp.eq.s32.totalorder %v18044_v4, 0  ;;  %vm8937_vm13 = vcmp.eq.s32.totalorder %v18044_v4, 2 }
 0x5ad   :  { %v9246_v41 = vsel %vm9244_vm9, %v17514_v12, %v19352_v38  ;;  %v9249_v46 = vsel %vm9247_vm5, %v19353_v22, %v17524_v2  ;;  %v9716_v63 = vsel %vm19354_vm15, nan, %v9715_v11  ;;  %vm9088_vm6 = vcmp.lt.s32.totalorder %v18046_v51, 2  ;;  %10558 = vmatpush.msra.mxu3 %v9871_v33  ;;  %v19369_v51 = vld [vmem:[#allocation39_spill] sm:$0xff] }
 0x5ae   :  { %v9405_v34 = vsel %vm9398_vm2, %v9401_v19, %v9404_v3  ;;  %v19355_v13 = vxor.u32 2147483648, %v17474_v18  ;;  %v19356_v2 = vxor.u32 2147483648, %v17454_v42  ;;  %vm19357_vm9 = vweird.f32 %v19195_v27 }
 0x5af   :  { %v9561_v59 = vsel %vm19357_vm9, nan, %v9560_v5  ;;  %v11265_v56 = vcvt.f32.s32 %v10580_v61  ;;  %vm8159_vm5 = vcmp.eq.s32.totalorder %v18026_v26, 0  ;;  %vm8779_vm10 = vcmp.eq.s32.totalorder %v18041_v21, 0  ;;  %10559 = vmatpush.msra.mxu3 %v9716_v63  ;;  %v19383_v5 = vld [vmem:[#allocation50_spill] sm:$0xff] }
 0x5b0   :  { %v9091_v12 = vsel %vm9089_vm12, %v17454_v42, %v19355_v13  ;;  %v9094_v0 = vsel %vm9092_vm1, %v19356_v2, %v17474_v18  ;;  %vm8782_vm4 = vcmp.eq.s32.totalorder %v18041_v21, 2  ;;  %vm8933_vm7 = vcmp.lt.s32.totalorder %v18044_v4, 2  ;;  %v19360_v42 = vld [vmem:[#allocation84_spill] sm:$0xff]  ;;  %v19389_v13 = vld [vmem:[#allocation78_spill] sm:$0xff] }
 0x5b1   :  { %v9250_v43 = vsel %vm9243_vm14, %v9246_v41, %v9249_v46  ;;  %v19359_v60 = vxor.u32 2147483648, %v19358_v49  ;;  %v19361_v27 = vxor.u32 2147483648, %v19360_v42  ;;  %vm19362_vm2 = vweird.f32 %v19188_v31  ;;  %10560 = vmatpush.msra.mxu3 %v9561_v59  ;;  %v19385_v46 = vld [vmem:[#allocation21_spill] sm:$0xff]  ;;  %v19391_v59 = vld [vmem:[#allocation30_spill] sm:$0xff] }
 0x5b2   :  { %v9406_v17 = vsel %vm19362_vm2, nan, %v9405_v34  ;;  %v10582_v6 = vmul.u32 256, %v11265_v56  ;;  %vm8469_vm11 = vcmp.eq.s32.totalorder %v18035_v44, 0  ;;  %vm8627_vm3 = vcmp.eq.s32.totalorder %v18039_v8, 2  ;;  %v19387_v34 = vld [vmem:[#allocation77_spill] sm:$0xff] }
 0x5b3   :  { %v8936_v18 = vsel %vm8934_vm8, %v19360_v42, %v19359_v60  ;;  %v8939_v24 = vsel %vm8937_vm13, %v19361_v27, %v19358_v49  ;;  %vm8778_vm12 = vcmp.lt.s32.totalorder %v18041_v21, 2  ;;  %v9095_v62 = vsel %vm9088_vm6, %v9091_v12, %v9094_v0  ;;  %10561 = vmatpush.msra.mxu3 %v9406_v17 }
 0x5b4   :  { %v19364_v55 = vxor.u32 2147483648, %v19363_v28  ;;  %v19366_v58 = vxor.u32 2147483648, %v19365_v9  ;;  %vm19368_vm1 = vweird.f32 %v19367_v35  ;;  %v10583_v10 = vsub.s32 %v10575_v52, %v10582_v6 }
 0x5b5   :  { %v9251_v30 = vsel %vm19368_vm1, nan, %v9250_v43  ;;  %vm8472_vm14 = vcmp.eq.s32.totalorder %v18035_v44, 2  ;;  %vm8623_vm15 = vcmp.lt.s32.totalorder %v18039_v8, 2  ;;  %v19370_v20 = vxor.u32 2147483648, %v19369_v51  ;;  %v19393_v43 = vld [vmem:[#allocation8_spill] sm:$0xff] }
 0x5b6   :  { %v8781_v32 = vsel %vm8779_vm10, %v19365_v9, %v19364_v55  ;;  %v8784_v31 = vsel %vm8782_vm4, %v19366_v58, %v19363_v28  ;;  %v8940_v39 = vsel %vm8933_vm7, %v8936_v18, %v8939_v24  ;;  %v19372_v36 = vxor.u32 2147483648, %v19371_v7  ;;  %10562 = vmatpush.msra.mxu3 %v9251_v30 }
 0x5b7   :  { %v8626_v45 = vsel %vm8624_vm0, %v19371_v7, %v19370_v20  ;;  %vm19374_vm8 = vweird.f32 %v19373_v14  ;;  %vm10584_vm13 = vcmp.lt.s32.totalorder %v10583_v10, 0  ;;  %v10585_v23 = vadd.s32 256, %v10583_v10 }
 0x5b8   :  { %v8629_v29 = vsel %vm8627_vm3, %v19372_v36, %v19369_v51  ;;  %v9096_v52 = vsel %vm19374_vm8, nan, %v9095_v62  ;;  %vm8314_vm6 = vcmp.eq.s32.totalorder %v18033_v57, 0  ;;  %vm8317_vm9 = vcmp.eq.s32.totalorder %v18033_v57, 2 }
 0x5b9   :  { %vm8468_vm10 = vcmp.lt.s32.totalorder %v18035_v44, 2  ;;  %v8785_v4 = vsel %vm8778_vm12, %v8781_v32, %v8784_v31  ;;  %v19376_v40 = vxor.u32 2147483648, %v19375_v47  ;;  %v19378_v19 = vxor.u32 2147483648, %v19377_v50  ;;  %10563 = vmatpush.msra.mxu3 %v9096_v52  ;;  %v19394_v44 = vld [vmem:[#allocation69_spill] sm:$0xff] }
 0x5ba   :  { %vm19380_vm0 = vweird.f32 %v19379_v25  ;;  %v10586_v3 = vsel %vm10584_vm13, %v10585_v23, %v10583_v10  ;;  %vm8162_vm4 = vcmp.eq.s32.totalorder %v18026_v26, 2  ;;  %v8630_v21 = vsel %vm8623_vm15, %v8626_v45, %v8629_v29 }
 0x5bb   :  { %v8471_v37 = vsel %vm8469_vm11, %v19377_v50, %v19376_v40  ;;  %v8474_v11 = vsel %vm8472_vm14, %v19378_v19, %v19375_v47  ;;  %v8941_v16 = vsel %vm19380_vm0, nan, %v8940_v39  ;;  %vm10587_vm7 = vcmp.ge.s32.totalorder %v10586_v3, 256 }
 0x5bc   :  { %v11192_v33 = vadd.s32 4294967040, %v10586_v3  ;;  %vm8313_vm2 = vcmp.lt.s32.totalorder %v18033_v57, 2  ;;  %v19382_v53 = vxor.u32 2147483648, %v19381_v48  ;;  %v19384_v41 = vxor.u32 2147483648, %v19383_v5  ;;  %10564 = vmatpush.msra.mxu3 %v8941_v16 }
 0x5bd   :  { %vm19386_vm11 = vweird.f32 %v19385_v46  ;;  %vm8158_vm3 = vcmp.lt.s32.totalorder %v18026_v26, 2  ;;  %v8475_v8 = vsel %vm8468_vm10, %v8471_v37, %v8474_v11  ;;  %v19388_v57 = vxor.u32 2147483648, %v19387_v34 }
 0x5be   :  { %v8316_v38 = vsel %vm8314_vm6, %v19383_v5, %v19382_v53  ;;  %v8319_v22 = vsel %vm8317_vm9, %v19384_v41, %v19381_v48  ;;  %v8786_v63 = vsel %vm19386_vm11, nan, %v8785_v4  ;;  %v10589_v61 = vsel %vm10587_vm7, %v11192_v33, %v10586_v3 }
 0x5bf   :  { %v8161_v12 = vsel %vm8159_vm5, %v19389_v13, %v19388_v57  ;;  %v19390_v2 = vxor.u32 2147483648, %v19389_v13  ;;  %vm19392_vm12 = vweird.f32 %v19391_v59  ;;  %v10590_v49 = vmul.u32 %v10589_v61, %v19393_v43  ;;  %10565 = vmatpush.msra.mxu3 %v8786_v63 }
 0x5c0   :  { %v8631_v56 = vsel %vm19392_vm12, nan, %v8630_v21  ;;  %v8320_v60 = vsel %vm8313_vm2, %v8316_v38, %v8319_v22  ;;  %vm19395_vm1 = vweird.f32 %v19394_v44  ;;  %vm19396_vm14 = vweird.f32 %v19273_v1 }
 0x5c1   :  { %v8164_v0 = vsel %vm8162_vm4, %v19390_v2, %v19387_v34  ;;  %v8476_v42 = vsel %vm19395_vm1, nan, %v8475_v8  ;;  %v10591_v18 = vcvt.s32.f32 %v10590_v49  ;;  %10566 = vmatpush.msra.mxu3 %v8631_v56  ;;  %v8321_v26 = vsel %vm19396_vm14, nan, %v8320_v60 }
 0x5c2   :  { %v8165_v27 = vsel %vm8158_vm3, %v8161_v12, %v8164_v0  ;;  %vm19397_vm5 = vweird.f32 %v19314_v15  ;;  %v19398_v14 = vmov 683565275   ;;  %v19399_v23 = vmov 2475754826  }
 0x5c3   :  { %v10592_v24 = vmul.f32 0.00390625, %v10591_v18  ;;  %10567 = vmatpush.msra.mxu3 %v8476_v42  ;;  %v8166_v17 = vsel %vm19397_vm5, nan, %v8165_v27  ;;  %v19400_v47 = vmov 2131351028   ;;  %v19401_v50 = vmov 2102212464  }
 0x5c4   :  { %v19402_v19 = vmov 920167782   ;;  %v19403_v48 = vmov 1326507024  }
 0x5c5   :  { %v10593_v6 = vfloor.f32 %v10592_v24  ;;  %10568 = vmatpush.msra.mxu3 %v8321_v26 }
 0x5c7   :  { %v11267_v62 = vcvt.f32.s32 %v10593_v6  ;;  %10569 = vmatpush.msra.mxu3 %v8166_v17 }
 0x5c8   :  { %10570 = vmatmul.f32.vlgmr.msra.gmra.mxu3 %v18016_v54 }
 0x5c9   :  { %v10595_v28 = vmul.u32 256, %v11267_v62 }
 0x5cb   :  { %v10596_v55 = vsub.s32 %v10590_v49, %v10595_v28 }
 0x5cd   :  { %vm10597_vm15 = vcmp.lt.s32.totalorder %v10596_v55, 0  ;;  %v10598_v9 = vadd.s32 256, %v10596_v55 }
 0x5cf   :  { %v10599_v32 = vsel %vm10597_vm15, %v10598_v9, %v10596_v55 }
 0x5d0   :  { %vm10600_vm8 = vcmp.ge.s32.totalorder %v10599_v32, 256  ;;  %v11193_v58 = vadd.s32 4294967040, %v10599_v32 }
 0x5d2   :  { %v10602_v1 = vsel %vm10600_vm8, %v11193_v58, %v10599_v32 }
 0x5d3   :  { %v10603_v31 = vcvt.s32.f32 %v10602_v1 }
 0x5d5   :  { %v18218_v35 = vmul.f32 0.024543693, %v10603_v31 }
 0x5d7   :  { %v10608_v15 = vand.u32 2139095040, %v18218_v35  ;;  %v10605_v51 = vand.u32 2147483647, %v18218_v35  ;;  %vm10607_vm14 = vcmp.lt.s32.totalorder %v18218_v35, 0 }
 0x5d9   :  { %v10609_v30 = vshrl.u32 %v10608_v15, 23  ;;  %v10612_v54 = vand.u32 8388607, %v10605_v51  ;;  %vm18277_vm5 = vcmp.le.f32.partialorder %v10605_v51, 0.7853982 }
 0x5db   :  { %v11194_v10 = vadd.s32 4294967169, %v10609_v30  ;;  %v10613_v7 = vor.u32 8388608, %v10612_v54 }
 0x5dd   :  { %v10615_v20 = vadd.s32 1, %v11194_v10  ;;  %v18231_v25 = vshll.u32 %v10613_v7, 8  ;;  %v19404_v10 = vmov 0  }
 0x5df   :  { %vm10616_vm13 = vcmp.gt.s32.totalorder %v10615_v20, 0  ;;  %v10654_v13 = vand.u32 65535, %v18231_v25  ;;  %v10655_v12 = vshrl.u32 %v18231_v25, 16 }
 0x5e0   :  { %v10617_v45 = vsel %vm10616_vm13, %v10615_v20, 0 }
 0x5e1   :  { %v10619_v39 = vand.u32 31, %v10617_v45  ;;  %v18224_v36 = vshrl.u32 %v10617_v45, 5 }
 0x5e3   :  { %v10620_v29 = vsub.s32 32, %v10619_v39  ;;  %v10622_v52 = vshll.u32 %v19398_v14, %v10619_v39  ;;  %v10625_v4 = vshll.u32 %v19399_v23, %v10619_v39  ;;  %v10628_v40 = vshll.u32 %v19400_v47, %v10619_v39 }
 0x5e4   :  { %v10631_v37 = vshll.u32 %v19401_v50, %v10619_v39  ;;  %v10634_v11 = vshll.u32 %v19402_v19, %v10619_v39  ;;  %vm10637_vm6 = vcmp.lt.s32.totalorder %v18224_v36, 1  ;;  %vm10639_vm9 = vcmp.lt.s32.totalorder %v18224_v36, 3 }
 0x5e5   :  { %v10623_v16 = vshrl.u32 %v19399_v23, %v10620_v29  ;;  %v10626_v3 = vshrl.u32 %v19400_v47, %v10620_v29  ;;  %v10629_v21 = vshrl.u32 %v19401_v50, %v10620_v29  ;;  %v10632_v33 = vshrl.u32 %v19402_v19, %v10620_v29 }
 0x5e6   :  { %v10635_v53 = vshrl.u32 %v19403_v48, %v10620_v29  ;;  %vm10640_vm10 = vcmp.lt.s32.totalorder %v18224_v36, 4  ;;  %vm10638_vm0 = vcmp.lt.s32.totalorder %v18224_v36, 2  ;;  %v10621_v32 = vshrl.u32 %v19398_v14, %v10620_v29 }
 0x5e7   :  { %v10624_v5 = vor.u32 %v10623_v16, %v10622_v52  ;;  %v10627_v38 = vor.u32 %v10626_v3, %v10625_v4  ;;  %v10630_v41 = vor.u32 %v10629_v21, %v10628_v40  ;;  %v10633_v22 = vor.u32 %v10632_v33, %v10631_v37 }
 0x5e8   :  { %v10636_v46 = vor.u32 %v10635_v53, %v10634_v11 }
 0x5e9   :  { %v10645_v63 = vsel %vm10637_vm6, %v10624_v5, %v10627_v38  ;;  %v10646_v8 = vsel %vm10640_vm10, %v10633_v22, 920167782  ;;  %v10649_v61 = vsel %vm10637_vm6, %v10627_v38, %v10630_v41  ;;  %v10642_v1 = vsel %vm10640_vm10, %v10630_v41, 2102212464 }
 0x5ea   :  { %v10647_v34 = vsel %vm10639_vm9, %v10630_v41, %v10646_v8  ;;  %v10650_v57 = vsel %vm10640_vm10, %v10636_v46, 1326507024  ;;  %v10641_v29 = vsel %vm10637_vm6, %v10621_v32, %v10624_v5  ;;  %v10643_v14 = vsel %vm10639_vm9, %v10627_v38, %v10642_v1 }
 0x5eb   :  { %v10648_v2 = vsel %vm10638_vm0, %v10645_v63, %v10647_v34  ;;  %v10651_v0 = vsel %vm10639_vm9, %v10633_v22, %v10650_v57  ;;  %v10644_v50 = vsel %vm10638_vm0, %v10641_v29, %v10643_v14 }
 0x5ec   :  { %v10652_v59 = vsel %vm10638_vm0, %v10649_v61, %v10651_v0  ;;  %v10678_v56 = vand.u32 65535, %v10648_v2  ;;  %v10679_v43 = vshrl.u32 %v10648_v2, 16  ;;  %v10698_v21 = vmul.u32 %v18231_v25, %v10644_v50 }
 0x5ed   :  { %v10656_v49 = vand.u32 65535, %v10652_v59  ;;  %v10657_v60 = vshrl.u32 %v10652_v59, 16  ;;  %vm10748_vm0 = vweird.f32 %v18218_v35 }
 0x5ee   :  { %v10680_v44 = vmul.u32 %v10678_v56, %v10654_v13  ;;  %v10681_v42 = vmul.u32 %v10679_v43, %v10654_v13  ;;  %v10682_v18 = vmul.u32 %v10678_v56, %v10655_v12  ;;  %v10683_v9 = vmul.u32 %v10679_v43, %v10655_v12 }
 0x5ef   :  { %v10658_v27 = vmul.u32 %v10656_v49, %v10654_v13  ;;  %v10659_v26 = vmul.u32 %v10657_v60, %v10654_v13  ;;  %v10660_v24 = vmul.u32 %v10656_v49, %v10655_v12  ;;  %v10661_v62 = vmul.u32 %v10657_v60, %v10655_v12 }
 0x5f0   :  { %v10684_v17 = vshll.u32 %v10681_v42, 16  ;;  %v10686_v6 = vshll.u32 %v10682_v18, 16  ;;  %v10685_v15 = vshrl.u32 %v10681_v42, 16  ;;  %v10687_v47 = vshrl.u32 %v10682_v18, 16 }
 0x5f1   :  { %v10662_v28 = vshll.u32 %v10659_v26, 16  ;;  %v10664_v55 = vshll.u32 %v10660_v24, 16  ;;  %v10663_v30 = vshrl.u32 %v10659_v26, 16  ;;  %v10665_v23 = vshrl.u32 %v10660_v24, 16 }
 0x5f2   :  { %vm10688_vm4 = vc.u32 %v10680_v44, %v10684_v17  ;;  %v10690_v58 = vadd.s32 %v10684_v17, %v10680_v44 }
 0x5f3   :  { %vm10666_vm7 = vc.u32 %v10658_v27, %v10662_v28  ;;  %v10668_v31 = vadd.s32 %v10662_v28, %v10658_v27  ;;  %v10689_v54 = vsel %vm10688_vm4, 1, %v19404_v10 }
 0x5f4   :  { %v10667_v20 = vsel %vm10666_vm7, 1, %v19404_v10  ;;  %vm10692_vm2 = vc.u32 %v10690_v58, %v10686_v6  ;;  %v10691_v45 = vadd.s32 %v10689_v54, %v10683_v9  ;;  %v10694_v19 = vadd.s32 %v10690_v58, %v10686_v6 }
 0x5f5   :  { %v10669_v7 = vadd.s32 %v10667_v20, %v10661_v62  ;;  %vm10670_vm11 = vc.u32 %v10668_v31, %v10664_v55  ;;  %v10693_v39 = vsel %vm10692_vm2, 1, %v19404_v10 }
 0x5f6   :  { %v10671_v52 = vsel %vm10670_vm11, 1, %v19404_v10  ;;  %v10695_v40 = vadd.s32 %v10693_v39, %v10691_v45 }
 0x5f7   :  { %v10673_v4 = vadd.s32 %v10671_v52, %v10669_v7 }
 0x5f8   :  { %v10696_v11 = vadd.s32 %v10695_v40, %v10685_v15 }
 0x5f9   :  { %v10674_v37 = vadd.s32 %v10673_v4, %v10663_v30 }
 0x5fa   :  { %v10697_v3 = vadd.s32 %v10696_v11, %v10687_v47 }
 0x5fb   :  { %v10675_v16 = vadd.s32 %v10674_v37, %v10665_v23 }
 0x5fc   :  { %v10701_v33 = vadd.s32 1, %v10697_v3 }
 0x5fd   :  { %vm10700_vm3 = vc.u32 %v10675_v16, %v10694_v19  ;;  %v10699_v61 = vadd.s32 %v10694_v19, %v10675_v16 }
 0x5fe   :  { %v10702_v48 = vsel %vm10700_vm3, %v10701_v33, %v10697_v3 }
 0x5ff   :  { %v10703_v53 = vadd.s32 %v10702_v48, %v10698_v21 }
 0x601   :  { %v10704_v5 = vadd.s32 536870912, %v10703_v53 }
 0x603   :  { %v10705_v38 = vshrl.u32 %v10704_v5, 30 }
 0x605   :  { %v10706_v41 = vshll.u32 %v10705_v38, 30  ;;  %v10729_v55 = vsub.s32 4, %v10705_v38 }
 0x607   :  { %v10707_v22 = vsub.s32 %v10703_v53, %v10706_v41  ;;  %v10730_v58 = vsel %vm10607_vm14, %v10729_v55, %v10705_v38 }
 0x608   :  { %v10732_v31 = vsel %vm18277_vm5, 0, %v10730_v58 }
 0x609   :  { %vm10708_vm12 = vcmp.lt.s32.totalorder %v10707_v22, 0  ;;  %v10709_v46 = vsub.s32 0, %v10707_v22  ;;  %v10903_v10 = vadd.s32 3, %v10732_v31  ;;  %v10749_v7 = vand.u32 3, %v10732_v31 }
 0x60b   :  { %v10710_v63 = vsel %vm10708_vm12, %v10709_v46, %v10707_v22  ;;  %v10904_v45 = vand.u32 3, %v10903_v10  ;;  %vm10751_vm15 = vcmp.eq.s32.totalorder %v10749_v7, 0  ;;  %vm10754_vm8 = vcmp.eq.s32.totalorder %v10749_v7, 2 }
 0x60c   :  { %v10711_v36 = vclz %v10710_v63  ;;  %vm10750_vm9 = vcmp.lt.s32.totalorder %v10749_v7, 2 }
 0x60d   :  { %vm10906_vm13 = vcmp.eq.s32.totalorder %v10904_v45, 0  ;;  %vm10909_vm6 = vcmp.eq.s32.totalorder %v10904_v45, 2  ;;  %vm10905_vm10 = vcmp.lt.s32.totalorder %v10904_v45, 2 }
 0x60e   :  { %v11195_v8 = vadd.s32 4294967294, %v10711_v36 }
 0x60f   :  { %v10511_v47 = vpop.f32.mrf.mxu0 }
 0x610   :  { %vm11196_vm1 = vcmp.lt.s32.totalorder %v11195_v8, 0 }
 0x611   :  { %v10714_v34 = vsel %vm11196_vm1, 0, %v11195_v8 }
 0x612   :  { %v10715_v57 = vsub.s32 32, %v10714_v34  ;;  %v10716_v13 = vshll.u32 %v10707_v22, %v10714_v34  ;;  %v10719_v12 = vsub.s32 4294967266, %v10714_v34 }
 0x614   :  { %v10717_v25 = vshrl.u32 %v10699_v61, %v10715_v57  ;;  %v10720_v2 = vadd.s32 127, %v10719_v12 }
 0x615   :  { %v10531_v40 = vpop.f32.mrf.mxu1 }
 0x616   :  { %v10718_v0 = vor.u32 %v10717_v25, %v10716_v13  ;;  %v10721_v59 = vshll.u32 %v10720_v2, 23  ;;  %v10532_v19 = vadd.f32 %v10531_v40, %v10511_v47 }
 0x618   :  { %v10722_v56 = vor.u32 4788187, %v10721_v59  ;;  %v10725_v43 = vcvt.s32.f32 %v10718_v0 }
 0x61a   :  { %v10723_v49 = vand.u32 2147483647, %v10722_v56 }
 0x61c   :  { %v10726_v60 = vmul.f32 %v10725_v43, %v10723_v49 }
 0x61e   :  { %v10727_v42 = vxor.u32 2147483648, %v10726_v60 }
 0x620   :  { %v10728_v18 = vsel %vm10607_vm14, %v10727_v42, %v10726_v60 }
 0x621   :  { %v10731_v27 = vsel %vm18277_vm5, %v18218_v35, %v10728_v18 }
 0x622   :  { %v10733_v26 = vmul.f32 %v10731_v27, %v10731_v27 }
 0x624   :  { %v10741_v24 = vmul.f32 -0.00019511016, %v10733_v26  ;;  %v10734_v17 = vmul.f32 -0.001358992, %v10733_v26 }
 0x625   :  { %v10551_v11 = vpop.f32.mrf.mxu2 }
 0x626   :  { %v10742_v6 = vadd.f32 0.008332121, %v10741_v24  ;;  %v10735_v62 = vadd.f32 0.041655596, %v10734_v17 }
 0x628   :  { %v10743_v28 = vmul.f32 %v10742_v6, %v10733_v26  ;;  %v10736_v9 = vmul.f32 %v10735_v62, %v10733_v26 }
 0x62a   :  { %v10744_v32 = vadd.f32 -0.16666654, %v10743_v28  ;;  %v10737_v51 = vadd.f32 -0.4999988, %v10736_v9 }
 0x62c   :  { %v10745_v1 = vmul.f32 %v10744_v32, %v10733_v26  ;;  %v10738_v15 = vmul.f32 %v10737_v51, %v10733_v26 }
 0x62e   :  { %v10746_v30 = vadd.f32 1.0, %v10745_v1  ;;  %v10739_v20 = vadd.f32 1.0, %v10738_v15 }
 0x630   :  { %v10747_v54 = vmul.f32 %v10746_v30, %v10731_v27  ;;  %v10755_v29 = vxor.u32 2147483648, %v10739_v20 }
 0x632   :  { %v10752_v39 = vxor.u32 2147483648, %v10747_v54  ;;  %v10756_v52 = vsel %vm10754_vm8, %v10755_v29, %v10747_v54  ;;  %v10911_v4 = vsel %vm10909_vm6, %v10755_v29, %v10747_v54 }
 0x634   :  { %v10753_v14 = vsel %vm10751_vm15, %v10739_v20, %v10752_v39  ;;  %v10908_v23 = vsel %vm10906_vm13, %v10739_v20, %v10752_v39 }
 0x635   :  { %v10757_v50 = vsel %vm10750_vm9, %v10753_v14, %v10756_v52  ;;  %v10912_v37 = vsel %vm10905_vm10, %v10908_v23, %v10911_v4 }
 0x636   :  { %v10758_v16 = vsel %vm10748_vm0, nan, %v10757_v50  ;;  %v10913_v3 = vsel %vm10748_vm0, nan, %v10912_v37 }
 0x637   :  { %v10914_v48 = vmul.f32 %v10758_v16, %v10532_v19  ;;  %v10924_v53 = vmul.f32 %v10913_v3, %v10532_v19 }
 0x64b   :  { %v10571_v21 = vpop.f32.mrf.mxu3 }
 0x64c   :  { %v10572_v33 = vadd.f32 %v10571_v21, %v10551_v11 }
 0x64e   :  { %v10915_v5 = vmul.f32 %v10913_v3, %v10572_v33  ;;  %v10923_v38 = vmul.f32 %v10758_v16, %v10572_v33 }
 0x650   :  { %v10916_v41 = vsub.f32 %v10914_v48, %v10915_v5  ;;  %v10925_v22 = vadd.f32 %v10924_v53, %v10923_v38 }
 0x652   :  { %v10917_v46 = vrot.slane %v10916_v41, 4  ;;  %v10926_v63 = vrot.slane %v10925_v22, 4 }
 0x654   :  { %v10918_v36 = vadd.f32 %v10917_v46, %v10916_v41  ;;  %v10927_v8 = vadd.f32 %v10926_v63, %v10925_v22 }
 0x656   :  { %v10919_v61 = vrot.slane %v10918_v36, 2  ;;  %v10928_v35 = vrot.slane %v10927_v8, 2 }
 0x658   :  { %v10920_v34 = vadd.f32 %v10919_v61, %v10918_v36  ;;  %v10929_v57 = vadd.f32 %v10928_v35, %v10927_v8 }
 0x65a   :  { %v10921_v13 = vrot.slane %v10920_v34, 1  ;;  %v10930_v12 = vrot.slane %v10929_v57, 1 }
 0x65c   :  { %v10922_v25 = vadd.f32 %v10921_v13, %v10920_v34  ;;  %v10931_v2 = vadd.f32 %v10930_v12, %v10929_v57 }
 0x65e   :  { %v10932_v0 = vmul.f32 %v10922_v25, %v10922_v25  ;;  %v10933_v59 = vmul.f32 %v10931_v2, %v10931_v2 }
 0x660   :  { %v10934_v56 = vadd.f32 %v10933_v59, %v10932_v0 }
 0x662   :  { %11277 = vrsqrt.f32 %v10934_v56  ;;  %vm10942_vm4 = vcmp.eq.f32.partialorder %v10934_v56, inf  ;;  %v10945_v26 = vand.u32 2147483648, %v10934_v56  ;;  %vm10944_vm7 = vcmp.eq.f32.partialorder %v10934_v56, 0.0 }
 0x668   :  { %v11278_v43 = vpop.eup %11277 }
 0x669   :  { %v10936_v49 = vmul.f32 %v11278_v43, %v10934_v56 }
 0x66b   :  { %v10937_v60 = vmul.f32 %v11278_v43, %v10936_v49 }
 0x66d   :  { %v10938_v44 = vmul.f32 0.5, %v10937_v60 }
 0x66f   :  { %v10939_v42 = vsub.f32 1.5, %v10938_v44 }
 0x671   :  { %v10940_v18 = vmul.f32 %v11278_v43, %v10939_v42 }
 0x673   :  { %v10941_v27 = vmul.f32 %v10940_v18, %v10934_v56 }
 0x675   :  { %v10943_v24 = vsel %vm10942_vm4, %v10934_v56, %v10941_v27 }
 0x676   :  { %v10946_v17 = vsel %vm10944_vm7, %v10945_v26, %v10943_v24 }
 0x677   :  { %10950 = vst [vmem:[#allocation5] sm:$0x1] %v10946_v17 }
 0x678   :  { %10961 = dma.vmem_to_hbm [thread:$0]  %s10957_s11, 16, %s10959_s14, [#allocation4]  }
 0x679   :  { %11329 = dma.done.wait [#allocation4], 16  }
 0x67a   :  { %11330 = vsyncadd [#allocation4], 4294967280 }
 0x67b   :  { %10966 = vsyncpa [#allocation3], 1 }
 0x67c   :  { %10967 = vsyncpa [#allocation4], 1 }

</bundles_post_ra>
